<compile_context>
chip_gen: v6e
topology: v6e:2x2x1
jax: 0.10.0
libtpu: 0.0.40
codegen_flags: <defaults>
</compile_context>

<pallas_src>
import jax
import jax.numpy as jnp
from jax.experimental import pallas as pl
from jax.experimental.pallas import tpu as pltpu

EPS = 1e-5                       # torch.nn.InstanceNorm2d default eps
COMPUTE_DTYPE = jnp.bfloat16     # MXU operand / activation dtype
IN_Y_DTYPE = jnp.bfloat16        # dtype of the pre-InstanceNorm intermediate
                                 # (set to jnp.float32 for stricter IN parity)
PATCH_BUFFERS = 2                # bump to 3 on v5e if the patch DMA is exposed


def _round_up(x, m):
    return ((x + m - 1) // m) * m


def _vmem_budget_bytes():
    """Generation-aware VMEM budget (leave headroom for Mosaic scratch)."""
    cap = None
    try:
        cap = getattr(pltpu.get_tpu_info(), "vmem_capacity_bytes", None)
    except Exception:
        cap = None
    if not cap:
        cap = 128 << 20
    if cap <= (80 << 20):                       # 64 MiB / TensorCore class (v7x)
        return max(min(40 << 20, cap - (8 << 20)), 16 << 20)
    return min(96 << 20, cap - (32 << 20))      # 128 MiB class (v5e / v6e)


def _plan_tiles(HW, K, O_pad, out_bytes, budget):
    """Pick (tm, kt, K_pad) for the GEMM grid from the VMEM budget."""
    K_pad = _round_up(K, 128)
    # kt: largest 128-multiple that divides K_pad exactly (no dead MXU work),
    # capped at 1024 so the streamed patch block stays modest.
    kt = 128
    for cand in range(min(K_pad, 1024), 0, -128):
        if K_pad % cand == 0:
            kt = cand
            break
    hw8 = _round_up(HW, 8)
    tm = 8
    for cand in (2048, 1024, 512, 256, 128, 64, 32, 16, 8):
        if cand > hw8:
            continue
        est = (PATCH_BUFFERS * cand * kt * 2     # streamed patches (bf16)
               + 2 * kt * O_pad * 2              # streamed weights (bf16)
               + 2 * cand * O_pad * out_bytes    # output block
               + cand * O_pad * 4                # f32 accumulator scratch
               + 8 * O_pad * 4)                  # stats / bias blocks
        if est + (4 << 20) <= budget:
            tm = cand
            break
    return tm, kt, K_pad


def _patch_spec(tm, kt):
    idx = lambda m, k: (m, k)
    if PATCH_BUFFERS != 2:
        return pl.BlockSpec((tm, kt), idx,
                            pipeline_mode=pl.Buffered(PATCH_BUFFERS))
    return pl.BlockSpec((tm, kt), idx)


# ---------------------------------------------------------------------------
# Pallas kernels
# ---------------------------------------------------------------------------
def _gemm_stats_kernel(p_ref, w_ref, y_ref, stats_ref, acc_ref):
    """Pass 1 of an InstanceNorm conv: GEMM + per-tile per-channel stats.

    p_ref:(tm,kt) bf16, w_ref:(kt,O) bf16, y_ref:(tm,O), stats_ref:(2,O) f32,
    acc_ref:(tm,O) f32 scratch.  Output blocks resident across the K axis.
    """
    k = pl.program_id(1)

    @pl.when(k == 0)
    def _():
        acc_ref[...] = jnp.zeros_like(acc_ref)

    acc_ref[...] += jnp.dot(p_ref[...], w_ref[...],
                            preferred_element_type=jnp.float32)

    @pl.when(k == pl.num_programs(1) - 1)
    def _():
        y = acc_ref[...]                                    # (tm, O) f32
        y_ref[...] = y.astype(y_ref.dtype)
        s = jnp.sum(y, axis=0, keepdims=True)               # (1, O)
        ss = jnp.sum(y * y, axis=0, keepdims=True)          # (1, O)
        stats_ref[...] = jnp.concatenate([s, ss], axis=0)   # (2, O)


def _gemm_bias_act_kernel(act):
    """GEMM + bias + activation (layers without InstanceNorm)."""
    def body(p_ref, w_ref, b_ref, o_ref, acc_ref):
        k = pl.program_id(1)

        @pl.when(k == 0)
        def _():
            acc_ref[...] = jnp.zeros_like(acc_ref)

        acc_ref[...] += jnp.dot(p_ref[...], w_ref[...],
                                preferred_element_type=jnp.float32)

        @pl.when(k == pl.num_programs(1) - 1)
        def _():
            y = acc_ref[...] + b_ref[...]
            if act == "relu":
                y = jnp.maximum(y, 0.0)
            elif act == "tanh":
                y = jnp.tanh(y)
            o_ref[...] = y.astype(o_ref.dtype)

    return body


def _norm_act_res_kernel(act, has_residual):
    """Pass 2 of an InstanceNorm conv: scale/shift + activation + residual."""
    def body(y_ref, scale_ref, shift_ref, *rest):
        if has_residual:
            r_ref, o_ref = rest
        else:
            (o_ref,) = rest
        y = y_ref[...].astype(jnp.float32) * scale_ref[...] + shift_ref[...]
        if act == "relu":
            y = jnp.maximum(y, 0.0)
        elif act == "tanh":
            y = jnp.tanh(y)
        if has_residual:
            y = y + r_ref[...].astype(jnp.float32)
        o_ref[...] = y.astype(o_ref.dtype)

    return body


# ---------------------------------------------------------------------------
# Fused conv-as-GEMM wrapper (two-pass InstanceNorm)
# ---------------------------------------------------------------------------
def _conv_gemm(patches, w_mat, bias, *, apply_in, act, residual=None,
               groups=1, out_dtype=COMPUTE_DTYPE):
    """patches (N, HW, K) @ w_mat (K, O) + fused IN / act / residual.

    Returns (N, HW, O)."""
    N, HW, K = patches.shape
    O = w_mat.shape[1]
    if groups > 1:
        assert O % 128 == 0, "phase groups must stay 128-lane aligned"

    O_pad = max(_round_up(O, 128), 128)          # lane-dense (>=128) stores
    budget = _vmem_budget_bytes()
    y_bytes = 2 if apply_in else jnp.dtype(out_dtype).itemsize
    tm, kt, K_pad = _plan_tiles(HW, K, O_pad, y_bytes, budget)
    HW_pad = _round_up(HW, tm)

    # Pad operands (zero rows/cols contribute nothing to GEMM or IN sums).
    if K_pad != K or O_pad != O:
        w_mat = jnp.pad(w_mat, ((0, K_pad - K), (0, O_pad - O)))
    if bias is not None and O_pad != O:
        bias = jnp.pad(bias, (0, O_pad - O))
    if K_pad != K or HW_pad != HW:
        patches = jnp.pad(patches, ((0, 0), (0, HW_pad - HW), (0, K_pad - K)))

    patches = patches.astype(COMPUTE_DTYPE).reshape(N * HW_pad, K_pad)
    w_mat = w_mat.astype(COMPUTE_DTYPE)

    m_per_sample = HW_pad // tm
    n_m = N * m_per_sample
    n_k = K_pad // kt

    vmem_a = (PATCH_BUFFERS * tm * kt * 2 + 2 * kt * O_pad * 2
              + 2 * tm * O_pad * y_bytes + tm * O_pad * 4 + 16 * O_pad * 4)
    vmem_a = int(min(max(2 * vmem_a, 16 << 20) + (4 << 20), budget))
    gemm_params = pltpu.CompilerParams(
        dimension_semantics=("parallel", "arbitrary"),
        vmem_limit_bytes=vmem_a)

    if apply_in:
        # -------- pass 1: GEMM + per-tile channel sums ----------------------
        y, stats = pl.pallas_call(
            _gemm_stats_kernel,
            grid=(n_m, n_k),
            in_specs=[_patch_spec(tm, kt),
                      pl.BlockSpec((kt, O_pad), lambda m, k: (k, 0))],
            out_specs=(pl.BlockSpec((tm, O_pad), lambda m, k: (m, 0)),
                       pl.BlockSpec((None, 2, O_pad), lambda m, k: (m, 0, 0))),
            out_shape=(jax.ShapeDtypeStruct((N * HW_pad, O_pad), IN_Y_DTYPE),
                       jax.ShapeDtypeStruct((n_m, 2, O_pad), jnp.float32)),
            scratch_shapes=[pltpu.VMEM((tm, O_pad), jnp.float32)],
            compiler_params=gemm_params,
        )(patches, w_mat)

        # -------- InstanceNorm statistics finalize (tiny, XLA glue) ---------
        stats = stats.reshape(N, m_per_sample, 2, O_pad).sum(axis=1)
        s, ss = stats[:, 0, :], stats[:, 1, :]               # (N, O_pad) f32
        if groups > 1:
            ob = O_pad // groups
            s = s.reshape(N, groups, ob).sum(axis=1)
            ss = ss.reshape(N, groups, ob).sum(axis=1)
            count = float(HW * groups)
        else:
            count = float(HW)
        # TODO(synk): one-pass E[x^2]-E[x]^2 in f32 is cancellation-prone for
        # |mean| >> std; switch to a second stats sweep if parity drifts.
        mean = s / count
        var = jnp.maximum(ss / count - mean * mean, 0.0)
        inv = jax.lax.rsqrt(var + EPS)
        scale, shift = inv, -mean * inv
        if groups > 1:
            scale = jnp.tile(scale, (1, groups))
            shift = jnp.tile(shift, (1, groups))

        # -------- pass 2: scale/shift + activation + residual ---------------
        y3 = y.reshape(N, HW_pad, O_pad)
        res3 = None
        if residual is not None:
            res3 = residual.astype(COMPUTE_DTYPE)
            if HW_pad != HW or O_pad != O:
                res3 = jnp.pad(res3, ((0, 0), (0, HW_pad - HW), (0, O_pad - O)))

        in_specs = [pl.BlockSpec((None, tm, O_pad), lambda n, m: (n, m, 0)),
                    pl.BlockSpec((None, 1, O_pad), lambda n, m: (n, 0, 0)),
                    pl.BlockSpec((None, 1, O_pad), lambda n, m: (n, 0, 0))]
        args = [y3, scale.reshape(N, 1, O_pad), shift.reshape(N, 1, O_pad)]
        if res3 is not None:
            in_specs.append(pl.BlockSpec((None, tm, O_pad),
                                         lambda n, m: (n, m, 0)))
            args.append(res3)

        vmem_b = (2 * tm * O_pad * (2 + 2 + jnp.dtype(out_dtype).itemsize)
                  + 32 * O_pad)
        vmem_b = int(min(max(2 * vmem_b, 16 << 20) + (4 << 20), budget))
        out3 = pl.pallas_call(
            _norm_act_res_kernel(act, res3 is not None),
            grid=(N, m_per_sample),
            in_specs=in_specs,
            out_specs=pl.BlockSpec((None, tm, O_pad), lambda n, m: (n, m, 0)),
            out_shape=jax.ShapeDtypeStruct((N, HW_pad, O_pad), out_dtype),
            compiler_params=pltpu.CompilerParams(
                dimension_semantics=("parallel", "parallel"),
                vmem_limit_bytes=vmem_b),
        )(*args)
    else:
        b2 = bias.reshape(1, O_pad).astype(jnp.float32)
        out = pl.pallas_call(
            _gemm_bias_act_kernel(act),
            grid=(n_m, n_k),
            in_specs=[_patch_spec(tm, kt),
                      pl.BlockSpec((kt, O_pad), lambda m, k: (k, 0)),
                      pl.BlockSpec((1, O_pad), lambda m, k: (0, 0))],
            out_specs=pl.BlockSpec((tm, O_pad), lambda m, k: (m, 0)),
            out_shape=jax.ShapeDtypeStruct((N * HW_pad, O_pad), out_dtype),
            scratch_shapes=[pltpu.VMEM((tm, O_pad), jnp.float32)],
            compiler_params=gemm_params,
        )(patches, w_mat, b2)
        out3 = out.reshape(N, HW_pad, O_pad)

    return out3[:, :HW, :O]


# ---------------------------------------------------------------------------
# JAX glue: im2col, padding, weight reshaping
# ---------------------------------------------------------------------------
def _im2col(x_nhwc, kh, kw, stride):
    """Extract conv patches. Returns (N, Ho*Wo, kh*kw*C), Ho, Wo."""
    # TODO(synk): replace the materialized im2col with per-tap halo reads
    # inside the GEMM kernel (pl.ANY + make_async_copy); dominant HBM-traffic
    # term for the 7x7 layers at 256x256.
    N, H, W, C = x_nhwc.shape
    Ho = (H - kh) // stride + 1
    Wo = (W - kw) // stride + 1
    cols = []
    for i in range(kh):
        for j in range(kw):
            cols.append(x_nhwc[:, i:i + (Ho - 1) * stride + 1:stride,
                                  j:j + (Wo - 1) * stride + 1:stride, :])
    p = jnp.stack(cols, axis=3)                  # (N, Ho, Wo, kh*kw, C)
    return p.reshape(N, Ho * Wo, kh * kw * C), Ho, Wo


def conv_block(x_nhwc, w_oihw, b, *, stride=1, apply_in=True, act="relu",
               residual=None, out_dtype=COMPUTE_DTYPE):
    """Conv2d (valid padding; pad beforehand) + optional IN / act / residual."""
    O, I, KH, KW = w_oihw.shape
    N = x_nhwc.shape[0]
    patches, Ho, Wo = _im2col(x_nhwc, KH, KW, stride)
    K = patches.shape[2]
    # (O, I, KH, KW) -> (KH, KW, I, O) -> (KH*KW*I, O) to match patch ordering.
    w_mat = jnp.transpose(w_oihw, (2, 3, 1, 0)).reshape(K, O)
    res = residual.reshape(N, Ho * Wo, O) if residual is not None else None
    bias = None if apply_in else b               # IN cancels the bias exactly
    out = _conv_gemm(patches, w_mat, bias, apply_in=apply_in, act=act,
                     residual=res, groups=1, out_dtype=out_dtype)
    return out.reshape(N, Ho, Wo, O)


# kernel-tap index used by output phase `a` when reading input offset `d`
# ((a, d) -> k; the pair (0, 1) contributes nothing).
_PHASE_TAP_TO_K = {(0, 0): 1, (1, 0): 2, (1, 1): 0}


def conv_transpose_block(x_nhwc, w_iokk, b, *, apply_in=True, act="relu"):
    """ConvTranspose2d(k=3, s=2, p=1, op=1) as a stride-1 2x2 conv producing
    the 4 output phases per coarse pixel (pixel shuffle / depth-to-space)."""
    I, O, KH, KW = w_iokk.shape            # torch layout (Cin, Cout, 3, 3)
    N, H, W, C = x_nhwc.shape

    # Taps (di, dj) in {0,1}^2 read x[m+di, n+dj]; pad bottom/right by 1.
    xp = jnp.pad(x_nhwc, ((0, 0), (0, 1), (0, 1), (0, 0)))
    patches, Ho, Wo = _im2col(xp, 2, 2, 1)          # (N, H*W, 4*Cin)

    # Weight matrix (4*Cin, 4*Cout): rows ordered (di, dj, cin), columns
    # ordered (a, b, cout): y[2m+a, 2n+b, co] = sum x[m+di, n+dj, ci] * W[..].
    zeros = jnp.zeros((I, O), w_iokk.dtype)
    rows = []
    for di in range(2):
        for dj in range(2):
            cols = []
            for a in range(2):
                for bp in range(2):
                    ki = _PHASE_TAP_TO_K.get((a, di))
                    kj = _PHASE_TAP_TO_K.get((bp, dj))
                    cols.append(zeros if ki is None or kj is None
                                else w_iokk[:, :, ki, kj])
            rows.append(jnp.concatenate(cols, axis=1))          # (Cin, 4*Cout)
    w_mat = jnp.concatenate(rows, axis=0)                       # (4Cin, 4Cout)
    bias = None if apply_in else jnp.concatenate([b] * 4)

    out = _conv_gemm(patches, w_mat, bias, apply_in=apply_in, act=act,
                     groups=4)                                  # (N, H*W, 4*O)
    # Depth-to-space: channel (a*2+b)*O + c  ->  pixel (2m+a, 2n+b), channel c.
    out = out.reshape(N, Ho, Wo, 2, 2, O)
    out = jnp.transpose(out, (0, 1, 3, 2, 4, 5)).reshape(N, 2 * Ho, 2 * Wo, O)
    return out


def _reflect_pad(x_nhwc, p):
    return jnp.pad(x_nhwc, ((0, 0), (p, p), (p, p), (0, 0)), mode="reflect")


def _zero_pad(x_nhwc, p):
    return jnp.pad(x_nhwc, ((0, 0), (p, p), (p, p), (0, 0)))


def resnet_block(x_nhwc, prm):
    h = _reflect_pad(x_nhwc, 1)
    h = conv_block(h, prm["w1"], prm["b1"], apply_in=True, act="relu")
    h = _reflect_pad(h, 1)
    h = conv_block(h, prm["w2"], prm["b2"], apply_in=True, act=None,
                   residual=x_nhwc)
    return h


# ---------------------------------------------------------------------------
# Generator forward (mirrors the nn.Sequential in the PyTorch module)
# ---------------------------------------------------------------------------
def generator_forward(x_nchw, params):
    # NCHW (PyTorch) -> NHWC; bf16 activations, f32 accumulation in-kernel.
    x = jnp.transpose(x_nchw, (0, 2, 3, 1)).astype(COMPUTE_DTYPE)

    h = _reflect_pad(x, 3)
    h = conv_block(h, params["c1_w"], params["c1_b"], stride=1,
                   apply_in=True, act="relu")                    # 3 -> 64
    h = _zero_pad(h, 1)
    h = conv_block(h, params["c2_w"], params["c2_b"], stride=2,
                   apply_in=True, act="relu")                    # 64 -> 128, /2
    h = _zero_pad(h, 1)
    h = conv_block(h, params["c3_w"], params["c3_b"], stride=2,
                   apply_in=True, act="relu")                    # 128 -> 256, /2

    for blk in params["res"]:
        h = resnet_block(h, blk)                                 # 6 ResNet blocks

    h = conv_transpose_block(h, params["t1_w"], params["t1_b"],
                             apply_in=True, act="relu")          # 256 -> 128, x2
    h = conv_transpose_block(h, params["t2_w"], params["t2_b"],
                             apply_in=True, act="relu")          # 128 -> 64, x2

    h = _reflect_pad(h, 3)
    h = conv_block(h, params["c4_w"], params["c4_b"], stride=1,
                   apply_in=False, act="tanh",
                   out_dtype=jnp.float32)                        # 64 -> 3

    return jnp.transpose(h, (0, 3, 1, 2))                        # -> NCHW


# ---------------------------------------------------------------------------
# Deterministic synthetic parameter init (normal(0, 0.02) like _init_weights)
# ---------------------------------------------------------------------------
def init_params(key):
    keys = iter(jax.random.split(key, 64))

    def conv_w(shape):
        return 0.02 * jax.random.normal(next(keys), shape, jnp.float32)

    p = {}
    p["c1_w"] = conv_w((64, 3, 7, 7));     p["c1_b"] = jnp.zeros((64,), jnp.float32)
    p["c2_w"] = conv_w((128, 64, 3, 3));   p["c2_b"] = jnp.zeros((128,), jnp.float32)
    p["c3_w"] = conv_w((256, 128, 3, 3));  p["c3_b"] = jnp.zeros((256,), jnp.float32)
    p["res"] = []
    for _ in range(6):
        p["res"].append({
            "w1": conv_w((256, 256, 3, 3)), "b1": jnp.zeros((256,), jnp.float32),
            "w2": conv_w((256, 256, 3, 3)), "b2": jnp.zeros((256,), jnp.float32),
        })
    # ConvTranspose2d weights are (in_channels, out_channels, kH, kW)
    p["t1_w"] = conv_w((256, 128, 3, 3));  p["t1_b"] = jnp.zeros((128,), jnp.float32)
    p["t2_w"] = conv_w((128, 64, 3, 3));   p["t2_b"] = jnp.zeros((64,), jnp.float32)
    p["c4_w"] = conv_w((3, 64, 7, 7));     p["c4_b"] = jnp.zeros((3,), jnp.float32)
    return p


if __name__ == "__main__":
    key = jax.random.PRNGKey(0)
    k_param, k_input = jax.random.split(key)

    params = init_params(k_param)
    # Small NCHW input consistent with the module (Conv2d(3, ...) first layer).
    x = jax.random.normal(k_input, (2, 3, 16, 16), jnp.float32)

    fwd = jax.jit(generator_forward)
    out = fwd(x, params)
    out = jax.block_until_ready(out)

    assert out.shape == (2, 3, 16, 16), out.shape
    assert bool(jnp.all(jnp.isfinite(out)))
    assert bool(jnp.all(jnp.abs(out) <= 1.0))   # tanh output range
    print("KERNEL_OK")
</pallas_src>

<mosaic_0001>
module attributes {stable_mosaic.version = 11 : i64} {
  func.func @body(%arg0: i32, %arg1: i32, %arg2: memref<1x256x128xbf16, #tpu.memory_space<vmem>>, %arg3: memref<1x1x128xf32, #tpu.memory_space<vmem>>, %arg4: memref<1x1x128xf32, #tpu.memory_space<vmem>>, %arg5: memref<1x256x128xbf16, #tpu.memory_space<vmem>>) attributes {dimension_semantics = [#tpu.dimension_semantics<parallel>, #tpu.dimension_semantics<parallel>], iteration_bounds = array<i64: 2, 1>, scalar_prefetch = 0 : i64, scratch_operands = 0 : i64, tpu.core_type = #tpu.core_type<tc>, window_params = [{transform_indices = @transform_0, window_bounds = array<i64: 1, 256, 128>}, {transform_indices = @transform_1, window_bounds = array<i64: 1, 1, 128>}, {transform_indices = @transform_2, window_bounds = array<i64: 1, 1, 128>}, {transform_indices = @transform_3, window_bounds = array<i64: 1, 256, 128>}]} {
    %c0 = arith.constant 0 : index
    %c0_0 = arith.constant 0 : index
    %c0_1 = arith.constant 0 : index
    %0 = vector.load %arg2[%c0, %c0_0, %c0_1] : memref<1x256x128xbf16, #tpu.memory_space<vmem>>, vector<1x256x128xbf16>
    %1 = vector.shape_cast %0 : vector<1x256x128xbf16> to vector<256x128xbf16>
    %2 = arith.extf %1 : vector<256x128xbf16> to vector<256x128xf32>
    %c0_2 = arith.constant 0 : index
    %c0_3 = arith.constant 0 : index
    %c0_4 = arith.constant 0 : index
    %3 = vector.load %arg3[%c0_2, %c0_3, %c0_4] : memref<1x1x128xf32, #tpu.memory_space<vmem>>, vector<1x1x128xf32>
    %4 = vector.shape_cast %3 : vector<1x1x128xf32> to vector<1x128xf32>
    %5 = vector.broadcast %4 : vector<1x128xf32> to vector<256x128xf32>
    %6 = arith.mulf %2, %5 : vector<256x128xf32>
    %c0_5 = arith.constant 0 : index
    %c0_6 = arith.constant 0 : index
    %c0_7 = arith.constant 0 : index
    %7 = vector.load %arg4[%c0_5, %c0_6, %c0_7] : memref<1x1x128xf32, #tpu.memory_space<vmem>>, vector<1x1x128xf32>
    %8 = vector.shape_cast %7 : vector<1x1x128xf32> to vector<1x128xf32>
    %9 = vector.broadcast %8 : vector<1x128xf32> to vector<256x128xf32>
    %10 = arith.addf %6, %9 : vector<256x128xf32>
    %cst = arith.constant 0.000000e+00 : f32
    %11 = vector.broadcast %cst : f32 to vector<256x128xf32>
    %12 = arith.maximumf %10, %11 : vector<256x128xf32>
    %13 = arith.truncf %12 : vector<256x128xf32> to vector<256x128xbf16>
    %c0_8 = arith.constant 0 : index
    %c0_9 = arith.constant 0 : index
    %c0_10 = arith.constant 0 : index
    %14 = vector.load %arg5[%c0_8, %c0_9, %c0_10] : memref<1x256x128xbf16, #tpu.memory_space<vmem>>, vector<1x256x128xbf16>
    %15 = vector.shape_cast %14 : vector<1x256x128xbf16> to vector<256x128xbf16>
    %16 = vector.shape_cast %13 : vector<256x128xbf16> to vector<1x256x128xbf16>
    tpu.vector_store %arg5[%c0_8, %c0_9, %c0_10], %16 {strides = array<i32>} : memref<1x256x128xbf16, #tpu.memory_space<vmem>>, vector<1x256x128xbf16>,
    return
  }
  func.func @transform_0(%arg0: i32, %arg1: i32) -> (i32, i32, i32) {
    %c0_i32 = arith.constant 0 : i32
    %c0_i32_0 = arith.constant 0 : i32
    return %arg0, %arg1, %c0_i32 : i32, i32, i32
  }
  func.func @transform_1(%arg0: i32, %arg1: i32) -> (i32, i32, i32) {
    %c0_i32 = arith.constant 0 : i32
    %c0_i32_0 = arith.constant 0 : i32
    %c0_i32_1 = arith.constant 0 : i32
    return %arg0, %c0_i32, %c0_i32_0 : i32, i32, i32
  }
  func.func @transform_2(%arg0: i32, %arg1: i32) -> (i32, i32, i32) {
    %c0_i32 = arith.constant 0 : i32
    %c0_i32_0 = arith.constant 0 : i32
    %c0_i32_1 = arith.constant 0 : i32
    return %arg0, %c0_i32, %c0_i32_0 : i32, i32, i32
  }
  func.func @transform_3(%arg0: i32, %arg1: i32) -> (i32, i32, i32) {
    %c0_i32 = arith.constant 0 : i32
    %c0_i32_0 = arith.constant 0 : i32
    return %arg0, %arg1, %c0_i32 : i32, i32, i32
  }
}

module attributes {stable_mosaic.version = 11 : i64} {
  func.func @_gemm_stats_kernel(%arg0: i32, %arg1: i32, %arg2: memref<256x256xbf16, #tpu.memory_space<vmem>>, %arg3: memref<256x128xbf16, #tpu.memory_space<vmem>>, %arg4: memref<256x128xbf16, #tpu.memory_space<vmem>>, %arg5: memref<1x2x128xf32, #tpu.memory_space<vmem>>, %arg6: memref<256x128xf32, #tpu.memory_space<vmem>>) attributes {dimension_semantics = [#tpu.dimension_semantics<parallel>, #tpu.dimension_semantics<arbitrary>], iteration_bounds = array<i64: 2, 1>, scalar_prefetch = 0 : i64, scratch_operands = 1 : i64, tpu.core_type = #tpu.core_type<tc>, window_params = [{transform_indices = @transform_0, window_bounds = array<i64: 256, 256>}, {transform_indices = @transform_1, window_bounds = array<i64: 256, 128>}, {transform_indices = @transform_2, window_bounds = array<i64: 256, 128>}, {transform_indices = @transform_3, window_bounds = array<i64: 1, 2, 128>}]} {
    %c0_i32 = arith.constant 0 : i32
    %0 = arith.cmpi eq, %arg1, %c0_i32 : i32
    %1 = arith.extui %0 : i1 to i32
    %c0_i32_0 = arith.constant 0 : i32
    %2 = arith.cmpi ne, %1, %c0_i32_0 : i32
    scf.if %2 {
      %cst_10 = arith.constant 0.000000e+00 : f32
      %12 = vector.broadcast %cst_10 : f32 to vector<256x128xf32>
      %c0_11 = arith.constant 0 : index
      %c0_12 = arith.constant 0 : index
      %13 = vector.load %arg6[%c0_11, %c0_12] : memref<256x128xf32, #tpu.memory_space<vmem>>, vector<256x128xf32>
      tpu.vector_store %arg6[%c0_11, %c0_12], %12 {strides = array<i32>} : memref<256x128xf32, #tpu.memory_space<vmem>>, vector<256x128xf32>,
    } else {
    }
    %c0 = arith.constant 0 : index
    %c0_1 = arith.constant 0 : index
    %3 = vector.load %arg6[%c0, %c0_1] : memref<256x128xf32, #tpu.memory_space<vmem>>, vector<256x128xf32>
    %c0_2 = arith.constant 0 : index
    %c0_3 = arith.constant 0 : index
    %4 = vector.load %arg2[%c0_2, %c0_3] : memref<256x256xbf16, #tpu.memory_space<vmem>>, vector<256x256xbf16>
    %c0_4 = arith.constant 0 : index
    %c0_5 = arith.constant 0 : index
    %5 = vector.load %arg3[%c0_4, %c0_5] : memref<256x128xbf16, #tpu.memory_space<vmem>>, vector<256x128xbf16>
    %cst = arith.constant dense<0.000000e+00> : vector<256x128xf32>
    %6 = tpu.matmul %4, %5, %cst {dimension_numbers = #tpu.dot_dimension_numbers<[1], [0], [0], [1], [0, 0, 1, 1], [], []>} : vector<256x256xbf16>, vector<256x128xbf16>, vector<256x128xf32> -> vector<256x128xf32>
    %7 = arith.addf %3, %6 : vector<256x128xf32>
    %c0_6 = arith.constant 0 : index
    %c0_7 = arith.constant 0 : index
    %8 = vector.load %arg6[%c0_6, %c0_7] : memref<256x128xf32, #tpu.memory_space<vmem>>, vector<256x128xf32>
    tpu.vector_store %arg6[%c0_6, %c0_7], %7 {strides = array<i32>} : memref<256x128xf32, #tpu.memory_space<vmem>>, vector<256x128xf32>,
    %c0_i32_8 = arith.constant 0 : i32
    %9 = arith.cmpi eq, %arg1, %c0_i32_8 : i32
    %10 = arith.extui %9 : i1 to i32
    %c0_i32_9 = arith.constant 0 : i32
    %11 = arith.cmpi ne, %10, %c0_i32_9 : i32
    scf.if %11 {
      %c0_10 = arith.constant 0 : index
      %c0_11 = arith.constant 0 : index
      %12 = vector.load %arg6[%c0_10, %c0_11] : memref<256x128xf32, #tpu.memory_space<vmem>>, vector<256x128xf32>
      %13 = arith.truncf %12 : vector<256x128xf32> to vector<256x128xbf16>
      %c0_12 = arith.constant 0 : index
      %c0_13 = arith.constant 0 : index
      %14 = vector.load %arg4[%c0_12, %c0_13] : memref<256x128xbf16, #tpu.memory_space<vmem>>, vector<256x128xbf16>
      tpu.vector_store %arg4[%c0_12, %c0_13], %13 {strides = array<i32>} : memref<256x128xbf16, #tpu.memory_space<vmem>>, vector<256x128xbf16>,
      %cst_14 = arith.constant dense<0.000000e+00> : vector<128xf32>
      %15 = vector.multi_reduction <add>, %12, %cst_14 [0] : vector<256x128xf32> to vector<128xf32>
      %16 = vector.shape_cast %15 : vector<128xf32> to vector<1x128xf32>
      %17 = arith.mulf %12, %12 : vector<256x128xf32>
      %cst_15 = arith.constant dense<0.000000e+00> : vector<128xf32>
      %18 = vector.multi_reduction <add>, %17, %cst_15 [0] : vector<256x128xf32> to vector<128xf32>
      %19 = vector.shape_cast %18 : vector<128xf32> to vector<1x128xf32>
      %20 = tpu.concatenate %16, %19 in 0 : vector<1x128xf32>, vector<1x128xf32> -> vector<2x128xf32>
      %c0_16 = arith.constant 0 : index
      %c0_17 = arith.constant 0 : index
      %c0_18 = arith.constant 0 : index
      %21 = vector.load %arg5[%c0_16, %c0_17, %c0_18] : memref<1x2x128xf32, #tpu.memory_space<vmem>>, vector<1x2x128xf32>
      %22 = vector.shape_cast %21 : vector<1x2x128xf32> to vector<2x128xf32>
      %23 = vector.shape_cast %20 : vector<2x128xf32> to vector<1x2x128xf32>
      tpu.vector_store %arg5[%c0_16, %c0_17, %c0_18], %23 {strides = array<i32>} : memref<1x2x128xf32, #tpu.memory_space<vmem>>, vector<1x2x128xf32>,
    } else {
    }
    return
  }
  func.func @transform_0(%arg0: i32, %arg1: i32) -> (i32, i32) {
    %c0_i32 = arith.constant 0 : i32
    return %arg0, %arg1 : i32, i32
  }
  func.func @transform_1(%arg0: i32, %arg1: i32) -> (i32, i32) {
    %c0_i32 = arith.constant 0 : i32
    %c0_i32_0 = arith.constant 0 : i32
    return %arg1, %c0_i32 : i32, i32
  }
  func.func @transform_2(%arg0: i32, %arg1: i32) -> (i32, i32) {
    %c0_i32 = arith.constant 0 : i32
    %c0_i32_0 = arith.constant 0 : i32
    return %arg0, %c0_i32 : i32, i32
  }
  func.func @transform_3(%arg0: i32, %arg1: i32) -> (i32, i32, i32) {
    %c0_i32 = arith.constant 0 : i32
    %c0_i32_0 = arith.constant 0 : i32
    %c0_i32_1 = arith.constant 0 : i32
    return %arg0, %c0_i32, %c0_i32_0 : i32, i32, i32
  }
}

module attributes {stable_mosaic.version = 11 : i64} {
  func.func @_gemm_stats_kernel(%arg0: i32, %arg1: i32, %arg2: memref<64x640xbf16, #tpu.memory_space<vmem>>, %arg3: memref<640x128xbf16, #tpu.memory_space<vmem>>, %arg4: memref<64x128xbf16, #tpu.memory_space<vmem>>, %arg5: memref<1x2x128xf32, #tpu.memory_space<vmem>>, %arg6: memref<64x128xf32, #tpu.memory_space<vmem>>) attributes {dimension_semantics = [#tpu.dimension_semantics<parallel>, #tpu.dimension_semantics<arbitrary>], iteration_bounds = array<i64: 2, 1>, scalar_prefetch = 0 : i64, scratch_operands = 1 : i64, tpu.core_type = #tpu.core_type<tc>, window_params = [{transform_indices = @transform_0, window_bounds = array<i64: 64, 640>}, {transform_indices = @transform_1, window_bounds = array<i64: 640, 128>}, {transform_indices = @transform_2, window_bounds = array<i64: 64, 128>}, {transform_indices = @transform_3, window_bounds = array<i64: 1, 2, 128>}]} {
    %c0_i32 = arith.constant 0 : i32
    %0 = arith.cmpi eq, %arg1, %c0_i32 : i32
    %1 = arith.extui %0 : i1 to i32
    %c0_i32_0 = arith.constant 0 : i32
    %2 = arith.cmpi ne, %1, %c0_i32_0 : i32
    scf.if %2 {
      %cst_10 = arith.constant 0.000000e+00 : f32
      %12 = vector.broadcast %cst_10 : f32 to vector<64x128xf32>
      %c0_11 = arith.constant 0 : index
      %c0_12 = arith.constant 0 : index
      %13 = vector.load %arg6[%c0_11, %c0_12] : memref<64x128xf32, #tpu.memory_space<vmem>>, vector<64x128xf32>
      tpu.vector_store %arg6[%c0_11, %c0_12], %12 {strides = array<i32>} : memref<64x128xf32, #tpu.memory_space<vmem>>, vector<64x128xf32>,
    } else {
    }
    %c0 = arith.constant 0 : index
    %c0_1 = arith.constant 0 : index
    %3 = vector.load %arg6[%c0, %c0_1] : memref<64x128xf32, #tpu.memory_space<vmem>>, vector<64x128xf32>
    %c0_2 = arith.constant 0 : index
    %c0_3 = arith.constant 0 : index
    %4 = vector.load %arg2[%c0_2, %c0_3] : memref<64x640xbf16, #tpu.memory_space<vmem>>, vector<64x640xbf16>
    %c0_4 = arith.constant 0 : index
    %c0_5 = arith.constant 0 : index
    %5 = vector.load %arg3[%c0_4, %c0_5] : memref<640x128xbf16, #tpu.memory_space<vmem>>, vector<640x128xbf16>
    %cst = arith.constant dense<0.000000e+00> : vector<64x128xf32>
    %6 = tpu.matmul %4, %5, %cst {dimension_numbers = #tpu.dot_dimension_numbers<[1], [0], [0], [1], [0, 0, 1, 1], [], []>} : vector<64x640xbf16>, vector<640x128xbf16>, vector<64x128xf32> -> vector<64x128xf32>
    %7 = arith.addf %3, %6 : vector<64x128xf32>
    %c0_6 = arith.constant 0 : index
    %c0_7 = arith.constant 0 : index
    %8 = vector.load %arg6[%c0_6, %c0_7] : memref<64x128xf32, #tpu.memory_space<vmem>>, vector<64x128xf32>
    tpu.vector_store %arg6[%c0_6, %c0_7], %7 {strides = array<i32>} : memref<64x128xf32, #tpu.memory_space<vmem>>, vector<64x128xf32>,
    %c0_i32_8 = arith.constant 0 : i32
    %9 = arith.cmpi eq, %arg1, %c0_i32_8 : i32
    %10 = arith.extui %9 : i1 to i32
    %c0_i32_9 = arith.constant 0 : i32
    %11 = arith.cmpi ne, %10, %c0_i32_9 : i32
    scf.if %11 {
      %c0_10 = arith.constant 0 : index
      %c0_11 = arith.constant 0 : index
      %12 = vector.load %arg6[%c0_10, %c0_11] : memref<64x128xf32, #tpu.memory_space<vmem>>, vector<64x128xf32>
      %13 = arith.truncf %12 : vector<64x128xf32> to vector<64x128xbf16>
      %c0_12 = arith.constant 0 : index
      %c0_13 = arith.constant 0 : index
      %14 = vector.load %arg4[%c0_12, %c0_13] : memref<64x128xbf16, #tpu.memory_space<vmem>>, vector<64x128xbf16>
      tpu.vector_store %arg4[%c0_12, %c0_13], %13 {strides = array<i32>} : memref<64x128xbf16, #tpu.memory_space<vmem>>, vector<64x128xbf16>,
      %cst_14 = arith.constant dense<0.000000e+00> : vector<128xf32>
      %15 = vector.multi_reduction <add>, %12, %cst_14 [0] : vector<64x128xf32> to vector<128xf32>
      %16 = vector.shape_cast %15 : vector<128xf32> to vector<1x128xf32>
      %17 = arith.mulf %12, %12 : vector<64x128xf32>
      %cst_15 = arith.constant dense<0.000000e+00> : vector<128xf32>
      %18 = vector.multi_reduction <add>, %17, %cst_15 [0] : vector<64x128xf32> to vector<128xf32>
      %19 = vector.shape_cast %18 : vector<128xf32> to vector<1x128xf32>
      %20 = tpu.concatenate %16, %19 in 0 : vector<1x128xf32>, vector<1x128xf32> -> vector<2x128xf32>
      %c0_16 = arith.constant 0 : index
      %c0_17 = arith.constant 0 : index
      %c0_18 = arith.constant 0 : index
      %21 = vector.load %arg5[%c0_16, %c0_17, %c0_18] : memref<1x2x128xf32, #tpu.memory_space<vmem>>, vector<1x2x128xf32>
      %22 = vector.shape_cast %21 : vector<1x2x128xf32> to vector<2x128xf32>
      %23 = vector.shape_cast %20 : vector<2x128xf32> to vector<1x2x128xf32>
      tpu.vector_store %arg5[%c0_16, %c0_17, %c0_18], %23 {strides = array<i32>} : memref<1x2x128xf32, #tpu.memory_space<vmem>>, vector<1x2x128xf32>,
    } else {
    }
    return
  }
  func.func @transform_0(%arg0: i32, %arg1: i32) -> (i32, i32) {
    %c0_i32 = arith.constant 0 : i32
    return %arg0, %arg1 : i32, i32
  }
  func.func @transform_1(%arg0: i32, %arg1: i32) -> (i32, i32) {
    %c0_i32 = arith.constant 0 : i32
    %c0_i32_0 = arith.constant 0 : i32
    return %arg1, %c0_i32 : i32, i32
  }
  func.func @transform_2(%arg0: i32, %arg1: i32) -> (i32, i32) {
    %c0_i32 = arith.constant 0 : i32
    %c0_i32_0 = arith.constant 0 : i32
    return %arg0, %c0_i32 : i32, i32
  }
  func.func @transform_3(%arg0: i32, %arg1: i32) -> (i32, i32, i32) {
    %c0_i32 = arith.constant 0 : i32
    %c0_i32_0 = arith.constant 0 : i32
    %c0_i32_1 = arith.constant 0 : i32
    return %arg0, %c0_i32, %c0_i32_0 : i32, i32, i32
  }
}

module attributes {stable_mosaic.version = 11 : i64} {
  func.func @body(%arg0: i32, %arg1: i32, %arg2: memref<1x64x128xbf16, #tpu.memory_space<vmem>>, %arg3: memref<1x1x128xf32, #tpu.memory_space<vmem>>, %arg4: memref<1x1x128xf32, #tpu.memory_space<vmem>>, %arg5: memref<1x64x128xbf16, #tpu.memory_space<vmem>>) attributes {dimension_semantics = [#tpu.dimension_semantics<parallel>, #tpu.dimension_semantics<parallel>], iteration_bounds = array<i64: 2, 1>, scalar_prefetch = 0 : i64, scratch_operands = 0 : i64, tpu.core_type = #tpu.core_type<tc>, window_params = [{transform_indices = @transform_0, window_bounds = array<i64: 1, 64, 128>}, {transform_indices = @transform_1, window_bounds = array<i64: 1, 1, 128>}, {transform_indices = @transform_2, window_bounds = array<i64: 1, 1, 128>}, {transform_indices = @transform_3, window_bounds = array<i64: 1, 64, 128>}]} {
    %c0 = arith.constant 0 : index
    %c0_0 = arith.constant 0 : index
    %c0_1 = arith.constant 0 : index
    %0 = vector.load %arg2[%c0, %c0_0, %c0_1] : memref<1x64x128xbf16, #tpu.memory_space<vmem>>, vector<1x64x128xbf16>
    %1 = vector.shape_cast %0 : vector<1x64x128xbf16> to vector<64x128xbf16>
    %2 = arith.extf %1 : vector<64x128xbf16> to vector<64x128xf32>
    %c0_2 = arith.constant 0 : index
    %c0_3 = arith.constant 0 : index
    %c0_4 = arith.constant 0 : index
    %3 = vector.load %arg3[%c0_2, %c0_3, %c0_4] : memref<1x1x128xf32, #tpu.memory_space<vmem>>, vector<1x1x128xf32>
    %4 = vector.shape_cast %3 : vector<1x1x128xf32> to vector<1x128xf32>
    %5 = vector.broadcast %4 : vector<1x128xf32> to vector<64x128xf32>
    %6 = arith.mulf %2, %5 : vector<64x128xf32>
    %c0_5 = arith.constant 0 : index
    %c0_6 = arith.constant 0 : index
    %c0_7 = arith.constant 0 : index
    %7 = vector.load %arg4[%c0_5, %c0_6, %c0_7] : memref<1x1x128xf32, #tpu.memory_space<vmem>>, vector<1x1x128xf32>
    %8 = vector.shape_cast %7 : vector<1x1x128xf32> to vector<1x128xf32>
    %9 = vector.broadcast %8 : vector<1x128xf32> to vector<64x128xf32>
    %10 = arith.addf %6, %9 : vector<64x128xf32>
    %cst = arith.constant 0.000000e+00 : f32
    %11 = vector.broadcast %cst : f32 to vector<64x128xf32>
    %12 = arith.maximumf %10, %11 : vector<64x128xf32>
    %13 = arith.truncf %12 : vector<64x128xf32> to vector<64x128xbf16>
    %c0_8 = arith.constant 0 : index
    %c0_9 = arith.constant 0 : index
    %c0_10 = arith.constant 0 : index
    %14 = vector.load %arg5[%c0_8, %c0_9, %c0_10] : memref<1x64x128xbf16, #tpu.memory_space<vmem>>, vector<1x64x128xbf16>
    %15 = vector.shape_cast %14 : vector<1x64x128xbf16> to vector<64x128xbf16>
    %16 = vector.shape_cast %13 : vector<64x128xbf16> to vector<1x64x128xbf16>
    tpu.vector_store %arg5[%c0_8, %c0_9, %c0_10], %16 {strides = array<i32>} : memref<1x64x128xbf16, #tpu.memory_space<vmem>>, vector<1x64x128xbf16>,
    return
  }
  func.func @transform_0(%arg0: i32, %arg1: i32) -> (i32, i32, i32) {
    %c0_i32 = arith.constant 0 : i32
    %c0_i32_0 = arith.constant 0 : i32
    return %arg0, %arg1, %c0_i32 : i32, i32, i32
  }
  func.func @transform_1(%arg0: i32, %arg1: i32) -> (i32, i32, i32) {
    %c0_i32 = arith.constant 0 : i32
    %c0_i32_0 = arith.constant 0 : i32
    %c0_i32_1 = arith.constant 0 : i32
    return %arg0, %c0_i32, %c0_i32_0 : i32, i32, i32
  }
  func.func @transform_2(%arg0: i32, %arg1: i32) -> (i32, i32, i32) {
    %c0_i32 = arith.constant 0 : i32
    %c0_i32_0 = arith.constant 0 : i32
    %c0_i32_1 = arith.constant 0 : i32
    return %arg0, %c0_i32, %c0_i32_0 : i32, i32, i32
  }
  func.func @transform_3(%arg0: i32, %arg1: i32) -> (i32, i32, i32) {
    %c0_i32 = arith.constant 0 : i32
    %c0_i32_0 = arith.constant 0 : i32
    return %arg0, %arg1, %c0_i32 : i32, i32, i32
  }
}

module attributes {stable_mosaic.version = 11 : i64} {
  func.func @_gemm_stats_kernel(%arg0: i32, %arg1: i32, %arg2: memref<16x384xbf16, #tpu.memory_space<vmem>>, %arg3: memref<384x256xbf16, #tpu.memory_space<vmem>>, %arg4: memref<16x256xbf16, #tpu.memory_space<vmem>>, %arg5: memref<1x2x256xf32, #tpu.memory_space<vmem>>, %arg6: memref<16x256xf32, #tpu.memory_space<vmem>>) attributes {dimension_semantics = [#tpu.dimension_semantics<parallel>, #tpu.dimension_semantics<arbitrary>], iteration_bounds = array<i64: 2, 3>, scalar_prefetch = 0 : i64, scratch_operands = 1 : i64, tpu.core_type = #tpu.core_type<tc>, window_params = [{transform_indices = @transform_0, window_bounds = array<i64: 16, 384>}, {transform_indices = @transform_1, window_bounds = array<i64: 384, 256>}, {transform_indices = @transform_2, window_bounds = array<i64: 16, 256>}, {transform_indices = @transform_3, window_bounds = array<i64: 1, 2, 256>}]} {
    %c0_i32 = arith.constant 0 : i32
    %0 = arith.cmpi eq, %arg1, %c0_i32 : i32
    %1 = arith.extui %0 : i1 to i32
    %c0_i32_0 = arith.constant 0 : i32
    %2 = arith.cmpi ne, %1, %c0_i32_0 : i32
    scf.if %2 {
      %cst_9 = arith.constant 0.000000e+00 : f32
      %12 = vector.broadcast %cst_9 : f32 to vector<16x256xf32>
      %c0_10 = arith.constant 0 : index
      %c0_11 = arith.constant 0 : index
      %13 = vector.load %arg6[%c0_10, %c0_11] : memref<16x256xf32, #tpu.memory_space<vmem>>, vector<16x256xf32>
      tpu.vector_store %arg6[%c0_10, %c0_11], %12 {strides = array<i32>} : memref<16x256xf32, #tpu.memory_space<vmem>>, vector<16x256xf32>,
    } else {
    }
    %c0 = arith.constant 0 : index
    %c0_1 = arith.constant 0 : index
    %3 = vector.load %arg6[%c0, %c0_1] : memref<16x256xf32, #tpu.memory_space<vmem>>, vector<16x256xf32>
    %c0_2 = arith.constant 0 : index
    %c0_3 = arith.constant 0 : index
    %4 = vector.load %arg2[%c0_2, %c0_3] : memref<16x384xbf16, #tpu.memory_space<vmem>>, vector<16x384xbf16>
    %c0_4 = arith.constant 0 : index
    %c0_5 = arith.constant 0 : index
    %5 = vector.load %arg3[%c0_4, %c0_5] : memref<384x256xbf16, #tpu.memory_space<vmem>>, vector<384x256xbf16>
    %cst = arith.constant dense<0.000000e+00> : vector<16x256xf32>
    %6 = tpu.matmul %4, %5, %cst {dimension_numbers = #tpu.dot_dimension_numbers<[1], [0], [0], [1], [0, 0, 1, 1], [], []>} : vector<16x384xbf16>, vector<384x256xbf16>, vector<16x256xf32> -> vector<16x256xf32>
    %7 = arith.addf %3, %6 : vector<16x256xf32>
    %c0_6 = arith.constant 0 : index
    %c0_7 = arith.constant 0 : index
    %8 = vector.load %arg6[%c0_6, %c0_7] : memref<16x256xf32, #tpu.memory_space<vmem>>, vector<16x256xf32>
    tpu.vector_store %arg6[%c0_6, %c0_7], %7 {strides = array<i32>} : memref<16x256xf32, #tpu.memory_space<vmem>>, vector<16x256xf32>,
    %c2_i32 = arith.constant 2 : i32
    %9 = arith.cmpi eq, %arg1, %c2_i32 : i32
    %10 = arith.extui %9 : i1 to i32
    %c0_i32_8 = arith.constant 0 : i32
    %11 = arith.cmpi ne, %10, %c0_i32_8 : i32
    scf.if %11 {
      %c0_9 = arith.constant 0 : index
      %c0_10 = arith.constant 0 : index
      %12 = vector.load %arg6[%c0_9, %c0_10] : memref<16x256xf32, #tpu.memory_space<vmem>>, vector<16x256xf32>
      %13 = arith.truncf %12 : vector<16x256xf32> to vector<16x256xbf16>
      %c0_11 = arith.constant 0 : index
      %c0_12 = arith.constant 0 : index
      %14 = vector.load %arg4[%c0_11, %c0_12] : memref<16x256xbf16, #tpu.memory_space<vmem>>, vector<16x256xbf16>
      tpu.vector_store %arg4[%c0_11, %c0_12], %13 {strides = array<i32>} : memref<16x256xbf16, #tpu.memory_space<vmem>>, vector<16x256xbf16>,
      %cst_13 = arith.constant dense<0.000000e+00> : vector<256xf32>
      %15 = vector.multi_reduction <add>, %12, %cst_13 [0] : vector<16x256xf32> to vector<256xf32>
      %16 = vector.shape_cast %15 : vector<256xf32> to vector<1x256xf32>
      %17 = arith.mulf %12, %12 : vector<16x256xf32>
      %cst_14 = arith.constant dense<0.000000e+00> : vector<256xf32>
      %18 = vector.multi_reduction <add>, %17, %cst_14 [0] : vector<16x256xf32> to vector<256xf32>
      %19 = vector.shape_cast %18 : vector<256xf32> to vector<1x256xf32>
      %20 = tpu.concatenate %16, %19 in 0 : vector<1x256xf32>, vector<1x256xf32> -> vector<2x256xf32>
      %c0_15 = arith.constant 0 : index
      %c0_16 = arith.constant 0 : index
      %c0_17 = arith.constant 0 : index
      %21 = vector.load %arg5[%c0_15, %c0_16, %c0_17] : memref<1x2x256xf32, #tpu.memory_space<vmem>>, vector<1x2x256xf32>
      %22 = vector.shape_cast %21 : vector<1x2x256xf32> to vector<2x256xf32>
      %23 = vector.shape_cast %20 : vector<2x256xf32> to vector<1x2x256xf32>
      tpu.vector_store %arg5[%c0_15, %c0_16, %c0_17], %23 {strides = array<i32>} : memref<1x2x256xf32, #tpu.memory_space<vmem>>, vector<1x2x256xf32>,
    } else {
    }
    return
  }
  func.func @transform_0(%arg0: i32, %arg1: i32) -> (i32, i32) {
    %c0_i32 = arith.constant 0 : i32
    return %arg0, %arg1 : i32, i32
  }
  func.func @transform_1(%arg0: i32, %arg1: i32) -> (i32, i32) {
    %c0_i32 = arith.constant 0 : i32
    %c0_i32_0 = arith.constant 0 : i32
    return %arg1, %c0_i32 : i32, i32
  }
  func.func @transform_2(%arg0: i32, %arg1: i32) -> (i32, i32) {
    %c0_i32 = arith.constant 0 : i32
    %c0_i32_0 = arith.constant 0 : i32
    return %arg0, %c0_i32 : i32, i32
  }
  func.func @transform_3(%arg0: i32, %arg1: i32) -> (i32, i32, i32) {
    %c0_i32 = arith.constant 0 : i32
    %c0_i32_0 = arith.constant 0 : i32
    %c0_i32_1 = arith.constant 0 : i32
    return %arg0, %c0_i32, %c0_i32_0 : i32, i32, i32
  }
}

module attributes {stable_mosaic.version = 11 : i64} {
  func.func @body(%arg0: i32, %arg1: i32, %arg2: memref<1x16x256xbf16, #tpu.memory_space<vmem>>, %arg3: memref<1x1x256xf32, #tpu.memory_space<vmem>>, %arg4: memref<1x1x256xf32, #tpu.memory_space<vmem>>, %arg5: memref<1x16x256xbf16, #tpu.memory_space<vmem>>) attributes {dimension_semantics = [#tpu.dimension_semantics<parallel>, #tpu.dimension_semantics<parallel>], iteration_bounds = array<i64: 2, 1>, scalar_prefetch = 0 : i64, scratch_operands = 0 : i64, tpu.core_type = #tpu.core_type<tc>, window_params = [{transform_indices = @transform_0, window_bounds = array<i64: 1, 16, 256>}, {transform_indices = @transform_1, window_bounds = array<i64: 1, 1, 256>}, {transform_indices = @transform_2, window_bounds = array<i64: 1, 1, 256>}, {transform_indices = @transform_3, window_bounds = array<i64: 1, 16, 256>}]} {
    %c0 = arith.constant 0 : index
    %c0_0 = arith.constant 0 : index
    %c0_1 = arith.constant 0 : index
    %0 = vector.load %arg2[%c0, %c0_0, %c0_1] : memref<1x16x256xbf16, #tpu.memory_space<vmem>>, vector<1x16x256xbf16>
    %1 = vector.shape_cast %0 : vector<1x16x256xbf16> to vector<16x256xbf16>
    %2 = arith.extf %1 : vector<16x256xbf16> to vector<16x256xf32>
    %c0_2 = arith.constant 0 : index
    %c0_3 = arith.constant 0 : index
    %c0_4 = arith.constant 0 : index
    %3 = vector.load %arg3[%c0_2, %c0_3, %c0_4] : memref<1x1x256xf32, #tpu.memory_space<vmem>>, vector<1x1x256xf32>
    %4 = vector.shape_cast %3 : vector<1x1x256xf32> to vector<1x256xf32>
    %5 = vector.broadcast %4 : vector<1x256xf32> to vector<16x256xf32>
    %6 = arith.mulf %2, %5 : vector<16x256xf32>
    %c0_5 = arith.constant 0 : index
    %c0_6 = arith.constant 0 : index
    %c0_7 = arith.constant 0 : index
    %7 = vector.load %arg4[%c0_5, %c0_6, %c0_7] : memref<1x1x256xf32, #tpu.memory_space<vmem>>, vector<1x1x256xf32>
    %8 = vector.shape_cast %7 : vector<1x1x256xf32> to vector<1x256xf32>
    %9 = vector.broadcast %8 : vector<1x256xf32> to vector<16x256xf32>
    %10 = arith.addf %6, %9 : vector<16x256xf32>
    %cst = arith.constant 0.000000e+00 : f32
    %11 = vector.broadcast %cst : f32 to vector<16x256xf32>
    %12 = arith.maximumf %10, %11 : vector<16x256xf32>
    %13 = arith.truncf %12 : vector<16x256xf32> to vector<16x256xbf16>
    %c0_8 = arith.constant 0 : index
    %c0_9 = arith.constant 0 : index
    %c0_10 = arith.constant 0 : index
    %14 = vector.load %arg5[%c0_8, %c0_9, %c0_10] : memref<1x16x256xbf16, #tpu.memory_space<vmem>>, vector<1x16x256xbf16>
    %15 = vector.shape_cast %14 : vector<1x16x256xbf16> to vector<16x256xbf16>
    %16 = vector.shape_cast %13 : vector<16x256xbf16> to vector<1x16x256xbf16>
    tpu.vector_store %arg5[%c0_8, %c0_9, %c0_10], %16 {strides = array<i32>} : memref<1x16x256xbf16, #tpu.memory_space<vmem>>, vector<1x16x256xbf16>,
    return
  }
  func.func @transform_0(%arg0: i32, %arg1: i32) -> (i32, i32, i32) {
    %c0_i32 = arith.constant 0 : i32
    %c0_i32_0 = arith.constant 0 : i32
    return %arg0, %arg1, %c0_i32 : i32, i32, i32
  }
  func.func @transform_1(%arg0: i32, %arg1: i32) -> (i32, i32, i32) {
    %c0_i32 = arith.constant 0 : i32
    %c0_i32_0 = arith.constant 0 : i32
    %c0_i32_1 = arith.constant 0 : i32
    return %arg0, %c0_i32, %c0_i32_0 : i32, i32, i32
  }
  func.func @transform_2(%arg0: i32, %arg1: i32) -> (i32, i32, i32) {
    %c0_i32 = arith.constant 0 : i32
    %c0_i32_0 = arith.constant 0 : i32
    %c0_i32_1 = arith.constant 0 : i32
    return %arg0, %c0_i32, %c0_i32_0 : i32, i32, i32
  }
  func.func @transform_3(%arg0: i32, %arg1: i32) -> (i32, i32, i32) {
    %c0_i32 = arith.constant 0 : i32
    %c0_i32_0 = arith.constant 0 : i32
    return %arg0, %arg1, %c0_i32 : i32, i32, i32
  }
}

module attributes {stable_mosaic.version = 11 : i64} {
  func.func @_gemm_stats_kernel(%arg0: i32, %arg1: i32, %arg2: memref<16x768xbf16, #tpu.memory_space<vmem>>, %arg3: memref<768x256xbf16, #tpu.memory_space<vmem>>, %arg4: memref<16x256xbf16, #tpu.memory_space<vmem>>, %arg5: memref<1x2x256xf32, #tpu.memory_space<vmem>>, %arg6: memref<16x256xf32, #tpu.memory_space<vmem>>) attributes {dimension_semantics = [#tpu.dimension_semantics<parallel>, #tpu.dimension_semantics<arbitrary>], iteration_bounds = array<i64: 2, 3>, scalar_prefetch = 0 : i64, scratch_operands = 1 : i64, tpu.core_type = #tpu.core_type<tc>, window_params = [{transform_indices = @transform_0, window_bounds = array<i64: 16, 768>}, {transform_indices = @transform_1, window_bounds = array<i64: 768, 256>}, {transform_indices = @transform_2, window_bounds = array<i64: 16, 256>}, {transform_indices = @transform_3, window_bounds = array<i64: 1, 2, 256>}]} {
    %c0_i32 = arith.constant 0 : i32
    %0 = arith.cmpi eq, %arg1, %c0_i32 : i32
    %1 = arith.extui %0 : i1 to i32
    %c0_i32_0 = arith.constant 0 : i32
    %2 = arith.cmpi ne, %1, %c0_i32_0 : i32
    scf.if %2 {
      %cst_9 = arith.constant 0.000000e+00 : f32
      %12 = vector.broadcast %cst_9 : f32 to vector<16x256xf32>
      %c0_10 = arith.constant 0 : index
      %c0_11 = arith.constant 0 : index
      %13 = vector.load %arg6[%c0_10, %c0_11] : memref<16x256xf32, #tpu.memory_space<vmem>>, vector<16x256xf32>
      tpu.vector_store %arg6[%c0_10, %c0_11], %12 {strides = array<i32>} : memref<16x256xf32, #tpu.memory_space<vmem>>, vector<16x256xf32>,
    } else {
    }
    %c0 = arith.constant 0 : index
    %c0_1 = arith.constant 0 : index
    %3 = vector.load %arg6[%c0, %c0_1] : memref<16x256xf32, #tpu.memory_space<vmem>>, vector<16x256xf32>
    %c0_2 = arith.constant 0 : index
    %c0_3 = arith.constant 0 : index
    %4 = vector.load %arg2[%c0_2, %c0_3] : memref<16x768xbf16, #tpu.memory_space<vmem>>, vector<16x768xbf16>
    %c0_4 = arith.constant 0 : index
    %c0_5 = arith.constant 0 : index
    %5 = vector.load %arg3[%c0_4, %c0_5] : memref<768x256xbf16, #tpu.memory_space<vmem>>, vector<768x256xbf16>
    %cst = arith.constant dense<0.000000e+00> : vector<16x256xf32>
    %6 = tpu.matmul %4, %5, %cst {dimension_numbers = #tpu.dot_dimension_numbers<[1], [0], [0], [1], [0, 0, 1, 1], [], []>} : vector<16x768xbf16>, vector<768x256xbf16>, vector<16x256xf32> -> vector<16x256xf32>
    %7 = arith.addf %3, %6 : vector<16x256xf32>
    %c0_6 = arith.constant 0 : index
    %c0_7 = arith.constant 0 : index
    %8 = vector.load %arg6[%c0_6, %c0_7] : memref<16x256xf32, #tpu.memory_space<vmem>>, vector<16x256xf32>
    tpu.vector_store %arg6[%c0_6, %c0_7], %7 {strides = array<i32>} : memref<16x256xf32, #tpu.memory_space<vmem>>, vector<16x256xf32>,
    %c2_i32 = arith.constant 2 : i32
    %9 = arith.cmpi eq, %arg1, %c2_i32 : i32
    %10 = arith.extui %9 : i1 to i32
    %c0_i32_8 = arith.constant 0 : i32
    %11 = arith.cmpi ne, %10, %c0_i32_8 : i32
    scf.if %11 {
      %c0_9 = arith.constant 0 : index
      %c0_10 = arith.constant 0 : index
      %12 = vector.load %arg6[%c0_9, %c0_10] : memref<16x256xf32, #tpu.memory_space<vmem>>, vector<16x256xf32>
      %13 = arith.truncf %12 : vector<16x256xf32> to vector<16x256xbf16>
      %c0_11 = arith.constant 0 : index
      %c0_12 = arith.constant 0 : index
      %14 = vector.load %arg4[%c0_11, %c0_12] : memref<16x256xbf16, #tpu.memory_space<vmem>>, vector<16x256xbf16>
      tpu.vector_store %arg4[%c0_11, %c0_12], %13 {strides = array<i32>} : memref<16x256xbf16, #tpu.memory_space<vmem>>, vector<16x256xbf16>,
      %cst_13 = arith.constant dense<0.000000e+00> : vector<256xf32>
      %15 = vector.multi_reduction <add>, %12, %cst_13 [0] : vector<16x256xf32> to vector<256xf32>
      %16 = vector.shape_cast %15 : vector<256xf32> to vector<1x256xf32>
      %17 = arith.mulf %12, %12 : vector<16x256xf32>
      %cst_14 = arith.constant dense<0.000000e+00> : vector<256xf32>
      %18 = vector.multi_reduction <add>, %17, %cst_14 [0] : vector<16x256xf32> to vector<256xf32>
      %19 = vector.shape_cast %18 : vector<256xf32> to vector<1x256xf32>
      %20 = tpu.concatenate %16, %19 in 0 : vector<1x256xf32>, vector<1x256xf32> -> vector<2x256xf32>
      %c0_15 = arith.constant 0 : index
      %c0_16 = arith.constant 0 : index
      %c0_17 = arith.constant 0 : index
      %21 = vector.load %arg5[%c0_15, %c0_16, %c0_17] : memref<1x2x256xf32, #tpu.memory_space<vmem>>, vector<1x2x256xf32>
      %22 = vector.shape_cast %21 : vector<1x2x256xf32> to vector<2x256xf32>
      %23 = vector.shape_cast %20 : vector<2x256xf32> to vector<1x2x256xf32>
      tpu.vector_store %arg5[%c0_15, %c0_16, %c0_17], %23 {strides = array<i32>} : memref<1x2x256xf32, #tpu.memory_space<vmem>>, vector<1x2x256xf32>,
    } else {
    }
    return
  }
  func.func @transform_0(%arg0: i32, %arg1: i32) -> (i32, i32) {
    %c0_i32 = arith.constant 0 : i32
    return %arg0, %arg1 : i32, i32
  }
  func.func @transform_1(%arg0: i32, %arg1: i32) -> (i32, i32) {
    %c0_i32 = arith.constant 0 : i32
    %c0_i32_0 = arith.constant 0 : i32
    return %arg1, %c0_i32 : i32, i32
  }
  func.func @transform_2(%arg0: i32, %arg1: i32) -> (i32, i32) {
    %c0_i32 = arith.constant 0 : i32
    %c0_i32_0 = arith.constant 0 : i32
    return %arg0, %c0_i32 : i32, i32
  }
  func.func @transform_3(%arg0: i32, %arg1: i32) -> (i32, i32, i32) {
    %c0_i32 = arith.constant 0 : i32
    %c0_i32_0 = arith.constant 0 : i32
    %c0_i32_1 = arith.constant 0 : i32
    return %arg0, %c0_i32, %c0_i32_0 : i32, i32, i32
  }
}

module attributes {stable_mosaic.version = 11 : i64} {
  func.func @body(%arg0: i32, %arg1: i32, %arg2: memref<1x16x256xbf16, #tpu.memory_space<vmem>>, %arg3: memref<1x1x256xf32, #tpu.memory_space<vmem>>, %arg4: memref<1x1x256xf32, #tpu.memory_space<vmem>>, %arg5: memref<1x16x256xbf16, #tpu.memory_space<vmem>>, %arg6: memref<1x16x256xbf16, #tpu.memory_space<vmem>>) attributes {dimension_semantics = [#tpu.dimension_semantics<parallel>, #tpu.dimension_semantics<parallel>], iteration_bounds = array<i64: 2, 1>, scalar_prefetch = 0 : i64, scratch_operands = 0 : i64, tpu.core_type = #tpu.core_type<tc>, window_params = [{transform_indices = @transform_0, window_bounds = array<i64: 1, 16, 256>}, {transform_indices = @transform_1, window_bounds = array<i64: 1, 1, 256>}, {transform_indices = @transform_2, window_bounds = array<i64: 1, 1, 256>}, {transform_indices = @transform_3, window_bounds = array<i64: 1, 16, 256>}, {transform_indices = @transform_4, window_bounds = array<i64: 1, 16, 256>}]} {
    %c0 = arith.constant 0 : index
    %c0_0 = arith.constant 0 : index
    %c0_1 = arith.constant 0 : index
    %0 = vector.load %arg2[%c0, %c0_0, %c0_1] : memref<1x16x256xbf16, #tpu.memory_space<vmem>>, vector<1x16x256xbf16>
    %1 = vector.shape_cast %0 : vector<1x16x256xbf16> to vector<16x256xbf16>
    %2 = arith.extf %1 : vector<16x256xbf16> to vector<16x256xf32>
    %c0_2 = arith.constant 0 : index
    %c0_3 = arith.constant 0 : index
    %c0_4 = arith.constant 0 : index
    %3 = vector.load %arg3[%c0_2, %c0_3, %c0_4] : memref<1x1x256xf32, #tpu.memory_space<vmem>>, vector<1x1x256xf32>
    %4 = vector.shape_cast %3 : vector<1x1x256xf32> to vector<1x256xf32>
    %5 = vector.broadcast %4 : vector<1x256xf32> to vector<16x256xf32>
    %6 = arith.mulf %2, %5 : vector<16x256xf32>
    %c0_5 = arith.constant 0 : index
    %c0_6 = arith.constant 0 : index
    %c0_7 = arith.constant 0 : index
    %7 = vector.load %arg4[%c0_5, %c0_6, %c0_7] : memref<1x1x256xf32, #tpu.memory_space<vmem>>, vector<1x1x256xf32>
    %8 = vector.shape_cast %7 : vector<1x1x256xf32> to vector<1x256xf32>
    %9 = vector.broadcast %8 : vector<1x256xf32> to vector<16x256xf32>
    %10 = arith.addf %6, %9 : vector<16x256xf32>
    %c0_8 = arith.constant 0 : index
    %c0_9 = arith.constant 0 : index
    %c0_10 = arith.constant 0 : index
    %11 = vector.load %arg5[%c0_8, %c0_9, %c0_10] : memref<1x16x256xbf16, #tpu.memory_space<vmem>>, vector<1x16x256xbf16>
    %12 = vector.shape_cast %11 : vector<1x16x256xbf16> to vector<16x256xbf16>
    %13 = arith.extf %12 : vector<16x256xbf16> to vector<16x256xf32>
    %14 = arith.addf %10, %13 : vector<16x256xf32>
    %15 = arith.truncf %14 : vector<16x256xf32> to vector<16x256xbf16>
    %c0_11 = arith.constant 0 : index
    %c0_12 = arith.constant 0 : index
    %c0_13 = arith.constant 0 : index
    %16 = vector.load %arg6[%c0_11, %c0_12, %c0_13] : memref<1x16x256xbf16, #tpu.memory_space<vmem>>, vector<1x16x256xbf16>
    %17 = vector.shape_cast %16 : vector<1x16x256xbf16> to vector<16x256xbf16>
    %18 = vector.shape_cast %15 : vector<16x256xbf16> to vector<1x16x256xbf16>
    tpu.vector_store %arg6[%c0_11, %c0_12, %c0_13], %18 {strides = array<i32>} : memref<1x16x256xbf16, #tpu.memory_space<vmem>>, vector<1x16x256xbf16>,
    return
  }
  func.func @transform_0(%arg0: i32, %arg1: i32) -> (i32, i32, i32) {
    %c0_i32 = arith.constant 0 : i32
    %c0_i32_0 = arith.constant 0 : i32
    return %arg0, %arg1, %c0_i32 : i32, i32, i32
  }
  func.func @transform_1(%arg0: i32, %arg1: i32) -> (i32, i32, i32) {
    %c0_i32 = arith.constant 0 : i32
    %c0_i32_0 = arith.constant 0 : i32
    %c0_i32_1 = arith.constant 0 : i32
    return %arg0, %c0_i32, %c0_i32_0 : i32, i32, i32
  }
  func.func @transform_2(%arg0: i32, %arg1: i32) -> (i32, i32, i32) {
    %c0_i32 = arith.constant 0 : i32
    %c0_i32_0 = arith.constant 0 : i32
    %c0_i32_1 = arith.constant 0 : i32
    return %arg0, %c0_i32, %c0_i32_0 : i32, i32, i32
  }
  func.func @transform_3(%arg0: i32, %arg1: i32) -> (i32, i32, i32) {
    %c0_i32 = arith.constant 0 : i32
    %c0_i32_0 = arith.constant 0 : i32
    return %arg0, %arg1, %c0_i32 : i32, i32, i32
  }
  func.func @transform_4(%arg0: i32, %arg1: i32) -> (i32, i32, i32) {
    %c0_i32 = arith.constant 0 : i32
    %c0_i32_0 = arith.constant 0 : i32
    return %arg0, %arg1, %c0_i32 : i32, i32, i32
  }
}

module attributes {stable_mosaic.version = 11 : i64} {
  func.func @_gemm_stats_kernel(%arg0: i32, %arg1: i32, %arg2: memref<16x1024xbf16, #tpu.memory_space<vmem>>, %arg3: memref<1024x512xbf16, #tpu.memory_space<vmem>>, %arg4: memref<16x512xbf16, #tpu.memory_space<vmem>>, %arg5: memref<1x2x512xf32, #tpu.memory_space<vmem>>, %arg6: memref<16x512xf32, #tpu.memory_space<vmem>>) attributes {dimension_semantics = [#tpu.dimension_semantics<parallel>, #tpu.dimension_semantics<arbitrary>], iteration_bounds = array<i64: 2, 1>, scalar_prefetch = 0 : i64, scratch_operands = 1 : i64, tpu.core_type = #tpu.core_type<tc>, window_params = [{transform_indices = @transform_0, window_bounds = array<i64: 16, 1024>}, {transform_indices = @transform_1, window_bounds = array<i64: 1024, 512>}, {transform_indices = @transform_2, window_bounds = array<i64: 16, 512>}, {transform_indices = @transform_3, window_bounds = array<i64: 1, 2, 512>}]} {
    %c0_i32 = arith.constant 0 : i32
    %0 = arith.cmpi eq, %arg1, %c0_i32 : i32
    %1 = arith.extui %0 : i1 to i32
    %c0_i32_0 = arith.constant 0 : i32
    %2 = arith.cmpi ne, %1, %c0_i32_0 : i32
    scf.if %2 {
      %cst_10 = arith.constant 0.000000e+00 : f32
      %12 = vector.broadcast %cst_10 : f32 to vector<16x512xf32>
      %c0_11 = arith.constant 0 : index
      %c0_12 = arith.constant 0 : index
      %13 = vector.load %arg6[%c0_11, %c0_12] : memref<16x512xf32, #tpu.memory_space<vmem>>, vector<16x512xf32>
      tpu.vector_store %arg6[%c0_11, %c0_12], %12 {strides = array<i32>} : memref<16x512xf32, #tpu.memory_space<vmem>>, vector<16x512xf32>,
    } else {
    }
    %c0 = arith.constant 0 : index
    %c0_1 = arith.constant 0 : index
    %3 = vector.load %arg6[%c0, %c0_1] : memref<16x512xf32, #tpu.memory_space<vmem>>, vector<16x512xf32>
    %c0_2 = arith.constant 0 : index
    %c0_3 = arith.constant 0 : index
    %4 = vector.load %arg2[%c0_2, %c0_3] : memref<16x1024xbf16, #tpu.memory_space<vmem>>, vector<16x1024xbf16>
    %c0_4 = arith.constant 0 : index
    %c0_5 = arith.constant 0 : index
    %5 = vector.load %arg3[%c0_4, %c0_5] : memref<1024x512xbf16, #tpu.memory_space<vmem>>, vector<1024x512xbf16>
    %cst = arith.constant dense<0.000000e+00> : vector<16x512xf32>
    %6 = tpu.matmul %4, %5, %cst {dimension_numbers = #tpu.dot_dimension_numbers<[1], [0], [0], [1], [0, 0, 1, 1], [], []>} : vector<16x1024xbf16>, vector<1024x512xbf16>, vector<16x512xf32> -> vector<16x512xf32>
    %7 = arith.addf %3, %6 : vector<16x512xf32>
    %c0_6 = arith.constant 0 : index
    %c0_7 = arith.constant 0 : index
    %8 = vector.load %arg6[%c0_6, %c0_7] : memref<16x512xf32, #tpu.memory_space<vmem>>, vector<16x512xf32>
    tpu.vector_store %arg6[%c0_6, %c0_7], %7 {strides = array<i32>} : memref<16x512xf32, #tpu.memory_space<vmem>>, vector<16x512xf32>,
    %c0_i32_8 = arith.constant 0 : i32
    %9 = arith.cmpi eq, %arg1, %c0_i32_8 : i32
    %10 = arith.extui %9 : i1 to i32
    %c0_i32_9 = arith.constant 0 : i32
    %11 = arith.cmpi ne, %10, %c0_i32_9 : i32
    scf.if %11 {
      %c0_10 = arith.constant 0 : index
      %c0_11 = arith.constant 0 : index
      %12 = vector.load %arg6[%c0_10, %c0_11] : memref<16x512xf32, #tpu.memory_space<vmem>>, vector<16x512xf32>
      %13 = arith.truncf %12 : vector<16x512xf32> to vector<16x512xbf16>
      %c0_12 = arith.constant 0 : index
      %c0_13 = arith.constant 0 : index
      %14 = vector.load %arg4[%c0_12, %c0_13] : memref<16x512xbf16, #tpu.memory_space<vmem>>, vector<16x512xbf16>
      tpu.vector_store %arg4[%c0_12, %c0_13], %13 {strides = array<i32>} : memref<16x512xbf16, #tpu.memory_space<vmem>>, vector<16x512xbf16>,
      %cst_14 = arith.constant dense<0.000000e+00> : vector<512xf32>
      %15 = vector.multi_reduction <add>, %12, %cst_14 [0] : vector<16x512xf32> to vector<512xf32>
      %16 = vector.shape_cast %15 : vector<512xf32> to vector<1x512xf32>
      %17 = arith.mulf %12, %12 : vector<16x512xf32>
      %cst_15 = arith.constant dense<0.000000e+00> : vector<512xf32>
      %18 = vector.multi_reduction <add>, %17, %cst_15 [0] : vector<16x512xf32> to vector<512xf32>
      %19 = vector.shape_cast %18 : vector<512xf32> to vector<1x512xf32>
      %20 = tpu.concatenate %16, %19 in 0 : vector<1x512xf32>, vector<1x512xf32> -> vector<2x512xf32>
      %c0_16 = arith.constant 0 : index
      %c0_17 = arith.constant 0 : index
      %c0_18 = arith.constant 0 : index
      %21 = vector.load %arg5[%c0_16, %c0_17, %c0_18] : memref<1x2x512xf32, #tpu.memory_space<vmem>>, vector<1x2x512xf32>
      %22 = vector.shape_cast %21 : vector<1x2x512xf32> to vector<2x512xf32>
      %23 = vector.shape_cast %20 : vector<2x512xf32> to vector<1x2x512xf32>
      tpu.vector_store %arg5[%c0_16, %c0_17, %c0_18], %23 {strides = array<i32>} : memref<1x2x512xf32, #tpu.memory_space<vmem>>, vector<1x2x512xf32>,
    } else {
    }
    return
  }
  func.func @transform_0(%arg0: i32, %arg1: i32) -> (i32, i32) {
    %c0_i32 = arith.constant 0 : i32
    return %arg0, %arg1 : i32, i32
  }
  func.func @transform_1(%arg0: i32, %arg1: i32) -> (i32, i32) {
    %c0_i32 = arith.constant 0 : i32
    %c0_i32_0 = arith.constant 0 : i32
    return %arg1, %c0_i32 : i32, i32
  }
  func.func @transform_2(%arg0: i32, %arg1: i32) -> (i32, i32) {
    %c0_i32 = arith.constant 0 : i32
    %c0_i32_0 = arith.constant 0 : i32
    return %arg0, %c0_i32 : i32, i32
  }
  func.func @transform_3(%arg0: i32, %arg1: i32) -> (i32, i32, i32) {
    %c0_i32 = arith.constant 0 : i32
    %c0_i32_0 = arith.constant 0 : i32
    %c0_i32_1 = arith.constant 0 : i32
    return %arg0, %c0_i32, %c0_i32_0 : i32, i32, i32
  }
}

module attributes {stable_mosaic.version = 11 : i64} {
  func.func @body(%arg0: i32, %arg1: i32, %arg2: memref<1x16x512xbf16, #tpu.memory_space<vmem>>, %arg3: memref<1x1x512xf32, #tpu.memory_space<vmem>>, %arg4: memref<1x1x512xf32, #tpu.memory_space<vmem>>, %arg5: memref<1x16x512xbf16, #tpu.memory_space<vmem>>) attributes {dimension_semantics = [#tpu.dimension_semantics<parallel>, #tpu.dimension_semantics<parallel>], iteration_bounds = array<i64: 2, 1>, scalar_prefetch = 0 : i64, scratch_operands = 0 : i64, tpu.core_type = #tpu.core_type<tc>, window_params = [{transform_indices = @transform_0, window_bounds = array<i64: 1, 16, 512>}, {transform_indices = @transform_1, window_bounds = array<i64: 1, 1, 512>}, {transform_indices = @transform_2, window_bounds = array<i64: 1, 1, 512>}, {transform_indices = @transform_3, window_bounds = array<i64: 1, 16, 512>}]} {
    %c0 = arith.constant 0 : index
    %c0_0 = arith.constant 0 : index
    %c0_1 = arith.constant 0 : index
    %0 = vector.load %arg2[%c0, %c0_0, %c0_1] : memref<1x16x512xbf16, #tpu.memory_space<vmem>>, vector<1x16x512xbf16>
    %1 = vector.shape_cast %0 : vector<1x16x512xbf16> to vector<16x512xbf16>
    %2 = arith.extf %1 : vector<16x512xbf16> to vector<16x512xf32>
    %c0_2 = arith.constant 0 : index
    %c0_3 = arith.constant 0 : index
    %c0_4 = arith.constant 0 : index
    %3 = vector.load %arg3[%c0_2, %c0_3, %c0_4] : memref<1x1x512xf32, #tpu.memory_space<vmem>>, vector<1x1x512xf32>
    %4 = vector.shape_cast %3 : vector<1x1x512xf32> to vector<1x512xf32>
    %5 = vector.broadcast %4 : vector<1x512xf32> to vector<16x512xf32>
    %6 = arith.mulf %2, %5 : vector<16x512xf32>
    %c0_5 = arith.constant 0 : index
    %c0_6 = arith.constant 0 : index
    %c0_7 = arith.constant 0 : index
    %7 = vector.load %arg4[%c0_5, %c0_6, %c0_7] : memref<1x1x512xf32, #tpu.memory_space<vmem>>, vector<1x1x512xf32>
    %8 = vector.shape_cast %7 : vector<1x1x512xf32> to vector<1x512xf32>
    %9 = vector.broadcast %8 : vector<1x512xf32> to vector<16x512xf32>
    %10 = arith.addf %6, %9 : vector<16x512xf32>
    %cst = arith.constant 0.000000e+00 : f32
    %11 = vector.broadcast %cst : f32 to vector<16x512xf32>
    %12 = arith.maximumf %10, %11 : vector<16x512xf32>
    %13 = arith.truncf %12 : vector<16x512xf32> to vector<16x512xbf16>
    %c0_8 = arith.constant 0 : index
    %c0_9 = arith.constant 0 : index
    %c0_10 = arith.constant 0 : index
    %14 = vector.load %arg5[%c0_8, %c0_9, %c0_10] : memref<1x16x512xbf16, #tpu.memory_space<vmem>>, vector<1x16x512xbf16>
    %15 = vector.shape_cast %14 : vector<1x16x512xbf16> to vector<16x512xbf16>
    %16 = vector.shape_cast %13 : vector<16x512xbf16> to vector<1x16x512xbf16>
    tpu.vector_store %arg5[%c0_8, %c0_9, %c0_10], %16 {strides = array<i32>} : memref<1x16x512xbf16, #tpu.memory_space<vmem>>, vector<1x16x512xbf16>,
    return
  }
  func.func @transform_0(%arg0: i32, %arg1: i32) -> (i32, i32, i32) {
    %c0_i32 = arith.constant 0 : i32
    %c0_i32_0 = arith.constant 0 : i32
    return %arg0, %arg1, %c0_i32 : i32, i32, i32
  }
  func.func @transform_1(%arg0: i32, %arg1: i32) -> (i32, i32, i32) {
    %c0_i32 = arith.constant 0 : i32
    %c0_i32_0 = arith.constant 0 : i32
    %c0_i32_1 = arith.constant 0 : i32
    return %arg0, %c0_i32, %c0_i32_0 : i32, i32, i32
  }
  func.func @transform_2(%arg0: i32, %arg1: i32) -> (i32, i32, i32) {
    %c0_i32 = arith.constant 0 : i32
    %c0_i32_0 = arith.constant 0 : i32
    %c0_i32_1 = arith.constant 0 : i32
    return %arg0, %c0_i32, %c0_i32_0 : i32, i32, i32
  }
  func.func @transform_3(%arg0: i32, %arg1: i32) -> (i32, i32, i32) {
    %c0_i32 = arith.constant 0 : i32
    %c0_i32_0 = arith.constant 0 : i32
    return %arg0, %arg1, %c0_i32 : i32, i32, i32
  }
}

module attributes {stable_mosaic.version = 11 : i64} {
  func.func @_gemm_stats_kernel(%arg0: i32, %arg1: i32, %arg2: memref<64x512xbf16, #tpu.memory_space<vmem>>, %arg3: memref<512x256xbf16, #tpu.memory_space<vmem>>, %arg4: memref<64x256xbf16, #tpu.memory_space<vmem>>, %arg5: memref<1x2x256xf32, #tpu.memory_space<vmem>>, %arg6: memref<64x256xf32, #tpu.memory_space<vmem>>) attributes {dimension_semantics = [#tpu.dimension_semantics<parallel>, #tpu.dimension_semantics<arbitrary>], iteration_bounds = array<i64: 2, 1>, scalar_prefetch = 0 : i64, scratch_operands = 1 : i64, tpu.core_type = #tpu.core_type<tc>, window_params = [{transform_indices = @transform_0, window_bounds = array<i64: 64, 512>}, {transform_indices = @transform_1, window_bounds = array<i64: 512, 256>}, {transform_indices = @transform_2, window_bounds = array<i64: 64, 256>}, {transform_indices = @transform_3, window_bounds = array<i64: 1, 2, 256>}]} {
    %c0_i32 = arith.constant 0 : i32
    %0 = arith.cmpi eq, %arg1, %c0_i32 : i32
    %1 = arith.extui %0 : i1 to i32
    %c0_i32_0 = arith.constant 0 : i32
    %2 = arith.cmpi ne, %1, %c0_i32_0 : i32
    scf.if %2 {
      %cst_10 = arith.constant 0.000000e+00 : f32
      %12 = vector.broadcast %cst_10 : f32 to vector<64x256xf32>
      %c0_11 = arith.constant 0 : index
      %c0_12 = arith.constant 0 : index
      %13 = vector.load %arg6[%c0_11, %c0_12] : memref<64x256xf32, #tpu.memory_space<vmem>>, vector<64x256xf32>
      tpu.vector_store %arg6[%c0_11, %c0_12], %12 {strides = array<i32>} : memref<64x256xf32, #tpu.memory_space<vmem>>, vector<64x256xf32>,
    } else {
    }
    %c0 = arith.constant 0 : index
    %c0_1 = arith.constant 0 : index
    %3 = vector.load %arg6[%c0, %c0_1] : memref<64x256xf32, #tpu.memory_space<vmem>>, vector<64x256xf32>
    %c0_2 = arith.constant 0 : index
    %c0_3 = arith.constant 0 : index
    %4 = vector.load %arg2[%c0_2, %c0_3] : memref<64x512xbf16, #tpu.memory_space<vmem>>, vector<64x512xbf16>
    %c0_4 = arith.constant 0 : index
    %c0_5 = arith.constant 0 : index
    %5 = vector.load %arg3[%c0_4, %c0_5] : memref<512x256xbf16, #tpu.memory_space<vmem>>, vector<512x256xbf16>
    %cst = arith.constant dense<0.000000e+00> : vector<64x256xf32>
    %6 = tpu.matmul %4, %5, %cst {dimension_numbers = #tpu.dot_dimension_numbers<[1], [0], [0], [1], [0, 0, 1, 1], [], []>} : vector<64x512xbf16>, vector<512x256xbf16>, vector<64x256xf32> -> vector<64x256xf32>
    %7 = arith.addf %3, %6 : vector<64x256xf32>
    %c0_6 = arith.constant 0 : index
    %c0_7 = arith.constant 0 : index
    %8 = vector.load %arg6[%c0_6, %c0_7] : memref<64x256xf32, #tpu.memory_space<vmem>>, vector<64x256xf32>
    tpu.vector_store %arg6[%c0_6, %c0_7], %7 {strides = array<i32>} : memref<64x256xf32, #tpu.memory_space<vmem>>, vector<64x256xf32>,
    %c0_i32_8 = arith.constant 0 : i32
    %9 = arith.cmpi eq, %arg1, %c0_i32_8 : i32
    %10 = arith.extui %9 : i1 to i32
    %c0_i32_9 = arith.constant 0 : i32
    %11 = arith.cmpi ne, %10, %c0_i32_9 : i32
    scf.if %11 {
      %c0_10 = arith.constant 0 : index
      %c0_11 = arith.constant 0 : index
      %12 = vector.load %arg6[%c0_10, %c0_11] : memref<64x256xf32, #tpu.memory_space<vmem>>, vector<64x256xf32>
      %13 = arith.truncf %12 : vector<64x256xf32> to vector<64x256xbf16>
      %c0_12 = arith.constant 0 : index
      %c0_13 = arith.constant 0 : index
      %14 = vector.load %arg4[%c0_12, %c0_13] : memref<64x256xbf16, #tpu.memory_space<vmem>>, vector<64x256xbf16>
      tpu.vector_store %arg4[%c0_12, %c0_13], %13 {strides = array<i32>} : memref<64x256xbf16, #tpu.memory_space<vmem>>, vector<64x256xbf16>,
      %cst_14 = arith.constant dense<0.000000e+00> : vector<256xf32>
      %15 = vector.multi_reduction <add>, %12, %cst_14 [0] : vector<64x256xf32> to vector<256xf32>
      %16 = vector.shape_cast %15 : vector<256xf32> to vector<1x256xf32>
      %17 = arith.mulf %12, %12 : vector<64x256xf32>
      %cst_15 = arith.constant dense<0.000000e+00> : vector<256xf32>
      %18 = vector.multi_reduction <add>, %17, %cst_15 [0] : vector<64x256xf32> to vector<256xf32>
      %19 = vector.shape_cast %18 : vector<256xf32> to vector<1x256xf32>
      %20 = tpu.concatenate %16, %19 in 0 : vector<1x256xf32>, vector<1x256xf32> -> vector<2x256xf32>
      %c0_16 = arith.constant 0 : index
      %c0_17 = arith.constant 0 : index
      %c0_18 = arith.constant 0 : index
      %21 = vector.load %arg5[%c0_16, %c0_17, %c0_18] : memref<1x2x256xf32, #tpu.memory_space<vmem>>, vector<1x2x256xf32>
      %22 = vector.shape_cast %21 : vector<1x2x256xf32> to vector<2x256xf32>
      %23 = vector.shape_cast %20 : vector<2x256xf32> to vector<1x2x256xf32>
      tpu.vector_store %arg5[%c0_16, %c0_17, %c0_18], %23 {strides = array<i32>} : memref<1x2x256xf32, #tpu.memory_space<vmem>>, vector<1x2x256xf32>,
    } else {
    }
    return
  }
  func.func @transform_0(%arg0: i32, %arg1: i32) -> (i32, i32) {
    %c0_i32 = arith.constant 0 : i32
    return %arg0, %arg1 : i32, i32
  }
  func.func @transform_1(%arg0: i32, %arg1: i32) -> (i32, i32) {
    %c0_i32 = arith.constant 0 : i32
    %c0_i32_0 = arith.constant 0 : i32
    return %arg1, %c0_i32 : i32, i32
  }
  func.func @transform_2(%arg0: i32, %arg1: i32) -> (i32, i32) {
    %c0_i32 = arith.constant 0 : i32
    %c0_i32_0 = arith.constant 0 : i32
    return %arg0, %c0_i32 : i32, i32
  }
  func.func @transform_3(%arg0: i32, %arg1: i32) -> (i32, i32, i32) {
    %c0_i32 = arith.constant 0 : i32
    %c0_i32_0 = arith.constant 0 : i32
    %c0_i32_1 = arith.constant 0 : i32
    return %arg0, %c0_i32, %c0_i32_0 : i32, i32, i32
  }
}

module attributes {stable_mosaic.version = 11 : i64} {
  func.func @body(%arg0: i32, %arg1: i32, %arg2: memref<1x64x256xbf16, #tpu.memory_space<vmem>>, %arg3: memref<1x1x256xf32, #tpu.memory_space<vmem>>, %arg4: memref<1x1x256xf32, #tpu.memory_space<vmem>>, %arg5: memref<1x64x256xbf16, #tpu.memory_space<vmem>>) attributes {dimension_semantics = [#tpu.dimension_semantics<parallel>, #tpu.dimension_semantics<parallel>], iteration_bounds = array<i64: 2, 1>, scalar_prefetch = 0 : i64, scratch_operands = 0 : i64, tpu.core_type = #tpu.core_type<tc>, window_params = [{transform_indices = @transform_0, window_bounds = array<i64: 1, 64, 256>}, {transform_indices = @transform_1, window_bounds = array<i64: 1, 1, 256>}, {transform_indices = @transform_2, window_bounds = array<i64: 1, 1, 256>}, {transform_indices = @transform_3, window_bounds = array<i64: 1, 64, 256>}]} {
    %c0 = arith.constant 0 : index
    %c0_0 = arith.constant 0 : index
    %c0_1 = arith.constant 0 : index
    %0 = vector.load %arg2[%c0, %c0_0, %c0_1] : memref<1x64x256xbf16, #tpu.memory_space<vmem>>, vector<1x64x256xbf16>
    %1 = vector.shape_cast %0 : vector<1x64x256xbf16> to vector<64x256xbf16>
    %2 = arith.extf %1 : vector<64x256xbf16> to vector<64x256xf32>
    %c0_2 = arith.constant 0 : index
    %c0_3 = arith.constant 0 : index
    %c0_4 = arith.constant 0 : index
    %3 = vector.load %arg3[%c0_2, %c0_3, %c0_4] : memref<1x1x256xf32, #tpu.memory_space<vmem>>, vector<1x1x256xf32>
    %4 = vector.shape_cast %3 : vector<1x1x256xf32> to vector<1x256xf32>
    %5 = vector.broadcast %4 : vector<1x256xf32> to vector<64x256xf32>
    %6 = arith.mulf %2, %5 : vector<64x256xf32>
    %c0_5 = arith.constant 0 : index
    %c0_6 = arith.constant 0 : index
    %c0_7 = arith.constant 0 : index
    %7 = vector.load %arg4[%c0_5, %c0_6, %c0_7] : memref<1x1x256xf32, #tpu.memory_space<vmem>>, vector<1x1x256xf32>
    %8 = vector.shape_cast %7 : vector<1x1x256xf32> to vector<1x256xf32>
    %9 = vector.broadcast %8 : vector<1x256xf32> to vector<64x256xf32>
    %10 = arith.addf %6, %9 : vector<64x256xf32>
    %cst = arith.constant 0.000000e+00 : f32
    %11 = vector.broadcast %cst : f32 to vector<64x256xf32>
    %12 = arith.maximumf %10, %11 : vector<64x256xf32>
    %13 = arith.truncf %12 : vector<64x256xf32> to vector<64x256xbf16>
    %c0_8 = arith.constant 0 : index
    %c0_9 = arith.constant 0 : index
    %c0_10 = arith.constant 0 : index
    %14 = vector.load %arg5[%c0_8, %c0_9, %c0_10] : memref<1x64x256xbf16, #tpu.memory_space<vmem>>, vector<1x64x256xbf16>
    %15 = vector.shape_cast %14 : vector<1x64x256xbf16> to vector<64x256xbf16>
    %16 = vector.shape_cast %13 : vector<64x256xbf16> to vector<1x64x256xbf16>
    tpu.vector_store %arg5[%c0_8, %c0_9, %c0_10], %16 {strides = array<i32>} : memref<1x64x256xbf16, #tpu.memory_space<vmem>>, vector<1x64x256xbf16>,
    return
  }
  func.func @transform_0(%arg0: i32, %arg1: i32) -> (i32, i32, i32) {
    %c0_i32 = arith.constant 0 : i32
    %c0_i32_0 = arith.constant 0 : i32
    return %arg0, %arg1, %c0_i32 : i32, i32, i32
  }
  func.func @transform_1(%arg0: i32, %arg1: i32) -> (i32, i32, i32) {
    %c0_i32 = arith.constant 0 : i32
    %c0_i32_0 = arith.constant 0 : i32
    %c0_i32_1 = arith.constant 0 : i32
    return %arg0, %c0_i32, %c0_i32_0 : i32, i32, i32
  }
  func.func @transform_2(%arg0: i32, %arg1: i32) -> (i32, i32, i32) {
    %c0_i32 = arith.constant 0 : i32
    %c0_i32_0 = arith.constant 0 : i32
    %c0_i32_1 = arith.constant 0 : i32
    return %arg0, %c0_i32, %c0_i32_0 : i32, i32, i32
  }
  func.func @transform_3(%arg0: i32, %arg1: i32) -> (i32, i32, i32) {
    %c0_i32 = arith.constant 0 : i32
    %c0_i32_0 = arith.constant 0 : i32
    return %arg0, %arg1, %c0_i32 : i32, i32, i32
  }
}

module attributes {stable_mosaic.version = 11 : i64} {
  func.func @body(%arg0: i32, %arg1: i32, %arg2: memref<256x640xbf16, #tpu.memory_space<vmem>>, %arg3: memref<640x128xbf16, #tpu.memory_space<vmem>>, %arg4: memref<1x128xf32, #tpu.memory_space<vmem>>, %arg5: memref<256x128xf32, #tpu.memory_space<vmem>>, %arg6: memref<256x128xf32, #tpu.memory_space<vmem>>) attributes {dimension_semantics = [#tpu.dimension_semantics<parallel>, #tpu.dimension_semantics<arbitrary>], iteration_bounds = array<i64: 2, 5>, scalar_prefetch = 0 : i64, scratch_operands = 1 : i64, tpu.core_type = #tpu.core_type<tc>, window_params = [{transform_indices = @transform_0, window_bounds = array<i64: 256, 640>}, {transform_indices = @transform_1, window_bounds = array<i64: 640, 128>}, {pipeline_mode = #tpu.pipeline_mode<synchronous>, transform_indices = @transform_2, window_bounds = array<i64: 1, 128>}, {transform_indices = @transform_3, window_bounds = array<i64: 256, 128>}]} {
    %c0_i32 = arith.constant 0 : i32
    %0 = arith.cmpi eq, %arg1, %c0_i32 : i32
    %1 = arith.extui %0 : i1 to i32
    %c0_i32_0 = arith.constant 0 : i32
    %2 = arith.cmpi ne, %1, %c0_i32_0 : i32
    scf.if %2 {
      %cst_9 = arith.constant 0.000000e+00 : f32
      %12 = vector.broadcast %cst_9 : f32 to vector<256x128xf32>
      %c0_10 = arith.constant 0 : index
      %c0_11 = arith.constant 0 : index
      %13 = vector.load %arg6[%c0_10, %c0_11] : memref<256x128xf32, #tpu.memory_space<vmem>>, vector<256x128xf32>
      tpu.vector_store %arg6[%c0_10, %c0_11], %12 {strides = array<i32>} : memref<256x128xf32, #tpu.memory_space<vmem>>, vector<256x128xf32>,
    } else {
    }
    %c0 = arith.constant 0 : index
    %c0_1 = arith.constant 0 : index
    %3 = vector.load %arg6[%c0, %c0_1] : memref<256x128xf32, #tpu.memory_space<vmem>>, vector<256x128xf32>
    %c0_2 = arith.constant 0 : index
    %c0_3 = arith.constant 0 : index
    %4 = vector.load %arg2[%c0_2, %c0_3] : memref<256x640xbf16, #tpu.memory_space<vmem>>, vector<256x640xbf16>
    %c0_4 = arith.constant 0 : index
    %c0_5 = arith.constant 0 : index
    %5 = vector.load %arg3[%c0_4, %c0_5] : memref<640x128xbf16, #tpu.memory_space<vmem>>, vector<640x128xbf16>
    %cst = arith.constant dense<0.000000e+00> : vector<256x128xf32>
    %6 = tpu.matmul %4, %5, %cst {dimension_numbers = #tpu.dot_dimension_numbers<[1], [0], [0], [1], [0, 0, 1, 1], [], []>} : vector<256x640xbf16>, vector<640x128xbf16>, vector<256x128xf32> -> vector<256x128xf32>
    %7 = arith.addf %3, %6 : vector<256x128xf32>
    %c0_6 = arith.constant 0 : index
    %c0_7 = arith.constant 0 : index
    %8 = vector.load %arg6[%c0_6, %c0_7] : memref<256x128xf32, #tpu.memory_space<vmem>>, vector<256x128xf32>
    tpu.vector_store %arg6[%c0_6, %c0_7], %7 {strides = array<i32>} : memref<256x128xf32, #tpu.memory_space<vmem>>, vector<256x128xf32>,
    %c4_i32 = arith.constant 4 : i32
    %9 = arith.cmpi eq, %arg1, %c4_i32 : i32
    %10 = arith.extui %9 : i1 to i32
    %c0_i32_8 = arith.constant 0 : i32
    %11 = arith.cmpi ne, %10, %c0_i32_8 : i32
    scf.if %11 {
      %c0_9 = arith.constant 0 : index
      %c0_10 = arith.constant 0 : index
      %12 = vector.load %arg6[%c0_9, %c0_10] : memref<256x128xf32, #tpu.memory_space<vmem>>, vector<256x128xf32>
      %c0_11 = arith.constant 0 : index
      %c0_12 = arith.constant 0 : index
      %13 = vector.load %arg4[%c0_11, %c0_12] : memref<1x128xf32, #tpu.memory_space<vmem>>, vector<1x128xf32>
      %14 = vector.broadcast %13 : vector<1x128xf32> to vector<256x128xf32>
      %15 = arith.addf %12, %14 : vector<256x128xf32>
      %16 = math.tanh %15 : vector<256x128xf32>
      %c0_13 = arith.constant 0 : index
      %c0_14 = arith.constant 0 : index
      %17 = vector.load %arg5[%c0_13, %c0_14] : memref<256x128xf32, #tpu.memory_space<vmem>>, vector<256x128xf32>
      tpu.vector_store %arg5[%c0_13, %c0_14], %16 {strides = array<i32>} : memref<256x128xf32, #tpu.memory_space<vmem>>, vector<256x128xf32>,
    } else {
    }
    return
  }
  func.func @transform_0(%arg0: i32, %arg1: i32) -> (i32, i32) {
    %c0_i32 = arith.constant 0 : i32
    return %arg0, %arg1 : i32, i32
  }
  func.func @transform_1(%arg0: i32, %arg1: i32) -> (i32, i32) {
    %c0_i32 = arith.constant 0 : i32
    %c0_i32_0 = arith.constant 0 : i32
    return %arg1, %c0_i32 : i32, i32
  }
  func.func @transform_2(%arg0: i32, %arg1: i32) -> (i32, i32) {
    %c0_i32 = arith.constant 0 : i32
    %c0_i32_0 = arith.constant 0 : i32
    %c0_i32_1 = arith.constant 0 : i32
    return %c0_i32, %c0_i32_0 : i32, i32
  }
  func.func @transform_3(%arg0: i32, %arg1: i32) -> (i32, i32) {
    %c0_i32 = arith.constant 0 : i32
    %c0_i32_0 = arith.constant 0 : i32
    return %arg0, %c0_i32 : i32, i32
  }
}

</mosaic_0001>

<bundles_post_ra>
// kernel: generator_forward.36
= control target key start
LH: loop header
LB: loop body
LE: loop exit
PB: predicated region body
PF: predicated region fallthrough
CT: control target
= control target key end

     0   :  { %s998_s12 = smov 0   ;;  %s1000_s13 = smov 0   ;;  %s1150_s0 = inlined_call_operand.vmem [shape: bf16[2,256,128], index: 0, kind: input, shape index: {}]   ;;  %s1151_s1 = inlined_call_operand.vmem [shape: f32[2,1,128], index: 1, kind: input, shape index: {}]   ;;  %s1152_s2 = inlined_call_operand.vmem [shape: f32[2,1,128], index: 2, kind: input, shape index: {}]   ;;  %s1153_s3 = inlined_call_operand.vmem [shape: bf16[2,256,128], index: 3, kind: output, shape index: {}]  }
   0x1   :  { %s1002_s14 = smov 0  }
   0x2 LB: > { %s25_s15 = sadd.s32 1, %s972_s13  ;;  %p681_p0 = scmp.ge.s32.totalorder %s976_s14, 1  ;;  %s976_s14 = sphi %s1002_s14, %s13_s14   ;;  %s972_s13 = sphi %s1000_s13, %s1155_s13   ;;  %s968_s12 = sphi %s998_s12, %s1154_s12  }
   0x3   : > { %p27_p1 = scmp.ge.s32.totalorder %s25_s15, 2  ;;  %p174_p2 = scmp.lt.s32.totalorder %s976_s14, 3 }
   0x5   : > { %s1157_s15 = smov (%p27_p1, %s25_s15), 0  ;;  %p175_p3 = pnand %p681_p0, %p174_p2 }
   0x6   : > { %p213_p4 = scmp.lt.s32.totalorder (!%p175_p3), %s968_s12, 1 }
   0x7   : > { %178 = sbr.rel (%p175_p3) target bundleno = 58 (0x3a), region = 32 }
   0xc   : > { %s1159_s12 = smov (!%p213_p4, %s968_s12), 1 }
   0xd   : > { %s722_s16 = sshll.u32 %s1159_s12, 7  ;;  %s224_s19 = scalar_lea.vmem %s1151_s1, %s1159_s12 }
   0xe   : > { %s1028_s22 = scalar_lea.vmem %s1150_s0, %s722_s16  ;;  %s227_s25 = scalar_lea.vmem %s1152_s2, %s1159_s12  ;;  %v1035_v1 = vld [vmem:[%s224_s19] ss:$0 sm:$0xff] }
   0xf   : > { %v757_v0 = vld [vmem:[%s1028_s22] sm:$0xff]   ;;  %v900_v2 = vld [vmem:[%s1028_s22 + $0x8] sm:$0xff]   ;;  %v901_v7 = vld [vmem:[%s1028_s22 + $0x10] sm:$0xff]   ;;  %s1065_s28 = scalar_lea.vmem %s1153_s3, %s722_s16 }
  0x10   : > { %v758_v3 = vunpack.c.l.bf16 %v757_v0  ;;  %v759_v4 = vunpack.c.h.bf16 %v757_v0  ;;  %v762_v5 = vunpack.c.l.bf16 %v900_v2  ;;  %v763_v6 = vunpack.c.h.bf16 %v900_v2  ;;  %v902_v8 = vld [vmem:[%s1028_s22 + $0x18] sm:$0xff]   ;;  %v1040_v9 = vld [vmem:[%s227_s25] ss:$0 sm:$0xff]  ;;  %v904_v35 = vld [vmem:[%s1028_s22 + $0x28] sm:$0xff]  }
  0x11   : > { %v766_v10 = vunpack.c.l.bf16 %v901_v7  ;;  %v767_v11 = vunpack.c.h.bf16 %v901_v7  ;;  %v770_v12 = vunpack.c.l.bf16 %v902_v8  ;;  %v771_v13 = vunpack.c.h.bf16 %v902_v8  ;;  %v903_v30 = vld [vmem:[%s1028_s22 + $0x20] sm:$0xff]   ;;  %v905_v40 = vld [vmem:[%s1028_s22 + $0x30] sm:$0xff]   ;;  %v906_v45 = vld [vmem:[%s1028_s22 + $0x38] sm:$0xff]  }
  0x12   : > { %v309_v14 = vmul.f32 %v758_v3, %v1035_v1  ;;  %v310_v15 = vmul.f32 %v759_v4, %v1035_v1  ;;  %v311_v16 = vmul.f32 %v762_v5, %v1035_v1  ;;  %v312_v17 = vmul.f32 %v763_v6, %v1035_v1  ;;  %v907_v3 = vld [vmem:[%s1028_s22 + $0x40] sm:$0xff]  }
  0x13   : > { %v313_v18 = vmul.f32 %v766_v10, %v1035_v1  ;;  %v314_v19 = vmul.f32 %v767_v11, %v1035_v1  ;;  %v315_v20 = vmul.f32 %v770_v12, %v1035_v1  ;;  %v316_v21 = vmul.f32 %v771_v13, %v1035_v1  ;;  %v908_v13 = vld [vmem:[%s1028_s22 + $0x48] sm:$0xff]  }
  0x14   : > { %v348_v22 = vadd.f32 %v1040_v9, %v309_v14  ;;  %v349_v23 = vadd.f32 %v1040_v9, %v310_v15  ;;  %v350_v24 = vadd.f32 %v1040_v9, %v311_v16  ;;  %v351_v25 = vadd.f32 %v1040_v9, %v312_v17 }
  0x15   : > { %v352_v26 = vadd.f32 %v1040_v9, %v313_v18  ;;  %v353_v27 = vadd.f32 %v1040_v9, %v314_v19  ;;  %v354_v28 = vadd.f32 %v1040_v9, %v315_v20  ;;  %v355_v29 = vadd.f32 %v1040_v9, %v316_v21  ;;  %v909_v18 = vld [vmem:[%s1028_s22 + $0x50] sm:$0xff]  }
  0x16   : > { %v380_v31 = vmax.f32 %v348_v22, 0.0  ;;  %v381_v32 = vmax.f32 %v349_v23, 0.0  ;;  %v382_v33 = vmax.f32 %v350_v24, 0.0  ;;  %v383_v34 = vmax.f32 %v351_v25, 0.0  ;;  %v910_v23 = vld [vmem:[%s1028_s22 + $0x58] sm:$0xff]  }
  0x17   : > { %v384_v36 = vmax.f32 %v352_v26, 0.0  ;;  %v385_v37 = vmax.f32 %v353_v27, 0.0  ;;  %v386_v38 = vmax.f32 %v354_v28, 0.0  ;;  %v387_v39 = vmax.f32 %v355_v29, 0.0 }
  0x18   : > { %v823_v41 = vpack.c.bf16 %v381_v32, %v380_v31  ;;  %v828_v42 = vpack.c.bf16 %v383_v34, %v382_v33  ;;  %v774_v43 = vunpack.c.l.bf16 %v903_v30  ;;  %v775_v44 = vunpack.c.h.bf16 %v903_v30 }
  0x19   : > { %v833_v46 = vpack.c.bf16 %v385_v37, %v384_v36  ;;  %v838_v47 = vpack.c.bf16 %v387_v39, %v386_v38  ;;  %v778_v48 = vunpack.c.l.bf16 %v904_v35  ;;  %v779_v49 = vunpack.c.h.bf16 %v904_v35 }
  0x1a   : > { %824 = vst [vmem:[%s1065_s28] sm:$0xff] %v823_v41   ;;  %915 = vst [vmem:[%s1065_s28 + $0x8] sm:$0xff] %v828_v42   ;;  %v317_v50 = vmul.f32 %v774_v43, %v1035_v1  ;;  %v318_v51 = vmul.f32 %v775_v44, %v1035_v1  ;;  %v782_v52 = vunpack.c.l.bf16 %v905_v40  ;;  %v783_v53 = vunpack.c.h.bf16 %v905_v40  ;;  %v911_v40 = vld [vmem:[%s1028_s22 + $0x60] sm:$0xff]  }
  0x1b   : > { %916 = vst [vmem:[%s1065_s28 + $0x10] sm:$0xff] %v833_v46   ;;  %917 = vst [vmem:[%s1065_s28 + $0x18] sm:$0xff] %v838_v47   ;;  %v319_v54 = vmul.f32 %v778_v48, %v1035_v1  ;;  %v320_v55 = vmul.f32 %v779_v49, %v1035_v1  ;;  %v786_v56 = vunpack.c.l.bf16 %v906_v45  ;;  %v787_v57 = vunpack.c.h.bf16 %v906_v45 }
  0x1c   : > { %v356_v58 = vadd.f32 %v1040_v9, %v317_v50  ;;  %v357_v59 = vadd.f32 %v1040_v9, %v318_v51  ;;  %v321_v60 = vmul.f32 %v782_v52, %v1035_v1  ;;  %v322_v61 = vmul.f32 %v783_v53, %v1035_v1  ;;  %v912_v53 = vld [vmem:[%s1028_s22 + $0x68] sm:$0xff]  }
  0x1d   : > { %v358_v62 = vadd.f32 %v1040_v9, %v319_v54  ;;  %v359_v63 = vadd.f32 %v1040_v9, %v320_v55  ;;  %v323_v0 = vmul.f32 %v786_v56, %v1035_v1  ;;  %v324_v2 = vmul.f32 %v787_v57, %v1035_v1 }
  0x1e   : > { %v388_v4 = vmax.f32 %v356_v58, 0.0  ;;  %v389_v5 = vmax.f32 %v357_v59, 0.0  ;;  %v360_v6 = vadd.f32 %v1040_v9, %v321_v60  ;;  %v361_v7 = vadd.f32 %v1040_v9, %v322_v61  ;;  %v913_v58 = vld [vmem:[%s1028_s22 + $0x70] sm:$0xff]  }
  0x1f   : > { %v390_v8 = vmax.f32 %v358_v62, 0.0  ;;  %v391_v10 = vmax.f32 %v359_v63, 0.0  ;;  %v362_v11 = vadd.f32 %v1040_v9, %v323_v0  ;;  %v363_v12 = vadd.f32 %v1040_v9, %v324_v2  ;;  %v914_v63 = vld [vmem:[%s1028_s22 + $0x78] sm:$0xff]  }
  0x20   : > { %v843_v14 = vpack.c.bf16 %v389_v5, %v388_v4  ;;  %v392_v15 = vmax.f32 %v360_v6, 0.0  ;;  %v393_v16 = vmax.f32 %v361_v7, 0.0  ;;  %v790_v17 = vunpack.c.l.bf16 %v907_v3 }
  0x21   : > { %v848_v19 = vpack.c.bf16 %v391_v10, %v390_v8  ;;  %v394_v20 = vmax.f32 %v362_v11, 0.0  ;;  %v395_v21 = vmax.f32 %v363_v12, 0.0  ;;  %v791_v22 = vunpack.c.h.bf16 %v907_v3 }
  0x22   : > { %918 = vst [vmem:[%s1065_s28 + $0x20] sm:$0xff] %v843_v14   ;;  %v853_v24 = vpack.c.bf16 %v393_v16, %v392_v15  ;;  %v325_v25 = vmul.f32 %v790_v17, %v1035_v1  ;;  %v794_v26 = vunpack.c.l.bf16 %v908_v13  ;;  %v795_v27 = vunpack.c.h.bf16 %v908_v13 }
  0x23   : > { %919 = vst [vmem:[%s1065_s28 + $0x28] sm:$0xff] %v848_v19   ;;  %v858_v28 = vpack.c.bf16 %v395_v21, %v394_v20  ;;  %v326_v29 = vmul.f32 %v791_v22, %v1035_v1  ;;  %v798_v30 = vunpack.c.l.bf16 %v909_v18  ;;  %v799_v31 = vunpack.c.h.bf16 %v909_v18 }
  0x24   : > { %920 = vst [vmem:[%s1065_s28 + $0x30] sm:$0xff] %v853_v24   ;;  %v364_v32 = vadd.f32 %v1040_v9, %v325_v25  ;;  %v327_v33 = vmul.f32 %v794_v26, %v1035_v1  ;;  %v328_v34 = vmul.f32 %v795_v27, %v1035_v1  ;;  %v802_v35 = vunpack.c.l.bf16 %v910_v23 }
  0x25   : > { %921 = vst [vmem:[%s1065_s28 + $0x38] sm:$0xff] %v858_v28   ;;  %v365_v36 = vadd.f32 %v1040_v9, %v326_v29  ;;  %v329_v37 = vmul.f32 %v798_v30, %v1035_v1  ;;  %v330_v38 = vmul.f32 %v799_v31, %v1035_v1  ;;  %v803_v39 = vunpack.c.h.bf16 %v910_v23 }
  0x26   : > { %v396_v41 = vmax.f32 %v364_v32, 0.0  ;;  %v366_v42 = vadd.f32 %v1040_v9, %v327_v33  ;;  %v367_v43 = vadd.f32 %v1040_v9, %v328_v34  ;;  %v331_v44 = vmul.f32 %v802_v35, %v1035_v1 }
  0x27   : > { %v397_v45 = vmax.f32 %v365_v36, 0.0  ;;  %v368_v46 = vadd.f32 %v1040_v9, %v329_v37  ;;  %v369_v47 = vadd.f32 %v1040_v9, %v330_v38  ;;  %v332_v48 = vmul.f32 %v803_v39, %v1035_v1 }
  0x28   : > { %v398_v49 = vmax.f32 %v366_v42, 0.0  ;;  %v399_v50 = vmax.f32 %v367_v43, 0.0  ;;  %v370_v51 = vadd.f32 %v1040_v9, %v331_v44  ;;  %v806_v52 = vunpack.c.l.bf16 %v911_v40 }
  0x29   : > { %v863_v54 = vpack.c.bf16 %v397_v45, %v396_v41  ;;  %v400_v55 = vmax.f32 %v368_v46, 0.0  ;;  %v401_v56 = vmax.f32 %v369_v47, 0.0  ;;  %v371_v57 = vadd.f32 %v1040_v9, %v332_v48 }
  0x2a   : > { %v868_v59 = vpack.c.bf16 %v399_v50, %v398_v49  ;;  %v402_v60 = vmax.f32 %v370_v51, 0.0  ;;  %v807_v61 = vunpack.c.h.bf16 %v911_v40  ;;  %v333_v62 = vmul.f32 %v806_v52, %v1035_v1 }
  0x2b   : > { %922 = vst [vmem:[%s1065_s28 + $0x40] sm:$0xff] %v863_v54   ;;  %v873_v0 = vpack.c.bf16 %v401_v56, %v400_v55  ;;  %v403_v2 = vmax.f32 %v371_v57, 0.0  ;;  %v810_v3 = vunpack.c.l.bf16 %v912_v53  ;;  %v811_v4 = vunpack.c.h.bf16 %v912_v53 }
  0x2c   : > { %923 = vst [vmem:[%s1065_s28 + $0x48] sm:$0xff] %v868_v59   ;;  %v334_v5 = vmul.f32 %v807_v61, %v1035_v1  ;;  %v372_v6 = vadd.f32 %v1040_v9, %v333_v62  ;;  %v814_v7 = vunpack.c.l.bf16 %v913_v58  ;;  %v815_v8 = vunpack.c.h.bf16 %v913_v58 }
  0x2d   : > { %924 = vst [vmem:[%s1065_s28 + $0x50] sm:$0xff] %v873_v0   ;;  %v878_v10 = vpack.c.bf16 %v403_v2, %v402_v60  ;;  %v335_v11 = vmul.f32 %v810_v3, %v1035_v1  ;;  %v336_v12 = vmul.f32 %v811_v4, %v1035_v1  ;;  %v818_v13 = vunpack.c.l.bf16 %v914_v63 }
  0x2e   : > { %v373_v14 = vadd.f32 %v1040_v9, %v334_v5  ;;  %v404_v15 = vmax.f32 %v372_v6, 0.0  ;;  %v337_v16 = vmul.f32 %v814_v7, %v1035_v1  ;;  %v338_v17 = vmul.f32 %v815_v8, %v1035_v1 }
  0x2f   : > { %925 = vst [vmem:[%s1065_s28 + $0x58] sm:$0xff] %v878_v10   ;;  %v374_v18 = vadd.f32 %v1040_v9, %v335_v11  ;;  %v375_v19 = vadd.f32 %v1040_v9, %v336_v12  ;;  %v819_v20 = vunpack.c.h.bf16 %v914_v63  ;;  %v339_v21 = vmul.f32 %v818_v13, %v1035_v1 }
  0x30   : > { %v405_v22 = vmax.f32 %v373_v14, 0.0  ;;  %v376_v23 = vadd.f32 %v1040_v9, %v337_v16  ;;  %v377_v24 = vadd.f32 %v1040_v9, %v338_v17 }
  0x31   : > { %v406_v25 = vmax.f32 %v374_v18, 0.0  ;;  %v407_v26 = vmax.f32 %v375_v19, 0.0  ;;  %v340_v27 = vmul.f32 %v819_v20, %v1035_v1  ;;  %v378_v28 = vadd.f32 %v1040_v9, %v339_v21 }
  0x32   : > { %v883_v29 = vpack.c.bf16 %v405_v22, %v404_v15  ;;  %v408_v30 = vmax.f32 %v376_v23, 0.0  ;;  %v409_v31 = vmax.f32 %v377_v24, 0.0 }
  0x33   : > { %v888_v32 = vpack.c.bf16 %v407_v26, %v406_v25  ;;  %v379_v33 = vadd.f32 %v1040_v9, %v340_v27  ;;  %v410_v34 = vmax.f32 %v378_v28, 0.0 }
  0x34   : > { %926 = vst [vmem:[%s1065_s28 + $0x60] sm:$0xff] %v883_v29   ;;  %v893_v35 = vpack.c.bf16 %v409_v31, %v408_v30 }
  0x35   : > { %927 = vst [vmem:[%s1065_s28 + $0x68] sm:$0xff] %v888_v32   ;;  %v411_v36 = vmax.f32 %v379_v33, 0.0 }
  0x36   : > { %928 = vst [vmem:[%s1065_s28 + $0x70] sm:$0xff] %v893_v35  }
  0x37   : > { %v898_v37 = vpack.c.bf16 %v411_v36, %v410_v34 }
  0x39   : > { %929 = vst [vmem:[%s1065_s28 + $0x78] sm:$0xff] %v898_v37  }
  0x3a PF: > { %s13_s14 = sadd.s32 1, %s976_s14   ;;  %s1154_s12 = smov %s972_s13 }
  0x3b   : > { %p10_p5 = scmp.ge.s32.totalorder %s13_s14, 4   ;;  %s1155_s13 = smov %s1157_s15 }
  0x3d   :  { %12 = sbr.rel (!%p10_p5) target bundleno = 2 (0x2), region = 68 }

// kernel: generator_forward.35
= control target key start
LH: loop header
LB: loop body
LE: loop exit
PB: predicated region body
PF: predicated region fallthrough
CT: control target
= control target key end

     0   :  { %s1755_s12 = smov 0   ;;  %s1757_s13 = smov 0   ;;  %s1996_s0 = inlined_call_operand.vmem [shape: bf16[512,256], index: 0, kind: input, shape index: {}]   ;;  %s1997_s1 = inlined_call_operand.vmem [shape: bf16[256,128], index: 1, kind: input, shape index: {}]   ;;  %s1998_s2 = inlined_call_operand.vmem [shape: bf16[512,128], index: 2, kind: output, shape index: {0}]   ;;  %s1999_s3 = inlined_call_operand.vmem [shape: f32[2,2,128], index: 3, kind: output, shape index: {1}]  }
   0x1   :  { %s1759_s14 = smov 0  }
   0x2 LB: > { %s26_s15 = sadd.s32 1, %s1729_s13  ;;  %p1278_p0 = scmp.ge.s32.totalorder %s1733_s14, 1  ;;  %s1733_s14 = sphi %s1759_s14, %s14_s14   ;;  %s1729_s13 = sphi %s1757_s13, %s2001_s13   ;;  %s1725_s12 = sphi %s1755_s12, %s2000_s12  }
   0x3   : > { %p28_p1 = scmp.ge.s32.totalorder %s26_s15, 2  ;;  %p172_p2 = scmp.lt.s32.totalorder %s1733_s14, 3 }
   0x5   : > { %s2003_s15 = smov (%p28_p1, %s26_s15), 0  ;;  %p173_p3 = pnand %p1278_p0, %p172_p2 }
   0x6   : > { %s1279_s18 = sshll.u32 (!%p173_p3), %s1725_s12, 5  ;;  %p234_p5 = scmp.lt.s32.totalorder (!%p173_p3), %s1725_s12, 1 }
   0x7   : > { %176 = sbr.rel (%p173_p3) target bundleno = 352 (0x160), region = 28  ;;  %p212_p4 = scmp.lt.s32.totalorder (!%p173_p3), %s1279_s18, 63 }
   0xc   : > { %v1647_v0 = vld [vmem:[%s1997_s1 + $0x78] sm:$0xff]   ;;  %v1649_v2 = vld [vmem:[%s1997_s1 + $0x70] sm:$0xff]   ;;  %v1651_v4 = vld [vmem:[%s1997_s1 + $0x68] sm:$0xff]   ;;  %s2005_s18 = smov (!%p212_p4, %s1279_s18), 63  ;;  %s2007_s12 = smov (!%p234_p5, %s1725_s12), 1  ;;  %vm1153_vm0 = vcmask 1040384  }
   0xd   : > { %v1648_v1 = vld [vmem:[%s1997_s1 + $0x38] sm:$0xff]   ;;  %1495 = vmatprep.subr.bf16.mxu0 %v1647_v0  ;;  %1607 = vmatprep.subr.bf16.mxu1 %v1647_v0  ;;  %v1650_v3 = vld [vmem:[%s1997_s1 + $0x30] sm:$0xff]   ;;  %v1652_v5 = vld [vmem:[%s1997_s1 + $0x28] sm:$0xff]   ;;  %s1367_s6 = sshll.u32 %s2005_s18, 3  ;;  %s1283_s4 = sshll.u32 %s2005_s18, 2 }
   0xe   : > { %1496 = vmatpush3.bf16.msra.mxu0 %v1648_v1  ;;  %1615 = vmatpush3.bf16.msra.mxu1 %v1648_v1  ;;  %v1653_v6 = vld [vmem:[%s1997_s1 + $0x60] sm:$0xff]   ;;  %v1655_v8 = vld [vmem:[%s1997_s1 + $0x58] sm:$0xff]   ;;  %s1809_s11 = scalar_lea.vmem %s1996_s0, %s1367_s6  ;;  %v1657_v10 = vld [vmem:[%s1997_s1 + $0x50] sm:$0xff]   ;;  %s1874_s7 = scalar_lea.vmem %s1998_s2, %s1283_s4 }
   0xf   : > { %1497 = vmatprep.subr.bf16.mxu0 %v1649_v2  ;;  %1608 = vmatprep.subr.bf16.mxu1 %v1649_v2  ;;  %v1654_v7 = vld [vmem:[%s1997_s1 + $0x20] sm:$0xff]   ;;  %v1656_v9 = vld [vmem:[%s1997_s1 + $0x18] sm:$0xff]   ;;  %v1658_v12 = vld [vmem:[%s1997_s1 + $0x10] sm:$0xff]   ;;  %s1284_s18 = sshll.u32 %s2007_s12, 1 }
  0x10   : > { %v1665_v11 = vld [vmem:[%s1809_s11 + $0x4] ss:$8 sps:$4 sm:$0xff]   ;;  %v1663_v18 = vld [vmem:[%s1809_s11] ss:$8 sps:$4 sm:$0xff]   ;;  %v1666_v19 = vld [vmem:[%s1809_s11 + $0x14] ss:$8 sps:$4 sm:$0xff]   ;;  %s237_s10 = scalar_lea.vmem %s1999_s3, %s1284_s18 }
  0x11   : > { %659 = vmatprep.mubr.bf16.mxu0 %v1665_v11  ;;  %v1659_v13 = vld [vmem:[%s1997_s1 + $0x48] sm:$0xff]   ;;  %v1661_v16 = vld [vmem:[%s1997_s1 + $0x40] sm:$0xff]   ;;  %v1681_v21 = vld [vmem:[%s1809_s11 + $0x94] ss:$8 sps:$4 sm:$0xff]  }
  0x12   : > { %1498 = vmatpush3.bf16.msra.mxu0 %v1650_v3  ;;  %1616 = vmatpush3.bf16.msra.mxu1 %v1650_v3  ;;  %v1677_v14 = vld [vmem:[%s1809_s11 + $0x84] ss:$8 sps:$4 sm:$0xff]   ;;  %v1675_v20 = vld [vmem:[%s1809_s11 + $0x80] ss:$8 sps:$4 sm:$0xff]   ;;  %v1668_v22 = vld [vmem:[%s1809_s11 + $0x10] ss:$8 sps:$4 sm:$0xff]  }
  0x13   : > { %1499 = vmatprep.subr.bf16.mxu0 %v1651_v4  ;;  %1609 = vmatprep.subr.bf16.mxu1 %v1651_v4  ;;  %v1660_v15 = vld [vmem:[%s1997_s1 + $0x8] sm:$0xff]   ;;  %v1662_v17 = vld [vmem:[%s1997_s1] sm:$0xff]   ;;  %v1683_v24 = vld [vmem:[%s1809_s11 + $0x90] ss:$8 sps:$4 sm:$0xff]  }
  0x14   : > { %723 = vmatprep.mubr.bf16.mxu1 %v1677_v14  ;;  %v1669_v23 = vld [vmem:[%s1809_s11 + $0x24] ss:$8 sps:$4 sm:$0xff]   ;;  %v1671_v26 = vld [vmem:[%s1809_s11 + $0x20] ss:$8 sps:$4 sm:$0xff]   ;;  %v1672_v27 = vld [vmem:[%s1809_s11 + $0x34] ss:$8 sps:$4 sm:$0xff]  }
  0x15   : > { %v1687_v25 = vld [vmem:[%s1809_s11 + $0xa4] ss:$8 sps:$4 sm:$0xff]   ;;  %v1689_v28 = vld [vmem:[%s1809_s11 + $0xa0] ss:$8 sps:$4 sm:$0xff]   ;;  %v1693_v29 = vld [vmem:[%s1809_s11 + $0xb4] ss:$8 sps:$4 sm:$0xff]  }
  0x16   : > { %1500 = vmatpush3.bf16.msra.mxu0 %v1652_v5  ;;  %1617 = vmatpush3.bf16.msra.mxu1 %v1652_v5  ;;  %v1674_v30 = vld [vmem:[%s1809_s11 + $0x30] ss:$8 sps:$4 sm:$0xff]   ;;  %v1678_v31 = vld [vmem:[%s1809_s11 + $0x44] ss:$8 sps:$4 sm:$0xff]   ;;  %v1680_v34 = vld [vmem:[%s1809_s11 + $0x40] ss:$8 sps:$4 sm:$0xff]  }
  0x17   : > { %1501 = vmatprep.subr.bf16.mxu0 %v1653_v6  ;;  %1610 = vmatprep.subr.bf16.mxu1 %v1653_v6  ;;  %v1695_v32 = vld [vmem:[%s1809_s11 + $0xb0] ss:$8 sps:$4 sm:$0xff]   ;;  %v1699_v33 = vld [vmem:[%s1809_s11 + $0xc4] ss:$8 sps:$4 sm:$0xff]   ;;  %v1684_v35 = vld [vmem:[%s1809_s11 + $0x54] ss:$8 sps:$4 sm:$0xff]  }
  0x18   : > { %v1701_v36 = vld [vmem:[%s1809_s11 + $0xc0] ss:$8 sps:$4 sm:$0xff]   ;;  %v1702_v37 = vld [vmem:[%s1809_s11 + $0xd4] ss:$8 sps:$4 sm:$0xff]   ;;  %v1686_v38 = vld [vmem:[%s1809_s11 + $0x50] ss:$8 sps:$4 sm:$0xff]  }
  0x19   : > { %v1690_v39 = vld [vmem:[%s1809_s11 + $0x64] ss:$8 sps:$4 sm:$0xff]   ;;  %v1704_v40 = vld [vmem:[%s1809_s11 + $0xd0] ss:$8 sps:$4 sm:$0xff]   ;;  %v1692_v42 = vld [vmem:[%s1809_s11 + $0x60] ss:$8 sps:$4 sm:$0xff]  }
  0x1a   : > { %1502 = vmatpush3.bf16.msra.mxu0 %v1654_v7  ;;  %1618 = vmatpush3.bf16.msra.mxu1 %v1654_v7  ;;  %v1705_v41 = vld [vmem:[%s1809_s11 + $0xe4] ss:$8 sps:$4 sm:$0xff]   ;;  %v1696_v43 = vld [vmem:[%s1809_s11 + $0x74] ss:$8 sps:$4 sm:$0xff]   ;;  %v1707_v44 = vld [vmem:[%s1809_s11 + $0xe0] ss:$8 sps:$4 sm:$0xff]  }
  0x1b   : > { %1503 = vmatprep.subr.bf16.mxu0 %v1655_v8  ;;  %1611 = vmatprep.subr.bf16.mxu1 %v1655_v8  ;;  %v1708_v45 = vld [vmem:[%s1809_s11 + $0xf4] ss:$8 sps:$4 sm:$0xff]   ;;  %v1698_v46 = vld [vmem:[%s1809_s11 + $0x70] ss:$8 sps:$4 sm:$0xff]  }
  0x1c   : > { %v1710_v47 = vld [vmem:[%s1809_s11 + $0xf0] ss:$8 sps:$4 sm:$0xff]  }
  0x1e   : > { %1504 = vmatpush3.bf16.msra.mxu0 %v1656_v9  ;;  %1619 = vmatpush3.bf16.msra.mxu1 %v1656_v9 }
  0x1f   : > { %1505 = vmatprep.subr.bf16.mxu0 %v1657_v10  ;;  %1612 = vmatprep.subr.bf16.mxu1 %v1657_v10 }
  0x22   : > { %1506 = vmatpush3.bf16.msra.mxu0 %v1658_v12  ;;  %1620 = vmatpush3.bf16.msra.mxu1 %v1658_v12 }
  0x23   : > { %1507 = vmatprep.subr.bf16.mxu0 %v1659_v13  ;;  %1613 = vmatprep.subr.bf16.mxu1 %v1659_v13 }
  0x26   : > { %1508 = vmatpush3.bf16.msra.mxu0 %v1660_v15  ;;  %1621 = vmatpush3.bf16.msra.mxu1 %v1660_v15 }
  0x27   : > { %1509 = vmatprep.subr.bf16.mxu0 %v1661_v16  ;;  %1614 = vmatprep.subr.bf16.mxu1 %v1661_v16 }
  0x2a   : > { %1510 = vmatpush3.bf16.msra.mxu0 %v1662_v17  ;;  %1622 = vmatpush3.bf16.msra.mxu1 %v1662_v17 }
  0x2d   : > { %660 = vmatmul.mubr.bf16.vlgmr.msra.gmra.mxu0 %v1663_v18  ;;  %724 = vmatmul.mubr.bf16.vlgmr.msra.gmra.mxu1 %v1675_v20 }
  0x2e   : > { %667 = vmatprep.mubr.bf16.mxu0 %v1666_v19  ;;  %731 = vmatprep.mubr.bf16.mxu1 %v1681_v21 }
  0x35   : > { %668 = vmatmul.mubr.bf16.gmra.mxu0 %v1668_v22  ;;  %732 = vmatmul.mubr.bf16.gmra.mxu1 %v1683_v24 }
  0x36   : > { %675 = vmatprep.mubr.bf16.mxu0 %v1669_v23  ;;  %739 = vmatprep.mubr.bf16.mxu1 %v1687_v25 }
  0x3d   : > { %676 = vmatmul.mubr.bf16.gmra.mxu0 %v1671_v26  ;;  %740 = vmatmul.mubr.bf16.gmra.mxu1 %v1689_v28 }
  0x3e   : > { %683 = vmatprep.mubr.bf16.mxu0 %v1672_v27  ;;  %747 = vmatprep.mubr.bf16.mxu1 %v1693_v29 }
  0x45   : > { %684 = vmatmul.mubr.bf16.gmra.mxu0 %v1674_v30  ;;  %748 = vmatmul.mubr.bf16.gmra.mxu1 %v1695_v32 }
  0x46   : > { %691 = vmatprep.mubr.bf16.mxu0 %v1678_v31  ;;  %755 = vmatprep.mubr.bf16.mxu1 %v1699_v33 }
  0x4d   : > { %692 = vmatmul.mubr.bf16.gmra.mxu0 %v1680_v34  ;;  %756 = vmatmul.mubr.bf16.gmra.mxu1 %v1701_v36 }
  0x4e   : > { %699 = vmatprep.mubr.bf16.mxu0 %v1684_v35  ;;  %763 = vmatprep.mubr.bf16.mxu1 %v1702_v37 }
  0x55   : > { %700 = vmatmul.mubr.bf16.gmra.mxu0 %v1686_v38  ;;  %764 = vmatmul.mubr.bf16.gmra.mxu1 %v1704_v40 }
  0x56   : > { %707 = vmatprep.mubr.bf16.mxu0 %v1690_v39  ;;  %771 = vmatprep.mubr.bf16.mxu1 %v1705_v41 }
  0x5d   : > { %708 = vmatmul.mubr.bf16.gmra.mxu0 %v1692_v42  ;;  %772 = vmatmul.mubr.bf16.gmra.mxu1 %v1707_v44 }
  0x5e   : > { %715 = vmatprep.mubr.bf16.mxu0 %v1696_v43  ;;  %779 = vmatprep.mubr.bf16.mxu1 %v1708_v45 }
  0x65   : > { %716 = vmatmul.mubr.bf16.gmra.mxu0 %v1698_v46  ;;  %780 = vmatmul.mubr.bf16.gmra.mxu1 %v1710_v47 }
  0xed   : > { %v1511_v48 = vpop.f32.mrf.mxu0  ;;  %v1559_v49 = vpop.f32.mrf.mxu1 }
  0xef   : > { %v1512_v50 = vpop.f32.mrf.mxu0  ;;  %v1560_v51 = vpop.f32.mrf.mxu1 }
  0xf0   : > { %v1865_v55 = vadd.f32 %v1560_v51, %v1559_v49  ;;  %v1867_v56 = vadd.f32 %v1512_v50, %v1511_v48 }
  0xf1   : > { %v1514_v52 = vpop.f32.mrf.mxu0  ;;  %v1562_v53 = vpop.f32.mrf.mxu1 }
  0xf2   : > { %v1084_v45 = vmul.f32 %v1867_v56, %v1867_v56 }
  0xf3   : > { %v1515_v54 = vpop.f32.mrf.mxu0  ;;  %v1563_v58 = vpop.f32.mrf.mxu1 }
  0xf4   : > { %v1869_v57 = vadd.f32 %v1515_v54, %v1514_v52  ;;  %v1876_v60 = vadd.f32 %v1563_v58, %v1562_v53 }
  0xf5   : > { %v1517_v59 = vpop.f32.mrf.mxu0  ;;  %v1565_v62 = vpop.f32.mrf.mxu1 }
  0xf6   : > { %v1403_v61 = vpack.c.bf16 %v1869_v57, %v1867_v56  ;;  %v1443_v0 = vpack.c.bf16 %v1876_v60, %v1865_v55  ;;  %v1085_v41 = vmul.f32 %v1869_v57, %v1869_v57  ;;  %v1047_v48 = vadd.f32 %v1869_v57, %v1867_v56 }
  0xf7   : > { %v1518_v63 = vpop.f32.mrf.mxu0  ;;  %v1566_v1 = vpop.f32.mrf.mxu1 }
  0xf8   : > { %1404 = vst [vmem:[%s1874_s7] sm:$0xff] %v1403_v61   ;;  %1487 = vst [vmem:[%s1874_s7 + $0x40] sm:$0xff] %v1443_v0   ;;  %v1884_v5 = vadd.f32 %v1566_v1, %v1565_v62  ;;  %v1519_v6 = vadd.f32 %v1518_v63, %v1517_v59  ;;  %v1116_v50 = vadd.f32 %v1085_v41, %v1084_v45 }
  0xf9   : > { %v1520_v2 = vpop.f32.mrf.mxu0  ;;  %v1568_v3 = vpop.f32.mrf.mxu1 }
  0xfa   : > { %v1086_v46 = vmul.f32 %v1519_v6, %v1519_v6  ;;  %v1048_v54 = vadd.f32 %v1519_v6, %v1047_v48 }
  0xfb   : > { %v1521_v4 = vpop.f32.mrf.mxu0  ;;  %v1569_v8 = vpop.f32.mrf.mxu1 }
  0xfc   : > { %v1522_v7 = vadd.f32 %v1521_v4, %v1520_v2  ;;  %v1886_v10 = vadd.f32 %v1569_v8, %v1568_v3  ;;  %v1117_v62 = vadd.f32 %v1116_v50, %v1086_v46 }
  0xfd   : > { %v1523_v9 = vpop.f32.mrf.mxu0  ;;  %v1571_v12 = vpop.f32.mrf.mxu1 }
  0xfe   : > { %v1408_v11 = vpack.c.bf16 %v1522_v7, %v1519_v6  ;;  %v1448_v14 = vpack.c.bf16 %v1886_v10, %v1884_v5  ;;  %v1087_v51 = vmul.f32 %v1522_v7, %v1522_v7  ;;  %v1049_v2 = vadd.f32 %v1522_v7, %v1048_v54 }
  0xff   : > { %v1524_v13 = vpop.f32.mrf.mxu0  ;;  %v1572_v15 = vpop.f32.mrf.mxu1 }
 0x100   : > { %1480 = vst [vmem:[%s1874_s7 + $0x8] sm:$0xff] %v1408_v11   ;;  %1488 = vst [vmem:[%s1874_s7 + $0x48] sm:$0xff] %v1448_v14   ;;  %v1892_v19 = vadd.f32 %v1572_v15, %v1571_v12  ;;  %v1525_v20 = vadd.f32 %v1524_v13, %v1523_v9  ;;  %v1118_v57 = vadd.f32 %v1117_v62, %v1087_v51 }
 0x101   : > { %v1526_v16 = vpop.f32.mrf.mxu0  ;;  %v1574_v17 = vpop.f32.mrf.mxu1 }
 0x102   : > { %v1088_v63 = vmul.f32 %v1525_v20, %v1525_v20  ;;  %v1050_v6 = vadd.f32 %v1525_v20, %v1049_v2 }
 0x103   : > { %v1527_v18 = vpop.f32.mrf.mxu0  ;;  %v1575_v22 = vpop.f32.mrf.mxu1 }
 0x104   : > { %v1528_v21 = vadd.f32 %v1527_v18, %v1526_v16  ;;  %v1894_v24 = vadd.f32 %v1575_v22, %v1574_v17  ;;  %v1119_v12 = vadd.f32 %v1118_v57, %v1088_v63 }
 0x105   : > { %v1529_v23 = vpop.f32.mrf.mxu0  ;;  %v1577_v26 = vpop.f32.mrf.mxu1 }
 0x106   : > { %v1413_v25 = vpack.c.bf16 %v1528_v21, %v1525_v20  ;;  %v1453_v28 = vpack.c.bf16 %v1894_v24, %v1892_v19  ;;  %v1089_v4 = vmul.f32 %v1528_v21, %v1528_v21  ;;  %v1051_v14 = vadd.f32 %v1528_v21, %v1050_v6 }
 0x107   : > { %v1530_v27 = vpop.f32.mrf.mxu0  ;;  %v1578_v29 = vpop.f32.mrf.mxu1 }
 0x108   : > { %1481 = vst [vmem:[%s1874_s7 + $0x10] sm:$0xff] %v1413_v25   ;;  %1489 = vst [vmem:[%s1874_s7 + $0x50] sm:$0xff] %v1453_v28   ;;  %v1900_v33 = vadd.f32 %v1578_v29, %v1577_v26  ;;  %v1531_v34 = vadd.f32 %v1530_v27, %v1529_v23  ;;  %v1120_v17 = vadd.f32 %v1119_v12, %v1089_v4 }
 0x109   : > { %v1532_v30 = vpop.f32.mrf.mxu0  ;;  %v1580_v31 = vpop.f32.mrf.mxu1 }
 0x10a   : > { %v1090_v15 = vmul.f32 %v1531_v34, %v1531_v34  ;;  %v1052_v22 = vadd.f32 %v1531_v34, %v1051_v14 }
 0x10b   : > { %v1533_v32 = vpop.f32.mrf.mxu0  ;;  %v1581_v36 = vpop.f32.mrf.mxu1 }
 0x10c   : > { %v1534_v35 = vadd.f32 %v1533_v32, %v1532_v30  ;;  %v1902_v38 = vadd.f32 %v1581_v36, %v1580_v31  ;;  %v1121_v29 = vadd.f32 %v1120_v17, %v1090_v15 }
 0x10d   : > { %v1535_v37 = vpop.f32.mrf.mxu0  ;;  %v1583_v40 = vpop.f32.mrf.mxu1 }
 0x10e   : > { %v1418_v39 = vpack.c.bf16 %v1534_v35, %v1531_v34  ;;  %v1458_v43 = vpack.c.bf16 %v1902_v38, %v1900_v33  ;;  %v1091_v23 = vmul.f32 %v1534_v35, %v1534_v35  ;;  %v1053_v30 = vadd.f32 %v1534_v35, %v1052_v22 }
 0x10f   : > { %v1536_v42 = vpop.f32.mrf.mxu0  ;;  %v1584_v44 = vpop.f32.mrf.mxu1 }
 0x110   : > { %1482 = vst [vmem:[%s1874_s7 + $0x18] sm:$0xff] %v1418_v39   ;;  %1490 = vst [vmem:[%s1874_s7 + $0x58] sm:$0xff] %v1458_v43   ;;  %v1914_v53 = vadd.f32 %v1584_v44, %v1583_v40  ;;  %v1537_v58 = vadd.f32 %v1536_v42, %v1535_v37  ;;  %v1122_v39 = vadd.f32 %v1121_v29, %v1091_v23 }
 0x111   : > { %v1538_v47 = vpop.f32.mrf.mxu0  ;;  %v1586_v49 = vpop.f32.mrf.mxu1 }
 0x112   : > { %v1092_v31 = vmul.f32 %v1537_v58, %v1537_v58  ;;  %v1054_v34 = vadd.f32 %v1537_v58, %v1053_v30 }
 0x113   : > { %v1539_v52 = vpop.f32.mrf.mxu0  ;;  %v1587_v61 = vpop.f32.mrf.mxu1 }
 0x114   : > { %v1540_v59 = vadd.f32 %v1539_v52, %v1538_v47  ;;  %v1916_v1 = vadd.f32 %v1587_v61, %v1586_v49  ;;  %v1123_v43 = vadd.f32 %v1122_v39, %v1092_v31 }
 0x115   : > { %v1541_v0 = vpop.f32.mrf.mxu0  ;;  %v1589_v56 = vpop.f32.mrf.mxu1 }
 0x116   : > { %v1423_v3 = vpack.c.bf16 %v1540_v59, %v1537_v58  ;;  %v1463_v9 = vpack.c.bf16 %v1916_v1, %v1914_v53  ;;  %v1093_v40 = vmul.f32 %v1540_v59, %v1540_v59  ;;  %v1055_v44 = vadd.f32 %v1540_v59, %v1054_v34 }
 0x117   : > { %v1542_v8 = vpop.f32.mrf.mxu0  ;;  %v1590_v11 = vpop.f32.mrf.mxu1 }
 0x118   : > { %1483 = vst [vmem:[%s1874_s7 + $0x20] sm:$0xff] %v1423_v3   ;;  %1491 = vst [vmem:[%s1874_s7 + $0x60] sm:$0xff] %v1463_v9   ;;  %v1922_v7 = vadd.f32 %v1590_v11, %v1589_v56  ;;  %v1543_v25 = vadd.f32 %v1542_v8, %v1541_v0  ;;  %v1124_v49 = vadd.f32 %v1123_v43, %v1093_v40 }
 0x119   : > { %v1544_v13 = vpop.f32.mrf.mxu0  ;;  %v1592_v16 = vpop.f32.mrf.mxu1  ;;  %v1102_v40 = vmul.f32 %v1884_v5, %v1884_v5  ;;  %v1103_v43 = vmul.f32 %v1886_v10, %v1886_v10 }
 0x11a   : > { %v1094_v45 = vmul.f32 %v1543_v25, %v1543_v25  ;;  %v1056_v50 = vadd.f32 %v1543_v25, %v1055_v44 }
 0x11b   : > { %v1545_v18 = vpop.f32.mrf.mxu0  ;;  %v1593_v27 = vpop.f32.mrf.mxu1 }
 0x11c   : > { %v1546_v26 = vadd.f32 %v1545_v18, %v1544_v13  ;;  %v1924_v28 = vadd.f32 %v1593_v27, %v1592_v16  ;;  %v1125_v62 = vadd.f32 %v1124_v49, %v1094_v45  ;;  %v1104_v45 = vmul.f32 %v1892_v19, %v1892_v19 }
 0x11d   : > { %v1547_v20 = vpop.f32.mrf.mxu0  ;;  %v1595_v32 = vpop.f32.mrf.mxu1 }
 0x11e   : > { %v1428_v21 = vpack.c.bf16 %v1546_v26, %v1543_v25  ;;  %v1468_v37 = vpack.c.bf16 %v1924_v28, %v1922_v7  ;;  %v1095_v51 = vmul.f32 %v1546_v26, %v1546_v26  ;;  %v1057_v63 = vadd.f32 %v1546_v26, %v1056_v50 }
 0x11f   : > { %v1548_v36 = vpop.f32.mrf.mxu0  ;;  %v1596_v41 = vpop.f32.mrf.mxu1 }
 0x120   : > { %1484 = vst [vmem:[%s1874_s7 + $0x28] sm:$0xff] %v1428_v21   ;;  %1492 = vst [vmem:[%s1874_s7 + $0x68] sm:$0xff] %v1468_v37   ;;  %v1549_v46 = vadd.f32 %v1548_v36, %v1547_v20  ;;  %v1930_v48 = vadd.f32 %v1596_v41, %v1595_v32  ;;  %v1126_v57 = vadd.f32 %v1125_v62, %v1095_v51 }
 0x121   : > { %v1550_v42 = vpop.f32.mrf.mxu0  ;;  %v1598_v47 = vpop.f32.mrf.mxu1  ;;  %v1100_v21 = vmul.f32 %v1865_v55, %v1865_v55  ;;  %v1101_v37 = vmul.f32 %v1876_v60, %v1876_v60 }
 0x122   : > { %v1096_v0 = vmul.f32 %v1549_v46, %v1549_v46  ;;  %v1058_v4 = vadd.f32 %v1549_v46, %v1057_v63  ;;  %v1109_v63 = vmul.f32 %v1916_v1, %v1916_v1 }
 0x123   : > { %v1551_v35 = vpop.f32.mrf.mxu0  ;;  %v1599_v54 = vpop.f32.mrf.mxu1 }
 0x124   : > { %v1552_v52 = vadd.f32 %v1551_v35, %v1550_v42  ;;  %v1932_v61 = vadd.f32 %v1599_v54, %v1598_v47  ;;  %v1127_v12 = vadd.f32 %v1126_v57, %v1096_v0 }
 0x125   : > { %v1553_v58 = vpop.f32.mrf.mxu0  ;;  %v1601_v2 = vpop.f32.mrf.mxu1 }
 0x126   : > { %v1433_v59 = vpack.c.bf16 %v1552_v52, %v1549_v46  ;;  %v1473_v56 = vpack.c.bf16 %v1932_v61, %v1930_v48  ;;  %v1097_v8 = vmul.f32 %v1552_v52, %v1552_v52  ;;  %v1059_v13 = vadd.f32 %v1552_v52, %v1058_v4 }
 0x127   : > { %v1554_v3 = vpop.f32.mrf.mxu0  ;;  %v1602_v6 = vpop.f32.mrf.mxu1 }
 0x128   : > { %1485 = vst [vmem:[%s1874_s7 + $0x30] sm:$0xff] %v1433_v59   ;;  %v1555_v9 = vadd.f32 %v1554_v3, %v1553_v58  ;;  %1493 = vst [vmem:[%s1874_s7 + $0x70] sm:$0xff] %v1473_v56   ;;  %v1603_v17 = vadd.f32 %v1602_v6, %v1601_v2  ;;  %v1128_v18 = vadd.f32 %v1127_v12, %v1097_v8 }
 0x129   : > { %v1556_v11 = vpop.f32.mrf.mxu0  ;;  %v1604_v15 = vpop.f32.mrf.mxu1  ;;  %v1110_v2 = vmul.f32 %v1922_v7, %v1922_v7 }
 0x12a   : > { %v1098_v14 = vmul.f32 %v1555_v9, %v1555_v9  ;;  %v1060_v22 = vadd.f32 %v1555_v9, %v1059_v13 }
 0x12b   : > { %v1557_v16 = vpop.f32.mrf.mxu0  ;;  %v1605_v25 = vpop.f32.mrf.mxu1 }
 0x12c   : > { %v1558_v23 = vadd.f32 %v1557_v16, %v1556_v11  ;;  %v1606_v26 = vadd.f32 %v1605_v25, %v1604_v15  ;;  %v1129_v27 = vadd.f32 %v1128_v18, %v1098_v14  ;;  %v1114_v11 = vmul.f32 %v1603_v17, %v1603_v17 }
 0x12e   : > { %v1438_v20 = vpack.c.bf16 %v1558_v23, %v1555_v9  ;;  %v1061_v29 = vadd.f32 %v1558_v23, %v1060_v22  ;;  %v1099_v30 = vmul.f32 %v1558_v23, %v1558_v23  ;;  %v1478_v31 = vpack.c.bf16 %v1606_v26, %v1603_v17 }
 0x12f   : > { %v1115_v14 = vmul.f32 %v1606_v26, %v1606_v26 }
 0x130   : > { %1486 = vst [vmem:[%s1874_s7 + $0x38] sm:$0xff] %v1438_v20   ;;  %v1062_v32 = vadd.f32 %v1865_v55, %v1061_v29  ;;  %v1130_v36 = vadd.f32 %v1129_v27, %v1099_v30  ;;  %1494 = vst [vmem:[%s1874_s7 + $0x78] sm:$0xff] %v1478_v31  }
 0x132   : > { %v1063_v39 = vadd.f32 %v1876_v60, %v1062_v32  ;;  %v1131_v34 = vadd.f32 %v1130_v36, %v1100_v21  ;;  %v1105_v60 = vmul.f32 %v1894_v24, %v1894_v24 }
 0x134   : > { %v1064_v41 = vadd.f32 %v1884_v5, %v1063_v39  ;;  %v1132_v42 = vadd.f32 %v1131_v34, %v1101_v37  ;;  %v1106_v5 = vmul.f32 %v1900_v33, %v1900_v33 }
 0x136   : > { %v1065_v44 = vadd.f32 %v1886_v10, %v1064_v41  ;;  %v1133_v55 = vadd.f32 %v1132_v42, %v1102_v40  ;;  %v1107_v10 = vmul.f32 %v1902_v38, %v1902_v38 }
 0x138   : > { %v1134_v46 = vadd.f32 %v1133_v55, %v1103_v43  ;;  %v1066_v47 = vadd.f32 %v1892_v19, %v1065_v44  ;;  %v1108_v19 = vmul.f32 %v1914_v53, %v1914_v53 }
 0x13a   : > { %v1067_v35 = vadd.f32 %v1894_v24, %v1066_v47  ;;  %v1135_v49 = vadd.f32 %v1134_v46, %v1104_v45 }
 0x13c   : > { %v1068_v50 = vadd.f32 %v1900_v33, %v1067_v35  ;;  %v1136_v51 = vadd.f32 %v1135_v49, %v1105_v60 }
 0x13e   : > { %v1069_v52 = vadd.f32 %v1902_v38, %v1068_v50  ;;  %v1137_v54 = vadd.f32 %v1136_v51, %v1106_v5 }
 0x140   : > { %v1070_v58 = vadd.f32 %v1914_v53, %v1069_v52  ;;  %v1138_v62 = vadd.f32 %v1137_v54, %v1107_v10  ;;  %v1111_v53 = vmul.f32 %v1924_v28, %v1924_v28 }
 0x142   : > { %v1071_v24 = vadd.f32 %v1916_v1, %v1070_v58  ;;  %v1139_v0 = vadd.f32 %v1138_v62, %v1108_v19  ;;  %v1112_v1 = vmul.f32 %v1930_v48, %v1930_v48 }
 0x144   : > { %v1140_v33 = vadd.f32 %v1139_v0, %v1109_v63  ;;  %v1072_v59 = vadd.f32 %v1922_v7, %v1071_v24  ;;  %v1113_v7 = vmul.f32 %v1932_v61, %v1932_v61 }
 0x146   : > { %v1141_v38 = vadd.f32 %v1140_v33, %v1110_v2  ;;  %v1073_v3 = vadd.f32 %v1924_v28, %v1072_v59 }
 0x148   : > { %v1142_v56 = vadd.f32 %v1141_v38, %v1111_v53  ;;  %v1074_v57 = vadd.f32 %v1930_v48, %v1073_v3 }
 0x14a   : > { %v1143_v4 = vadd.f32 %v1142_v56, %v1112_v1  ;;  %v1075_v8 = vadd.f32 %v1932_v61, %v1074_v57 }
 0x14c   : > { %v1144_v9 = vadd.f32 %v1143_v4, %v1113_v7  ;;  %v1076_v6 = vadd.f32 %v1603_v17, %v1075_v8 }
 0x14e   : > { %v1145_v12 = vadd.f32 %v1144_v9, %v1114_v11  ;;  %v1077_v13 = vadd.f32 %v1606_v26, %v1076_v6 }
 0x150   : > { %v1078_v28 = vrot.slane %v1077_v13, 4  ;;  %v1146_v15 = vadd.f32 %v1145_v12, %v1115_v14 }
 0x152   : > { %v1079_v16 = vadd.f32 %v1078_v28, %v1077_v13  ;;  %v1147_v18 = vrot.slane %v1146_v15, 4 }
 0x154   : > { %v1080_v22 = vrot.slane %v1079_v16, 2  ;;  %v1148_v48 = vadd.f32 %v1147_v18, %v1146_v15 }
 0x156   : > { %v1081_v23 = vadd.f32 %v1080_v22, %v1079_v16  ;;  %v1149_v25 = vrot.slane %v1148_v48, 2 }
 0x158   : > { %v1082_v27 = vrot.slane %v1081_v23, 1  ;;  %v1150_v20 = vadd.f32 %v1149_v25, %v1148_v48 }
 0x15a   : > { %v1151_v61 = vrot.slane %v1150_v20, 1  ;;  %v1083_v17 = vadd.f32 %v1082_v27, %v1081_v23 }
 0x15c   : > { %v1152_v26 = vadd.f32 %v1151_v61, %v1150_v20 }
 0x15e   : > { %v1154_v29 = vsel %vm1153_vm0, %v1083_v17, %v1152_v26 }
 0x15f   : > { %1155 = vst [vmem:[%s237_s10] sm:$0x3] %v1154_v29 }
 0x160 PF: > { %s14_s14 = sadd.s32 1, %s1733_s14   ;;  %s2000_s12 = smov %s1729_s13 }
 0x161   : > { %p11_p6 = scmp.ge.s32.totalorder %s14_s14, 4   ;;  %s2001_s13 = smov %s2003_s15 }
 0x163   :  { %13 = sbr.rel (!%p11_p6) target bundleno = 2 (0x2), region = 81 }

// kernel: generator_forward.38
= control target key start
LH: loop header
LB: loop body
LE: loop exit
PB: predicated region body
PF: predicated region fallthrough
CT: control target
= control target key end

     0   :  { %s578_s12 = smov 0   ;;  %s580_s13 = smov 0   ;;  %s626_s0 = inlined_call_operand.vmem [shape: bf16[2,64,128], index: 0, kind: input, shape index: {}]   ;;  %s627_s1 = inlined_call_operand.vmem [shape: f32[2,1,128], index: 1, kind: input, shape index: {}]   ;;  %s628_s2 = inlined_call_operand.vmem [shape: f32[2,1,128], index: 2, kind: input, shape index: {}]   ;;  %s629_s3 = inlined_call_operand.vmem [shape: bf16[2,64,128], index: 3, kind: output, shape index: {}]  }
   0x1   :  { %s582_s14 = smov 0  }
   0x2 LB: > { %s25_s15 = sadd.s32 1, %s552_s13  ;;  %p441_p0 = scmp.ge.s32.totalorder %s556_s14, 1  ;;  %s556_s14 = sphi %s582_s14, %s13_s14   ;;  %s552_s13 = sphi %s580_s13, %s631_s13   ;;  %s548_s12 = sphi %s578_s12, %s630_s12  }
   0x3   : > { %p27_p1 = scmp.ge.s32.totalorder %s25_s15, 2  ;;  %p174_p2 = scmp.lt.s32.totalorder %s556_s14, 3 }
   0x5   : > { %s633_s15 = smov (%p27_p1, %s25_s15), 0  ;;  %p175_p3 = pnand %p441_p0, %p174_p2 }
   0x6   : > { %p213_p4 = scmp.lt.s32.totalorder (!%p175_p3), %s548_s12, 1 }
   0x7   : > { %178 = sbr.rel (%p175_p3) target bundleno = 28 (0x1c), region = 32 }
   0xc   : > { %s635_s12 = smov (!%p213_p4, %s548_s12), 1 }
   0xd   : > { %s458_s16 = sshll.u32 %s635_s12, 5  ;;  %s224_s19 = scalar_lea.vmem %s627_s1, %s635_s12 }
   0xe   : > { %s220_s22 = scalar_lea.vmem %s626_s0, %s458_s16  ;;  %s227_s25 = scalar_lea.vmem %s628_s2, %s635_s12  ;;  %v446_v1 = vld [vmem:[%s224_s19] ss:$0 sm:$0xff] }
   0xf   : > { %v469_v0 = vld [vmem:[%s220_s22] sm:$0xff]   ;;  %v504_v2 = vld [vmem:[%s220_s22 + $0x8] sm:$0xff]   ;;  %v505_v7 = vld [vmem:[%s220_s22 + $0x10] sm:$0xff]   ;;  %s236_s28 = scalar_lea.vmem %s629_s3, %s458_s16 }
  0x10   : > { %v470_v3 = vunpack.c.l.bf16 %v469_v0  ;;  %v471_v4 = vunpack.c.h.bf16 %v469_v0  ;;  %v474_v5 = vunpack.c.l.bf16 %v504_v2  ;;  %v475_v6 = vunpack.c.h.bf16 %v504_v2  ;;  %v506_v8 = vld [vmem:[%s220_s22 + $0x18] sm:$0xff]   ;;  %v447_v9 = vld [vmem:[%s227_s25] ss:$0 sm:$0xff] }
  0x11   : > { %v478_v10 = vunpack.c.l.bf16 %v505_v7  ;;  %v479_v11 = vunpack.c.h.bf16 %v505_v7  ;;  %v482_v12 = vunpack.c.l.bf16 %v506_v8  ;;  %v483_v13 = vunpack.c.h.bf16 %v506_v8 }
  0x12   : > { %v261_v14 = vmul.f32 %v470_v3, %v446_v1  ;;  %v262_v15 = vmul.f32 %v471_v4, %v446_v1  ;;  %v263_v16 = vmul.f32 %v474_v5, %v446_v1  ;;  %v264_v17 = vmul.f32 %v475_v6, %v446_v1 }
  0x13   : > { %v265_v18 = vmul.f32 %v478_v10, %v446_v1  ;;  %v266_v19 = vmul.f32 %v479_v11, %v446_v1  ;;  %v267_v20 = vmul.f32 %v482_v12, %v446_v1  ;;  %v268_v21 = vmul.f32 %v483_v13, %v446_v1 }
  0x14   : > { %v276_v22 = vadd.f32 %v447_v9, %v261_v14  ;;  %v277_v23 = vadd.f32 %v447_v9, %v262_v15  ;;  %v278_v24 = vadd.f32 %v447_v9, %v263_v16  ;;  %v279_v25 = vadd.f32 %v447_v9, %v264_v17 }
  0x15   : > { %v280_v26 = vadd.f32 %v447_v9, %v265_v18  ;;  %v281_v27 = vadd.f32 %v447_v9, %v266_v19  ;;  %v282_v28 = vadd.f32 %v447_v9, %v267_v20  ;;  %v283_v29 = vadd.f32 %v447_v9, %v268_v21 }
  0x16   : > { %v284_v30 = vmax.f32 %v276_v22, 0.0  ;;  %v285_v31 = vmax.f32 %v277_v23, 0.0  ;;  %v286_v32 = vmax.f32 %v278_v24, 0.0  ;;  %v287_v33 = vmax.f32 %v279_v25, 0.0 }
  0x17   : > { %v288_v34 = vmax.f32 %v280_v26, 0.0  ;;  %v289_v35 = vmax.f32 %v281_v27, 0.0  ;;  %v290_v36 = vmax.f32 %v282_v28, 0.0  ;;  %v291_v37 = vmax.f32 %v283_v29, 0.0 }
  0x18   : > { %v487_v38 = vpack.c.bf16 %v285_v31, %v284_v30  ;;  %v492_v39 = vpack.c.bf16 %v287_v33, %v286_v32 }
  0x19   : > { %v497_v40 = vpack.c.bf16 %v289_v35, %v288_v34  ;;  %v502_v41 = vpack.c.bf16 %v291_v37, %v290_v36 }
  0x1a   : > { %488 = vst [vmem:[%s236_s28] sm:$0xff] %v487_v38   ;;  %507 = vst [vmem:[%s236_s28 + $0x8] sm:$0xff] %v492_v39  }
  0x1b   : > { %508 = vst [vmem:[%s236_s28 + $0x10] sm:$0xff] %v497_v40   ;;  %509 = vst [vmem:[%s236_s28 + $0x18] sm:$0xff] %v502_v41  }
  0x1c PF: > { %s13_s14 = sadd.s32 1, %s556_s14   ;;  %s630_s12 = smov %s552_s13 }
  0x1d   : > { %p10_p5 = scmp.ge.s32.totalorder %s13_s14, 4   ;;  %s631_s13 = smov %s633_s15 }
  0x1f   :  { %12 = sbr.rel (!%p10_p5) target bundleno = 2 (0x2), region = 68 }

// kernel: generator_forward.37
= control target key start
LH: loop header
LB: loop body
LE: loop exit
PB: predicated region body
PF: predicated region fallthrough
CT: control target
= control target key end

     0   :  { %s1504_s12 = smov 0   ;;  %s1506_s13 = smov 0   ;;  %s1691_s0 = inlined_call_operand.vmem [shape: bf16[128,640], index: 0, kind: input, shape index: {}]   ;;  %s1692_s1 = inlined_call_operand.vmem [shape: bf16[640,128], index: 1, kind: input, shape index: {}]   ;;  %s1693_s2 = inlined_call_operand.vmem [shape: bf16[128,128], index: 2, kind: output, shape index: {0}]   ;;  %s1694_s3 = inlined_call_operand.vmem [shape: f32[2,2,128], index: 3, kind: output, shape index: {1}]  }
   0x1   :  { %s1508_s14 = smov 0  }
   0x2 LB: > { %s26_s15 = sadd.s32 1, %s1478_s13  ;;  %p1128_p0 = scmp.ge.s32.totalorder %s1482_s14, 1  ;;  %s1482_s14 = sphi %s1508_s14, %s14_s14   ;;  %s1478_s13 = sphi %s1506_s13, %s1696_s13   ;;  %s1474_s12 = sphi %s1504_s12, %s1695_s12  }
   0x3   : > { %p28_p1 = scmp.ge.s32.totalorder %s26_s15, 2  ;;  %p172_p2 = scmp.lt.s32.totalorder %s1482_s14, 3 }
   0x5   : > { %s1698_s15 = smov (%p28_p1, %s26_s15), 0  ;;  %p173_p3 = pnand %p1128_p0, %p172_p2 }
   0x6   : > { %s1129_s23 = sshll.u32 (!%p173_p3), %s1474_s12, 3  ;;  %p234_p5 = scmp.lt.s32.totalorder (!%p173_p3), %s1474_s12, 1 }
   0x7   : > { %176 = sbr.rel (%p173_p3) target bundleno = 310 (0x136), region = 28  ;;  %p212_p4 = scmp.lt.s32.totalorder (!%p173_p3), %s1129_s23, 15 }
   0xc   : > { %v1392_v0 = vld [vmem:[%s1692_s1 + $0x78] sm:$0xff]   ;;  %v1396_v4 = vld [vmem:[%s1692_s1 + $0x70] sm:$0xff]   ;;  %v1400_v8 = vld [vmem:[%s1692_s1 + $0x68] sm:$0xff]   ;;  %s1700_s23 = smov (!%p212_p4, %s1129_s23), 15  ;;  %s1702_s12 = smov (!%p234_p5, %s1474_s12), 1  ;;  %vm1003_vm0 = vcmask 1040384  }
   0xd   : > { %v1393_v1 = vld [vmem:[%s1692_s1 + $0xf8] sm:$0xff]   ;;  %1235 = vmatprep.subr.bf16.mxu0 %v1392_v0  ;;  %v1397_v5 = vld [vmem:[%s1692_s1 + $0xf0] sm:$0xff]   ;;  %v1401_v9 = vld [vmem:[%s1692_s1 + $0xe8] sm:$0xff]   ;;  %s1367_s24 = smul.u32 20, %s1700_s23  ;;  %s1132_s7 = sshll.u32 %s1700_s23, 2 }
   0xe   : > { %v1394_v2 = vld [vmem:[%s1692_s1 + $0x38] sm:$0xff]   ;;  %1275 = vmatprep.subr.bf16.mxu1 %v1393_v1  ;;  %v1398_v6 = vld [vmem:[%s1692_s1 + $0x30] sm:$0xff]   ;;  %v1402_v10 = vld [vmem:[%s1692_s1 + $0x28] sm:$0xff]   ;;  %s232_s10 = scalar_lea.vmem %s1693_s2, %s1132_s7  ;;  %s1133_s23 = sshll.u32 %s1702_s12, 1 }
   0xf   : > { %v1395_v3 = vld [vmem:[%s1692_s1 + $0xb8] sm:$0xff]   ;;  %1236 = vmatpush3.bf16.msra.mxu0 %v1394_v2  ;;  %v1399_v7 = vld [vmem:[%s1692_s1 + $0xb0] sm:$0xff]   ;;  %v1403_v11 = vld [vmem:[%s1692_s1 + $0xa8] sm:$0xff]   ;;  %s1621_s8 = scalar_lea.vmem %s1691_s0, %s1367_s24  ;;  %s237_s17 = scalar_lea.vmem %s1694_s3, %s1133_s23 }
  0x10   : > { %1276 = vmatpush3.bf16.msra.mxu1 %v1395_v3  ;;  %1237 = vmatprep.subr.bf16.mxu0 %v1396_v4  ;;  %v1404_v12 = vld [vmem:[%s1692_s1 + $0x60] sm:$0xff]   ;;  %v1408_v16 = vld [vmem:[%s1692_s1 + $0x58] sm:$0xff]   ;;  %v1412_v20 = vld [vmem:[%s1692_s1 + $0x50] sm:$0xff]  }
  0x11   : > { %1277 = vmatprep.subr.bf16.mxu1 %v1397_v5  ;;  %v1405_v13 = vld [vmem:[%s1692_s1 + $0xe0] sm:$0xff]   ;;  %v1409_v17 = vld [vmem:[%s1692_s1 + $0xd8] sm:$0xff]   ;;  %v1413_v21 = vld [vmem:[%s1692_s1 + $0xd0] sm:$0xff]  }
  0x12   : > { %v1406_v14 = vld [vmem:[%s1692_s1 + $0x20] sm:$0xff]   ;;  %v1410_v18 = vld [vmem:[%s1692_s1 + $0x18] sm:$0xff]   ;;  %v1414_v22 = vld [vmem:[%s1692_s1 + $0x10] sm:$0xff]  }
  0x13   : > { %1238 = vmatpush3.bf16.msra.mxu0 %v1398_v6  ;;  %v1407_v15 = vld [vmem:[%s1692_s1 + $0xa0] sm:$0xff]   ;;  %v1411_v19 = vld [vmem:[%s1692_s1 + $0x98] sm:$0xff]   ;;  %v1415_v23 = vld [vmem:[%s1692_s1 + $0x90] sm:$0xff]  }
  0x14   : > { %1278 = vmatpush3.bf16.msra.mxu1 %v1399_v7  ;;  %1239 = vmatprep.subr.bf16.mxu0 %v1400_v8  ;;  %v1416_v24 = vld [vmem:[%s1692_s1 + $0x48] sm:$0xff]   ;;  %v1420_v28 = vld [vmem:[%s1692_s1 + $0x40] sm:$0xff]   ;;  %v1430_v36 = vld [vmem:[%s1692_s1 + $0x138] sm:$0xff]  }
  0x15   : > { %1279 = vmatprep.subr.bf16.mxu1 %v1401_v9  ;;  %v1417_v25 = vld [vmem:[%s1692_s1 + $0xc8] sm:$0xff]   ;;  %v1421_v29 = vld [vmem:[%s1692_s1 + $0xc0] sm:$0xff]   ;;  %v1431_v37 = vld [vmem:[%s1692_s1 + $0x130] sm:$0xff]  }
  0x16   : > { %v1418_v26 = vld [vmem:[%s1692_s1 + $0x8] sm:$0xff]   ;;  %v1422_v30 = vld [vmem:[%s1692_s1] sm:$0xff]   ;;  %v1442_v45 = vld [vmem:[%s1621_s8 + $0x5c] ss:$20 sps:$4 sm:$0xff]  }
  0x17   : > { %1240 = vmatpush3.bf16.msra.mxu0 %v1402_v10  ;;  %v1419_v27 = vld [vmem:[%s1692_s1 + $0x88] sm:$0xff]   ;;  %v1423_v31 = vld [vmem:[%s1692_s1 + $0x80] sm:$0xff]   ;;  %v1446_v46 = vld [vmem:[%s1692_s1 + $0x118] sm:$0xff]  }
  0x18   : > { %1280 = vmatpush3.bf16.msra.mxu1 %v1403_v11  ;;  %1241 = vmatprep.subr.bf16.mxu0 %v1404_v12  ;;  %v1424_v32 = vld [vmem:[%s1621_s8] ss:$20 sps:$4 sm:$0xff]   ;;  %v1426_v33 = vld [vmem:[%s1621_s8 + $0x4] ss:$20 sps:$4 sm:$0xff]   ;;  %v1427_v34 = vld [vmem:[%s1621_s8 + $0x8] ss:$20 sps:$4 sm:$0xff]  }
  0x19   : > { %1281 = vmatprep.subr.bf16.mxu1 %v1405_v13  ;;  %v1429_v35 = vld [vmem:[%s1621_s8 + $0xc] ss:$20 sps:$4 sm:$0xff]   ;;  %739 = vmatprep.mubr.bf16.mxu0 %v1426_v33  ;;  %v1434_v39 = vld [vmem:[%s1621_s8 + $0x34] ss:$20 sps:$4 sm:$0xff]   ;;  %v1437_v42 = vld [vmem:[%s1621_s8 + $0x30] ss:$20 sps:$4 sm:$0xff]  }
  0x1a   : > { %804 = vmatprep.mubr.bf16.mxu1 %v1429_v35  ;;  %v1432_v38 = vld [vmem:[%s1621_s8 + $0x2c] ss:$20 sps:$4 sm:$0xff]   ;;  %v1436_v40 = vld [vmem:[%s1621_s8 + $0x28] ss:$20 sps:$4 sm:$0xff]   ;;  %v1444_v47 = vld [vmem:[%s1621_s8 + $0x50] ss:$20 sps:$4 sm:$0xff]  }
  0x1b   : > { %1242 = vmatpush3.bf16.msra.mxu0 %v1406_v14  ;;  %v1438_v41 = vld [vmem:[%s1692_s1 + $0x128] sm:$0xff]   ;;  %v1439_v44 = vld [vmem:[%s1692_s1 + $0x120] sm:$0xff]   ;;  %v1448_v49 = vld [vmem:[%s1621_s8 + $0x7c] ss:$20 sps:$4 sm:$0xff]  }
  0x1c   : > { %1282 = vmatpush3.bf16.msra.mxu1 %v1407_v15  ;;  %1243 = vmatprep.subr.bf16.mxu0 %v1408_v16  ;;  %v1440_v43 = vld [vmem:[%s1621_s8 + $0x54] ss:$20 sps:$4 sm:$0xff]   ;;  %v1445_v48 = vld [vmem:[%s1621_s8 + $0x58] ss:$20 sps:$4 sm:$0xff]   ;;  %v1456_v55 = vld [vmem:[%s1621_s8 + $0x10] ss:$20 sps:$4 sm:$0xff]  }
  0x1d   : > { %1283 = vmatprep.subr.bf16.mxu1 %v1409_v17  ;;  %v1450_v50 = vld [vmem:[%s1621_s8 + $0x84] ss:$20 sps:$4 sm:$0xff]   ;;  %v1447_v51 = vld [vmem:[%s1692_s1 + $0x110] sm:$0xff]   ;;  %v1454_v52 = vld [vmem:[%s1692_s1 + $0x108] sm:$0xff]  }
  0x1e   : > { %v1452_v53 = vld [vmem:[%s1621_s8 + $0x78] ss:$20 sps:$4 sm:$0xff]   ;;  %v1453_v54 = vld [vmem:[%s1621_s8 + $0x80] ss:$20 sps:$4 sm:$0xff]   ;;  %v1459_v59 = vld [vmem:[%s1621_s8 + $0x88] ss:$20 sps:$4 sm:$0xff]  }
  0x1f   : > { %1244 = vmatpush3.bf16.msra.mxu0 %v1410_v18  ;;  %v1457_v56 = vld [vmem:[%s1621_s8 + $0x60] ss:$20 sps:$4 sm:$0xff]   ;;  %v1458_v58 = vld [vmem:[%s1621_s8 + $0x38] ss:$20 sps:$4 sm:$0xff]  }
  0x20   : > { %1284 = vmatpush3.bf16.msra.mxu1 %v1411_v19  ;;  %1245 = vmatprep.subr.bf16.mxu0 %v1412_v20  ;;  %v1455_v57 = vld [vmem:[%s1692_s1 + $0x100] sm:$0xff]  }
  0x21   : > { %1285 = vmatprep.subr.bf16.mxu1 %v1413_v21 }
  0x23   : > { %1246 = vmatpush3.bf16.msra.mxu0 %v1414_v22 }
  0x24   : > { %1286 = vmatpush3.bf16.msra.mxu1 %v1415_v23  ;;  %1247 = vmatprep.subr.bf16.mxu0 %v1416_v24 }
  0x25   : > { %1287 = vmatprep.subr.bf16.mxu1 %v1417_v25 }
  0x27   : > { %1248 = vmatpush3.bf16.msra.mxu0 %v1418_v26 }
  0x28   : > { %1288 = vmatpush3.bf16.msra.mxu1 %v1419_v27  ;;  %1249 = vmatprep.subr.bf16.mxu0 %v1420_v28 }
  0x29   : > { %1289 = vmatprep.subr.bf16.mxu1 %v1421_v29 }
  0x2b   : > { %1250 = vmatpush3.bf16.msra.mxu0 %v1422_v30 }
  0x2c   : > { %1290 = vmatpush3.bf16.msra.mxu1 %v1423_v31  ;;  %1327 = vmatprep.subr.bf16.mxu0 %v1430_v36 }
  0x2d   : > { %1351 = vmatprep.subr.bf16.mxu1 %v1430_v36 }
  0x2e   : > { %740 = vmatmul.mubr.bf16.vlgmr.msra.gmra.mxu0 %v1424_v32 }
  0x2f   : > { %805 = vmatmul.mubr.bf16.vlgmr.msra.gmra.mxu1 %v1427_v34  ;;  %1328 = vmatpush3.bf16.msra.mxu0 %v1430_v36 }
  0x30   : > { %1359 = vmatpush3.bf16.msra.mxu1 %v1430_v36  ;;  %1329 = vmatprep.subr.bf16.mxu0 %v1431_v37 }
  0x31   : > { %1352 = vmatprep.subr.bf16.mxu1 %v1431_v37  ;;  %747 = vmatprep.mubr.bf16.mxu0 %v1432_v38 }
  0x32   : > { %812 = vmatprep.mubr.bf16.mxu1 %v1434_v39 }
  0x33   : > { %1330 = vmatpush3.bf16.msra.mxu0 %v1431_v37 }
  0x34   : > { %1360 = vmatpush3.bf16.msra.mxu1 %v1431_v37  ;;  %1331 = vmatprep.subr.bf16.mxu0 %v1438_v41 }
  0x35   : > { %1353 = vmatprep.subr.bf16.mxu1 %v1438_v41 }
  0x36   : > { %748 = vmatmul.mubr.bf16.gmra.mxu0 %v1436_v40 }
  0x37   : > { %813 = vmatmul.mubr.bf16.gmra.mxu1 %v1437_v42  ;;  %755 = vmatprep.mubr.bf16.mxu0 %v1440_v43 }
  0x38   : > { %1332 = vmatpush3.bf16.msra.mxu0 %v1438_v41  ;;  %820 = vmatprep.mubr.bf16.mxu1 %v1442_v45 }
  0x39   : > { %1361 = vmatpush3.bf16.msra.mxu1 %v1438_v41  ;;  %1333 = vmatprep.subr.bf16.mxu0 %v1439_v44 }
  0x3a   : > { %1354 = vmatprep.subr.bf16.mxu1 %v1439_v44 }
  0x3c   : > { %1334 = vmatpush3.bf16.msra.mxu0 %v1439_v44 }
  0x3d   : > { %1362 = vmatpush3.bf16.msra.mxu1 %v1439_v44  ;;  %1335 = vmatprep.subr.bf16.mxu0 %v1446_v46 }
  0x3e   : > { %756 = vmatmul.mubr.bf16.gmra.mxu0 %v1444_v47  ;;  %1355 = vmatprep.subr.bf16.mxu1 %v1446_v46 }
  0x3f   : > { %821 = vmatmul.mubr.bf16.gmra.mxu1 %v1445_v48  ;;  %763 = vmatprep.mubr.bf16.mxu0 %v1448_v49 }
  0x40   : > { %1336 = vmatpush3.bf16.msra.mxu0 %v1446_v46  ;;  %828 = vmatprep.mubr.bf16.mxu1 %v1450_v50 }
  0x41   : > { %1363 = vmatpush3.bf16.msra.mxu1 %v1446_v46  ;;  %1337 = vmatprep.subr.bf16.mxu0 %v1447_v51 }
  0x42   : > { %1356 = vmatprep.subr.bf16.mxu1 %v1447_v51 }
  0x44   : > { %1338 = vmatpush3.bf16.msra.mxu0 %v1447_v51 }
  0x45   : > { %1364 = vmatpush3.bf16.msra.mxu1 %v1447_v51  ;;  %1339 = vmatprep.subr.bf16.mxu0 %v1454_v52 }
  0x46   : > { %764 = vmatmul.mubr.bf16.gmra.mxu0 %v1452_v53  ;;  %1357 = vmatprep.subr.bf16.mxu1 %v1454_v52 }
  0x47   : > { %829 = vmatmul.mubr.bf16.gmra.mxu1 %v1453_v54  ;;  %1343 = vmatprep.mubr.bf16.mxu0 %v1456_v55 }
  0x48   : > { %1340 = vmatpush3.bf16.msra.mxu0 %v1454_v52  ;;  %1347 = vmatprep.mubr.bf16.mxu1 %v1457_v56 }
  0x49   : > { %1365 = vmatpush3.bf16.msra.mxu1 %v1454_v52  ;;  %1341 = vmatprep.subr.bf16.mxu0 %v1455_v57 }
  0x4a   : > { %1358 = vmatprep.subr.bf16.mxu1 %v1455_v57 }
  0x4c   : > { %1342 = vmatpush3.bf16.msra.mxu0 %v1455_v57 }
  0x4d   : > { %1366 = vmatpush3.bf16.msra.mxu1 %v1455_v57 }
  0x4f   : > { %1344 = vmatmul.mubr.bf16.vlgmr.msra.gmra.mxu0 %v1458_v58 }
  0x50   : > { %1348 = vmatmul.mubr.bf16.vlgmr.msra.gmra.mxu1 %v1459_v59 }
  0xee   : > { %v1251_v60 = vpop.f32.mrf.mxu0 }
  0xef   : > { %v1291_v61 = vpop.f32.mrf.mxu1 }
  0xf0   : > { %v1252_v62 = vpop.f32.mrf.mxu0 }
  0xf1   : > { %v1292_v63 = vpop.f32.mrf.mxu1  ;;  %v1253_v27 = vadd.f32 %v1252_v62, %v1251_v60 }
  0xf2   : > { %v1254_v0 = vpop.f32.mrf.mxu0  ;;  %v1293_v28 = vadd.f32 %v1292_v63, %v1291_v61 }
  0xf3   : > { %v1294_v1 = vpop.f32.mrf.mxu1 }
  0xf4   : > { %v1255_v2 = vpop.f32.mrf.mxu0  ;;  %v807_v48 = vadd.f32 %v1293_v28, %v1253_v27 }
  0xf5   : > { %v1295_v3 = vpop.f32.mrf.mxu1  ;;  %v1256_v39 = vadd.f32 %v1255_v2, %v1254_v0 }
  0xf6   : > { %v1257_v4 = vpop.f32.mrf.mxu0  ;;  %v1296_v40 = vadd.f32 %v1295_v3, %v1294_v1 }
  0xf7   : > { %v1297_v5 = vpop.f32.mrf.mxu1 }
  0xf8   : > { %v1258_v6 = vpop.f32.mrf.mxu0  ;;  %v810_v58 = vadd.f32 %v1296_v40, %v1256_v39 }
  0xf9   : > { %v1298_v7 = vpop.f32.mrf.mxu1  ;;  %v1259_v30 = vadd.f32 %v1258_v6, %v1257_v4 }
  0xfa   : > { %v1260_v8 = vpop.f32.mrf.mxu0  ;;  %v1299_v31 = vadd.f32 %v1298_v7, %v1297_v5 }
  0xfb   : > { %v1300_v9 = vpop.f32.mrf.mxu1 }
  0xfc   : > { %v1261_v10 = vpop.f32.mrf.mxu0  ;;  %v815_v47 = vadd.f32 %v1299_v31, %v1259_v30 }
  0xfd   : > { %v1301_v11 = vpop.f32.mrf.mxu1  ;;  %v1262_v32 = vadd.f32 %v1261_v10, %v1260_v8 }
  0xfe   : > { %v1263_v12 = vpop.f32.mrf.mxu0  ;;  %v1302_v33 = vadd.f32 %v1301_v11, %v1300_v9 }
  0xff   : > { %v1303_v13 = vpop.f32.mrf.mxu1 }
 0x100   : > { %v1264_v14 = vpop.f32.mrf.mxu0  ;;  %v818_v50 = vadd.f32 %v1302_v33, %v1262_v32 }
 0x101   : > { %v1304_v15 = vpop.f32.mrf.mxu1  ;;  %v1265_v42 = vadd.f32 %v1264_v14, %v1263_v12 }
 0x102   : > { %v1266_v16 = vpop.f32.mrf.mxu0  ;;  %v1305_v43 = vadd.f32 %v1304_v15, %v1303_v13 }
 0x103   : > { %v1306_v17 = vpop.f32.mrf.mxu1 }
 0x104   : > { %v1267_v18 = vpop.f32.mrf.mxu0  ;;  %v823_v60 = vadd.f32 %v1305_v43, %v1265_v42 }
 0x105   : > { %v1307_v19 = vpop.f32.mrf.mxu1  ;;  %v1268_v44 = vadd.f32 %v1267_v18, %v1266_v16 }
 0x106   : > { %v1269_v20 = vpop.f32.mrf.mxu0  ;;  %v1308_v45 = vadd.f32 %v1307_v19, %v1306_v17 }
 0x107   : > { %v1309_v21 = vpop.f32.mrf.mxu1 }
 0x108   : > { %v1270_v22 = vpop.f32.mrf.mxu0  ;;  %v826_v63 = vadd.f32 %v1308_v45, %v1268_v44 }
 0x109   : > { %v1310_v23 = vpop.f32.mrf.mxu1  ;;  %v1271_v34 = vadd.f32 %v1270_v22, %v1269_v20 }
 0x10a   : > { %v1272_v24 = vpop.f32.mrf.mxu0  ;;  %v1311_v35 = vadd.f32 %v1310_v23, %v1309_v21 }
 0x10b   : > { %v1312_v25 = vpop.f32.mrf.mxu1 }
 0x10c   : > { %v1273_v26 = vpop.f32.mrf.mxu0  ;;  %v831_v51 = vadd.f32 %v1311_v35, %v1271_v34 }
 0x10d   : > { %v1313_v29 = vpop.f32.mrf.mxu1  ;;  %v1274_v36 = vadd.f32 %v1273_v26, %v1272_v24 }
 0x10e   : > { %v1314_v37 = vadd.f32 %v1313_v29, %v1312_v25 }
 0x10f   : > { %v1345_v38 = vpop.f32.mrf.mxu0 }
 0x110   : > { %v1349_v41 = vpop.f32.mrf.mxu1  ;;  %v834_v53 = vadd.f32 %v1314_v37, %v1274_v36  ;;  %v880_v54 = vadd.f32 %v1345_v38, %v815_v47 }
 0x111   : > { %v871_v46 = vpop.f32.mrf.mxu0  ;;  %v896_v59 = vadd.f32 %v1349_v41, %v831_v51 }
 0x112   : > { %v887_v49 = vpop.f32.mrf.mxu1  ;;  %v872_v55 = vadd.f32 %v871_v46, %v807_v48  ;;  %v984_v11 = vmul.f32 %v880_v54, %v880_v54 }
 0x113   : > { %v1346_v52 = vpop.f32.mrf.mxu0  ;;  %v888_v3 = vadd.f32 %v887_v49, %v823_v60  ;;  %v988_v23 = vmul.f32 %v896_v59, %v896_v59 }
 0x114   : > { %v883_v56 = vadd.f32 %v1346_v52, %v818_v50  ;;  %v1350_v57 = vpop.f32.mrf.mxu1  ;;  %v982_v6 = vmul.f32 %v872_v55, %v872_v55 }
 0x115   : > { %v899_v61 = vadd.f32 %v1350_v57, %v834_v53  ;;  %v874_v62 = vpop.f32.mrf.mxu0  ;;  %v986_v17 = vmul.f32 %v888_v3, %v888_v3 }
 0x116   : > { %v1220_v0 = vpack.c.bf16 %v883_v56, %v880_v54  ;;  %v875_v1 = vadd.f32 %v874_v62, %v810_v58  ;;  %v890_v2 = vpop.f32.mrf.mxu1  ;;  %v985_v14 = vmul.f32 %v883_v56, %v883_v56 }
 0x117   : > { %v1230_v4 = vpack.c.bf16 %v899_v61, %v896_v59  ;;  %v891_v5 = vadd.f32 %v890_v2, %v826_v63  ;;  %v989_v26 = vmul.f32 %v899_v61, %v899_v61 }
 0x118   : > { %1232 = vst [vmem:[%s232_s10 + $0x8] sm:$0xff] %v1220_v0   ;;  %v1215_v7 = vpack.c.bf16 %v875_v1, %v872_v55  ;;  %v969_v8 = vadd.f32 %v875_v1, %v872_v55  ;;  %v983_v9 = vmul.f32 %v875_v1, %v875_v1 }
 0x119   : > { %1234 = vst [vmem:[%s232_s10 + $0x18] sm:$0xff] %v1230_v4   ;;  %v1225_v10 = vpack.c.bf16 %v891_v5, %v888_v3  ;;  %v987_v21 = vmul.f32 %v891_v5, %v891_v5 }
 0x11a   : > { %1216 = vst [vmem:[%s232_s10] sm:$0xff] %v1215_v7   ;;  %v970_v12 = vadd.f32 %v969_v8, %v880_v54  ;;  %v990_v13 = vadd.f32 %v983_v9, %v982_v6 }
 0x11b   : > { %1233 = vst [vmem:[%s232_s10 + $0x10] sm:$0xff] %v1225_v10  }
 0x11c   : > { %v991_v15 = vadd.f32 %v990_v13, %v984_v11  ;;  %v971_v16 = vadd.f32 %v970_v12, %v883_v56 }
 0x11e   : > { %v972_v18 = vadd.f32 %v971_v16, %v888_v3  ;;  %v992_v19 = vadd.f32 %v991_v15, %v985_v14 }
 0x120   : > { %v973_v20 = vadd.f32 %v972_v18, %v891_v5  ;;  %v993_v22 = vadd.f32 %v992_v19, %v986_v17 }
 0x122   : > { %v974_v24 = vadd.f32 %v973_v20, %v896_v59  ;;  %v994_v25 = vadd.f32 %v993_v22, %v987_v21 }
 0x124   : > { %v975_v27 = vadd.f32 %v974_v24, %v899_v61  ;;  %v995_v28 = vadd.f32 %v994_v25, %v988_v23 }
 0x126   : > { %v976_v29 = vrot.slane %v975_v27, 4  ;;  %v996_v30 = vadd.f32 %v995_v28, %v989_v26 }
 0x128   : > { %v977_v31 = vadd.f32 %v976_v29, %v975_v27  ;;  %v997_v32 = vrot.slane %v996_v30, 4 }
 0x12a   : > { %v978_v33 = vrot.slane %v977_v31, 2  ;;  %v998_v34 = vadd.f32 %v997_v32, %v996_v30 }
 0x12c   : > { %v979_v35 = vadd.f32 %v978_v33, %v977_v31  ;;  %v999_v36 = vrot.slane %v998_v34, 2 }
 0x12e   : > { %v980_v37 = vrot.slane %v979_v35, 1  ;;  %v1000_v38 = vadd.f32 %v999_v36, %v998_v34 }
 0x130   : > { %v1001_v39 = vrot.slane %v1000_v38, 1  ;;  %v981_v40 = vadd.f32 %v980_v37, %v979_v35 }
 0x132   : > { %v1002_v41 = vadd.f32 %v1001_v39, %v1000_v38 }
 0x134   : > { %v1004_v42 = vsel %vm1003_vm0, %v981_v40, %v1002_v41 }
 0x135   : > { %1005 = vst [vmem:[%s237_s17] sm:$0x3] %v1004_v42 }
 0x136 PF: > { %s14_s14 = sadd.s32 1, %s1482_s14   ;;  %s1695_s12 = smov %s1478_s13 }
 0x137   : > { %p11_p6 = scmp.ge.s32.totalorder %s14_s14, 4   ;;  %s1696_s13 = smov %s1698_s15 }
 0x139   :  { %13 = sbr.rel (!%p11_p6) target bundleno = 2 (0x2), region = 81 }

// kernel: generator_forward.39
= control target key start
LH: loop header
LB: loop body
LE: loop exit
PB: predicated region body
PF: predicated region fallthrough
CT: control target
= control target key end

     0   :  { %s1176_s12 = smov 0   ;;  %s1178_s13 = smov 0   ;;  %s1337_s0 = inlined_call_operand.vmem [shape: bf16[32,1152], index: 0, kind: input, shape index: {}]   ;;  %s1338_s1 = inlined_call_operand.vmem [shape: bf16[1152,256], index: 1, kind: input, shape index: {}]   ;;  %s1339_s2 = inlined_call_operand.vmem [shape: bf16[32,256], index: 2, kind: output, shape index: {0}]   ;;  %s1340_s3 = inlined_call_operand.vmem [shape: f32[2,2,256], index: 3, kind: output, shape index: {1}]  }
   0x1   :  { %s1180_s14 = smov 0   ;;  %s1182_s15 = smov 0  }
   0x2   :  { %s1184_s16 = smov 0   ;;  %s1186_s17 = smov 0  }
   0x3   :  { %s1188_s18 = smov 0  }
   0x4 LB: > { %s23_s19 = sadd.s32 1, %s1144_s16  ;;  %s26_s20 = sadd.s32 1, %s1148_s17  ;;  %s1152_s18 = sphi %s1188_s18, %s14_s18   ;;  %s1148_s17 = sphi %s1186_s17, %s1346_s17   ;;  %s1144_s16 = sphi %s1184_s16, %s1345_s16   ;;  %s1140_s15 = sphi %s1182_s15, %s1344_s15   ;;  %s1136_s14 = sphi %s1180_s14, %s1343_s14   ;;  %s1132_s13 = sphi %s1178_s13, %s1342_s13   ;;  %s1128_s12 = sphi %s1176_s12, %s1341_s12  }
   0x5   : > { %p24_p0 = scmp.ge.s32.totalorder %s23_s19, 3  ;;  %p42_p1 = scmp.ne.s32.totalorder %s1132_s13, %s1128_s12 }
   0x6   : > { %p43_p2 = scmp.eq.s32.totalorder %s1152_s18, 0  ;;  %s35_s24 = sadd.s32 1, %s1132_s13 }
   0x7   : > { %s1348_s19 = smov (%p24_p0, %s23_s19), 0  ;;  %s1350_s20 = smov (!%p24_p0, %s26_s20), %s1148_s17 }
   0x8   : > { %p44_p3 = por %p43_p2, %p42_p1  ;;  %p28_p4 = scmp.ge.s32.totalorder %s1350_s20, 2 }
   0x9   : > { %s31_s21 = ssub.s32 %s1144_s16, %s1348_s19  ;;  %p882_p6 = scmp.ge.s32.totalorder %s1152_s18, 6 }
   0xa   : > { %s1352_s20 = smov (%p28_p4, %s1350_s20), 0 }
   0xb   : > { %s30_s22 = ssub.s32 %s1148_s17, %s1352_s20  ;;  %146 = sbr.rel (%p882_p6) target bundleno = 27 (0x1b), region = 16 }
   0xc   : > { %s32_s23 = sor.u32 %s31_s21, %s30_s22 }
   0xd   : > { %p33_p5 = scmp.eq.s32.totalorder %s32_s23, 0 }
   0xf   : > { %s1227_s25 = scalar_select %p33_p5, %s1132_s13, %s35_s24  }
  0x10   : > { %149 = sbr.rel (!%p44_p3) target bundleno = 27 (0x1b), region = 20  ;;  %s151_s26 = sand.u32 (%p44_p3), 1, %s1132_s13  }
  0x11   : > { %s155_s27 = smul.u32 (%p44_p3), 3, %s1144_s16 }
  0x12   : > { %s961_s28 = smul.u32 (%p44_p3), 24, %s151_s26 }
  0x13   : > { %s962_s29 = smul.u32 (%p44_p3), 18, %s1148_s17 }
  0x14   : > { %s153_s8 = scalar_lea.vmem (%p44_p3), [#allocation3], %s961_s28 }
  0x15   : > { %s157_s30 = sadd.s32 %s962_s29, %s155_s27 }
  0x16   : > { %s885_s4 = sshll.u32 %s157_s30, 2 }
  0x17   : > { %s159_s7 = scalar_lea.vmem %s1337_s0, %s885_s4 }
  0x18   : > { %v174_v0 = vld [vmem:[%s159_s7] sm:$0xff]  ;;  %v886_v2 = vld [vmem:[%s159_s7 + $0x8] sm:$0xf]  ;;  %v888_v3 = vld [vmem:[%s159_s7 + $0x2c] sm:$0xf] }
  0x19   : > { %v176_v1 = vld [vmem:[%s159_s7 + $0x24] sm:$0xff]  ;;  %175 = vst [vmem:[%s153_s8] sm:$0xff] %v174_v0  ;;  %887 = vst [vmem:[%s153_s8 + $0x8] sm:$0xf] %v886_v2 }
  0x1a   : > { %177 = vst [vmem:[%s153_s8 + $0xc] sm:$0xff] %v176_v1  ;;  %889 = vst [vmem:[%s153_s8 + $0x14] sm:$0xf] %v888_v3 }
  0x1b PF: > { %p890_p7 = scmp.ge.s32.totalorder %s1152_s18, 1  ;;  %p204_p8 = scmp.lt.s32.totalorder %s1152_s18, 7 }
  0x1d   : > { %p205_p9 = pnand %p890_p7, %p204_p8 }
  0x1e   : > { %s211_s9 = sand.u32 (!%p205_p9), 1, %s1128_s12   ;;  %s248_s10 = smul.u32 (!%p205_p9), 48, %s1136_s14 }
  0x1f   : > { %208 = sbr.rel (%p205_p9) target bundleno = 343 (0x157), region = 50  ;;  %s893_s21 = sshll.u32 (!%p205_p9), %s1140_s15, 1 }
  0x20   : > { %s963_s11 = smul.u32 (!%p205_p9), 24, %s211_s9  ;;  %p249_p10 = scmp.lt.s32.totalorder (!%p205_p9), %s248_s10, 143 }
  0x21   : > { %p256_p11 = scmp.lt.s32.totalorder (!%p205_p9), %s893_s21, 3  ;;  %p262_p12 = scmp.lt.s32.totalorder (!%p205_p9), %s1140_s15, 1 }
  0x22   : > { %s1258_s7 = scalar_lea.vmem (!%p205_p9), [#allocation3], %s963_s11  ;;  %p898_p13 = scmp.ne.s32.totalorder (!%p205_p9), %s1136_s14, 0 }
  0x24   : > { %s1354_s10 = smov (!%p249_p10, %s248_s10), 143  ;;  %s1356_s21 = smov (!%p256_p11, %s893_s21), 3 }
  0x25   : > { %s956_s22 = sshll.u32 %s1354_s10, 3  ;;  %s957_s27 = sshll.u32 %s1356_s21, 3 }
  0x26   : > { %s1245_s26 = scalar_lea.vmem %s1338_s1, %s956_s22  ;;  %s1250_s30 = scalar_lea.vmem %s1339_s2, %s957_s27 }
  0x27   : > { %s1358_s15 = smov (!%p262_p12, %s1140_s15), 1  ;;  %271 = sbr.rel (%p898_p13) target bundleno = 47 (0x2f), region = 58 }
  0x28   : > { %s958_s12 = sshll.u32 %s1358_s15, 2 }
  0x29   : > { %s1256_s6 = scalar_lea.vmem %s1340_s3, %s958_s12 }
  0x2c   : > { %v1154_v4 = vmov 0.0  }
  0x2d   : > { %272 = vst [vmem:[#allocation2 + $0x10] sm:$0xff] %v1154_v4  ;;  %273 = vst [vmem:[#allocation2] sm:$0xff] %v1154_v4 }
  0x2e   : > { %274 = vst [vmem:[#allocation2 + $0x18] sm:$0xff] %v1154_v4  ;;  %275 = vst [vmem:[#allocation2 + $0x8] sm:$0xff] %v1154_v4 }
  0x2f PF: > { %v1022_v5 = vld [vmem:[%s1245_s26 + $0x74] ss:$8 sps:$4 sm:$0xff]   ;;  %v1024_v6 = vld [vmem:[%s1245_s26 + $0x70] ss:$8 sps:$4 sm:$0xff]   ;;  %v1155_v7 = vmov 0   ;;  %p950_p0 = scmp.ne.s32.totalorder %s1136_s14, 2 }
  0x30   : > { %663 = vmatprep.mubr.bf16.mxu1 %v1155_v7  ;;  %588 = vmatprep.subr.bf16.mxu0 %v1022_v5  ;;  %v1025_v8 = vld [vmem:[%s1245_s26 + $0x64] ss:$8 sps:$4 sm:$0xff]   ;;  %v1027_v9 = vld [vmem:[%s1245_s26 + $0x60] ss:$8 sps:$4 sm:$0xff]   ;;  %v1028_v10 = vld [vmem:[%s1245_s26 + $0x54] ss:$8 sps:$4 sm:$0xff]  }
  0x31   : > { %589 = vmatpush1.bf16.msra.mxu0 %v1024_v6  ;;  %v1030_v11 = vld [vmem:[%s1245_s26 + $0x50] ss:$8 sps:$4 sm:$0xff]   ;;  %v1031_v12 = vld [vmem:[%s1245_s26 + $0x44] ss:$8 sps:$4 sm:$0xff]   ;;  %v1043_v13 = vld [vmem:[%s1245_s26 + $0x174] ss:$8 sps:$4 sm:$0xff]  }
  0x32   : > { %590 = vmatprep.subr.bf16.mxu0 %v1025_v8  ;;  %v1045_v14 = vld [vmem:[%s1245_s26 + $0x170] ss:$8 sps:$4 sm:$0xff]   ;;  %v1033_v15 = vld [vmem:[%s1245_s26 + $0x40] ss:$8 sps:$4 sm:$0xff]   ;;  %v1034_v16 = vld [vmem:[%s1245_s26 + $0x34] ss:$8 sps:$4 sm:$0xff]   ;;  %631 = vmatprep.subr.bf16.mxu1 %v1043_v13 }
  0x33   : > { %v1049_v17 = vld [vmem:[%s1245_s26 + $0x164] ss:$8 sps:$4 sm:$0xff]   ;;  %632 = vmatpush1.bf16.msra.mxu1 %v1045_v14  ;;  %v1051_v18 = vld [vmem:[%s1245_s26 + $0x160] ss:$8 sps:$4 sm:$0xff]   ;;  %v1036_v19 = vld [vmem:[%s1245_s26 + $0x30] ss:$8 sps:$4 sm:$0xff]  }
  0x34   : > { %633 = vmatprep.subr.bf16.mxu1 %v1049_v17  ;;  %v1055_v20 = vld [vmem:[%s1245_s26 + $0x154] ss:$8 sps:$4 sm:$0xff]   ;;  %v1037_v21 = vld [vmem:[%s1245_s26 + $0x24] ss:$8 sps:$4 sm:$0xff]   ;;  %v1057_v22 = vld [vmem:[%s1245_s26 + $0x150] ss:$8 sps:$4 sm:$0xff]  }
  0x35   : > { %591 = vmatpush1.bf16.msra.mxu0 %v1027_v9  ;;  %v1061_v23 = vld [vmem:[%s1245_s26 + $0x144] ss:$8 sps:$4 sm:$0xff]   ;;  %v1039_v24 = vld [vmem:[%s1245_s26 + $0x20] ss:$8 sps:$4 sm:$0xff]   ;;  %v1040_v25 = vld [vmem:[%s1245_s26 + $0x14] ss:$8 sps:$4 sm:$0xff]  }
  0x36   : > { %592 = vmatprep.subr.bf16.mxu0 %v1028_v10  ;;  %v1063_v26 = vld [vmem:[%s1245_s26 + $0x140] ss:$8 sps:$4 sm:$0xff]   ;;  %v1067_v27 = vld [vmem:[%s1245_s26 + $0x134] ss:$8 sps:$4 sm:$0xff]   ;;  %v1042_v28 = vld [vmem:[%s1245_s26 + $0x10] ss:$8 sps:$4 sm:$0xff]  }
  0x37   : > { %634 = vmatpush1.bf16.msra.mxu1 %v1051_v18  ;;  %v1046_v29 = vld [vmem:[%s1245_s26 + $0x4] ss:$8 sps:$4 sm:$0xff]   ;;  %v1069_v30 = vld [vmem:[%s1245_s26 + $0x130] ss:$8 sps:$4 sm:$0xff]   ;;  %v1048_v32 = vld [vmem:[%s1245_s26] ss:$8 sps:$4 sm:$0xff]  }
  0x38   : > { %635 = vmatprep.subr.bf16.mxu1 %v1055_v20  ;;  %v1073_v31 = vld [vmem:[%s1245_s26 + $0x124] ss:$8 sps:$4 sm:$0xff]   ;;  %v1052_v33 = vld [vmem:[%s1245_s26 + $0xf4] ss:$8 sps:$4 sm:$0xff]   ;;  %v1075_v34 = vld [vmem:[%s1245_s26 + $0x120] ss:$8 sps:$4 sm:$0xff]  }
  0x39   : > { %593 = vmatpush1.bf16.msra.mxu0 %v1030_v11  ;;  %v1079_v35 = vld [vmem:[%s1245_s26 + $0x114] ss:$8 sps:$4 sm:$0xff]   ;;  %v1054_v36 = vld [vmem:[%s1245_s26 + $0xf0] ss:$8 sps:$4 sm:$0xff]   ;;  %v1058_v37 = vld [vmem:[%s1245_s26 + $0xe4] ss:$8 sps:$4 sm:$0xff]  }
  0x3a   : > { %594 = vmatprep.subr.bf16.mxu0 %v1031_v12  ;;  %v1081_v38 = vld [vmem:[%s1245_s26 + $0x110] ss:$8 sps:$4 sm:$0xff]   ;;  %v1085_v39 = vld [vmem:[%s1245_s26 + $0x104] ss:$8 sps:$4 sm:$0xff]   ;;  %v1060_v41 = vld [vmem:[%s1245_s26 + $0xe0] ss:$8 sps:$4 sm:$0xff]  }
  0x3b   : > { %636 = vmatpush1.bf16.msra.mxu1 %v1057_v22  ;;  %v1097_v40 = vld [vmem:[%s1258_s7 + $0x4] ss:$12 sps:$4 sm:$0xff]   ;;  %v1091_v46 = vld [vmem:[%s1258_s7 + $0x8] ss:$12 sps:$4 sm:$0xff]   ;;  %v1095_v56 = vld [vmem:[%s1258_s7] ss:$12 sps:$4 sm:$0xff]  }
  0x3c   : > { %637 = vmatprep.subr.bf16.mxu1 %v1061_v23  ;;  %v1064_v42 = vld [vmem:[%s1245_s26 + $0xd4] ss:$8 sps:$4 sm:$0xff]   ;;  %620 = vmatprep.mubr.bf16.mxu0 %v1097_v40  ;;  %v1087_v43 = vld [vmem:[%s1245_s26 + $0x100] ss:$8 sps:$4 sm:$0xff]   ;;  %v1066_v44 = vld [vmem:[%s1245_s26 + $0xd0] ss:$8 sps:$4 sm:$0xff]  }
  0x3d   : > { %595 = vmatpush1.bf16.msra.mxu0 %v1033_v15  ;;  %v1070_v45 = vld [vmem:[%s1245_s26 + $0xc4] ss:$8 sps:$4 sm:$0xff]   ;;  %v1072_v47 = vld [vmem:[%s1245_s26 + $0xc0] ss:$8 sps:$4 sm:$0xff]   ;;  %v1076_v48 = vld [vmem:[%s1245_s26 + $0xb4] ss:$8 sps:$4 sm:$0xff]  }
  0x3e   : > { %596 = vmatprep.subr.bf16.mxu0 %v1034_v16  ;;  %v1078_v49 = vld [vmem:[%s1245_s26 + $0xb0] ss:$8 sps:$4 sm:$0xff]   ;;  %v1082_v50 = vld [vmem:[%s1245_s26 + $0xa4] ss:$8 sps:$4 sm:$0xff]   ;;  %v1084_v51 = vld [vmem:[%s1245_s26 + $0xa0] ss:$8 sps:$4 sm:$0xff]  }
  0x3f   : > { %638 = vmatpush1.bf16.msra.mxu1 %v1063_v26  ;;  %v1088_v52 = vld [vmem:[%s1245_s26 + $0x94] ss:$8 sps:$4 sm:$0xff]   ;;  %v1090_v53 = vld [vmem:[%s1245_s26 + $0x90] ss:$8 sps:$4 sm:$0xff]   ;;  %v1092_v54 = vld [vmem:[%s1245_s26 + $0x84] ss:$8 sps:$4 sm:$0xff]  }
  0x40   : > { %639 = vmatprep.subr.bf16.mxu1 %v1067_v27  ;;  %v1094_v55 = vld [vmem:[%s1245_s26 + $0x80] ss:$8 sps:$4 sm:$0xff]   ;;  %v276_v59 = vld [vmem:[#allocation2 + $0x10] sm:$0xff]  ;;  %v278_v3 = vld [vmem:[#allocation2 + $0x18] sm:$0xff] }
  0x41   : > { %597 = vmatpush1.bf16.msra.mxu0 %v1036_v19  ;;  %v277_v63 = vld [vmem:[#allocation2] sm:$0xff]  ;;  %v279_v8 = vld [vmem:[#allocation2 + $0x8] sm:$0xff] }
  0x42   : > { %598 = vmatprep.subr.bf16.mxu0 %v1037_v21 }
  0x43   : > { %640 = vmatpush1.bf16.msra.mxu1 %v1069_v30 }
  0x44   : > { %641 = vmatprep.subr.bf16.mxu1 %v1073_v31 }
  0x45   : > { %599 = vmatpush1.bf16.msra.mxu0 %v1039_v24 }
  0x46   : > { %600 = vmatprep.subr.bf16.mxu0 %v1040_v25 }
  0x47   : > { %642 = vmatpush1.bf16.msra.mxu1 %v1075_v34 }
  0x48   : > { %643 = vmatprep.subr.bf16.mxu1 %v1079_v35 }
  0x49   : > { %601 = vmatpush1.bf16.msra.mxu0 %v1042_v28 }
  0x4a   : > { %602 = vmatprep.subr.bf16.mxu0 %v1046_v29 }
  0x4b   : > { %644 = vmatpush1.bf16.msra.mxu1 %v1081_v38 }
  0x4c   : > { %645 = vmatprep.subr.bf16.mxu1 %v1085_v39 }
  0x4d   : > { %603 = vmatpush1.bf16.msra.mxu0 %v1048_v32 }
  0x4e   : > { %604 = vmatprep.subr.bf16.mxu0 %v1052_v33 }
  0x4f   : > { %646 = vmatpush1.bf16.msra.mxu1 %v1087_v43 }
  0x51   : > { %605 = vmatpush2.bf16.msra.mxu0 %v1054_v36 }
  0x52   : > { %606 = vmatprep.subr.bf16.mxu0 %v1058_v37  ;;  %664 = vmatmul.mubr.bf16.vlgmr.msra.gmra.mxu1 %v1091_v46 }
  0x55   : > { %607 = vmatpush2.bf16.msra.mxu0 %v1060_v41 }
  0x56   : > { %608 = vmatprep.subr.bf16.mxu0 %v1064_v42 }
  0x59   : > { %609 = vmatpush2.bf16.msra.mxu0 %v1066_v44 }
  0x5a   : > { %610 = vmatprep.subr.bf16.mxu0 %v1070_v45 }
  0x5d   : > { %611 = vmatpush2.bf16.msra.mxu0 %v1072_v47 }
  0x5e   : > { %612 = vmatprep.subr.bf16.mxu0 %v1076_v48 }
  0x61   : > { %613 = vmatpush2.bf16.msra.mxu0 %v1078_v49 }
  0x62   : > { %614 = vmatprep.subr.bf16.mxu0 %v1082_v50 }
  0x65   : > { %615 = vmatpush2.bf16.msra.mxu0 %v1084_v51 }
  0x66   : > { %616 = vmatprep.subr.bf16.mxu0 %v1088_v52 }
  0x69   : > { %617 = vmatpush2.bf16.msra.mxu0 %v1090_v53 }
  0x6a   : > { %618 = vmatprep.subr.bf16.mxu0 %v1092_v54 }
  0x6d   : > { %619 = vmatpush2.bf16.msra.mxu0 %v1094_v55 }
  0x70   : > { %621 = vmatmul.mubr.bf16.vlgmr.msra.gmra.mxu0 %v1095_v56 }
 0x112   : > { %v665_v57 = vpop.f32.mrf.mxu1 }
 0x114   : > { %v667_v58 = vpop.f32.mrf.mxu1 }
 0x116   : > { %v669_v62 = vpop.f32.mrf.mxu1 }
 0x118   : > { %v671_v7 = vpop.f32.mrf.mxu1 }
 0x130   : > { %v622_v60 = vpop.f32.mrf.mxu0 }
 0x131   : > { %v666_v61 = vadd.f32 %v665_v57, %v622_v60 }
 0x132   : > { %v624_v0 = vpop.f32.mrf.mxu0 }
 0x133   : > { %v674_v1 = vadd.f32 %v666_v61, %v276_v59  ;;  %v668_v2 = vadd.f32 %v667_v58, %v624_v0 }
 0x134   : > { %v626_v4 = vpop.f32.mrf.mxu0 }
 0x135   : > { %678 = vst [vmem:[#allocation2 + $0x10] sm:$0xff] %v674_v1  ;;  %v675_v5 = vadd.f32 %v668_v2, %v277_v63  ;;  %v670_v6 = vadd.f32 %v669_v62, %v626_v4 }
 0x136   : > { %v628_v9 = vpop.f32.mrf.mxu0 }
 0x137   : > { %679 = vst [vmem:[#allocation2] sm:$0xff] %v675_v5  ;;  %v676_v10 = vadd.f32 %v670_v6, %v278_v3  ;;  %v672_v11 = vadd.f32 %v671_v7, %v628_v9  ;;  %685 = sbr.rel (%p950_p0) target bundleno = 343 (0x157), region = 62 }
 0x139   : > { %680 = vst [vmem:[#allocation2 + $0x18] sm:$0xff] %v676_v10  ;;  %v677_v12 = vadd.f32 %v672_v11, %v279_v8 }
 0x13b   : > { %681 = vst [vmem:[#allocation2 + $0x8] sm:$0xff] %v677_v12 }
 0x13c   : > { %v686_v13 = vld [vmem:[#allocation2 + $0x10] sm:$0xff]  ;;  %vm736_vm0 = vcmask 1040384  }
 0x13d   : > { %v718_v17 = vmul.f32 %v686_v13, %v686_v13 }
 0x13e   : > { %v687_v14 = vld [vmem:[#allocation2] sm:$0xff] }
 0x13f   : > { %v959_v16 = vpack.c.bf16 %v687_v14, %v686_v13  ;;  %v719_v18 = vmul.f32 %v687_v14, %v687_v14 }
 0x140   : > { %v688_v15 = vld [vmem:[#allocation2 + $0x18] sm:$0xff] }
 0x141   : > { %v704_v20 = vadd.f32 %v688_v15, %v686_v13  ;;  %v720_v23 = vmul.f32 %v688_v15, %v688_v15  ;;  %702 = vst [vmem:[%s1250_s30] sm:$0xff] %v959_v16 }
 0x142   : > { %v689_v19 = vld [vmem:[#allocation2 + $0x8] sm:$0xff] }
 0x143   : > { %v960_v21 = vpack.c.bf16 %v689_v19, %v688_v15  ;;  %v711_v22 = vadd.f32 %v689_v19, %v687_v14  ;;  %v721_v24 = vmul.f32 %v689_v19, %v689_v19  ;;  %v705_v25 = vrot.slane %v704_v20, 4 }
 0x144   : > { %v722_v27 = vadd.f32 %v720_v23, %v718_v17 }
 0x145   : > { %703 = vst [vmem:[%s1250_s30 + $0x8] sm:$0xff] %v960_v21  ;;  %v712_v26 = vrot.slane %v711_v22, 4  ;;  %v729_v28 = vadd.f32 %v721_v24, %v719_v18  ;;  %v706_v29 = vadd.f32 %v705_v25, %v704_v20 }
 0x146   : > { %v723_v31 = vrot.slane %v722_v27, 4 }
 0x147   : > { %v713_v30 = vadd.f32 %v712_v26, %v711_v22  ;;  %v730_v32 = vrot.slane %v729_v28, 4  ;;  %v707_v33 = vrot.slane %v706_v29, 2 }
 0x148   : > { %v724_v35 = vadd.f32 %v723_v31, %v722_v27 }
 0x149   : > { %v714_v34 = vrot.slane %v713_v30, 2  ;;  %v731_v36 = vadd.f32 %v730_v32, %v729_v28  ;;  %v708_v37 = vadd.f32 %v707_v33, %v706_v29 }
 0x14a   : > { %v725_v39 = vrot.slane %v724_v35, 2 }
 0x14b   : > { %v715_v38 = vadd.f32 %v714_v34, %v713_v30  ;;  %v732_v40 = vrot.slane %v731_v36, 2  ;;  %v709_v41 = vrot.slane %v708_v37, 1 }
 0x14c   : > { %v726_v43 = vadd.f32 %v725_v39, %v724_v35 }
 0x14d   : > { %v716_v42 = vrot.slane %v715_v38, 1  ;;  %v733_v44 = vadd.f32 %v732_v40, %v731_v36  ;;  %v710_v45 = vadd.f32 %v709_v41, %v708_v37 }
 0x14e   : > { %v727_v47 = vrot.slane %v726_v43, 1 }
 0x14f   : > { %v717_v46 = vadd.f32 %v716_v42, %v715_v38  ;;  %v734_v48 = vrot.slane %v733_v44, 1 }
 0x150   : > { %v728_v49 = vadd.f32 %v727_v47, %v726_v43 }
 0x151   : > { %v735_v50 = vadd.f32 %v734_v48, %v733_v44 }
 0x152   : > { %v737_v51 = vsel %vm736_vm0, %v710_v45, %v728_v49 }
 0x153   : > { %v738_v52 = vsel %vm736_vm0, %v717_v46, %v735_v50 }
 0x154   : > { %v741_v53 = vcombine.low %v737_v51, %v738_v52 }
 0x156   : > { %953 = vst.sshfl [vmem:[%s1256_s6] sm:$0x33 pattern:$0x76325410] %v741_v53 }
 0x157 PF: > { %s14_s18 = sadd.s32 1, %s1152_s18   ;;  %s1341_s12 = smov %s1132_s13 }
 0x158   : > { %p11_p1 = scmp.ge.s32.totalorder %s14_s18, 8   ;;  %s1342_s13 = smov %s1227_s25 }
 0x159   : > { %s1343_s14 = smov %s1144_s16  ;;  %s1344_s15 = smov %s1148_s17 }
 0x15a   : > { %s1345_s16 = smov %s1348_s19  ;;  %s1346_s17 = smov %s1352_s20 }
 0x15b   :  { %13 = sbr.rel (!%p11_p1) target bundleno = 4 (0x4), region = 118 }

// kernel: generator_forward.40
= control target key start
LH: loop header
LB: loop body
LE: loop exit
PB: predicated region body
PF: predicated region fallthrough
CT: control target
= control target key end

     0   :  { %s512_s12 = smov 0   ;;  %s514_s13 = smov 0   ;;  %s559_s0 = inlined_call_operand.vmem [shape: bf16[2,16,256], index: 0, kind: input, shape index: {}]   ;;  %s560_s1 = inlined_call_operand.vmem [shape: f32[2,1,256], index: 1, kind: input, shape index: {}]   ;;  %s561_s2 = inlined_call_operand.vmem [shape: f32[2,1,256], index: 2, kind: input, shape index: {}]   ;;  %s562_s3 = inlined_call_operand.vmem [shape: bf16[2,16,256], index: 3, kind: output, shape index: {}]  }
   0x1   :  { %s516_s14 = smov 0  }
   0x2 LB: > { %s25_s15 = sadd.s32 1, %s486_s13  ;;  %p429_p0 = scmp.ge.s32.totalorder %s490_s14, 1  ;;  %s490_s14 = sphi %s516_s14, %s13_s14   ;;  %s486_s13 = sphi %s514_s13, %s564_s13   ;;  %s482_s12 = sphi %s512_s12, %s563_s12  }
   0x3   : > { %p27_p1 = scmp.ge.s32.totalorder %s25_s15, 2  ;;  %p177_p2 = scmp.lt.s32.totalorder %s490_s14, 3 }
   0x5   : > { %s566_s15 = smov (%p27_p1, %s25_s15), 0  ;;  %p178_p3 = pnand %p429_p0, %p177_p2 }
   0x6   : > { %p220_p4 = scmp.lt.s32.totalorder (!%p178_p3), %s482_s12, 1 }
   0x7   : > { %181 = sbr.rel (%p178_p3) target bundleno = 29 (0x1d), region = 32 }
   0xc   : > { %v257_v0 = vlaneseq  ;;  %s568_s12 = smov (!%p220_p4, %s482_s12), 1 }
   0xd   : > { %s440_s16 = sshll.u32 %s568_s12, 4  ;;  %s432_s17 = sshll.u32 %s568_s12, 1 }
   0xe   : > { %v258_v1 = vshrl.u32 %v257_v0, 7  ;;  %s228_s20 = scalar_lea.vmem %s559_s0, %s440_s16  ;;  %s233_s23 = scalar_lea.vmem %s560_s1, %s432_s17 }
   0xf   : > { %s237_s26 = scalar_lea.vmem %s561_s2, %s432_s17  ;;  %v249_v4 = vld [vmem:[%s228_s20] sm:$0xff]  ;;  %v250_v5 = vld [vmem:[%s228_s20 + $0x8] sm:$0xff]  ;;  %s247_s29 = scalar_lea.vmem %s562_s3, %s440_s16 }
  0x10   : > { %v259_v2 = vsub.s32 0, %v258_v1  ;;  %v263_v3 = vsub.s32 1, %v258_v1  ;;  %v255_v6 = vld [vmem:[%s233_s23] sm:$0x3]  ;;  %v251_v7 = vunpack.c.l.bf16 %v249_v4  ;;  %v252_v8 = vunpack.c.h.bf16 %v249_v4 }
  0x11   : > { %v253_v9 = vunpack.c.l.bf16 %v250_v5  ;;  %v254_v10 = vunpack.c.h.bf16 %v250_v5  ;;  %v271_v11 = vld [vmem:[%s237_s26] sm:$0x3] }
  0x12   : > { %v260_v12 = vrot.slane %v255_v6, %v259_v2  ;;  %v264_v13 = vrot.slane %v255_v6, %v263_v3  ;;  %v276_v14 = vrot.slane %v271_v11, %v259_v2  ;;  %v280_v15 = vrot.slane %v271_v11, %v263_v3 }
  0x14   : > { %v267_v16 = vmul.f32 %v260_v12, %v251_v7  ;;  %v268_v17 = vmul.f32 %v264_v13, %v252_v8  ;;  %v269_v18 = vmul.f32 %v260_v12, %v253_v9  ;;  %v270_v19 = vmul.f32 %v264_v13, %v254_v10 }
  0x16   : > { %v283_v20 = vadd.f32 %v276_v14, %v267_v16  ;;  %v284_v21 = vadd.f32 %v280_v15, %v268_v17  ;;  %v285_v22 = vadd.f32 %v276_v14, %v269_v18  ;;  %v286_v23 = vadd.f32 %v280_v15, %v270_v19 }
  0x18   : > { %v287_v24 = vmax.f32 %v283_v20, 0.0  ;;  %v288_v25 = vmax.f32 %v284_v21, 0.0  ;;  %v289_v26 = vmax.f32 %v285_v22, 0.0  ;;  %v290_v27 = vmax.f32 %v286_v23, 0.0 }
  0x1a   : > { %v442_v28 = vpack.c.bf16 %v288_v25, %v287_v24  ;;  %v443_v29 = vpack.c.bf16 %v290_v27, %v289_v26 }
  0x1c   : > { %303 = vst [vmem:[%s247_s29] sm:$0xff] %v442_v28  ;;  %304 = vst [vmem:[%s247_s29 + $0x8] sm:$0xff] %v443_v29 }
  0x1d PF: > { %s13_s14 = sadd.s32 1, %s490_s14   ;;  %s563_s12 = smov %s486_s13 }
  0x1e   : > { %p10_p5 = scmp.ge.s32.totalorder %s13_s14, 4   ;;  %s564_s13 = smov %s566_s15 }
  0x20   :  { %12 = sbr.rel (!%p10_p5) target bundleno = 2 (0x2), region = 68 }

// kernel: generator_forward.44
= control target key start
LH: loop header
LB: loop body
LE: loop exit
PB: predicated region body
PF: predicated region fallthrough
CT: control target
= control target key end

     0   :  { %s613_s15 = smov 0   ;;  %s615_s16 = smov 0   ;;  %s660_s0 = inlined_call_operand.vmem [shape: bf16[2,16,256], index: 0, kind: input, shape index: {}]   ;;  %s661_s1 = inlined_call_operand.vmem [shape: f32[2,1,256], index: 1, kind: input, shape index: {}]   ;;  %s662_s2 = inlined_call_operand.vmem [shape: f32[2,1,256], index: 2, kind: input, shape index: {}]   ;;  %s663_s3 = inlined_call_operand.vmem [shape: bf16[2,16,256], index: 3, kind: input, shape index: {}]   ;;  %s664_s4 = inlined_call_operand.vmem [shape: bf16[2,16,256], index: 4, kind: output, shape index: {}]  }
   0x1   :  { %s617_s17 = smov 0  }
   0x2 LB: > { %s26_s18 = sadd.s32 1, %s582_s16  ;;  %p522_p0 = scmp.ge.s32.totalorder %s586_s17, 1  ;;  %s586_s17 = sphi %s617_s17, %s14_s17   ;;  %s582_s16 = sphi %s615_s16, %s666_s16   ;;  %s578_s15 = sphi %s613_s15, %s665_s15  }
   0x3   : > { %p28_p1 = scmp.ge.s32.totalorder %s26_s18, 2  ;;  %p220_p2 = scmp.lt.s32.totalorder %s586_s17, 3 }
   0x5   : > { %s668_s18 = smov (%p28_p1, %s26_s18), 0  ;;  %p221_p3 = pnand %p522_p0, %p220_p2 }
   0x6   : > { %p275_p4 = scmp.lt.s32.totalorder (!%p221_p3), %s578_s15, 1 }
   0x7   : > { %224 = sbr.rel (%p221_p3) target bundleno = 29 (0x1d), region = 36 }
   0xc   : > { %v323_v0 = vlaneseq  ;;  %s670_s15 = smov (!%p275_p4, %s578_s15), 1 }
   0xd   : > { %s631_s19 = sshll.u32 %s670_s15, 4  ;;  %s525_s20 = sshll.u32 %s670_s15, 1 }
   0xe   : > { %v324_v1 = vshrl.u32 %v323_v0, 7  ;;  %s283_s23 = scalar_lea.vmem %s660_s0, %s631_s19  ;;  %s288_s26 = scalar_lea.vmem %s661_s1, %s525_s20 }
   0xf   : > { %s292_s29 = scalar_lea.vmem %s662_s2, %s525_s20  ;;  %s302_s6 = scalar_lea.vmem %s663_s3, %s631_s19  ;;  %v315_v4 = vld [vmem:[%s283_s23] sm:$0xff]  ;;  %v316_v5 = vld [vmem:[%s283_s23 + $0x8] sm:$0xff] }
  0x10   : > { %v325_v2 = vsub.s32 0, %v324_v1  ;;  %v329_v3 = vsub.s32 1, %v324_v1  ;;  %v321_v6 = vld [vmem:[%s288_s26] sm:$0x3]  ;;  %v317_v7 = vunpack.c.l.bf16 %v315_v4  ;;  %v318_v8 = vunpack.c.h.bf16 %v315_v4  ;;  %v354_v13 = vld [vmem:[%s302_s6 + $0x8] sm:$0xff]  ;;  %s313_s9 = scalar_lea.vmem %s664_s4, %s631_s19 }
  0x11   : > { %v319_v9 = vunpack.c.l.bf16 %v316_v5  ;;  %v320_v10 = vunpack.c.h.bf16 %v316_v5  ;;  %v337_v11 = vld [vmem:[%s292_s29] sm:$0x3]  ;;  %v357_v20 = vunpack.c.l.bf16 %v354_v13  ;;  %v358_v21 = vunpack.c.h.bf16 %v354_v13 }
  0x12   : > { %v353_v12 = vld [vmem:[%s302_s6] sm:$0xff]  ;;  %v326_v14 = vrot.slane %v321_v6, %v325_v2  ;;  %v330_v15 = vrot.slane %v321_v6, %v329_v3  ;;  %v342_v16 = vrot.slane %v337_v11, %v325_v2  ;;  %v346_v17 = vrot.slane %v337_v11, %v329_v3 }
  0x13   : > { %v355_v18 = vunpack.c.l.bf16 %v353_v12  ;;  %v356_v19 = vunpack.c.h.bf16 %v353_v12 }
  0x14   : > { %v333_v22 = vmul.f32 %v326_v14, %v317_v7  ;;  %v334_v23 = vmul.f32 %v330_v15, %v318_v8  ;;  %v335_v24 = vmul.f32 %v326_v14, %v319_v9  ;;  %v336_v25 = vmul.f32 %v330_v15, %v320_v10 }
  0x16   : > { %v349_v26 = vadd.f32 %v342_v16, %v333_v22  ;;  %v350_v27 = vadd.f32 %v346_v17, %v334_v23  ;;  %v351_v28 = vadd.f32 %v342_v16, %v335_v24  ;;  %v352_v29 = vadd.f32 %v346_v17, %v336_v25 }
  0x18   : > { %v359_v30 = vadd.f32 %v355_v18, %v349_v26  ;;  %v360_v31 = vadd.f32 %v356_v19, %v350_v27  ;;  %v361_v32 = vadd.f32 %v357_v20, %v351_v28  ;;  %v362_v33 = vadd.f32 %v358_v21, %v352_v29 }
  0x1a   : > { %v538_v34 = vpack.c.bf16 %v360_v31, %v359_v30  ;;  %v539_v35 = vpack.c.bf16 %v362_v33, %v361_v32 }
  0x1c   : > { %375 = vst [vmem:[%s313_s9] sm:$0xff] %v538_v34  ;;  %376 = vst [vmem:[%s313_s9 + $0x8] sm:$0xff] %v539_v35 }
  0x1d PF: > { %s14_s17 = sadd.s32 1, %s586_s17   ;;  %s665_s15 = smov %s582_s16 }
  0x1e   : > { %p11_p5 = scmp.ge.s32.totalorder %s14_s17, 4   ;;  %s666_s16 = smov %s668_s18 }
  0x20   :  { %13 = sbr.rel (!%p11_p5) target bundleno = 2 (0x2), region = 75 }

// kernel: generator_forward.41
= control target key start
LH: loop header
LB: loop body
LE: loop exit
PB: predicated region body
PF: predicated region fallthrough
CT: control target
= control target key end

     0   :  { %s1634_s12 = smov 0   ;;  %s1636_s13 = smov 0   ;;  %s1846_s0 = inlined_call_operand.vmem [shape: bf16[32,2304], index: 0, kind: input, shape index: {}]   ;;  %s1847_s1 = inlined_call_operand.vmem [shape: bf16[2304,256], index: 1, kind: input, shape index: {}]   ;;  %s1848_s2 = inlined_call_operand.vmem [shape: bf16[32,256], index: 2, kind: output, shape index: {0}]   ;;  %s1849_s3 = inlined_call_operand.vmem [shape: f32[2,2,256], index: 3, kind: output, shape index: {1}]  }
   0x1   :  { %s1638_s14 = smov 0   ;;  %s1640_s15 = smov 0  }
   0x2   :  { %s1642_s16 = smov 0   ;;  %s1644_s17 = smov 0  }
   0x3   :  { %s1646_s18 = smov 0  }
   0x4 LB: > { %s23_s19 = sadd.s32 1, %s1603_s16  ;;  %s26_s20 = sadd.s32 1, %s1607_s17  ;;  %s1611_s18 = sphi %s1646_s18, %s14_s18   ;;  %s1607_s17 = sphi %s1644_s17, %s1855_s17   ;;  %s1603_s16 = sphi %s1642_s16, %s1854_s16   ;;  %s1599_s15 = sphi %s1640_s15, %s1853_s15   ;;  %s1595_s14 = sphi %s1638_s14, %s1852_s14   ;;  %s1591_s13 = sphi %s1636_s13, %s1851_s13   ;;  %s1587_s12 = sphi %s1634_s12, %s1850_s12  }
   0x5   : > { %p24_p0 = scmp.ge.s32.totalorder %s23_s19, 3  ;;  %p42_p1 = scmp.ne.s32.totalorder %s1591_s13, %s1587_s12 }
   0x6   : > { %p43_p2 = scmp.eq.s32.totalorder %s1611_s18, 0  ;;  %s35_s24 = sadd.s32 1, %s1591_s13 }
   0x7   : > { %s1857_s19 = smov (%p24_p0, %s23_s19), 0  ;;  %s1859_s20 = smov (!%p24_p0, %s26_s20), %s1607_s17 }
   0x8   : > { %p44_p3 = por %p43_p2, %p42_p1  ;;  %p28_p4 = scmp.ge.s32.totalorder %s1859_s20, 2 }
   0x9   : > { %s31_s21 = ssub.s32 %s1603_s16, %s1857_s19  ;;  %p1218_p6 = scmp.ge.s32.totalorder %s1611_s18, 6 }
   0xa   : > { %s1861_s20 = smov (%p28_p4, %s1859_s20), 0 }
   0xb   : > { %s30_s22 = ssub.s32 %s1607_s17, %s1861_s20  ;;  %146 = sbr.rel (%p1218_p6) target bundleno = 28 (0x1c), region = 16 }
   0xc   : > { %s32_s23 = sor.u32 %s31_s21, %s30_s22 }
   0xd   : > { %p33_p5 = scmp.eq.s32.totalorder %s32_s23, 0 }
   0xf   : > { %s1685_s25 = scalar_select %p33_p5, %s1591_s13, %s35_s24  }
  0x10   : > { %149 = sbr.rel (!%p44_p3) target bundleno = 28 (0x1c), region = 20  ;;  %s151_s26 = sand.u32 (%p44_p3), 1, %s1591_s13  }
  0x11   : > { %s155_s27 = smul.u32 (%p44_p3), 6, %s1603_s16 }
  0x12   : > { %s1344_s28 = smul.u32 (%p44_p3), 48, %s151_s26 }
  0x13   : > { %s1345_s29 = smul.u32 (%p44_p3), 36, %s1607_s17 }
  0x14   : > { %s153_s8 = scalar_lea.vmem (%p44_p3), [#allocation3], %s1344_s28 }
  0x15   : > { %s157_s30 = sadd.s32 %s1345_s29, %s155_s27 }
  0x16   : > { %s1221_s4 = sshll.u32 %s157_s30, 2 }
  0x17   : > { %s159_s7 = scalar_lea.vmem %s1846_s0, %s1221_s4 }
  0x18   : > { %v172_v0 = vld [vmem:[%s159_s7] sm:$0xff]  ;;  %v174_v1 = vld [vmem:[%s159_s7 + $0x8] sm:$0xff]  ;;  %v176_v2 = vld [vmem:[%s159_s7 + $0x10] sm:$0xff] }
  0x19   : > { %173 = vst [vmem:[%s153_s8] sm:$0xff] %v172_v0  ;;  %175 = vst [vmem:[%s153_s8 + $0x8] sm:$0xff] %v174_v1  ;;  %v178_v3 = vld [vmem:[%s159_s7 + $0x48] sm:$0xff]  ;;  %v180_v4 = vld [vmem:[%s159_s7 + $0x50] sm:$0xff] }
  0x1a   : > { %177 = vst [vmem:[%s153_s8 + $0x10] sm:$0xff] %v176_v2  ;;  %v182_v5 = vld [vmem:[%s159_s7 + $0x58] sm:$0xff]  ;;  %179 = vst [vmem:[%s153_s8 + $0x18] sm:$0xff] %v178_v3 }
  0x1b   : > { %181 = vst [vmem:[%s153_s8 + $0x20] sm:$0xff] %v180_v4  ;;  %183 = vst [vmem:[%s153_s8 + $0x28] sm:$0xff] %v182_v5 }
  0x1c PF: > { %p1222_p7 = scmp.ge.s32.totalorder %s1611_s18, 1  ;;  %p198_p8 = scmp.lt.s32.totalorder %s1611_s18, 7 }
  0x1e   : > { %p199_p9 = pnand %p1222_p7, %p198_p8 }
  0x1f   : > { %s205_s9 = sand.u32 (!%p199_p9), 1, %s1587_s12   ;;  %s242_s10 = smul.u32 (!%p199_p9), 96, %s1595_s14 }
  0x20   : > { %202 = sbr.rel (%p199_p9) target bundleno = 408 (0x198), region = 47  ;;  %s1225_s21 = sshll.u32 (!%p199_p9), %s1599_s15, 1 }
  0x21   : > { %s1346_s11 = smul.u32 (!%p199_p9), 48, %s205_s9  ;;  %p243_p10 = scmp.lt.s32.totalorder (!%p199_p9), %s242_s10, 287 }
  0x22   : > { %p250_p11 = scmp.lt.s32.totalorder (!%p199_p9), %s1225_s21, 3  ;;  %p256_p12 = scmp.lt.s32.totalorder (!%p199_p9), %s1599_s15, 1 }
  0x23   : > { %s1716_s7 = scalar_lea.vmem (!%p199_p9), [#allocation3], %s1346_s11  ;;  %p1230_p13 = scmp.ne.s32.totalorder (!%p199_p9), %s1595_s14, 0 }
  0x25   : > { %s1863_s10 = smov (!%p243_p10, %s242_s10), 287  ;;  %s1865_s21 = smov (!%p250_p11, %s1225_s21), 3 }
  0x26   : > { %s1339_s22 = sshll.u32 %s1863_s10, 3  ;;  %s1340_s27 = sshll.u32 %s1865_s21, 3 }
  0x27   : > { %s1703_s26 = scalar_lea.vmem %s1847_s1, %s1339_s22  ;;  %s1708_s30 = scalar_lea.vmem %s1848_s2, %s1340_s27 }
  0x28   : > { %s1867_s15 = smov (!%p256_p12, %s1599_s15), 1  ;;  %264 = sbr.rel (%p1230_p13) target bundleno = 48 (0x30), region = 55 }
  0x29   : > { %s1341_s12 = sshll.u32 %s1867_s15, 2 }
  0x2a   : > { %s1714_s6 = scalar_lea.vmem %s1849_s3, %s1341_s12 }
  0x2d   : > { %v1613_v6 = vmov 0.0  }
  0x2e   : > { %265 = vst [vmem:[#allocation2 + $0x10] sm:$0xff] %v1613_v6  ;;  %266 = vst [vmem:[#allocation2] sm:$0xff] %v1613_v6 }
  0x2f   : > { %267 = vst [vmem:[#allocation2 + $0x18] sm:$0xff] %v1613_v6  ;;  %268 = vst [vmem:[#allocation2 + $0x8] sm:$0xff] %v1613_v6 }
  0x30 PF: > { %v1404_v7 = vld [vmem:[%s1703_s26 + $0x74] ss:$8 sps:$4 sm:$0xff]   ;;  %v1408_v9 = vld [vmem:[%s1703_s26 + $0x70] ss:$8 sps:$4 sm:$0xff]   ;;  %v1410_v11 = vld [vmem:[%s1703_s26 + $0x64] ss:$8 sps:$4 sm:$0xff]  }
  0x31   : > { %v1406_v8 = vld [vmem:[%s1703_s26 + $0x174] ss:$8 sps:$4 sm:$0xff]   ;;  %885 = vmatprep.subr.bf16.mxu0 %v1404_v7  ;;  %v1409_v10 = vld [vmem:[%s1703_s26 + $0x170] ss:$8 sps:$4 sm:$0xff]   ;;  %v1412_v12 = vld [vmem:[%s1703_s26 + $0x164] ss:$8 sps:$4 sm:$0xff]  }
  0x32   : > { %928 = vmatprep.subr.bf16.mxu1 %v1406_v8  ;;  %886 = vmatpush1.bf16.msra.mxu0 %v1408_v9  ;;  %v1414_v13 = vld [vmem:[%s1703_s26 + $0x60] ss:$8 sps:$4 sm:$0xff]   ;;  %v1416_v15 = vld [vmem:[%s1703_s26 + $0x54] ss:$8 sps:$4 sm:$0xff]   ;;  %v1420_v17 = vld [vmem:[%s1703_s26 + $0x50] ss:$8 sps:$4 sm:$0xff]  }
  0x33   : > { %929 = vmatpush1.bf16.msra.mxu1 %v1409_v10  ;;  %887 = vmatprep.subr.bf16.mxu0 %v1410_v11  ;;  %v1415_v14 = vld [vmem:[%s1703_s26 + $0x160] ss:$8 sps:$4 sm:$0xff]   ;;  %v1418_v16 = vld [vmem:[%s1703_s26 + $0x154] ss:$8 sps:$4 sm:$0xff]   ;;  %v1421_v18 = vld [vmem:[%s1703_s26 + $0x150] ss:$8 sps:$4 sm:$0xff]  }
  0x34   : > { %930 = vmatprep.subr.bf16.mxu1 %v1412_v12  ;;  %v1422_v19 = vld [vmem:[%s1703_s26 + $0x44] ss:$8 sps:$4 sm:$0xff]   ;;  %v1426_v21 = vld [vmem:[%s1703_s26 + $0x40] ss:$8 sps:$4 sm:$0xff]   ;;  %v1428_v23 = vld [vmem:[%s1703_s26 + $0x34] ss:$8 sps:$4 sm:$0xff]  }
  0x35   : > { %v1424_v20 = vld [vmem:[%s1703_s26 + $0x144] ss:$8 sps:$4 sm:$0xff]   ;;  %v1427_v22 = vld [vmem:[%s1703_s26 + $0x140] ss:$8 sps:$4 sm:$0xff]   ;;  %v1430_v24 = vld [vmem:[%s1703_s26 + $0x134] ss:$8 sps:$4 sm:$0xff]  }
  0x36   : > { %888 = vmatpush1.bf16.msra.mxu0 %v1414_v13  ;;  %v1432_v25 = vld [vmem:[%s1703_s26 + $0x30] ss:$8 sps:$4 sm:$0xff]   ;;  %v1434_v27 = vld [vmem:[%s1703_s26 + $0x24] ss:$8 sps:$4 sm:$0xff]   ;;  %v1438_v29 = vld [vmem:[%s1703_s26 + $0x20] ss:$8 sps:$4 sm:$0xff]  }
  0x37   : > { %931 = vmatpush1.bf16.msra.mxu1 %v1415_v14  ;;  %889 = vmatprep.subr.bf16.mxu0 %v1416_v15  ;;  %v1433_v26 = vld [vmem:[%s1703_s26 + $0x130] ss:$8 sps:$4 sm:$0xff]   ;;  %v1436_v28 = vld [vmem:[%s1703_s26 + $0x124] ss:$8 sps:$4 sm:$0xff]   ;;  %v1439_v30 = vld [vmem:[%s1703_s26 + $0x120] ss:$8 sps:$4 sm:$0xff]  }
  0x38   : > { %932 = vmatprep.subr.bf16.mxu1 %v1418_v16  ;;  %v1440_v31 = vld [vmem:[%s1703_s26 + $0x14] ss:$8 sps:$4 sm:$0xff]   ;;  %v1444_v33 = vld [vmem:[%s1703_s26 + $0x10] ss:$8 sps:$4 sm:$0xff]   ;;  %v1446_v35 = vld [vmem:[%s1703_s26 + $0x4] ss:$8 sps:$4 sm:$0xff]  }
  0x39   : > { %v1442_v32 = vld [vmem:[%s1703_s26 + $0x114] ss:$8 sps:$4 sm:$0xff]   ;;  %v1445_v34 = vld [vmem:[%s1703_s26 + $0x110] ss:$8 sps:$4 sm:$0xff]   ;;  %v1448_v36 = vld [vmem:[%s1703_s26 + $0x104] ss:$8 sps:$4 sm:$0xff]  }
  0x3a   : > { %890 = vmatpush1.bf16.msra.mxu0 %v1420_v17  ;;  %v1450_v37 = vld [vmem:[%s1703_s26] ss:$8 sps:$4 sm:$0xff]   ;;  %v1452_v39 = vld [vmem:[%s1703_s26 + $0xf4] ss:$8 sps:$4 sm:$0xff]   ;;  %v1456_v41 = vld [vmem:[%s1703_s26 + $0xf0] ss:$8 sps:$4 sm:$0xff]  }
  0x3b   : > { %933 = vmatpush1.bf16.msra.mxu1 %v1421_v18  ;;  %891 = vmatprep.subr.bf16.mxu0 %v1422_v19  ;;  %v1451_v38 = vld [vmem:[%s1703_s26 + $0x100] ss:$8 sps:$4 sm:$0xff]   ;;  %v1454_v40 = vld [vmem:[%s1703_s26 + $0x1f4] ss:$8 sps:$4 sm:$0xff]   ;;  %v1457_v42 = vld [vmem:[%s1703_s26 + $0x1f0] ss:$8 sps:$4 sm:$0xff]  }
  0x3c   : > { %934 = vmatprep.subr.bf16.mxu1 %v1424_v20  ;;  %v1458_v43 = vld [vmem:[%s1703_s26 + $0xe4] ss:$8 sps:$4 sm:$0xff]   ;;  %v1462_v45 = vld [vmem:[%s1703_s26 + $0xe0] ss:$8 sps:$4 sm:$0xff]   ;;  %v1464_v47 = vld [vmem:[%s1703_s26 + $0xd4] ss:$8 sps:$4 sm:$0xff]  }
  0x3d   : > { %v1460_v44 = vld [vmem:[%s1703_s26 + $0x1e4] ss:$8 sps:$4 sm:$0xff]   ;;  %v1463_v46 = vld [vmem:[%s1703_s26 + $0x1e0] ss:$8 sps:$4 sm:$0xff]   ;;  %v1466_v48 = vld [vmem:[%s1703_s26 + $0x1d4] ss:$8 sps:$4 sm:$0xff]  }
  0x3e   : > { %892 = vmatpush1.bf16.msra.mxu0 %v1426_v21  ;;  %v1468_v49 = vld [vmem:[%s1703_s26 + $0xd0] ss:$8 sps:$4 sm:$0xff]   ;;  %v1470_v51 = vld [vmem:[%s1703_s26 + $0xc4] ss:$8 sps:$4 sm:$0xff]   ;;  %v1474_v53 = vld [vmem:[%s1703_s26 + $0xc0] ss:$8 sps:$4 sm:$0xff]  }
  0x3f   : > { %935 = vmatpush1.bf16.msra.mxu1 %v1427_v22  ;;  %893 = vmatprep.subr.bf16.mxu0 %v1428_v23  ;;  %v1469_v50 = vld [vmem:[%s1703_s26 + $0x1d0] ss:$8 sps:$4 sm:$0xff]   ;;  %v1472_v52 = vld [vmem:[%s1703_s26 + $0x1c4] ss:$8 sps:$4 sm:$0xff]   ;;  %v1475_v54 = vld [vmem:[%s1703_s26 + $0x1c0] ss:$8 sps:$4 sm:$0xff]  }
  0x40   : > { %936 = vmatprep.subr.bf16.mxu1 %v1430_v24  ;;  %v1476_v55 = vld [vmem:[%s1703_s26 + $0xb4] ss:$8 sps:$4 sm:$0xff]   ;;  %v1480_v59 = vld [vmem:[%s1703_s26 + $0xb0] ss:$8 sps:$4 sm:$0xff]   ;;  %v1482_v61 = vld [vmem:[%s1703_s26 + $0xa4] ss:$8 sps:$4 sm:$0xff]  }
  0x41   : > { %v1502_v56 = vld [vmem:[%s1716_s7 + $0x4] ss:$24 sps:$4 sm:$0xff]   ;;  %v1481_v60 = vld [vmem:[%s1703_s26 + $0x1b0] ss:$8 sps:$4 sm:$0xff]   ;;  %v1486_v63 = vld [vmem:[%s1703_s26 + $0xa0] ss:$8 sps:$4 sm:$0xff]  }
  0x42   : > { %894 = vmatpush1.bf16.msra.mxu0 %v1432_v25  ;;  %v1478_v57 = vld [vmem:[%s1703_s26 + $0x1b4] ss:$8 sps:$4 sm:$0xff]   ;;  %917 = vmatprep.mubr.bf16.mxu0 %v1502_v56  ;;  %v1484_v62 = vld [vmem:[%s1703_s26 + $0x1a4] ss:$8 sps:$4 sm:$0xff]   ;;  %v1487_v0 = vld [vmem:[%s1703_s26 + $0x1a0] ss:$8 sps:$4 sm:$0xff]  }
  0x43   : > { %937 = vmatpush1.bf16.msra.mxu1 %v1433_v26  ;;  %895 = vmatprep.subr.bf16.mxu0 %v1434_v27  ;;  %v1505_v58 = vld [vmem:[%s1716_s7 + $0xc] ss:$24 sps:$4 sm:$0xff]   ;;  %v1492_v3 = vld [vmem:[%s1703_s26 + $0x90] ss:$8 sps:$4 sm:$0xff]   ;;  %v1498_v7 = vld [vmem:[%s1703_s26 + $0x80] ss:$8 sps:$4 sm:$0xff]  }
  0x44   : > { %938 = vmatprep.subr.bf16.mxu1 %v1436_v28  ;;  %960 = vmatprep.mubr.bf16.mxu1 %v1505_v58  ;;  %v1488_v1 = vld [vmem:[%s1703_s26 + $0x94] ss:$8 sps:$4 sm:$0xff]   ;;  %v1493_v4 = vld [vmem:[%s1703_s26 + $0x190] ss:$8 sps:$4 sm:$0xff]   ;;  %v1494_v5 = vld [vmem:[%s1703_s26 + $0x84] ss:$8 sps:$4 sm:$0xff]  }
  0x45   : > { %v1490_v2 = vld [vmem:[%s1703_s26 + $0x194] ss:$8 sps:$4 sm:$0xff]   ;;  %v1496_v6 = vld [vmem:[%s1703_s26 + $0x184] ss:$8 sps:$4 sm:$0xff]   ;;  %v1499_v8 = vld [vmem:[%s1703_s26 + $0x180] ss:$8 sps:$4 sm:$0xff]  }
  0x46   : > { %896 = vmatpush1.bf16.msra.mxu0 %v1438_v29  ;;  %v1508_v9 = vld [vmem:[%s1703_s26 + $0x274] ss:$8 sps:$4 sm:$0xff]   ;;  %v1500_v10 = vld [vmem:[%s1716_s7] ss:$24 sps:$4 sm:$0xff]   ;;  %v1511_v13 = vld [vmem:[%s1703_s26 + $0x264] ss:$8 sps:$4 sm:$0xff]  }
  0x47   : > { %939 = vmatpush1.bf16.msra.mxu1 %v1439_v30  ;;  %897 = vmatprep.subr.bf16.mxu0 %v1440_v31  ;;  %v1503_v11 = vld [vmem:[%s1716_s7 + $0x8] ss:$24 sps:$4 sm:$0xff]   ;;  %v1556_v14 = vld [vmem:[%s1716_s7 + $0x14] ss:$24 sps:$4 sm:$0xff]   ;;  %p1333_p0 = scmp.ne.s32.totalorder %s1595_s14, 2 }
  0x48   : > { %940 = vmatprep.subr.bf16.mxu1 %v1442_v32  ;;  %v1506_v12 = vld [vmem:[%s1703_s26 + $0x270] ss:$8 sps:$4 sm:$0xff]   ;;  %v1509_v15 = vld [vmem:[%s1703_s26 + $0x260] ss:$8 sps:$4 sm:$0xff]   ;;  %v1514_v16 = vld [vmem:[%s1703_s26 + $0x254] ss:$8 sps:$4 sm:$0xff]  }
  0x49   : > { %v1512_v17 = vld [vmem:[%s1703_s26 + $0x250] ss:$8 sps:$4 sm:$0xff]   ;;  %v1517_v18 = vld [vmem:[%s1703_s26 + $0x244] ss:$8 sps:$4 sm:$0xff]   ;;  %v1515_v19 = vld [vmem:[%s1703_s26 + $0x240] ss:$8 sps:$4 sm:$0xff]  }
  0x4a   : > { %898 = vmatpush1.bf16.msra.mxu0 %v1444_v33  ;;  %v1520_v20 = vld [vmem:[%s1703_s26 + $0x234] ss:$8 sps:$4 sm:$0xff]   ;;  %v1518_v21 = vld [vmem:[%s1703_s26 + $0x230] ss:$8 sps:$4 sm:$0xff]   ;;  %v1523_v22 = vld [vmem:[%s1703_s26 + $0x224] ss:$8 sps:$4 sm:$0xff]  }
  0x4b   : > { %941 = vmatpush1.bf16.msra.mxu1 %v1445_v34  ;;  %899 = vmatprep.subr.bf16.mxu0 %v1446_v35  ;;  %v1521_v23 = vld [vmem:[%s1703_s26 + $0x220] ss:$8 sps:$4 sm:$0xff]   ;;  %v1526_v24 = vld [vmem:[%s1703_s26 + $0x214] ss:$8 sps:$4 sm:$0xff]   ;;  %v1524_v25 = vld [vmem:[%s1703_s26 + $0x210] ss:$8 sps:$4 sm:$0xff]  }
  0x4c   : > { %942 = vmatprep.subr.bf16.mxu1 %v1448_v36  ;;  %v1529_v26 = vld [vmem:[%s1703_s26 + $0x204] ss:$8 sps:$4 sm:$0xff]   ;;  %v1527_v27 = vld [vmem:[%s1703_s26 + $0x200] ss:$8 sps:$4 sm:$0xff]   ;;  %v1532_v28 = vld [vmem:[%s1703_s26 + $0x2f4] ss:$8 sps:$4 sm:$0xff]  }
  0x4d   : > { %v1530_v29 = vld [vmem:[%s1703_s26 + $0x2f0] ss:$8 sps:$4 sm:$0xff]   ;;  %v1535_v30 = vld [vmem:[%s1703_s26 + $0x2e4] ss:$8 sps:$4 sm:$0xff]   ;;  %v1533_v31 = vld [vmem:[%s1703_s26 + $0x2e0] ss:$8 sps:$4 sm:$0xff]  }
  0x4e   : > { %900 = vmatpush1.bf16.msra.mxu0 %v1450_v37  ;;  %v1538_v32 = vld [vmem:[%s1703_s26 + $0x2d4] ss:$8 sps:$4 sm:$0xff]   ;;  %v1536_v33 = vld [vmem:[%s1703_s26 + $0x2d0] ss:$8 sps:$4 sm:$0xff]   ;;  %v1541_v34 = vld [vmem:[%s1703_s26 + $0x2c4] ss:$8 sps:$4 sm:$0xff]  }
  0x4f   : > { %943 = vmatpush1.bf16.msra.mxu1 %v1451_v38  ;;  %901 = vmatprep.subr.bf16.mxu0 %v1452_v39  ;;  %v1539_v35 = vld [vmem:[%s1703_s26 + $0x2c0] ss:$8 sps:$4 sm:$0xff]   ;;  %v1544_v36 = vld [vmem:[%s1703_s26 + $0x2b4] ss:$8 sps:$4 sm:$0xff]   ;;  %v1542_v37 = vld [vmem:[%s1703_s26 + $0x2b0] ss:$8 sps:$4 sm:$0xff]  }
  0x50   : > { %944 = vmatprep.subr.bf16.mxu1 %v1454_v40  ;;  %v1547_v38 = vld [vmem:[%s1703_s26 + $0x2a4] ss:$8 sps:$4 sm:$0xff]   ;;  %v1545_v39 = vld [vmem:[%s1703_s26 + $0x2a0] ss:$8 sps:$4 sm:$0xff]   ;;  %v1550_v40 = vld [vmem:[%s1703_s26 + $0x294] ss:$8 sps:$4 sm:$0xff]  }
  0x51   : > { %v270_v58 = vld [vmem:[#allocation2] sm:$0xff] }
  0x52   : > { %902 = vmatpush2.bf16.msra.mxu0 %v1456_v41  ;;  %v1548_v41 = vld [vmem:[%s1703_s26 + $0x290] ss:$8 sps:$4 sm:$0xff]  }
  0x53   : > { %945 = vmatpush2.bf16.msra.mxu1 %v1457_v42  ;;  %903 = vmatprep.subr.bf16.mxu0 %v1458_v43  ;;  %v1553_v42 = vld [vmem:[%s1703_s26 + $0x284] ss:$8 sps:$4 sm:$0xff]   ;;  %v1551_v43 = vld [vmem:[%s1703_s26 + $0x280] ss:$8 sps:$4 sm:$0xff]  }
  0x54   : > { %946 = vmatprep.subr.bf16.mxu1 %v1460_v44  ;;  %v1554_v44 = vld [vmem:[%s1716_s7 + $0x10] ss:$24 sps:$4 sm:$0xff]  }
  0x56   : > { %904 = vmatpush2.bf16.msra.mxu0 %v1462_v45 }
  0x57   : > { %947 = vmatpush2.bf16.msra.mxu1 %v1463_v46  ;;  %905 = vmatprep.subr.bf16.mxu0 %v1464_v47 }
  0x58   : > { %948 = vmatprep.subr.bf16.mxu1 %v1466_v48 }
  0x5a   : > { %906 = vmatpush2.bf16.msra.mxu0 %v1468_v49 }
  0x5b   : > { %949 = vmatpush2.bf16.msra.mxu1 %v1469_v50  ;;  %907 = vmatprep.subr.bf16.mxu0 %v1470_v51 }
  0x5c   : > { %950 = vmatprep.subr.bf16.mxu1 %v1472_v52 }
  0x5e   : > { %908 = vmatpush2.bf16.msra.mxu0 %v1474_v53  ;;  %v269_v53 = vld [vmem:[#allocation2 + $0x10] sm:$0xff] }
  0x5f   : > { %951 = vmatpush2.bf16.msra.mxu1 %v1475_v54  ;;  %909 = vmatprep.subr.bf16.mxu0 %v1476_v55 }
  0x60   : > { %952 = vmatprep.subr.bf16.mxu1 %v1478_v57 }
  0x62   : > { %910 = vmatpush2.bf16.msra.mxu0 %v1480_v59 }
  0x63   : > { %953 = vmatpush2.bf16.msra.mxu1 %v1481_v60  ;;  %911 = vmatprep.subr.bf16.mxu0 %v1482_v61 }
  0x64   : > { %954 = vmatprep.subr.bf16.mxu1 %v1484_v62 }
  0x66   : > { %912 = vmatpush2.bf16.msra.mxu0 %v1486_v63  ;;  %v271_v63 = vld [vmem:[#allocation2 + $0x18] sm:$0xff] }
  0x67   : > { %955 = vmatpush2.bf16.msra.mxu1 %v1487_v0  ;;  %913 = vmatprep.subr.bf16.mxu0 %v1488_v1 }
  0x68   : > { %956 = vmatprep.subr.bf16.mxu1 %v1490_v2 }
  0x6a   : > { %914 = vmatpush2.bf16.msra.mxu0 %v1492_v3 }
  0x6b   : > { %957 = vmatpush2.bf16.msra.mxu1 %v1493_v4  ;;  %915 = vmatprep.subr.bf16.mxu0 %v1494_v5  ;;  %v272_v4 = vld [vmem:[#allocation2 + $0x8] sm:$0xff] }
  0x6c   : > { %958 = vmatprep.subr.bf16.mxu1 %v1496_v6 }
  0x6e   : > { %916 = vmatpush2.bf16.msra.mxu0 %v1498_v7 }
  0x6f   : > { %959 = vmatpush2.bf16.msra.mxu1 %v1499_v8  ;;  %971 = vmatprep.subr.bf16.mxu0 %v1508_v9 }
  0x71   : > { %918 = vmatmul.mubr.bf16.vlgmr.msra.gmra.mxu0 %v1500_v10 }
  0x72   : > { %961 = vmatmul.mubr.bf16.vlgmr.msra.gmra.mxu1 %v1503_v11  ;;  %972 = vmatpush1.bf16.msra.mxu0 %v1506_v12 }
  0x73   : > { %973 = vmatprep.subr.bf16.mxu0 %v1511_v13  ;;  %1003 = vmatprep.mubr.bf16.mxu0 %v1556_v14 }
  0x76   : > { %974 = vmatpush1.bf16.msra.mxu0 %v1509_v15 }
  0x77   : > { %975 = vmatprep.subr.bf16.mxu0 %v1514_v16 }
  0x7a   : > { %976 = vmatpush1.bf16.msra.mxu0 %v1512_v17 }
  0x7b   : > { %977 = vmatprep.subr.bf16.mxu0 %v1517_v18 }
  0x7e   : > { %978 = vmatpush1.bf16.msra.mxu0 %v1515_v19 }
  0x7f   : > { %979 = vmatprep.subr.bf16.mxu0 %v1520_v20 }
  0x82   : > { %980 = vmatpush1.bf16.msra.mxu0 %v1518_v21 }
  0x83   : > { %981 = vmatprep.subr.bf16.mxu0 %v1523_v22 }
  0x86   : > { %982 = vmatpush1.bf16.msra.mxu0 %v1521_v23 }
  0x87   : > { %983 = vmatprep.subr.bf16.mxu0 %v1526_v24 }
  0x8a   : > { %984 = vmatpush1.bf16.msra.mxu0 %v1524_v25 }
  0x8b   : > { %985 = vmatprep.subr.bf16.mxu0 %v1529_v26 }
  0x8e   : > { %986 = vmatpush1.bf16.msra.mxu0 %v1527_v27 }
  0x8f   : > { %987 = vmatprep.subr.bf16.mxu0 %v1532_v28 }
  0x92   : > { %988 = vmatpush2.bf16.msra.mxu0 %v1530_v29 }
  0x93   : > { %989 = vmatprep.subr.bf16.mxu0 %v1535_v30 }
  0x96   : > { %990 = vmatpush2.bf16.msra.mxu0 %v1533_v31 }
  0x97   : > { %991 = vmatprep.subr.bf16.mxu0 %v1538_v32 }
  0x9a   : > { %992 = vmatpush2.bf16.msra.mxu0 %v1536_v33 }
  0x9b   : > { %993 = vmatprep.subr.bf16.mxu0 %v1541_v34 }
  0x9e   : > { %994 = vmatpush2.bf16.msra.mxu0 %v1539_v35 }
  0x9f   : > { %995 = vmatprep.subr.bf16.mxu0 %v1544_v36 }
  0xa2   : > { %996 = vmatpush2.bf16.msra.mxu0 %v1542_v37 }
  0xa3   : > { %997 = vmatprep.subr.bf16.mxu0 %v1547_v38 }
  0xa6   : > { %998 = vmatpush2.bf16.msra.mxu0 %v1545_v39 }
  0xa7   : > { %999 = vmatprep.subr.bf16.mxu0 %v1550_v40 }
  0xaa   : > { %1000 = vmatpush2.bf16.msra.mxu0 %v1548_v41 }
  0xab   : > { %1001 = vmatprep.subr.bf16.mxu0 %v1553_v42 }
  0xae   : > { %1002 = vmatpush2.bf16.msra.mxu0 %v1551_v43 }
  0xb1   : > { %1004 = vmatmul.mubr.bf16.vlgmr.msra.gmra.mxu0 %v1554_v44 }
 0x131   : > { %v919_v45 = vpop.f32.mrf.mxu0 }
 0x132   : > { %v962_v46 = vpop.f32.mrf.mxu1 }
 0x133   : > { %v921_v47 = vpop.f32.mrf.mxu0  ;;  %v963_v52 = vadd.f32 %v962_v46, %v919_v45 }
 0x134   : > { %v964_v48 = vpop.f32.mrf.mxu1 }
 0x135   : > { %v923_v49 = vpop.f32.mrf.mxu0  ;;  %v965_v55 = vadd.f32 %v964_v48, %v921_v47 }
 0x136   : > { %v966_v50 = vpop.f32.mrf.mxu1 }
 0x137   : > { %v925_v51 = vpop.f32.mrf.mxu0  ;;  %v967_v60 = vadd.f32 %v966_v50, %v923_v49 }
 0x138   : > { %v968_v57 = vpop.f32.mrf.mxu1 }
 0x139   : > { %v969_v1 = vadd.f32 %v968_v57, %v925_v51 }
 0x171   : > { %v1005_v54 = vpop.f32.mrf.mxu0 }
 0x172   : > { %v1006_v56 = vadd.f32 %v1005_v54, %v963_v52 }
 0x173   : > { %v1007_v59 = vpop.f32.mrf.mxu0 }
 0x174   : > { %v1014_v61 = vadd.f32 %v1006_v56, %v269_v53  ;;  %v1008_v62 = vadd.f32 %v1007_v59, %v965_v55 }
 0x175   : > { %v1009_v0 = vpop.f32.mrf.mxu0 }
 0x176   : > { %1018 = vst [vmem:[#allocation2 + $0x10] sm:$0xff] %v1014_v61  ;;  %v1015_v2 = vadd.f32 %v1008_v62, %v270_v58  ;;  %v1010_v3 = vadd.f32 %v1009_v0, %v967_v60 }
 0x177   : > { %v1011_v5 = vpop.f32.mrf.mxu0 }
 0x178   : > { %1019 = vst [vmem:[#allocation2] sm:$0xff] %v1015_v2  ;;  %v1016_v6 = vadd.f32 %v1010_v3, %v271_v63  ;;  %v1012_v7 = vadd.f32 %v1011_v5, %v969_v1  ;;  %1025 = sbr.rel (%p1333_p0) target bundleno = 408 (0x198), region = 59 }
 0x17a   : > { %1020 = vst [vmem:[#allocation2 + $0x18] sm:$0xff] %v1016_v6  ;;  %v1017_v8 = vadd.f32 %v1012_v7, %v272_v4 }
 0x17c   : > { %1021 = vst [vmem:[#allocation2 + $0x8] sm:$0xff] %v1017_v8 }
 0x17d   : > { %v1026_v9 = vld [vmem:[#allocation2 + $0x10] sm:$0xff]  ;;  %vm1076_vm0 = vcmask 1040384  }
 0x17e   : > { %v1058_v13 = vmul.f32 %v1026_v9, %v1026_v9 }
 0x17f   : > { %v1027_v10 = vld [vmem:[#allocation2] sm:$0xff] }
 0x180   : > { %v1342_v12 = vpack.c.bf16 %v1027_v10, %v1026_v9  ;;  %v1059_v14 = vmul.f32 %v1027_v10, %v1027_v10 }
 0x181   : > { %v1028_v11 = vld [vmem:[#allocation2 + $0x18] sm:$0xff] }
 0x182   : > { %v1044_v16 = vadd.f32 %v1028_v11, %v1026_v9  ;;  %v1060_v19 = vmul.f32 %v1028_v11, %v1028_v11  ;;  %1042 = vst [vmem:[%s1708_s30] sm:$0xff] %v1342_v12 }
 0x183   : > { %v1029_v15 = vld [vmem:[#allocation2 + $0x8] sm:$0xff] }
 0x184   : > { %v1343_v17 = vpack.c.bf16 %v1029_v15, %v1028_v11  ;;  %v1051_v18 = vadd.f32 %v1029_v15, %v1027_v10  ;;  %v1061_v20 = vmul.f32 %v1029_v15, %v1029_v15  ;;  %v1045_v21 = vrot.slane %v1044_v16, 4 }
 0x185   : > { %v1062_v23 = vadd.f32 %v1060_v19, %v1058_v13 }
 0x186   : > { %1043 = vst [vmem:[%s1708_s30 + $0x8] sm:$0xff] %v1343_v17  ;;  %v1052_v22 = vrot.slane %v1051_v18, 4  ;;  %v1069_v24 = vadd.f32 %v1061_v20, %v1059_v14  ;;  %v1046_v25 = vadd.f32 %v1045_v21, %v1044_v16 }
 0x187   : > { %v1063_v27 = vrot.slane %v1062_v23, 4 }
 0x188   : > { %v1053_v26 = vadd.f32 %v1052_v22, %v1051_v18  ;;  %v1070_v28 = vrot.slane %v1069_v24, 4  ;;  %v1047_v29 = vrot.slane %v1046_v25, 2 }
 0x189   : > { %v1064_v31 = vadd.f32 %v1063_v27, %v1062_v23 }
 0x18a   : > { %v1054_v30 = vrot.slane %v1053_v26, 2  ;;  %v1071_v32 = vadd.f32 %v1070_v28, %v1069_v24  ;;  %v1048_v33 = vadd.f32 %v1047_v29, %v1046_v25 }
 0x18b   : > { %v1065_v35 = vrot.slane %v1064_v31, 2 }
 0x18c   : > { %v1055_v34 = vadd.f32 %v1054_v30, %v1053_v26  ;;  %v1072_v36 = vrot.slane %v1071_v32, 2  ;;  %v1049_v37 = vrot.slane %v1048_v33, 1 }
 0x18d   : > { %v1066_v39 = vadd.f32 %v1065_v35, %v1064_v31 }
 0x18e   : > { %v1056_v38 = vrot.slane %v1055_v34, 1  ;;  %v1073_v40 = vadd.f32 %v1072_v36, %v1071_v32  ;;  %v1050_v41 = vadd.f32 %v1049_v37, %v1048_v33 }
 0x18f   : > { %v1067_v43 = vrot.slane %v1066_v39, 1 }
 0x190   : > { %v1057_v42 = vadd.f32 %v1056_v38, %v1055_v34  ;;  %v1074_v44 = vrot.slane %v1073_v40, 1 }
 0x191   : > { %v1068_v45 = vadd.f32 %v1067_v43, %v1066_v39 }
 0x192   : > { %v1075_v46 = vadd.f32 %v1074_v44, %v1073_v40 }
 0x193   : > { %v1077_v47 = vsel %vm1076_vm0, %v1050_v41, %v1068_v45 }
 0x194   : > { %v1078_v48 = vsel %vm1076_vm0, %v1057_v42, %v1075_v46 }
 0x195   : > { %v1081_v49 = vcombine.low %v1077_v47, %v1078_v48 }
 0x197   : > { %1336 = vst.sshfl [vmem:[%s1714_s6] sm:$0x33 pattern:$0x76325410] %v1081_v49 }
 0x198 PF: > { %s14_s18 = sadd.s32 1, %s1611_s18   ;;  %s1850_s12 = smov %s1591_s13 }
 0x199   : > { %p11_p1 = scmp.ge.s32.totalorder %s14_s18, 8   ;;  %s1851_s13 = smov %s1685_s25 }
 0x19a   : > { %s1852_s14 = smov %s1603_s16  ;;  %s1853_s15 = smov %s1607_s17 }
 0x19b   : > { %s1854_s16 = smov %s1857_s19  ;;  %s1855_s17 = smov %s1861_s20 }
 0x19c   :  { %13 = sbr.rel (!%p11_p1) target bundleno = 4 (0x4), region = 109 }

// kernel: generator_forward.66
= control target key start
LH: loop header
LB: loop body
LE: loop exit
PB: predicated region body
PF: predicated region fallthrough
CT: control target
= control target key end

     0   :  { %s568_s12 = smov 0   ;;  %s570_s13 = smov 0   ;;  %s615_s0 = inlined_call_operand.vmem [shape: bf16[2,16,512], index: 0, kind: input, shape index: {}]   ;;  %s616_s1 = inlined_call_operand.vmem [shape: f32[2,1,512], index: 1, kind: input, shape index: {}]   ;;  %s617_s2 = inlined_call_operand.vmem [shape: f32[2,1,512], index: 2, kind: input, shape index: {}]   ;;  %s618_s3 = inlined_call_operand.vmem [shape: bf16[2,16,512], index: 3, kind: output, shape index: {}]  }
   0x1   :  { %s572_s14 = smov 0  }
   0x2 LB: > { %s25_s15 = sadd.s32 1, %s542_s13  ;;  %p481_p0 = scmp.ge.s32.totalorder %s546_s14, 1  ;;  %s546_s14 = sphi %s572_s14, %s13_s14   ;;  %s542_s13 = sphi %s570_s13, %s620_s13   ;;  %s538_s12 = sphi %s568_s12, %s619_s12  }
   0x3   : > { %p27_p1 = scmp.ge.s32.totalorder %s25_s15, 2  ;;  %p177_p2 = scmp.lt.s32.totalorder %s546_s14, 3 }
   0x5   : > { %s622_s15 = smov (%p27_p1, %s25_s15), 0  ;;  %p178_p3 = pnand %p481_p0, %p177_p2 }
   0x6   : > { %p220_p4 = scmp.lt.s32.totalorder (!%p178_p3), %s538_s12, 1 }
   0x7   : > { %181 = sbr.rel (%p178_p3) target bundleno = 32 (0x20), region = 32 }
   0xc   : > { %v263_v0 = vlaneseq  ;;  %s624_s12 = smov (!%p220_p4, %s538_s12), 1 }
   0xd   : > { %s494_s16 = sshll.u32 %s624_s12, 5  ;;  %s484_s17 = sshll.u32 %s624_s12, 2 }
   0xe   : > { %v264_v1 = vshrl.u32 %v263_v0, 7  ;;  %s228_s20 = scalar_lea.vmem %s615_s0, %s494_s16  ;;  %s233_s23 = scalar_lea.vmem %s616_s1, %s484_s17 }
   0xf   : > { %s237_s26 = scalar_lea.vmem %s617_s2, %s484_s17  ;;  %v249_v6 = vld [vmem:[%s228_s20] sm:$0xff]  ;;  %v250_v8 = vld [vmem:[%s228_s20 + $0x8] sm:$0xff]  ;;  %v251_v14 = vld [vmem:[%s228_s20 + $0x10] sm:$0xff]  ;;  %s247_s29 = scalar_lea.vmem %s618_s3, %s494_s16 }
  0x10   : > { %v265_v2 = vsub.s32 0, %v264_v1  ;;  %v269_v3 = vsub.s32 1, %v264_v1  ;;  %v273_v4 = vsub.s32 2, %v264_v1  ;;  %v277_v5 = vsub.s32 3, %v264_v1  ;;  %v261_v7 = vld [vmem:[%s233_s23] sm:$0xf] }
  0x11   : > { %v253_v9 = vunpack.c.l.bf16 %v249_v6  ;;  %v254_v10 = vunpack.c.h.bf16 %v249_v6  ;;  %v291_v13 = vld [vmem:[%s237_s26] sm:$0xf]  ;;  %v255_v17 = vunpack.c.l.bf16 %v250_v8  ;;  %v256_v18 = vunpack.c.h.bf16 %v250_v8  ;;  %v252_v23 = vld [vmem:[%s228_s20 + $0x18] sm:$0xff] }
  0x12   : > { %v266_v11 = vrot.slane %v261_v7, %v265_v2  ;;  %v270_v12 = vrot.slane %v261_v7, %v269_v3  ;;  %v296_v15 = vrot.slane %v291_v13, %v265_v2  ;;  %v300_v16 = vrot.slane %v291_v13, %v269_v3 }
  0x13   : > { %v274_v21 = vrot.slane %v261_v7, %v273_v4  ;;  %v278_v22 = vrot.slane %v261_v7, %v277_v5  ;;  %v304_v24 = vrot.slane %v291_v13, %v273_v4  ;;  %v308_v25 = vrot.slane %v291_v13, %v277_v5 }
  0x14   : > { %v283_v19 = vmul.f32 %v266_v11, %v253_v9  ;;  %v284_v20 = vmul.f32 %v270_v12, %v254_v10  ;;  %v257_v26 = vunpack.c.l.bf16 %v251_v14  ;;  %v258_v27 = vunpack.c.h.bf16 %v251_v14 }
  0x15   : > { %v285_v30 = vmul.f32 %v274_v21, %v255_v17  ;;  %v286_v31 = vmul.f32 %v278_v22, %v256_v18  ;;  %v259_v34 = vunpack.c.l.bf16 %v252_v23  ;;  %v260_v35 = vunpack.c.h.bf16 %v252_v23 }
  0x16   : > { %v313_v28 = vadd.f32 %v296_v15, %v283_v19  ;;  %v314_v29 = vadd.f32 %v300_v16, %v284_v20  ;;  %v287_v32 = vmul.f32 %v266_v11, %v257_v26  ;;  %v288_v33 = vmul.f32 %v270_v12, %v258_v27 }
  0x17   : > { %v315_v38 = vadd.f32 %v304_v24, %v285_v30  ;;  %v316_v39 = vadd.f32 %v308_v25, %v286_v31  ;;  %v289_v42 = vmul.f32 %v274_v21, %v259_v34  ;;  %v290_v43 = vmul.f32 %v278_v22, %v260_v35 }
  0x18   : > { %v321_v36 = vmax.f32 %v313_v28, 0.0  ;;  %v322_v37 = vmax.f32 %v314_v29, 0.0  ;;  %v317_v40 = vadd.f32 %v296_v15, %v287_v32  ;;  %v318_v41 = vadd.f32 %v300_v16, %v288_v33 }
  0x19   : > { %v323_v45 = vmax.f32 %v315_v38, 0.0  ;;  %v324_v46 = vmax.f32 %v316_v39, 0.0  ;;  %v319_v49 = vadd.f32 %v304_v24, %v289_v42  ;;  %v320_v50 = vadd.f32 %v308_v25, %v290_v43 }
  0x1a   : > { %v496_v44 = vpack.c.bf16 %v322_v37, %v321_v36  ;;  %v325_v47 = vmax.f32 %v317_v40, 0.0  ;;  %v326_v48 = vmax.f32 %v318_v41, 0.0 }
  0x1b   : > { %v497_v51 = vpack.c.bf16 %v324_v46, %v323_v45  ;;  %v327_v53 = vmax.f32 %v319_v49, 0.0  ;;  %v328_v54 = vmax.f32 %v320_v50, 0.0 }
  0x1c   : > { %353 = vst [vmem:[%s247_s29] sm:$0xff] %v496_v44  ;;  %v498_v52 = vpack.c.bf16 %v326_v48, %v325_v47 }
  0x1d   : > { %354 = vst [vmem:[%s247_s29 + $0x8] sm:$0xff] %v497_v51  ;;  %v499_v55 = vpack.c.bf16 %v328_v54, %v327_v53 }
  0x1e   : > { %355 = vst [vmem:[%s247_s29 + $0x10] sm:$0xff] %v498_v52 }
  0x1f   : > { %356 = vst [vmem:[%s247_s29 + $0x18] sm:$0xff] %v499_v55 }
  0x20 PF: > { %s13_s14 = sadd.s32 1, %s546_s14   ;;  %s619_s12 = smov %s542_s13 }
  0x21   : > { %p10_p5 = scmp.ge.s32.totalorder %s13_s14, 4   ;;  %s620_s13 = smov %s622_s15 }
  0x23   :  { %12 = sbr.rel (!%p10_p5) target bundleno = 2 (0x2), region = 68 }

// kernel: generator_forward.65
= control target key start
LH: loop header
LB: loop body
LE: loop exit
PB: predicated region body
PF: predicated region fallthrough
CT: control target
= control target key end

     0   :  { %s3206_s12 = smov 0   ;;  %s3208_s13 = smov 0   ;;  %s4096_s0 = inlined_call_operand.vmem [shape: bf16[32,1024], index: 0, kind: input, shape index: {}]   ;;  %s4097_s1 = inlined_call_operand.vmem [shape: bf16[1024,512], index: 1, kind: input, shape index: {}]   ;;  %s4098_s2 = inlined_call_operand.vmem [shape: bf16[32,512], index: 2, kind: output, shape index: {0}]   ;;  %s4099_s3 = inlined_call_operand.vmem [shape: f32[2,2,512], index: 3, kind: output, shape index: {1}]  }
   0x1   :  { %s3210_s14 = smov 0  }
   0x2 LB: > { %s26_s15 = sadd.s32 1, %s3179_s13  ;;  %p2466_p0 = scmp.ge.s32.totalorder %s3183_s14, 1  ;;  %s3183_s14 = sphi %s3210_s14, %s14_s14   ;;  %s3179_s13 = sphi %s3208_s13, %s4101_s13   ;;  %s3175_s12 = sphi %s3206_s12, %s4100_s12  }
   0x3   : > { %p28_p1 = scmp.ge.s32.totalorder %s26_s15, 2  ;;  %p173_p2 = scmp.lt.s32.totalorder %s3183_s14, 3 }
   0x5   : > { %s4103_s15 = smov (%p28_p1, %s26_s15), 0  ;;  %p174_p3 = pnand %p2466_p0, %p173_p2 }
   0x6   : > { %s2467_s30 = sshll.u32 (!%p174_p3), %s3175_s12, 1  ;;  %p240_p5 = scmp.lt.s32.totalorder (!%p174_p3), %s3175_s12, 1 }
   0x7   : > { %177 = sbr.rel (%p174_p3) target bundleno = 497 (0x1f1), region = 28  ;;  %p216_p4 = scmp.lt.s32.totalorder (!%p174_p3), %s2467_s30, 3 }
   0xc   : > { %v2777_v0 = vld [vmem:[%s4097_s1 + $0xe4] ss:$16 sps:$4 sm:$0xff]   ;;  %v2781_v2 = vld [vmem:[%s4097_s1 + $0xe0] ss:$16 sps:$4 sm:$0xff]   ;;  %s4105_s30 = smov (!%p216_p4, %s2467_s30), 3  ;;  %vm2312_vm0 = vcmask 1040384  }
   0xd   : > { %v2779_v1 = vld [vmem:[%s4097_s1 + $0x2e4] ss:$16 sps:$4 sm:$0xff]   ;;  %1849 = vmatprep.subr.bf16.mxu0 %v2777_v0  ;;  %v2782_v3 = vld [vmem:[%s4097_s1 + $0x2e0] ss:$16 sps:$4 sm:$0xff]   ;;  %s2745_s4 = sshll.u32 %s4105_s30, 5  ;;  %s2746_s28 = sshll.u32 %s4105_s30, 4 }
   0xe   : > { %1892 = vmatprep.subr.bf16.mxu1 %v2779_v1  ;;  %v2783_v4 = vld [vmem:[%s4097_s1 + $0xc4] ss:$16 sps:$4 sm:$0xff]   ;;  %1850 = vmatpush1.bf16.msra.mxu0 %v2781_v2  ;;  %v2787_v6 = vld [vmem:[%s4097_s1 + $0xc0] ss:$16 sps:$4 sm:$0xff]   ;;  %s3365_s17 = scalar_lea.vmem %s4096_s0, %s2745_s4  ;;  %s4063_s5 = scalar_lea.vmem %s4098_s2, %s2746_s28 }
   0xf   : > { %1893 = vmatpush1.bf16.msra.mxu1 %v2782_v3  ;;  %v2785_v5 = vld [vmem:[%s4097_s1 + $0x2c4] ss:$16 sps:$4 sm:$0xff]   ;;  %1851 = vmatprep.subr.bf16.mxu0 %v2783_v4  ;;  %v2788_v7 = vld [vmem:[%s4097_s1 + $0x2c0] ss:$16 sps:$4 sm:$0xff]   ;;  %v266_v50 = vld [vmem:[%s3365_s17 + $0x8] sm:$0xff]  ;;  %s4107_s12 = smov (!%p240_p5, %s3175_s12), 1 }
  0x10   : > { %1894 = vmatprep.subr.bf16.mxu1 %v2785_v5  ;;  %v2789_v8 = vld [vmem:[%s4097_s1 + $0xa4] ss:$16 sps:$4 sm:$0xff]   ;;  %v2793_v10 = vld [vmem:[%s4097_s1 + $0xa0] ss:$16 sps:$4 sm:$0xff]   ;;  %v270_v51 = vld [vmem:[%s3365_s17 + $0x28] sm:$0xff]  ;;  %s2747_s30 = sshll.u32 %s4107_s12, 3 }
  0x11   : > { %v2791_v9 = vld [vmem:[%s4097_s1 + $0x2a4] ss:$16 sps:$4 sm:$0xff]   ;;  %v2794_v11 = vld [vmem:[%s4097_s1 + $0x2a0] ss:$16 sps:$4 sm:$0xff]   ;;  %v3391_v55 = vcombine.high %v266_v50, %v270_v51 }
  0x12   : > { %1852 = vmatpush1.bf16.msra.mxu0 %v2787_v6  ;;  %v2795_v12 = vld [vmem:[%s4097_s1 + $0x84] ss:$16 sps:$4 sm:$0xff]   ;;  %v2799_v14 = vld [vmem:[%s4097_s1 + $0x80] ss:$16 sps:$4 sm:$0xff]  }
  0x13   : > { %1895 = vmatpush1.bf16.msra.mxu1 %v2788_v7  ;;  %1853 = vmatprep.subr.bf16.mxu0 %v2789_v8  ;;  %v2797_v13 = vld [vmem:[%s4097_s1 + $0x284] ss:$16 sps:$4 sm:$0xff]   ;;  %v2800_v15 = vld [vmem:[%s4097_s1 + $0x280] ss:$16 sps:$4 sm:$0xff]  }
  0x14   : > { %1896 = vmatprep.subr.bf16.mxu1 %v2791_v9  ;;  %v2801_v16 = vld [vmem:[%s4097_s1 + $0x64] ss:$16 sps:$4 sm:$0xff]   ;;  %v2805_v18 = vld [vmem:[%s4097_s1 + $0x60] ss:$16 sps:$4 sm:$0xff]   ;;  %1924 = vmatprep.mubr.bf16.mxu1 %v3391_v55  ;;  %v3445_v9 = vcombine.low %v266_v50, %v270_v51 }
  0x15   : > { %v2803_v17 = vld [vmem:[%s4097_s1 + $0x264] ss:$16 sps:$4 sm:$0xff]   ;;  %v2806_v19 = vld [vmem:[%s4097_s1 + $0x260] ss:$16 sps:$4 sm:$0xff]  }
  0x16   : > { %1854 = vmatpush1.bf16.msra.mxu0 %v2793_v10  ;;  %v2807_v20 = vld [vmem:[%s4097_s1 + $0x44] ss:$16 sps:$4 sm:$0xff]   ;;  %v2811_v22 = vld [vmem:[%s4097_s1 + $0x40] ss:$16 sps:$4 sm:$0xff]  }
  0x17   : > { %1897 = vmatpush1.bf16.msra.mxu1 %v2794_v11  ;;  %1855 = vmatprep.subr.bf16.mxu0 %v2795_v12  ;;  %v2809_v21 = vld [vmem:[%s4097_s1 + $0x244] ss:$16 sps:$4 sm:$0xff]   ;;  %v2812_v23 = vld [vmem:[%s4097_s1 + $0x240] ss:$16 sps:$4 sm:$0xff]  }
  0x18   : > { %1898 = vmatprep.subr.bf16.mxu1 %v2797_v13  ;;  %v2813_v24 = vld [vmem:[%s4097_s1 + $0x24] ss:$16 sps:$4 sm:$0xff]   ;;  %v2817_v26 = vld [vmem:[%s4097_s1 + $0x20] ss:$16 sps:$4 sm:$0xff]  }
  0x19   : > { %v2815_v25 = vld [vmem:[%s4097_s1 + $0x224] ss:$16 sps:$4 sm:$0xff]   ;;  %v2818_v27 = vld [vmem:[%s4097_s1 + $0x220] ss:$16 sps:$4 sm:$0xff]  }
  0x1a   : > { %1856 = vmatpush1.bf16.msra.mxu0 %v2799_v14  ;;  %v2819_v28 = vld [vmem:[%s4097_s1 + $0x4] ss:$16 sps:$4 sm:$0xff]   ;;  %v2823_v30 = vld [vmem:[%s4097_s1] ss:$16 sps:$4 sm:$0xff]  }
  0x1b   : > { %1899 = vmatpush1.bf16.msra.mxu1 %v2800_v15  ;;  %1857 = vmatprep.subr.bf16.mxu0 %v2801_v16  ;;  %v2821_v29 = vld [vmem:[%s4097_s1 + $0x204] ss:$16 sps:$4 sm:$0xff]   ;;  %v2824_v31 = vld [vmem:[%s4097_s1 + $0x200] ss:$16 sps:$4 sm:$0xff]  }
  0x1c   : > { %1900 = vmatprep.subr.bf16.mxu1 %v2803_v17  ;;  %v2825_v32 = vld [vmem:[%s4097_s1 + $0x1e4] ss:$16 sps:$4 sm:$0xff]   ;;  %v2829_v34 = vld [vmem:[%s4097_s1 + $0x1e0] ss:$16 sps:$4 sm:$0xff]  }
  0x1d   : > { %v2827_v33 = vld [vmem:[%s4097_s1 + $0x3e4] ss:$16 sps:$4 sm:$0xff]   ;;  %v2830_v35 = vld [vmem:[%s4097_s1 + $0x3e0] ss:$16 sps:$4 sm:$0xff]  }
  0x1e   : > { %1858 = vmatpush1.bf16.msra.mxu0 %v2805_v18  ;;  %v2831_v36 = vld [vmem:[%s4097_s1 + $0x1c4] ss:$16 sps:$4 sm:$0xff]   ;;  %v2835_v38 = vld [vmem:[%s4097_s1 + $0x1c0] ss:$16 sps:$4 sm:$0xff]  }
  0x1f   : > { %1901 = vmatpush1.bf16.msra.mxu1 %v2806_v19  ;;  %1859 = vmatprep.subr.bf16.mxu0 %v2807_v20  ;;  %v2833_v37 = vld [vmem:[%s4097_s1 + $0x3c4] ss:$16 sps:$4 sm:$0xff]   ;;  %v2836_v39 = vld [vmem:[%s4097_s1 + $0x3c0] ss:$16 sps:$4 sm:$0xff]  }
  0x20   : > { %1902 = vmatprep.subr.bf16.mxu1 %v2809_v21  ;;  %v2837_v40 = vld [vmem:[%s4097_s1 + $0x1a4] ss:$16 sps:$4 sm:$0xff]   ;;  %v2841_v42 = vld [vmem:[%s4097_s1 + $0x1a0] ss:$16 sps:$4 sm:$0xff]  }
  0x21   : > { %v2839_v41 = vld [vmem:[%s4097_s1 + $0x3a4] ss:$16 sps:$4 sm:$0xff]   ;;  %v2842_v43 = vld [vmem:[%s4097_s1 + $0x3a0] ss:$16 sps:$4 sm:$0xff]  }
  0x22   : > { %1860 = vmatpush1.bf16.msra.mxu0 %v2811_v22  ;;  %v2843_v44 = vld [vmem:[%s4097_s1 + $0x184] ss:$16 sps:$4 sm:$0xff]   ;;  %v2847_v46 = vld [vmem:[%s4097_s1 + $0x180] ss:$16 sps:$4 sm:$0xff]  }
  0x23   : > { %1903 = vmatpush1.bf16.msra.mxu1 %v2812_v23  ;;  %1861 = vmatprep.subr.bf16.mxu0 %v2813_v24  ;;  %v2845_v45 = vld [vmem:[%s4097_s1 + $0x384] ss:$16 sps:$4 sm:$0xff]   ;;  %v2848_v47 = vld [vmem:[%s4097_s1 + $0x380] ss:$16 sps:$4 sm:$0xff]  }
  0x24   : > { %1904 = vmatprep.subr.bf16.mxu1 %v2815_v25  ;;  %v265_v48 = vld [vmem:[%s3365_s17] sm:$0xff] }
  0x25   : > { %v269_v49 = vld [vmem:[%s3365_s17 + $0x20] sm:$0xff] }
  0x26   : > { %1862 = vmatpush1.bf16.msra.mxu0 %v2817_v26  ;;  %v2849_v52 = vld [vmem:[%s4097_s1 + $0x164] ss:$16 sps:$4 sm:$0xff]   ;;  %v3386_v53 = vcombine.high %v265_v48, %v269_v49  ;;  %v2853_v56 = vld [vmem:[%s4097_s1 + $0x160] ss:$16 sps:$4 sm:$0xff]   ;;  %v3443_v8 = vcombine.low %v265_v48, %v269_v49 }
  0x27   : > { %1905 = vmatpush1.bf16.msra.mxu1 %v2818_v27  ;;  %1863 = vmatprep.subr.bf16.mxu0 %v2819_v28  ;;  %v2851_v54 = vld [vmem:[%s4097_s1 + $0x364] ss:$16 sps:$4 sm:$0xff]   ;;  %v2854_v57 = vld [vmem:[%s4097_s1 + $0x360] ss:$16 sps:$4 sm:$0xff]  }
  0x28   : > { %1906 = vmatprep.subr.bf16.mxu1 %v2821_v29  ;;  %1881 = vmatprep.mubr.bf16.mxu0 %v3386_v53  ;;  %v2855_v58 = vld [vmem:[%s4097_s1 + $0x144] ss:$16 sps:$4 sm:$0xff]   ;;  %v2859_v60 = vld [vmem:[%s4097_s1 + $0x140] ss:$16 sps:$4 sm:$0xff]  }
  0x29   : > { %v2857_v59 = vld [vmem:[%s4097_s1 + $0x344] ss:$16 sps:$4 sm:$0xff]   ;;  %v2860_v61 = vld [vmem:[%s4097_s1 + $0x340] ss:$16 sps:$4 sm:$0xff]  }
  0x2a   : > { %1864 = vmatpush1.bf16.msra.mxu0 %v2823_v30  ;;  %v2861_v62 = vld [vmem:[%s4097_s1 + $0x124] ss:$16 sps:$4 sm:$0xff]   ;;  %v2865_v0 = vld [vmem:[%s4097_s1 + $0x120] ss:$16 sps:$4 sm:$0xff]  }
  0x2b   : > { %1907 = vmatpush1.bf16.msra.mxu1 %v2824_v31  ;;  %1865 = vmatprep.subr.bf16.mxu0 %v2825_v32  ;;  %v2863_v63 = vld [vmem:[%s4097_s1 + $0x324] ss:$16 sps:$4 sm:$0xff]   ;;  %v2866_v1 = vld [vmem:[%s4097_s1 + $0x320] ss:$16 sps:$4 sm:$0xff]  }
  0x2c   : > { %1908 = vmatprep.subr.bf16.mxu1 %v2827_v33  ;;  %v2867_v2 = vld [vmem:[%s4097_s1 + $0x104] ss:$16 sps:$4 sm:$0xff]   ;;  %v2871_v4 = vld [vmem:[%s4097_s1 + $0x100] ss:$16 sps:$4 sm:$0xff]  }
  0x2d   : > { %v2869_v3 = vld [vmem:[%s4097_s1 + $0x304] ss:$16 sps:$4 sm:$0xff]   ;;  %v2872_v5 = vld [vmem:[%s4097_s1 + $0x300] ss:$16 sps:$4 sm:$0xff]  }
  0x2e   : > { %1866 = vmatpush2.bf16.msra.mxu0 %v2829_v34  ;;  %v2875_v6 = vld [vmem:[%s4097_s1 + $0x4e4] ss:$16 sps:$4 sm:$0xff]   ;;  %v2873_v10 = vld [vmem:[%s4097_s1 + $0x4e0] ss:$16 sps:$4 sm:$0xff]  }
  0x2f   : > { %1909 = vmatpush2.bf16.msra.mxu1 %v2830_v35  ;;  %1867 = vmatprep.subr.bf16.mxu0 %v2831_v36  ;;  %v2878_v7 = vld [vmem:[%s4097_s1 + $0x6e4] ss:$16 sps:$4 sm:$0xff]   ;;  %v2876_v11 = vld [vmem:[%s4097_s1 + $0x6e0] ss:$16 sps:$4 sm:$0xff]  }
  0x30   : > { %1910 = vmatprep.subr.bf16.mxu1 %v2833_v37  ;;  %v2881_v12 = vld [vmem:[%s4097_s1 + $0x4c4] ss:$16 sps:$4 sm:$0xff]   ;;  %v2879_v14 = vld [vmem:[%s4097_s1 + $0x4c0] ss:$16 sps:$4 sm:$0xff]  }
  0x31   : > { %v2884_v13 = vld [vmem:[%s4097_s1 + $0x6c4] ss:$16 sps:$4 sm:$0xff]   ;;  %v2882_v15 = vld [vmem:[%s4097_s1 + $0x6c0] ss:$16 sps:$4 sm:$0xff]  }
  0x32   : > { %1868 = vmatpush2.bf16.msra.mxu0 %v2835_v38  ;;  %v2887_v16 = vld [vmem:[%s4097_s1 + $0x4a4] ss:$16 sps:$4 sm:$0xff]   ;;  %v2885_v18 = vld [vmem:[%s4097_s1 + $0x4a0] ss:$16 sps:$4 sm:$0xff]   ;;  %v3534_v38 = vld [vmem:[%s3365_s17 + $0x18] sm:$0xff] }
  0x33   : > { %1911 = vmatpush2.bf16.msra.mxu1 %v2836_v39  ;;  %1869 = vmatprep.subr.bf16.mxu0 %v2837_v40  ;;  %v2890_v17 = vld [vmem:[%s4097_s1 + $0x6a4] ss:$16 sps:$4 sm:$0xff]   ;;  %v2888_v19 = vld [vmem:[%s4097_s1 + $0x6a0] ss:$16 sps:$4 sm:$0xff]   ;;  %v3537_v39 = vld [vmem:[%s3365_s17 + $0x38] sm:$0xff] }
  0x34   : > { %1912 = vmatprep.subr.bf16.mxu1 %v2839_v41  ;;  %v2893_v20 = vld [vmem:[%s4097_s1 + $0x484] ss:$16 sps:$4 sm:$0xff]   ;;  %v2891_v22 = vld [vmem:[%s4097_s1 + $0x480] ss:$16 sps:$4 sm:$0xff]  }
  0x35   : > { %v2896_v21 = vld [vmem:[%s4097_s1 + $0x684] ss:$16 sps:$4 sm:$0xff]   ;;  %v2894_v23 = vld [vmem:[%s4097_s1 + $0x680] ss:$16 sps:$4 sm:$0xff]  }
  0x36   : > { %1870 = vmatpush2.bf16.msra.mxu0 %v2841_v42  ;;  %v2899_v24 = vld [vmem:[%s4097_s1 + $0x464] ss:$16 sps:$4 sm:$0xff]   ;;  %v2897_v26 = vld [vmem:[%s4097_s1 + $0x460] ss:$16 sps:$4 sm:$0xff]  }
  0x37   : > { %1913 = vmatpush2.bf16.msra.mxu1 %v2842_v43  ;;  %1871 = vmatprep.subr.bf16.mxu0 %v2843_v44  ;;  %v2902_v25 = vld [vmem:[%s4097_s1 + $0x664] ss:$16 sps:$4 sm:$0xff]   ;;  %v2900_v27 = vld [vmem:[%s4097_s1 + $0x660] ss:$16 sps:$4 sm:$0xff]   ;;  %v3551_v43 = vcombine.high %v3534_v38, %v3537_v39 }
  0x38   : > { %1914 = vmatprep.subr.bf16.mxu1 %v2845_v45  ;;  %v2905_v28 = vld [vmem:[%s4097_s1 + $0x444] ss:$16 sps:$4 sm:$0xff]   ;;  %v2903_v30 = vld [vmem:[%s4097_s1 + $0x440] ss:$16 sps:$4 sm:$0xff]  }
  0x39   : > { %v2908_v29 = vld [vmem:[%s4097_s1 + $0x644] ss:$16 sps:$4 sm:$0xff]   ;;  %v2906_v31 = vld [vmem:[%s4097_s1 + $0x640] ss:$16 sps:$4 sm:$0xff]  }
  0x3a   : > { %1872 = vmatpush2.bf16.msra.mxu0 %v2847_v46  ;;  %v2911_v32 = vld [vmem:[%s4097_s1 + $0x424] ss:$16 sps:$4 sm:$0xff]   ;;  %v2909_v34 = vld [vmem:[%s4097_s1 + $0x420] ss:$16 sps:$4 sm:$0xff]  }
  0x3b   : > { %1915 = vmatpush2.bf16.msra.mxu1 %v2848_v47  ;;  %1873 = vmatprep.subr.bf16.mxu0 %v2849_v52  ;;  %v2914_v33 = vld [vmem:[%s4097_s1 + $0x624] ss:$16 sps:$4 sm:$0xff]   ;;  %v2912_v35 = vld [vmem:[%s4097_s1 + $0x620] ss:$16 sps:$4 sm:$0xff]  }
  0x3c   : > { %1916 = vmatprep.subr.bf16.mxu1 %v2851_v54  ;;  %v3528_v36 = vld [vmem:[%s3365_s17 + $0x10] sm:$0xff] }
  0x3d   : > { %v3531_v37 = vld [vmem:[%s3365_s17 + $0x30] sm:$0xff]  ;;  %s244_s17 = scalar_lea.vmem %s4099_s3, %s2747_s30 }
  0x3e   : > { %1874 = vmatpush2.bf16.msra.mxu0 %v2853_v56  ;;  %v2917_v40 = vld [vmem:[%s4097_s1 + $0x404] ss:$16 sps:$4 sm:$0xff]   ;;  %v3544_v41 = vcombine.high %v3528_v36, %v3531_v37  ;;  %v2915_v44 = vld [vmem:[%s4097_s1 + $0x400] ss:$16 sps:$4 sm:$0xff]  }
  0x3f   : > { %1917 = vmatpush2.bf16.msra.mxu1 %v2854_v57  ;;  %1875 = vmatprep.subr.bf16.mxu0 %v2855_v58  ;;  %v2920_v42 = vld [vmem:[%s4097_s1 + $0x604] ss:$16 sps:$4 sm:$0xff]   ;;  %v2918_v45 = vld [vmem:[%s4097_s1 + $0x600] ss:$16 sps:$4 sm:$0xff]  }
  0x40   : > { %1918 = vmatprep.subr.bf16.mxu1 %v2857_v59  ;;  %v2923_v46 = vld [vmem:[%s4097_s1 + $0x5e4] ss:$16 sps:$4 sm:$0xff]   ;;  %v2921_v48 = vld [vmem:[%s4097_s1 + $0x5e0] ss:$16 sps:$4 sm:$0xff]  }
  0x41   : > { %v2926_v47 = vld [vmem:[%s4097_s1 + $0x7e4] ss:$16 sps:$4 sm:$0xff]   ;;  %v2924_v49 = vld [vmem:[%s4097_s1 + $0x7e0] ss:$16 sps:$4 sm:$0xff]  }
  0x42   : > { %1876 = vmatpush2.bf16.msra.mxu0 %v2859_v60  ;;  %v2929_v50 = vld [vmem:[%s4097_s1 + $0x5c4] ss:$16 sps:$4 sm:$0xff]   ;;  %v2927_v52 = vld [vmem:[%s4097_s1 + $0x5c0] ss:$16 sps:$4 sm:$0xff]  }
  0x43   : > { %1919 = vmatpush2.bf16.msra.mxu1 %v2860_v61  ;;  %1877 = vmatprep.subr.bf16.mxu0 %v2861_v62  ;;  %v2932_v51 = vld [vmem:[%s4097_s1 + $0x7c4] ss:$16 sps:$4 sm:$0xff]   ;;  %v2930_v54 = vld [vmem:[%s4097_s1 + $0x7c0] ss:$16 sps:$4 sm:$0xff]  }
  0x44   : > { %1920 = vmatprep.subr.bf16.mxu1 %v2863_v63  ;;  %v2935_v56 = vld [vmem:[%s4097_s1 + $0x5a4] ss:$16 sps:$4 sm:$0xff]   ;;  %v2933_v58 = vld [vmem:[%s4097_s1 + $0x5a0] ss:$16 sps:$4 sm:$0xff]  }
  0x45   : > { %v2938_v57 = vld [vmem:[%s4097_s1 + $0x7a4] ss:$16 sps:$4 sm:$0xff]   ;;  %v2936_v59 = vld [vmem:[%s4097_s1 + $0x7a0] ss:$16 sps:$4 sm:$0xff]  }
  0x46   : > { %1878 = vmatpush2.bf16.msra.mxu0 %v2865_v0  ;;  %v2941_v60 = vld [vmem:[%s4097_s1 + $0x584] ss:$16 sps:$4 sm:$0xff]   ;;  %v2939_v62 = vld [vmem:[%s4097_s1 + $0x580] ss:$16 sps:$4 sm:$0xff]  }
  0x47   : > { %1921 = vmatpush2.bf16.msra.mxu1 %v2866_v1  ;;  %1879 = vmatprep.subr.bf16.mxu0 %v2867_v2  ;;  %v2944_v61 = vld [vmem:[%s4097_s1 + $0x784] ss:$16 sps:$4 sm:$0xff]   ;;  %v2942_v63 = vld [vmem:[%s4097_s1 + $0x780] ss:$16 sps:$4 sm:$0xff]  }
  0x48   : > { %1922 = vmatprep.subr.bf16.mxu1 %v2869_v3  ;;  %v2947_v0 = vld [vmem:[%s4097_s1 + $0x564] ss:$16 sps:$4 sm:$0xff]   ;;  %v2945_v2 = vld [vmem:[%s4097_s1 + $0x560] ss:$16 sps:$4 sm:$0xff]  }
  0x49   : > { %v2950_v1 = vld [vmem:[%s4097_s1 + $0x764] ss:$16 sps:$4 sm:$0xff]   ;;  %v2948_v3 = vld [vmem:[%s4097_s1 + $0x760] ss:$16 sps:$4 sm:$0xff]  }
  0x4a   : > { %1880 = vmatpush2.bf16.msra.mxu0 %v2871_v4  ;;  %v2953_v4 = vld [vmem:[%s4097_s1 + $0x544] ss:$16 sps:$4 sm:$0xff]  }
  0x4b   : > { %1923 = vmatpush2.bf16.msra.mxu1 %v2872_v5  ;;  %1935 = vmatprep.subr.bf16.mxu0 %v2875_v6  ;;  %v2956_v5 = vld [vmem:[%s4097_s1 + $0x744] ss:$16 sps:$4 sm:$0xff]   ;;  %v2951_v6 = vld [vmem:[%s4097_s1 + $0x540] ss:$16 sps:$4 sm:$0xff]  }
  0x4c   : > { %1978 = vmatprep.subr.bf16.mxu1 %v2878_v7  ;;  %v2954_v7 = vld [vmem:[%s4097_s1 + $0x740] ss:$16 sps:$4 sm:$0xff]  }
  0x4d   : > { %1882 = vmatmul.mubr.bf16.vlgmr.msra.gmra.mxu0 %v3443_v8 }
  0x4e   : > { %1925 = vmatmul.mubr.bf16.vlgmr.msra.gmra.mxu1 %v3445_v9  ;;  %1936 = vmatpush1.bf16.msra.mxu0 %v2873_v10  ;;  %v2959_v10 = vld [vmem:[%s4097_s1 + $0x524] ss:$16 sps:$4 sm:$0xff]  }
  0x4f   : > { %1979 = vmatpush1.bf16.msra.mxu1 %v2876_v11  ;;  %1937 = vmatprep.subr.bf16.mxu0 %v2881_v12  ;;  %v2962_v11 = vld [vmem:[%s4097_s1 + $0x724] ss:$16 sps:$4 sm:$0xff]   ;;  %v2957_v12 = vld [vmem:[%s4097_s1 + $0x520] ss:$16 sps:$4 sm:$0xff]  }
  0x50   : > { %1980 = vmatprep.subr.bf16.mxu1 %v2884_v13  ;;  %1967 = vmatprep.mubr.bf16.mxu0 %v3544_v41  ;;  %v2960_v13 = vld [vmem:[%s4097_s1 + $0x720] ss:$16 sps:$4 sm:$0xff]  }
  0x51   : > { %2010 = vmatprep.mubr.bf16.mxu1 %v3551_v43 }
  0x52   : > { %1938 = vmatpush1.bf16.msra.mxu0 %v2879_v14  ;;  %v2965_v14 = vld [vmem:[%s4097_s1 + $0x504] ss:$16 sps:$4 sm:$0xff]  }
  0x53   : > { %1981 = vmatpush1.bf16.msra.mxu1 %v2882_v15  ;;  %1939 = vmatprep.subr.bf16.mxu0 %v2887_v16  ;;  %v2968_v15 = vld [vmem:[%s4097_s1 + $0x704] ss:$16 sps:$4 sm:$0xff]   ;;  %v2963_v16 = vld [vmem:[%s4097_s1 + $0x500] ss:$16 sps:$4 sm:$0xff]  }
  0x54   : > { %1982 = vmatprep.subr.bf16.mxu1 %v2890_v17  ;;  %v2966_v17 = vld [vmem:[%s4097_s1 + $0x700] ss:$16 sps:$4 sm:$0xff]  }
  0x56   : > { %1940 = vmatpush1.bf16.msra.mxu0 %v2885_v18  ;;  %v2971_v18 = vld [vmem:[%s4097_s1 + $0xec] ss:$16 sps:$4 sm:$0xff]  }
  0x57   : > { %1983 = vmatpush1.bf16.msra.mxu1 %v2888_v19  ;;  %1941 = vmatprep.subr.bf16.mxu0 %v2893_v20  ;;  %v2974_v19 = vld [vmem:[%s4097_s1 + $0x2ec] ss:$16 sps:$4 sm:$0xff]   ;;  %v3665_v20 = vcombine.low %v3528_v36, %v3531_v37  ;;  %v2993_v36 = vld [vmem:[%s4097_s1 + $0x68] ss:$16 sps:$4 sm:$0xff]  }
  0x58   : > { %1984 = vmatprep.subr.bf16.mxu1 %v2896_v21  ;;  %v3669_v21 = vcombine.low %v3534_v38, %v3537_v39  ;;  %v2996_v37 = vld [vmem:[%s4097_s1 + $0x268] ss:$16 sps:$4 sm:$0xff]   ;;  %v3001_v38 = vld [vmem:[%s4097_s1 + $0x4c] ss:$16 sps:$4 sm:$0xff]  }
  0x59   : > { %v3004_v39 = vld [vmem:[%s4097_s1 + $0x24c] ss:$16 sps:$4 sm:$0xff]  }
  0x5a   : > { %1942 = vmatpush1.bf16.msra.mxu0 %v2891_v22  ;;  %v2969_v22 = vld [vmem:[%s4097_s1 + $0xe8] ss:$16 sps:$4 sm:$0xff]  }
  0x5b   : > { %1985 = vmatpush1.bf16.msra.mxu1 %v2894_v23  ;;  %1943 = vmatprep.subr.bf16.mxu0 %v2899_v24  ;;  %v2972_v23 = vld [vmem:[%s4097_s1 + $0x2e8] ss:$16 sps:$4 sm:$0xff]   ;;  %v2977_v24 = vld [vmem:[%s4097_s1 + $0xcc] ss:$16 sps:$4 sm:$0xff]  }
  0x5c   : > { %1986 = vmatprep.subr.bf16.mxu1 %v2902_v25  ;;  %v2980_v25 = vld [vmem:[%s4097_s1 + $0x2cc] ss:$16 sps:$4 sm:$0xff]  }
  0x5e   : > { %1944 = vmatpush1.bf16.msra.mxu0 %v2897_v26  ;;  %v2975_v26 = vld [vmem:[%s4097_s1 + $0xc8] ss:$16 sps:$4 sm:$0xff]  }
  0x5f   : > { %1987 = vmatpush1.bf16.msra.mxu1 %v2900_v27  ;;  %1945 = vmatprep.subr.bf16.mxu0 %v2905_v28  ;;  %v2978_v27 = vld [vmem:[%s4097_s1 + $0x2c8] ss:$16 sps:$4 sm:$0xff]   ;;  %v2983_v28 = vld [vmem:[%s4097_s1 + $0xac] ss:$16 sps:$4 sm:$0xff]  }
  0x60   : > { %1988 = vmatprep.subr.bf16.mxu1 %v2908_v29  ;;  %v2986_v29 = vld [vmem:[%s4097_s1 + $0x2ac] ss:$16 sps:$4 sm:$0xff]  }
  0x62   : > { %1946 = vmatpush1.bf16.msra.mxu0 %v2903_v30  ;;  %v2981_v30 = vld [vmem:[%s4097_s1 + $0xa8] ss:$16 sps:$4 sm:$0xff]  }
  0x63   : > { %1989 = vmatpush1.bf16.msra.mxu1 %v2906_v31  ;;  %1947 = vmatprep.subr.bf16.mxu0 %v2911_v32  ;;  %v2984_v31 = vld [vmem:[%s4097_s1 + $0x2a8] ss:$16 sps:$4 sm:$0xff]   ;;  %v2989_v32 = vld [vmem:[%s4097_s1 + $0x8c] ss:$16 sps:$4 sm:$0xff]  }
  0x64   : > { %1990 = vmatprep.subr.bf16.mxu1 %v2914_v33  ;;  %v2990_v33 = vld [vmem:[%s4097_s1 + $0x288] ss:$16 sps:$4 sm:$0xff]  }
  0x66   : > { %1948 = vmatpush1.bf16.msra.mxu0 %v2909_v34  ;;  %v2995_v34 = vld [vmem:[%s4097_s1 + $0x6c] ss:$16 sps:$4 sm:$0xff]  }
  0x67   : > { %1991 = vmatpush1.bf16.msra.mxu1 %v2912_v35  ;;  %1949 = vmatprep.subr.bf16.mxu0 %v2917_v40  ;;  %v2998_v35 = vld [vmem:[%s4097_s1 + $0x26c] ss:$16 sps:$4 sm:$0xff]   ;;  %v2999_v40 = vld [vmem:[%s4097_s1 + $0x48] ss:$16 sps:$4 sm:$0xff]  }
  0x68   : > { %1992 = vmatprep.subr.bf16.mxu1 %v2920_v42  ;;  %v3002_v42 = vld [vmem:[%s4097_s1 + $0x248] ss:$16 sps:$4 sm:$0xff]  }
  0x6a   : > { %1950 = vmatpush1.bf16.msra.mxu0 %v2915_v44  ;;  %v3007_v44 = vld [vmem:[%s4097_s1 + $0x2c] ss:$16 sps:$4 sm:$0xff]  }
  0x6b   : > { %1993 = vmatpush1.bf16.msra.mxu1 %v2918_v45  ;;  %1951 = vmatprep.subr.bf16.mxu0 %v2923_v46  ;;  %v3010_v45 = vld [vmem:[%s4097_s1 + $0x22c] ss:$16 sps:$4 sm:$0xff]   ;;  %v3005_v46 = vld [vmem:[%s4097_s1 + $0x28] ss:$16 sps:$4 sm:$0xff]  }
  0x6c   : > { %1994 = vmatprep.subr.bf16.mxu1 %v2926_v47  ;;  %v3008_v47 = vld [vmem:[%s4097_s1 + $0x228] ss:$16 sps:$4 sm:$0xff]  }
  0x6e   : > { %1952 = vmatpush2.bf16.msra.mxu0 %v2921_v48  ;;  %v3013_v48 = vld [vmem:[%s4097_s1 + $0xc] ss:$16 sps:$4 sm:$0xff]  }
  0x6f   : > { %1995 = vmatpush2.bf16.msra.mxu1 %v2924_v49  ;;  %1953 = vmatprep.subr.bf16.mxu0 %v2929_v50  ;;  %v3016_v49 = vld [vmem:[%s4097_s1 + $0x20c] ss:$16 sps:$4 sm:$0xff]   ;;  %v3011_v50 = vld [vmem:[%s4097_s1 + $0x8] ss:$16 sps:$4 sm:$0xff]  }
  0x70   : > { %1996 = vmatprep.subr.bf16.mxu1 %v2932_v51  ;;  %v3014_v51 = vld [vmem:[%s4097_s1 + $0x208] ss:$16 sps:$4 sm:$0xff]  }
  0x72   : > { %1954 = vmatpush2.bf16.msra.mxu0 %v2927_v52  ;;  %v3019_v52 = vld [vmem:[%s4097_s1 + $0x1ec] ss:$16 sps:$4 sm:$0xff]  }
  0x73   : > { %1997 = vmatpush2.bf16.msra.mxu1 %v2930_v54  ;;  %1955 = vmatprep.subr.bf16.mxu0 %v2935_v56  ;;  %v3022_v54 = vld [vmem:[%s4097_s1 + $0x3ec] ss:$16 sps:$4 sm:$0xff]   ;;  %v3017_v56 = vld [vmem:[%s4097_s1 + $0x1e8] ss:$16 sps:$4 sm:$0xff]  }
  0x74   : > { %1998 = vmatprep.subr.bf16.mxu1 %v2938_v57  ;;  %v3020_v57 = vld [vmem:[%s4097_s1 + $0x3e8] ss:$16 sps:$4 sm:$0xff]  }
  0x76   : > { %1956 = vmatpush2.bf16.msra.mxu0 %v2933_v58  ;;  %v3025_v58 = vld [vmem:[%s4097_s1 + $0x1cc] ss:$16 sps:$4 sm:$0xff]  }
  0x77   : > { %1999 = vmatpush2.bf16.msra.mxu1 %v2936_v59  ;;  %1957 = vmatprep.subr.bf16.mxu0 %v2941_v60  ;;  %v3028_v59 = vld [vmem:[%s4097_s1 + $0x3cc] ss:$16 sps:$4 sm:$0xff]   ;;  %v3023_v60 = vld [vmem:[%s4097_s1 + $0x1c8] ss:$16 sps:$4 sm:$0xff]  }
  0x78   : > { %2000 = vmatprep.subr.bf16.mxu1 %v2944_v61  ;;  %v3026_v61 = vld [vmem:[%s4097_s1 + $0x3c8] ss:$16 sps:$4 sm:$0xff]  }
  0x7a   : > { %1958 = vmatpush2.bf16.msra.mxu0 %v2939_v62  ;;  %v3031_v62 = vld [vmem:[%s4097_s1 + $0x1ac] ss:$16 sps:$4 sm:$0xff]  }
  0x7b   : > { %2001 = vmatpush2.bf16.msra.mxu1 %v2942_v63  ;;  %1959 = vmatprep.subr.bf16.mxu0 %v2947_v0  ;;  %v3034_v63 = vld [vmem:[%s4097_s1 + $0x3ac] ss:$16 sps:$4 sm:$0xff]   ;;  %v3029_v0 = vld [vmem:[%s4097_s1 + $0x1a8] ss:$16 sps:$4 sm:$0xff]  }
  0x7c   : > { %2002 = vmatprep.subr.bf16.mxu1 %v2950_v1  ;;  %v3032_v1 = vld [vmem:[%s4097_s1 + $0x3a8] ss:$16 sps:$4 sm:$0xff]  }
  0x7e   : > { %1960 = vmatpush2.bf16.msra.mxu0 %v2945_v2  ;;  %v3037_v2 = vld [vmem:[%s4097_s1 + $0x18c] ss:$16 sps:$4 sm:$0xff]  }
  0x7f   : > { %2003 = vmatpush2.bf16.msra.mxu1 %v2948_v3  ;;  %1961 = vmatprep.subr.bf16.mxu0 %v2953_v4  ;;  %v3040_v3 = vld [vmem:[%s4097_s1 + $0x38c] ss:$16 sps:$4 sm:$0xff]   ;;  %v3035_v4 = vld [vmem:[%s4097_s1 + $0x188] ss:$16 sps:$4 sm:$0xff]  }
  0x80   : > { %2004 = vmatprep.subr.bf16.mxu1 %v2956_v5  ;;  %v3038_v5 = vld [vmem:[%s4097_s1 + $0x388] ss:$16 sps:$4 sm:$0xff]  }
  0x82   : > { %1962 = vmatpush2.bf16.msra.mxu0 %v2951_v6  ;;  %v3043_v6 = vld [vmem:[%s4097_s1 + $0x16c] ss:$16 sps:$4 sm:$0xff]  }
  0x83   : > { %2005 = vmatpush2.bf16.msra.mxu1 %v2954_v7  ;;  %1963 = vmatprep.subr.bf16.mxu0 %v2959_v10  ;;  %v3046_v7 = vld [vmem:[%s4097_s1 + $0x36c] ss:$16 sps:$4 sm:$0xff]   ;;  %v3041_v10 = vld [vmem:[%s4097_s1 + $0x168] ss:$16 sps:$4 sm:$0xff]  }
  0x84   : > { %2006 = vmatprep.subr.bf16.mxu1 %v2962_v11  ;;  %v3044_v11 = vld [vmem:[%s4097_s1 + $0x368] ss:$16 sps:$4 sm:$0xff]  }
  0x86   : > { %1964 = vmatpush2.bf16.msra.mxu0 %v2957_v12  ;;  %v3049_v12 = vld [vmem:[%s4097_s1 + $0x14c] ss:$16 sps:$4 sm:$0xff]  }
  0x87   : > { %2007 = vmatpush2.bf16.msra.mxu1 %v2960_v13  ;;  %1965 = vmatprep.subr.bf16.mxu0 %v2965_v14  ;;  %v3052_v13 = vld [vmem:[%s4097_s1 + $0x34c] ss:$16 sps:$4 sm:$0xff]   ;;  %v3047_v14 = vld [vmem:[%s4097_s1 + $0x148] ss:$16 sps:$4 sm:$0xff]  }
  0x88   : > { %2008 = vmatprep.subr.bf16.mxu1 %v2968_v15  ;;  %v3050_v15 = vld [vmem:[%s4097_s1 + $0x348] ss:$16 sps:$4 sm:$0xff]  }
  0x8a   : > { %1966 = vmatpush2.bf16.msra.mxu0 %v2963_v16  ;;  %v3055_v16 = vld [vmem:[%s4097_s1 + $0x12c] ss:$16 sps:$4 sm:$0xff]  }
  0x8b   : > { %2009 = vmatpush2.bf16.msra.mxu1 %v2966_v17  ;;  %2021 = vmatprep.subr.bf16.mxu0 %v2971_v18  ;;  %v3058_v17 = vld [vmem:[%s4097_s1 + $0x32c] ss:$16 sps:$4 sm:$0xff]   ;;  %v3053_v18 = vld [vmem:[%s4097_s1 + $0x128] ss:$16 sps:$4 sm:$0xff]  }
  0x8c   : > { %2064 = vmatprep.subr.bf16.mxu1 %v2974_v19  ;;  %v3056_v19 = vld [vmem:[%s4097_s1 + $0x328] ss:$16 sps:$4 sm:$0xff]  }
  0x8d   : > { %1968 = vmatmul.mubr.bf16.vlgmr.msra.gmra.mxu0 %v3665_v20 }
  0x8e   : > { %2011 = vmatmul.mubr.bf16.vlgmr.msra.gmra.mxu1 %v3669_v21  ;;  %2022 = vmatpush1.bf16.msra.mxu0 %v2969_v22  ;;  %v3061_v22 = vld [vmem:[%s4097_s1 + $0x10c] ss:$16 sps:$4 sm:$0xff]  }
  0x8f   : > { %2065 = vmatpush1.bf16.msra.mxu1 %v2972_v23  ;;  %2023 = vmatprep.subr.bf16.mxu0 %v2977_v24  ;;  %v3064_v23 = vld [vmem:[%s4097_s1 + $0x30c] ss:$16 sps:$4 sm:$0xff]   ;;  %v3059_v24 = vld [vmem:[%s4097_s1 + $0x108] ss:$16 sps:$4 sm:$0xff]  }
  0x90   : > { %2066 = vmatprep.subr.bf16.mxu1 %v2980_v25  ;;  %2053 = vmatprep.mubr.bf16.mxu0 %v3386_v53  ;;  %v2992_v53 = vld [vmem:[%s4097_s1 + $0x28c] ss:$16 sps:$4 sm:$0xff]   ;;  %v3062_v25 = vld [vmem:[%s4097_s1 + $0x308] ss:$16 sps:$4 sm:$0xff]  }
  0x91   : > { %2096 = vmatprep.mubr.bf16.mxu1 %v3391_v55  ;;  %v2987_v55 = vld [vmem:[%s4097_s1 + $0x88] ss:$16 sps:$4 sm:$0xff]  }
  0x92   : > { %2024 = vmatpush1.bf16.msra.mxu0 %v2975_v26  ;;  %v3067_v26 = vld [vmem:[%s4097_s1 + $0x4ec] ss:$16 sps:$4 sm:$0xff]  }
  0x93   : > { %2067 = vmatpush1.bf16.msra.mxu1 %v2978_v27  ;;  %2025 = vmatprep.subr.bf16.mxu0 %v2983_v28  ;;  %v3070_v27 = vld [vmem:[%s4097_s1 + $0x6ec] ss:$16 sps:$4 sm:$0xff]   ;;  %v3065_v28 = vld [vmem:[%s4097_s1 + $0x4e8] ss:$16 sps:$4 sm:$0xff]  }
  0x94   : > { %2068 = vmatprep.subr.bf16.mxu1 %v2986_v29  ;;  %v3068_v29 = vld [vmem:[%s4097_s1 + $0x6e8] ss:$16 sps:$4 sm:$0xff]  }
  0x96   : > { %2026 = vmatpush1.bf16.msra.mxu0 %v2981_v30  ;;  %v3073_v30 = vld [vmem:[%s4097_s1 + $0x4cc] ss:$16 sps:$4 sm:$0xff]  }
  0x97   : > { %2069 = vmatpush1.bf16.msra.mxu1 %v2984_v31  ;;  %2027 = vmatprep.subr.bf16.mxu0 %v2989_v32  ;;  %v3076_v31 = vld [vmem:[%s4097_s1 + $0x6cc] ss:$16 sps:$4 sm:$0xff]   ;;  %v3071_v32 = vld [vmem:[%s4097_s1 + $0x4c8] ss:$16 sps:$4 sm:$0xff]  }
  0x98   : > { %2070 = vmatprep.subr.bf16.mxu1 %v2992_v53  ;;  %v3074_v53 = vld [vmem:[%s4097_s1 + $0x6c8] ss:$16 sps:$4 sm:$0xff]  }
  0x9a   : > { %2028 = vmatpush1.bf16.msra.mxu0 %v2987_v55  ;;  %v3079_v55 = vld [vmem:[%s4097_s1 + $0x4ac] ss:$16 sps:$4 sm:$0xff]  }
  0x9b   : > { %2071 = vmatpush1.bf16.msra.mxu1 %v2990_v33  ;;  %2029 = vmatprep.subr.bf16.mxu0 %v2995_v34  ;;  %v3080_v33 = vld [vmem:[%s4097_s1 + $0x6a8] ss:$16 sps:$4 sm:$0xff]   ;;  %v3085_v34 = vld [vmem:[%s4097_s1 + $0x48c] ss:$16 sps:$4 sm:$0xff]  }
  0x9c   : > { %2072 = vmatprep.subr.bf16.mxu1 %v2998_v35  ;;  %v3086_v35 = vld [vmem:[%s4097_s1 + $0x688] ss:$16 sps:$4 sm:$0xff]  }
  0x9e   : > { %2030 = vmatpush1.bf16.msra.mxu0 %v2993_v36  ;;  %v3091_v36 = vld [vmem:[%s4097_s1 + $0x46c] ss:$16 sps:$4 sm:$0xff]  }
  0x9f   : > { %2073 = vmatpush1.bf16.msra.mxu1 %v2996_v37  ;;  %2031 = vmatprep.subr.bf16.mxu0 %v3001_v38  ;;  %v3094_v37 = vld [vmem:[%s4097_s1 + $0x66c] ss:$16 sps:$4 sm:$0xff]   ;;  %v3089_v38 = vld [vmem:[%s4097_s1 + $0x468] ss:$16 sps:$4 sm:$0xff]  }
  0xa0   : > { %2074 = vmatprep.subr.bf16.mxu1 %v3004_v39  ;;  %v3092_v39 = vld [vmem:[%s4097_s1 + $0x668] ss:$16 sps:$4 sm:$0xff]  }
  0xa2   : > { %2032 = vmatpush1.bf16.msra.mxu0 %v2999_v40  ;;  %v3097_v40 = vld [vmem:[%s4097_s1 + $0x44c] ss:$16 sps:$4 sm:$0xff]  }
  0xa3   : > { %2075 = vmatpush1.bf16.msra.mxu1 %v3002_v42  ;;  %2033 = vmatprep.subr.bf16.mxu0 %v3007_v44  ;;  %v3100_v42 = vld [vmem:[%s4097_s1 + $0x64c] ss:$16 sps:$4 sm:$0xff]   ;;  %v3095_v44 = vld [vmem:[%s4097_s1 + $0x448] ss:$16 sps:$4 sm:$0xff]  }
  0xa4   : > { %2076 = vmatprep.subr.bf16.mxu1 %v3010_v45  ;;  %v3098_v45 = vld [vmem:[%s4097_s1 + $0x648] ss:$16 sps:$4 sm:$0xff]  }
  0xa6   : > { %2034 = vmatpush1.bf16.msra.mxu0 %v3005_v46  ;;  %v3103_v46 = vld [vmem:[%s4097_s1 + $0x42c] ss:$16 sps:$4 sm:$0xff]  }
  0xa7   : > { %2077 = vmatpush1.bf16.msra.mxu1 %v3008_v47  ;;  %2035 = vmatprep.subr.bf16.mxu0 %v3013_v48  ;;  %v3106_v47 = vld [vmem:[%s4097_s1 + $0x62c] ss:$16 sps:$4 sm:$0xff]   ;;  %v3101_v48 = vld [vmem:[%s4097_s1 + $0x428] ss:$16 sps:$4 sm:$0xff]  }
  0xa8   : > { %2078 = vmatprep.subr.bf16.mxu1 %v3016_v49  ;;  %v3104_v49 = vld [vmem:[%s4097_s1 + $0x628] ss:$16 sps:$4 sm:$0xff]  }
  0xaa   : > { %2036 = vmatpush1.bf16.msra.mxu0 %v3011_v50  ;;  %v3109_v50 = vld [vmem:[%s4097_s1 + $0x40c] ss:$16 sps:$4 sm:$0xff]  }
  0xab   : > { %2079 = vmatpush1.bf16.msra.mxu1 %v3014_v51  ;;  %2037 = vmatprep.subr.bf16.mxu0 %v3019_v52  ;;  %v3112_v51 = vld [vmem:[%s4097_s1 + $0x60c] ss:$16 sps:$4 sm:$0xff]   ;;  %v3107_v52 = vld [vmem:[%s4097_s1 + $0x408] ss:$16 sps:$4 sm:$0xff]  }
  0xac   : > { %2080 = vmatprep.subr.bf16.mxu1 %v3022_v54  ;;  %v3110_v54 = vld [vmem:[%s4097_s1 + $0x608] ss:$16 sps:$4 sm:$0xff]  }
  0xae   : > { %2038 = vmatpush2.bf16.msra.mxu0 %v3017_v56  ;;  %v3115_v56 = vld [vmem:[%s4097_s1 + $0x5ec] ss:$16 sps:$4 sm:$0xff]  }
  0xaf   : > { %2081 = vmatpush2.bf16.msra.mxu1 %v3020_v57  ;;  %2039 = vmatprep.subr.bf16.mxu0 %v3025_v58  ;;  %v3118_v57 = vld [vmem:[%s4097_s1 + $0x7ec] ss:$16 sps:$4 sm:$0xff]   ;;  %v3113_v58 = vld [vmem:[%s4097_s1 + $0x5e8] ss:$16 sps:$4 sm:$0xff]  }
  0xb0   : > { %2082 = vmatprep.subr.bf16.mxu1 %v3028_v59  ;;  %v3116_v59 = vld [vmem:[%s4097_s1 + $0x7e8] ss:$16 sps:$4 sm:$0xff]  }
  0xb2   : > { %2040 = vmatpush2.bf16.msra.mxu0 %v3023_v60  ;;  %v3121_v60 = vld [vmem:[%s4097_s1 + $0x5cc] ss:$16 sps:$4 sm:$0xff]  }
  0xb3   : > { %2083 = vmatpush2.bf16.msra.mxu1 %v3026_v61  ;;  %2041 = vmatprep.subr.bf16.mxu0 %v3031_v62  ;;  %v3124_v61 = vld [vmem:[%s4097_s1 + $0x7cc] ss:$16 sps:$4 sm:$0xff]   ;;  %v3119_v62 = vld [vmem:[%s4097_s1 + $0x5c8] ss:$16 sps:$4 sm:$0xff]  }
  0xb4   : > { %2084 = vmatprep.subr.bf16.mxu1 %v3034_v63  ;;  %v3122_v63 = vld [vmem:[%s4097_s1 + $0x7c8] ss:$16 sps:$4 sm:$0xff]  }
  0xb6   : > { %2042 = vmatpush2.bf16.msra.mxu0 %v3029_v0  ;;  %v3127_v0 = vld [vmem:[%s4097_s1 + $0x5ac] ss:$16 sps:$4 sm:$0xff]  }
  0xb7   : > { %2085 = vmatpush2.bf16.msra.mxu1 %v3032_v1  ;;  %2043 = vmatprep.subr.bf16.mxu0 %v3037_v2  ;;  %v3130_v1 = vld [vmem:[%s4097_s1 + $0x7ac] ss:$16 sps:$4 sm:$0xff]   ;;  %v3125_v2 = vld [vmem:[%s4097_s1 + $0x5a8] ss:$16 sps:$4 sm:$0xff]  }
  0xb8   : > { %2086 = vmatprep.subr.bf16.mxu1 %v3040_v3  ;;  %v3128_v3 = vld [vmem:[%s4097_s1 + $0x7a8] ss:$16 sps:$4 sm:$0xff]  }
  0xba   : > { %2044 = vmatpush2.bf16.msra.mxu0 %v3035_v4  ;;  %v3133_v4 = vld [vmem:[%s4097_s1 + $0x58c] ss:$16 sps:$4 sm:$0xff]  }
  0xbb   : > { %2087 = vmatpush2.bf16.msra.mxu1 %v3038_v5  ;;  %2045 = vmatprep.subr.bf16.mxu0 %v3043_v6  ;;  %v3136_v5 = vld [vmem:[%s4097_s1 + $0x78c] ss:$16 sps:$4 sm:$0xff]   ;;  %v3131_v6 = vld [vmem:[%s4097_s1 + $0x588] ss:$16 sps:$4 sm:$0xff]  }
  0xbc   : > { %2088 = vmatprep.subr.bf16.mxu1 %v3046_v7  ;;  %v3134_v7 = vld [vmem:[%s4097_s1 + $0x788] ss:$16 sps:$4 sm:$0xff]  }
  0xbe   : > { %2046 = vmatpush2.bf16.msra.mxu0 %v3041_v10  ;;  %v3139_v10 = vld [vmem:[%s4097_s1 + $0x56c] ss:$16 sps:$4 sm:$0xff]  }
  0xbf   : > { %2089 = vmatpush2.bf16.msra.mxu1 %v3044_v11  ;;  %2047 = vmatprep.subr.bf16.mxu0 %v3049_v12  ;;  %v3142_v11 = vld [vmem:[%s4097_s1 + $0x76c] ss:$16 sps:$4 sm:$0xff]   ;;  %v3137_v12 = vld [vmem:[%s4097_s1 + $0x568] ss:$16 sps:$4 sm:$0xff]  }
  0xc0   : > { %2090 = vmatprep.subr.bf16.mxu1 %v3052_v13  ;;  %v3140_v13 = vld [vmem:[%s4097_s1 + $0x768] ss:$16 sps:$4 sm:$0xff]  }
  0xc2   : > { %2048 = vmatpush2.bf16.msra.mxu0 %v3047_v14  ;;  %v3145_v14 = vld [vmem:[%s4097_s1 + $0x54c] ss:$16 sps:$4 sm:$0xff]  }
  0xc3   : > { %2091 = vmatpush2.bf16.msra.mxu1 %v3050_v15  ;;  %2049 = vmatprep.subr.bf16.mxu0 %v3055_v16  ;;  %v3148_v15 = vld [vmem:[%s4097_s1 + $0x74c] ss:$16 sps:$4 sm:$0xff]   ;;  %v3143_v16 = vld [vmem:[%s4097_s1 + $0x548] ss:$16 sps:$4 sm:$0xff]  }
  0xc4   : > { %2092 = vmatprep.subr.bf16.mxu1 %v3058_v17  ;;  %v3146_v17 = vld [vmem:[%s4097_s1 + $0x748] ss:$16 sps:$4 sm:$0xff]  }
  0xc6   : > { %2050 = vmatpush2.bf16.msra.mxu0 %v3053_v18  ;;  %v3151_v18 = vld [vmem:[%s4097_s1 + $0x52c] ss:$16 sps:$4 sm:$0xff]  }
  0xc7   : > { %2093 = vmatpush2.bf16.msra.mxu1 %v3056_v19  ;;  %2051 = vmatprep.subr.bf16.mxu0 %v3061_v22  ;;  %v3154_v19 = vld [vmem:[%s4097_s1 + $0x72c] ss:$16 sps:$4 sm:$0xff]   ;;  %v3149_v22 = vld [vmem:[%s4097_s1 + $0x528] ss:$16 sps:$4 sm:$0xff]  }
  0xc8   : > { %2094 = vmatprep.subr.bf16.mxu1 %v3064_v23  ;;  %v3152_v23 = vld [vmem:[%s4097_s1 + $0x728] ss:$16 sps:$4 sm:$0xff]  }
  0xca   : > { %2052 = vmatpush2.bf16.msra.mxu0 %v3059_v24  ;;  %v3157_v24 = vld [vmem:[%s4097_s1 + $0x50c] ss:$16 sps:$4 sm:$0xff]  }
  0xcb   : > { %2095 = vmatpush2.bf16.msra.mxu1 %v3062_v25  ;;  %2107 = vmatprep.subr.bf16.mxu0 %v3067_v26  ;;  %v3160_v25 = vld [vmem:[%s4097_s1 + $0x70c] ss:$16 sps:$4 sm:$0xff]   ;;  %v3155_v26 = vld [vmem:[%s4097_s1 + $0x508] ss:$16 sps:$4 sm:$0xff]  }
  0xcc   : > { %2150 = vmatprep.subr.bf16.mxu1 %v3070_v27  ;;  %v3158_v27 = vld [vmem:[%s4097_s1 + $0x708] ss:$16 sps:$4 sm:$0xff]  }
  0xcd   : > { %2054 = vmatmul.mubr.bf16.vlgmr.msra.gmra.mxu0 %v3443_v8  ;;  %v3082_v8 = vld [vmem:[%s4097_s1 + $0x6ac] ss:$16 sps:$4 sm:$0xff]  }
  0xce   : > { %2097 = vmatmul.mubr.bf16.vlgmr.msra.gmra.mxu1 %v3445_v9  ;;  %2108 = vmatpush1.bf16.msra.mxu0 %v3065_v28  ;;  %v3077_v9 = vld [vmem:[%s4097_s1 + $0x4a8] ss:$16 sps:$4 sm:$0xff]  }
  0xcf   : > { %2151 = vmatpush1.bf16.msra.mxu1 %v3068_v29  ;;  %2109 = vmatprep.subr.bf16.mxu0 %v3073_v30 }
  0xd0   : > { %2152 = vmatprep.subr.bf16.mxu1 %v3076_v31  ;;  %2139 = vmatprep.mubr.bf16.mxu0 %v3544_v41  ;;  %v3088_v41 = vld [vmem:[%s4097_s1 + $0x68c] ss:$16 sps:$4 sm:$0xff]  }
  0xd1   : > { %2182 = vmatprep.mubr.bf16.mxu1 %v3551_v43  ;;  %v3083_v43 = vld [vmem:[%s4097_s1 + $0x488] ss:$16 sps:$4 sm:$0xff]  }
  0xd2   : > { %2110 = vmatpush1.bf16.msra.mxu0 %v3071_v32 }
  0xd3   : > { %2153 = vmatpush1.bf16.msra.mxu1 %v3074_v53  ;;  %2111 = vmatprep.subr.bf16.mxu0 %v3079_v55 }
  0xd4   : > { %2154 = vmatprep.subr.bf16.mxu1 %v3082_v8 }
  0xd6   : > { %2112 = vmatpush1.bf16.msra.mxu0 %v3077_v9 }
  0xd7   : > { %2155 = vmatpush1.bf16.msra.mxu1 %v3080_v33  ;;  %2113 = vmatprep.subr.bf16.mxu0 %v3085_v34 }
  0xd8   : > { %2156 = vmatprep.subr.bf16.mxu1 %v3088_v41 }
  0xda   : > { %2114 = vmatpush1.bf16.msra.mxu0 %v3083_v43 }
  0xdb   : > { %2157 = vmatpush1.bf16.msra.mxu1 %v3086_v35  ;;  %2115 = vmatprep.subr.bf16.mxu0 %v3091_v36 }
  0xdc   : > { %2158 = vmatprep.subr.bf16.mxu1 %v3094_v37 }
  0xde   : > { %2116 = vmatpush1.bf16.msra.mxu0 %v3089_v38 }
  0xdf   : > { %2159 = vmatpush1.bf16.msra.mxu1 %v3092_v39  ;;  %2117 = vmatprep.subr.bf16.mxu0 %v3097_v40 }
  0xe0   : > { %2160 = vmatprep.subr.bf16.mxu1 %v3100_v42 }
  0xe2   : > { %2118 = vmatpush1.bf16.msra.mxu0 %v3095_v44 }
  0xe3   : > { %2161 = vmatpush1.bf16.msra.mxu1 %v3098_v45  ;;  %2119 = vmatprep.subr.bf16.mxu0 %v3103_v46 }
  0xe4   : > { %2162 = vmatprep.subr.bf16.mxu1 %v3106_v47 }
  0xe6   : > { %2120 = vmatpush1.bf16.msra.mxu0 %v3101_v48 }
  0xe7   : > { %2163 = vmatpush1.bf16.msra.mxu1 %v3104_v49  ;;  %2121 = vmatprep.subr.bf16.mxu0 %v3109_v50 }
  0xe8   : > { %2164 = vmatprep.subr.bf16.mxu1 %v3112_v51 }
  0xea   : > { %2122 = vmatpush1.bf16.msra.mxu0 %v3107_v52 }
  0xeb   : > { %2165 = vmatpush1.bf16.msra.mxu1 %v3110_v54  ;;  %2123 = vmatprep.subr.bf16.mxu0 %v3115_v56 }
  0xec   : > { %2166 = vmatprep.subr.bf16.mxu1 %v3118_v57 }
  0xee   : > { %2124 = vmatpush2.bf16.msra.mxu0 %v3113_v58 }
  0xef   : > { %2167 = vmatpush2.bf16.msra.mxu1 %v3116_v59  ;;  %2125 = vmatprep.subr.bf16.mxu0 %v3121_v60 }
  0xf0   : > { %2168 = vmatprep.subr.bf16.mxu1 %v3124_v61 }
  0xf2   : > { %2126 = vmatpush2.bf16.msra.mxu0 %v3119_v62 }
  0xf3   : > { %2169 = vmatpush2.bf16.msra.mxu1 %v3122_v63  ;;  %2127 = vmatprep.subr.bf16.mxu0 %v3127_v0 }
  0xf4   : > { %2170 = vmatprep.subr.bf16.mxu1 %v3130_v1 }
  0xf6   : > { %2128 = vmatpush2.bf16.msra.mxu0 %v3125_v2 }
  0xf7   : > { %2171 = vmatpush2.bf16.msra.mxu1 %v3128_v3  ;;  %2129 = vmatprep.subr.bf16.mxu0 %v3133_v4 }
  0xf8   : > { %2172 = vmatprep.subr.bf16.mxu1 %v3136_v5 }
  0xfa   : > { %2130 = vmatpush2.bf16.msra.mxu0 %v3131_v6 }
  0xfb   : > { %2173 = vmatpush2.bf16.msra.mxu1 %v3134_v7  ;;  %2131 = vmatprep.subr.bf16.mxu0 %v3139_v10 }
  0xfc   : > { %2174 = vmatprep.subr.bf16.mxu1 %v3142_v11 }
  0xfe   : > { %2132 = vmatpush2.bf16.msra.mxu0 %v3137_v12 }
  0xff   : > { %2175 = vmatpush2.bf16.msra.mxu1 %v3140_v13  ;;  %2133 = vmatprep.subr.bf16.mxu0 %v3145_v14 }
 0x100   : > { %2176 = vmatprep.subr.bf16.mxu1 %v3148_v15 }
 0x102   : > { %2134 = vmatpush2.bf16.msra.mxu0 %v3143_v16 }
 0x103   : > { %2177 = vmatpush2.bf16.msra.mxu1 %v3146_v17  ;;  %2135 = vmatprep.subr.bf16.mxu0 %v3151_v18 }
 0x104   : > { %2178 = vmatprep.subr.bf16.mxu1 %v3154_v19 }
 0x106   : > { %2136 = vmatpush2.bf16.msra.mxu0 %v3149_v22 }
 0x107   : > { %2179 = vmatpush2.bf16.msra.mxu1 %v3152_v23  ;;  %2137 = vmatprep.subr.bf16.mxu0 %v3157_v24 }
 0x108   : > { %2180 = vmatprep.subr.bf16.mxu1 %v3160_v25 }
 0x10a   : > { %2138 = vmatpush2.bf16.msra.mxu0 %v3155_v26 }
 0x10b   : > { %2181 = vmatpush2.bf16.msra.mxu1 %v3158_v27 }
 0x10d   : > { %2140 = vmatmul.mubr.bf16.vlgmr.msra.gmra.mxu0 %v3665_v20  ;;  %v1883_v28 = vpop.f32.mrf.mxu0 }
 0x10e   : > { %2183 = vmatmul.mubr.bf16.vlgmr.msra.gmra.mxu1 %v3669_v21  ;;  %v1926_v29 = vpop.f32.mrf.mxu1 }
 0x10f   : > { %v1885_v30 = vpop.f32.mrf.mxu0  ;;  %v1927_v9 = vadd.f32 %v1926_v29, %v1883_v28 }
 0x110   : > { %v1928_v31 = vpop.f32.mrf.mxu1 }
 0x111   : > { %v1887_v32 = vpop.f32.mrf.mxu0  ;;  %v1929_v41 = vadd.f32 %v1928_v31, %v1885_v30 }
 0x112   : > { %v1930_v53 = vpop.f32.mrf.mxu1 }
 0x113   : > { %v1889_v55 = vpop.f32.mrf.mxu0  ;;  %v1931_v37 = vadd.f32 %v1930_v53, %v1887_v32 }
 0x114   : > { %v1932_v8 = vpop.f32.mrf.mxu1 }
 0x115   : > { %v1933_v39 = vadd.f32 %v1932_v8, %v1889_v55 }
 0x14d   : > { %v1969_v33 = vpop.f32.mrf.mxu0 }
 0x14e   : > { %v2012_v34 = vpop.f32.mrf.mxu1  ;;  %v1970_v43 = vadd.f32 %v1969_v33, %v1927_v9 }
 0x14f   : > { %v1971_v35 = vpop.f32.mrf.mxu0 }
 0x150   : > { %v2014_v36 = vpop.f32.mrf.mxu1  ;;  %v1972_v20 = vadd.f32 %v1971_v35, %v1929_v41  ;;  %v2013_v40 = vadd.f32 %v2012_v34, %v1970_v43 }
 0x151   : > { %v1973_v21 = vpop.f32.mrf.mxu0 }
 0x152   : > { %v2016_v38 = vpop.f32.mrf.mxu1  ;;  %v2015_v42 = vadd.f32 %v2014_v36, %v1972_v20  ;;  %v1974_v44 = vadd.f32 %v1973_v21, %v1931_v37  ;;  %v2276_v50 = vmul.f32 %v2013_v40, %v2013_v40 }
 0x153   : > { %v1975_v45 = vpop.f32.mrf.mxu0 }
 0x154   : > { %v2748_v46 = vpack.c.bf16 %v2015_v42, %v2013_v40  ;;  %v2017_v47 = vadd.f32 %v2016_v38, %v1974_v44  ;;  %v1976_v48 = vadd.f32 %v1975_v45, %v1933_v39  ;;  %v2018_v49 = vpop.f32.mrf.mxu1  ;;  %v2277_v60 = vmul.f32 %v2015_v42, %v2015_v42 }
 0x156   : > { %2244 = vst [vmem:[%s4063_s5] sm:$0xff] %v2748_v46  ;;  %v2248_v51 = vadd.f32 %v2017_v47, %v2013_v40  ;;  %v2280_v52 = vmul.f32 %v2017_v47, %v2017_v47  ;;  %v2019_v54 = vadd.f32 %v2018_v49, %v1976_v48 }
 0x158   : > { %v2249_v56 = vrot.slane %v2248_v51, 4  ;;  %v2284_v57 = vadd.f32 %v2280_v52, %v2276_v50  ;;  %v2750_v58 = vpack.c.bf16 %v2019_v54, %v2017_v47  ;;  %v2255_v59 = vadd.f32 %v2019_v54, %v2015_v42 }
 0x159   : > { %v2281_v61 = vmul.f32 %v2019_v54, %v2019_v54 }
 0x15a   : > { %v2250_v62 = vadd.f32 %v2249_v56, %v2248_v51  ;;  %v2285_v63 = vrot.slane %v2284_v57, 4  ;;  %2246 = vst [vmem:[%s4063_s5 + $0x10] sm:$0xff] %v2750_v58  ;;  %v2256_v0 = vrot.slane %v2255_v59, 4 }
 0x15b   : > { %v2291_v1 = vadd.f32 %v2281_v61, %v2277_v60 }
 0x15c   : > { %v2251_v2 = vrot.slane %v2250_v62, 2  ;;  %v2286_v3 = vadd.f32 %v2285_v63, %v2284_v57  ;;  %v2257_v4 = vadd.f32 %v2256_v0, %v2255_v59 }
 0x15d   : > { %v2292_v5 = vrot.slane %v2291_v1, 4 }
 0x15e   : > { %v2252_v6 = vadd.f32 %v2251_v2, %v2250_v62  ;;  %v2287_v7 = vrot.slane %v2286_v3, 2  ;;  %v2258_v10 = vrot.slane %v2257_v4, 2 }
 0x15f   : > { %v2293_v11 = vadd.f32 %v2292_v5, %v2291_v1 }
 0x160   : > { %v2253_v12 = vrot.slane %v2252_v6, 1  ;;  %v2288_v13 = vadd.f32 %v2287_v7, %v2286_v3  ;;  %v2259_v14 = vadd.f32 %v2258_v10, %v2257_v4 }
 0x161   : > { %v2294_v15 = vrot.slane %v2293_v11, 2 }
 0x162   : > { %v2289_v16 = vrot.slane %v2288_v13, 1  ;;  %v2260_v17 = vrot.slane %v2259_v14, 1  ;;  %v2254_v19 = vadd.f32 %v2253_v12, %v2252_v6 }
 0x163   : > { %v2295_v18 = vadd.f32 %v2294_v15, %v2293_v11  ;;  %v2326_v15 = vlaneseq }
 0x164   : > { %v2290_v22 = vadd.f32 %v2289_v16, %v2288_v13  ;;  %v2261_v25 = vadd.f32 %v2260_v17, %v2259_v14  ;;  %v3185_v13 = vmov 1983009808  }
 0x165   : > { %v2296_v23 = vrot.slane %v2295_v18, 1  ;;  %v2324_v14 = vunpack.c.l.s4 %v3185_v13 }
 0x166   : > { %v4068_v24 = vsel %vm2312_vm0, %v2254_v19, %v2290_v22 }
 0x167   : > { %v2297_v26 = vadd.f32 %v2296_v23, %v2295_v18 }
 0x169   : > { %v4071_v27 = vsel %vm2312_vm0, %v2261_v25, %v2297_v26  ;;  %v2325_v26 = vunpack.c.0.s8 %v2324_v14 }
 0x16a   : > { %v2321_v28 = vcombine.low %v4068_v24, %v4071_v27 }
 0x18d   : > { %v2055_v29 = vpop.f32.mrf.mxu0 }
 0x18e   : > { %v2098_v30 = vpop.f32.mrf.mxu1 }
 0x18f   : > { %v2057_v31 = vpop.f32.mrf.mxu0  ;;  %v2099_v33 = vadd.f32 %v2098_v30, %v2055_v29  ;;  %v2327_v29 = vshrl.u32 %v2326_v15, 7 }
 0x190   : > { %v2100_v32 = vpop.f32.mrf.mxu1 }
 0x191   : > { %v2059_v53 = vpop.f32.mrf.mxu0  ;;  %v2101_v43 = vadd.f32 %v2100_v32, %v2057_v31 }
 0x192   : > { %v2102_v55 = vpop.f32.mrf.mxu1 }
 0x193   : > { %v2061_v8 = vpop.f32.mrf.mxu0  ;;  %v2103_v20 = vadd.f32 %v2102_v55, %v2059_v53 }
 0x194   : > { %v2104_v9 = vpop.f32.mrf.mxu1 }
 0x195   : > { %v2105_v40 = vadd.f32 %v2104_v9, %v2061_v8  ;;  %v2328_v8 = vsub.s32 %v2325_v26, %v2327_v29 }
 0x1cd   : > { %v2141_v34 = vpop.f32.mrf.mxu0 }
 0x1ce   : > { %v2184_v41 = vpop.f32.mrf.mxu1  ;;  %v2142_v35 = vadd.f32 %v2141_v34, %v2099_v33 }
 0x1cf   : > { %v2143_v36 = vpop.f32.mrf.mxu0 }
 0x1d0   : > { %v2186_v37 = vpop.f32.mrf.mxu1  ;;  %v2144_v21 = vadd.f32 %v2143_v36, %v2101_v43  ;;  %v2185_v42 = vadd.f32 %v2184_v41, %v2142_v35  ;;  %v2329_v41 = vrot.slane %v2321_v28, %v2328_v8 }
 0x1d1   : > { %v2145_v38 = vpop.f32.mrf.mxu0 }
 0x1d2   : > { %v2188_v39 = vpop.f32.mrf.mxu1  ;;  %v2187_v44 = vadd.f32 %v2186_v37, %v2144_v21  ;;  %v2146_v45 = vadd.f32 %v2145_v38, %v2103_v20  ;;  %v2278_v51 = vmul.f32 %v2185_v42, %v2185_v42 }
 0x1d3   : > { %v2147_v46 = vpop.f32.mrf.mxu0 }
 0x1d4   : > { %v2749_v47 = vpack.c.bf16 %v2187_v44, %v2185_v42  ;;  %v2189_v48 = vadd.f32 %v2188_v39, %v2146_v45  ;;  %v2148_v49 = vadd.f32 %v2147_v46, %v2105_v40  ;;  %v2190_v50 = vpop.f32.mrf.mxu1  ;;  %v2279_v61 = vmul.f32 %v2187_v44, %v2187_v44 }
 0x1d6   : > { %2245 = vst [vmem:[%s4063_s5 + $0x8] sm:$0xff] %v2749_v47  ;;  %v2262_v52 = vadd.f32 %v2189_v48, %v2185_v42  ;;  %v2282_v54 = vmul.f32 %v2189_v48, %v2189_v48  ;;  %v2191_v56 = vadd.f32 %v2190_v50, %v2148_v49 }
 0x1d8   : > { %v2263_v57 = vrot.slane %v2262_v52, 4  ;;  %v2298_v58 = vadd.f32 %v2282_v54, %v2278_v51  ;;  %v2751_v59 = vpack.c.bf16 %v2191_v56, %v2189_v48  ;;  %v2269_v60 = vadd.f32 %v2191_v56, %v2187_v44 }
 0x1d9   : > { %v2283_v62 = vmul.f32 %v2191_v56, %v2191_v56 }
 0x1da   : > { %v2264_v63 = vadd.f32 %v2263_v57, %v2262_v52  ;;  %v2299_v0 = vrot.slane %v2298_v58, 4  ;;  %2247 = vst [vmem:[%s4063_s5 + $0x18] sm:$0xff] %v2751_v59  ;;  %v2270_v1 = vrot.slane %v2269_v60, 4 }
 0x1db   : > { %v2305_v2 = vadd.f32 %v2283_v62, %v2279_v61 }
 0x1dc   : > { %v2265_v3 = vrot.slane %v2264_v63, 2  ;;  %v2300_v4 = vadd.f32 %v2299_v0, %v2298_v58  ;;  %v2271_v5 = vadd.f32 %v2270_v1, %v2269_v60 }
 0x1dd   : > { %v2306_v6 = vrot.slane %v2305_v2, 4 }
 0x1de   : > { %v2301_v7 = vrot.slane %v2300_v4, 2  ;;  %v2272_v10 = vrot.slane %v2271_v5, 2  ;;  %v2266_v11 = vadd.f32 %v2265_v3, %v2264_v63 }
 0x1df   : > { %v2307_v12 = vadd.f32 %v2306_v6, %v2305_v2 }
 0x1e0   : > { %v2302_v16 = vadd.f32 %v2301_v7, %v2300_v4  ;;  %v2273_v17 = vadd.f32 %v2272_v10, %v2271_v5  ;;  %v2267_v22 = vrot.slane %v2266_v11, 1 }
 0x1e1   : > { %v2308_v18 = vrot.slane %v2307_v12, 2 }
 0x1e2   : > { %v2303_v19 = vrot.slane %v2302_v16, 1  ;;  %v2274_v23 = vrot.slane %v2273_v17, 1  ;;  %v2268_v32 = vadd.f32 %v2267_v22, %v2266_v11 }
 0x1e3   : > { %v2309_v25 = vadd.f32 %v2308_v18, %v2307_v12 }
 0x1e4   : > { %v2304_v30 = vadd.f32 %v2303_v19, %v2302_v16  ;;  %v2275_v53 = vadd.f32 %v2274_v23, %v2273_v17 }
 0x1e5   : > { %v2310_v31 = vrot.slane %v2309_v25, 1 }
 0x1e6   : > { %v2315_v9 = vsel %vm2312_vm0, %v2268_v32, %v2304_v30 }
 0x1e7   : > { %v2311_v55 = vadd.f32 %v2310_v31, %v2309_v25 }
 0x1e9   : > { %v2316_v33 = vsel %vm2312_vm0, %v2275_v53, %v2311_v55 }
 0x1ea   : > { %v2322_v34 = vcombine.low %v2315_v9, %v2316_v33 }
 0x1ec   : > { %v2336_v43 = vrot.slane %v2322_v34, %v2328_v8 }
 0x1ee   : > { %v2337_v35 = vcombine.low %v2329_v41, %v2336_v43 }
 0x1f0   : > { %2339 = vst [vmem:[%s244_s17] sm:$0xff] %v2337_v35 }
 0x1f1 PF: > { %s14_s14 = sadd.s32 1, %s3183_s14   ;;  %s4100_s12 = smov %s3179_s13 }
 0x1f2   : > { %p11_p6 = scmp.ge.s32.totalorder %s14_s14, 4   ;;  %s4101_s13 = smov %s4103_s15 }
 0x1f4   :  { %13 = sbr.rel (!%p11_p6) target bundleno = 2 (0x2), region = 81 }

// kernel: generator_forward.67
= control target key start
LH: loop header
LB: loop body
LE: loop exit
PB: predicated region body
PF: predicated region fallthrough
CT: control target
= control target key end

     0   :  { %s1522_s12 = smov 0   ;;  %s1524_s13 = smov 0   ;;  %s1787_s0 = inlined_call_operand.vmem [shape: bf16[128,512], index: 0, kind: input, shape index: {}]   ;;  %s1788_s1 = inlined_call_operand.vmem [shape: bf16[512,256], index: 1, kind: input, shape index: {}]   ;;  %s1789_s2 = inlined_call_operand.vmem [shape: bf16[128,256], index: 2, kind: output, shape index: {0}]   ;;  %s1790_s3 = inlined_call_operand.vmem [shape: f32[2,2,256], index: 3, kind: output, shape index: {1}]  }
   0x1   :  { %s1526_s14 = smov 0  }
   0x2 LB: > { %s26_s15 = sadd.s32 1, %s1496_s13  ;;  %p1223_p0 = scmp.ge.s32.totalorder %s1500_s14, 1  ;;  %s1500_s14 = sphi %s1526_s14, %s14_s14   ;;  %s1496_s13 = sphi %s1524_s13, %s1792_s13   ;;  %s1492_s12 = sphi %s1522_s12, %s1791_s12  }
   0x3   : > { %p28_p1 = scmp.ge.s32.totalorder %s26_s15, 2  ;;  %p173_p2 = scmp.lt.s32.totalorder %s1500_s14, 3 }
   0x5   : > { %s1794_s15 = smov (%p28_p1, %s26_s15), 0  ;;  %p174_p3 = pnand %p1223_p0, %p173_p2 }
   0x6   : > { %s1224_s30 = sshll.u32 (!%p174_p3), %s1492_s12, 3  ;;  %p240_p5 = scmp.lt.s32.totalorder (!%p174_p3), %s1492_s12, 1 }
   0x7   : > { %177 = sbr.rel (%p174_p3) target bundleno = 324 (0x144), region = 28  ;;  %p216_p4 = scmp.lt.s32.totalorder (!%p174_p3), %s1224_s30, 15 }
   0xc   : > { %v1358_v0 = vld [vmem:[%s1788_s1 + $0x74] ss:$8 sps:$4 sm:$0xff]   ;;  %v1362_v2 = vld [vmem:[%s1788_s1 + $0x70] ss:$8 sps:$4 sm:$0xff]   ;;  %v1364_v4 = vld [vmem:[%s1788_s1 + $0x64] ss:$8 sps:$4 sm:$0xff]  }
   0xd   : > { %v1360_v1 = vld [vmem:[%s1788_s1 + $0x174] ss:$8 sps:$4 sm:$0xff]   ;;  %761 = vmatprep.subr.bf16.mxu0 %v1358_v0  ;;  %v1363_v3 = vld [vmem:[%s1788_s1 + $0x170] ss:$8 sps:$4 sm:$0xff]   ;;  %v1366_v5 = vld [vmem:[%s1788_s1 + $0x164] ss:$8 sps:$4 sm:$0xff]  }
   0xe   : > { %834 = vmatprep.subr.bf16.mxu1 %v1360_v1  ;;  %762 = vmatpush1.bf16.msra.mxu0 %v1362_v2  ;;  %v1368_v6 = vld [vmem:[%s1788_s1 + $0x60] ss:$8 sps:$4 sm:$0xff]   ;;  %v1370_v8 = vld [vmem:[%s1788_s1 + $0x54] ss:$8 sps:$4 sm:$0xff]   ;;  %v1374_v10 = vld [vmem:[%s1788_s1 + $0x50] ss:$8 sps:$4 sm:$0xff]  }
   0xf   : > { %835 = vmatpush1.bf16.msra.mxu1 %v1363_v3  ;;  %763 = vmatprep.subr.bf16.mxu0 %v1364_v4  ;;  %v1369_v7 = vld [vmem:[%s1788_s1 + $0x160] ss:$8 sps:$4 sm:$0xff]   ;;  %v1372_v9 = vld [vmem:[%s1788_s1 + $0x154] ss:$8 sps:$4 sm:$0xff]   ;;  %v1375_v11 = vld [vmem:[%s1788_s1 + $0x150] ss:$8 sps:$4 sm:$0xff]  }
  0x10   : > { %836 = vmatprep.subr.bf16.mxu1 %v1366_v5  ;;  %v1376_v12 = vld [vmem:[%s1788_s1 + $0x44] ss:$8 sps:$4 sm:$0xff]   ;;  %v1380_v14 = vld [vmem:[%s1788_s1 + $0x40] ss:$8 sps:$4 sm:$0xff]   ;;  %v1382_v16 = vld [vmem:[%s1788_s1 + $0x34] ss:$8 sps:$4 sm:$0xff]  }
  0x11   : > { %v1378_v13 = vld [vmem:[%s1788_s1 + $0x144] ss:$8 sps:$4 sm:$0xff]   ;;  %v1381_v15 = vld [vmem:[%s1788_s1 + $0x140] ss:$8 sps:$4 sm:$0xff]   ;;  %v1384_v17 = vld [vmem:[%s1788_s1 + $0x134] ss:$8 sps:$4 sm:$0xff]  }
  0x12   : > { %764 = vmatpush1.bf16.msra.mxu0 %v1368_v6  ;;  %v1386_v18 = vld [vmem:[%s1788_s1 + $0x30] ss:$8 sps:$4 sm:$0xff]   ;;  %v1388_v20 = vld [vmem:[%s1788_s1 + $0x24] ss:$8 sps:$4 sm:$0xff]   ;;  %v1392_v22 = vld [vmem:[%s1788_s1 + $0x20] ss:$8 sps:$4 sm:$0xff]  }
  0x13   : > { %837 = vmatpush1.bf16.msra.mxu1 %v1369_v7  ;;  %765 = vmatprep.subr.bf16.mxu0 %v1370_v8  ;;  %v1387_v19 = vld [vmem:[%s1788_s1 + $0x130] ss:$8 sps:$4 sm:$0xff]   ;;  %v1390_v21 = vld [vmem:[%s1788_s1 + $0x124] ss:$8 sps:$4 sm:$0xff]   ;;  %v1393_v23 = vld [vmem:[%s1788_s1 + $0x120] ss:$8 sps:$4 sm:$0xff]  }
  0x14   : > { %838 = vmatprep.subr.bf16.mxu1 %v1372_v9  ;;  %v1394_v24 = vld [vmem:[%s1788_s1 + $0x14] ss:$8 sps:$4 sm:$0xff]   ;;  %v1398_v26 = vld [vmem:[%s1788_s1 + $0x10] ss:$8 sps:$4 sm:$0xff]   ;;  %v1400_v28 = vld [vmem:[%s1788_s1 + $0x4] ss:$8 sps:$4 sm:$0xff]  }
  0x15   : > { %v1396_v25 = vld [vmem:[%s1788_s1 + $0x114] ss:$8 sps:$4 sm:$0xff]   ;;  %v1399_v27 = vld [vmem:[%s1788_s1 + $0x110] ss:$8 sps:$4 sm:$0xff]   ;;  %v1402_v29 = vld [vmem:[%s1788_s1 + $0x104] ss:$8 sps:$4 sm:$0xff]  }
  0x16   : > { %766 = vmatpush1.bf16.msra.mxu0 %v1374_v10  ;;  %v1404_v30 = vld [vmem:[%s1788_s1] ss:$8 sps:$4 sm:$0xff]   ;;  %v1406_v32 = vld [vmem:[%s1788_s1 + $0xf4] ss:$8 sps:$4 sm:$0xff]   ;;  %v1410_v34 = vld [vmem:[%s1788_s1 + $0xf0] ss:$8 sps:$4 sm:$0xff]  }
  0x17   : > { %839 = vmatpush1.bf16.msra.mxu1 %v1375_v11  ;;  %767 = vmatprep.subr.bf16.mxu0 %v1376_v12  ;;  %v1405_v31 = vld [vmem:[%s1788_s1 + $0x100] ss:$8 sps:$4 sm:$0xff]   ;;  %v1408_v33 = vld [vmem:[%s1788_s1 + $0x1f4] ss:$8 sps:$4 sm:$0xff]   ;;  %v1411_v35 = vld [vmem:[%s1788_s1 + $0x1f0] ss:$8 sps:$4 sm:$0xff]  }
  0x18   : > { %840 = vmatprep.subr.bf16.mxu1 %v1378_v13  ;;  %v1412_v36 = vld [vmem:[%s1788_s1 + $0xe4] ss:$8 sps:$4 sm:$0xff]   ;;  %s1796_s30 = smov (!%p216_p4, %s1224_s30), 15  ;;  %v1416_v38 = vld [vmem:[%s1788_s1 + $0xe0] ss:$8 sps:$4 sm:$0xff]   ;;  %s1798_s12 = smov (!%p240_p5, %s1492_s12), 1 }
  0x19   : > { %v1414_v37 = vld [vmem:[%s1788_s1 + $0x1e4] ss:$8 sps:$4 sm:$0xff]   ;;  %v1417_v39 = vld [vmem:[%s1788_s1 + $0x1e0] ss:$8 sps:$4 sm:$0xff]   ;;  %v1418_v40 = vld [vmem:[%s1788_s1 + $0xd4] ss:$8 sps:$4 sm:$0xff]  }
  0x1a   : > { %768 = vmatpush1.bf16.msra.mxu0 %v1380_v14  ;;  %v1420_v41 = vld [vmem:[%s1788_s1 + $0x1d4] ss:$8 sps:$4 sm:$0xff]   ;;  %s1323_s6 = sshll.u32 %s1796_s30, 4  ;;  %v1422_v42 = vld [vmem:[%s1788_s1 + $0xd0] ss:$8 sps:$4 sm:$0xff]   ;;  %s1324_s11 = sshll.u32 %s1796_s30, 3 }
  0x1b   : > { %841 = vmatpush1.bf16.msra.mxu1 %v1381_v15  ;;  %769 = vmatprep.subr.bf16.mxu0 %v1382_v16  ;;  %v1423_v43 = vld [vmem:[%s1788_s1 + $0x1d0] ss:$8 sps:$4 sm:$0xff]   ;;  %v1424_v44 = vld [vmem:[%s1788_s1 + $0xc4] ss:$8 sps:$4 sm:$0xff]   ;;  %s1684_s19 = scalar_lea.vmem %s1787_s0, %s1323_s6  ;;  %v1428_v46 = vld [vmem:[%s1788_s1 + $0xc0] ss:$8 sps:$4 sm:$0xff]   ;;  %s1763_s18 = scalar_lea.vmem %s1789_s2, %s1324_s11 }
  0x1c   : > { %842 = vmatprep.subr.bf16.mxu1 %v1384_v17  ;;  %v1426_v45 = vld [vmem:[%s1788_s1 + $0x1c4] ss:$8 sps:$4 sm:$0xff]   ;;  %v1429_v47 = vld [vmem:[%s1788_s1 + $0x1c0] ss:$8 sps:$4 sm:$0xff]   ;;  %v1430_v48 = vld [vmem:[%s1788_s1 + $0xb4] ss:$8 sps:$4 sm:$0xff]  }
  0x1d   : > { %v1456_v49 = vld [vmem:[%s1684_s19 + $0x4] ss:$16 sps:$4 sm:$0xff]   ;;  %v1459_v51 = vld [vmem:[%s1684_s19 + $0xc] ss:$16 sps:$4 sm:$0xff]   ;;  %v1434_v52 = vld [vmem:[%s1788_s1 + $0xb0] ss:$8 sps:$4 sm:$0xff]  }
  0x1e   : > { %770 = vmatpush1.bf16.msra.mxu0 %v1386_v18  ;;  %v1432_v50 = vld [vmem:[%s1788_s1 + $0x1b4] ss:$8 sps:$4 sm:$0xff]   ;;  %793 = vmatprep.mubr.bf16.mxu0 %v1456_v49  ;;  %v1435_v53 = vld [vmem:[%s1788_s1 + $0x1b0] ss:$8 sps:$4 sm:$0xff]   ;;  %v1436_v54 = vld [vmem:[%s1788_s1 + $0xa4] ss:$8 sps:$4 sm:$0xff]  }
  0x1f   : > { %843 = vmatpush1.bf16.msra.mxu1 %v1387_v19  ;;  %771 = vmatprep.subr.bf16.mxu0 %v1388_v20  ;;  %v1438_v55 = vld [vmem:[%s1788_s1 + $0x1a4] ss:$8 sps:$4 sm:$0xff]   ;;  %v1440_v56 = vld [vmem:[%s1788_s1 + $0xa0] ss:$8 sps:$4 sm:$0xff]   ;;  %v1442_v58 = vld [vmem:[%s1788_s1 + $0x94] ss:$8 sps:$4 sm:$0xff]  }
  0x20   : > { %844 = vmatprep.subr.bf16.mxu1 %v1390_v21  ;;  %866 = vmatprep.mubr.bf16.mxu1 %v1459_v51  ;;  %v1441_v57 = vld [vmem:[%s1788_s1 + $0x1a0] ss:$8 sps:$4 sm:$0xff]   ;;  %v1444_v59 = vld [vmem:[%s1788_s1 + $0x194] ss:$8 sps:$4 sm:$0xff]   ;;  %v1446_v60 = vld [vmem:[%s1788_s1 + $0x90] ss:$8 sps:$4 sm:$0xff]  }
  0x21   : > { %v1447_v61 = vld [vmem:[%s1788_s1 + $0x190] ss:$8 sps:$4 sm:$0xff]   ;;  %v1448_v62 = vld [vmem:[%s1788_s1 + $0x84] ss:$8 sps:$4 sm:$0xff]   ;;  %v1452_v0 = vld [vmem:[%s1788_s1 + $0x80] ss:$8 sps:$4 sm:$0xff]  }
  0x22   : > { %772 = vmatpush1.bf16.msra.mxu0 %v1392_v22  ;;  %v1450_v63 = vld [vmem:[%s1788_s1 + $0x184] ss:$8 sps:$4 sm:$0xff]   ;;  %v1453_v1 = vld [vmem:[%s1788_s1 + $0x180] ss:$8 sps:$4 sm:$0xff]   ;;  %vm1082_vm0 = vcmask 1040384   ;;  %s1325_s30 = sshll.u32 %s1798_s12, 2 }
  0x23   : > { %845 = vmatpush1.bf16.msra.mxu1 %v1393_v23  ;;  %773 = vmatprep.subr.bf16.mxu0 %v1394_v24  ;;  %v1454_v2 = vld [vmem:[%s1684_s19] ss:$16 sps:$4 sm:$0xff]   ;;  %v1457_v3 = vld [vmem:[%s1684_s19 + $0x8] ss:$16 sps:$4 sm:$0xff]   ;;  %v1460_v4 = vld [vmem:[%s1684_s19 + $0x24] ss:$16 sps:$4 sm:$0xff]   ;;  %s244_s21 = scalar_lea.vmem %s1790_s3, %s1325_s30 }
  0x24   : > { %846 = vmatprep.subr.bf16.mxu1 %v1396_v25  ;;  %v1462_v5 = vld [vmem:[%s1684_s19 + $0x2c] ss:$16 sps:$4 sm:$0xff]   ;;  %v1464_v6 = vld [vmem:[%s1684_s19 + $0x20] ss:$16 sps:$4 sm:$0xff]   ;;  %v1465_v7 = vld [vmem:[%s1684_s19 + $0x28] ss:$16 sps:$4 sm:$0xff]  }
  0x25   : > { %v1466_v8 = vld [vmem:[%s1684_s19 + $0x44] ss:$16 sps:$4 sm:$0xff]   ;;  %v1468_v9 = vld [vmem:[%s1684_s19 + $0x4c] ss:$16 sps:$4 sm:$0xff]   ;;  %v1470_v10 = vld [vmem:[%s1684_s19 + $0x40] ss:$16 sps:$4 sm:$0xff]  }
  0x26   : > { %774 = vmatpush1.bf16.msra.mxu0 %v1398_v26  ;;  %v1471_v11 = vld [vmem:[%s1684_s19 + $0x48] ss:$16 sps:$4 sm:$0xff]   ;;  %v1472_v12 = vld [vmem:[%s1684_s19 + $0x64] ss:$16 sps:$4 sm:$0xff]   ;;  %v1474_v13 = vld [vmem:[%s1684_s19 + $0x6c] ss:$16 sps:$4 sm:$0xff]  }
  0x27   : > { %847 = vmatpush1.bf16.msra.mxu1 %v1399_v27  ;;  %775 = vmatprep.subr.bf16.mxu0 %v1400_v28  ;;  %v1476_v14 = vld [vmem:[%s1684_s19 + $0x60] ss:$16 sps:$4 sm:$0xff]   ;;  %v1477_v15 = vld [vmem:[%s1684_s19 + $0x68] ss:$16 sps:$4 sm:$0xff]  }
  0x28   : > { %848 = vmatprep.subr.bf16.mxu1 %v1402_v29 }
  0x2a   : > { %776 = vmatpush1.bf16.msra.mxu0 %v1404_v30 }
  0x2b   : > { %849 = vmatpush1.bf16.msra.mxu1 %v1405_v31  ;;  %777 = vmatprep.subr.bf16.mxu0 %v1406_v32 }
  0x2c   : > { %850 = vmatprep.subr.bf16.mxu1 %v1408_v33 }
  0x2e   : > { %778 = vmatpush2.bf16.msra.mxu0 %v1410_v34 }
  0x2f   : > { %851 = vmatpush2.bf16.msra.mxu1 %v1411_v35  ;;  %779 = vmatprep.subr.bf16.mxu0 %v1412_v36 }
  0x30   : > { %852 = vmatprep.subr.bf16.mxu1 %v1414_v37 }
  0x32   : > { %780 = vmatpush2.bf16.msra.mxu0 %v1416_v38 }
  0x33   : > { %853 = vmatpush2.bf16.msra.mxu1 %v1417_v39  ;;  %781 = vmatprep.subr.bf16.mxu0 %v1418_v40 }
  0x34   : > { %854 = vmatprep.subr.bf16.mxu1 %v1420_v41 }
  0x36   : > { %782 = vmatpush2.bf16.msra.mxu0 %v1422_v42 }
  0x37   : > { %855 = vmatpush2.bf16.msra.mxu1 %v1423_v43  ;;  %783 = vmatprep.subr.bf16.mxu0 %v1424_v44 }
  0x38   : > { %856 = vmatprep.subr.bf16.mxu1 %v1426_v45 }
  0x3a   : > { %784 = vmatpush2.bf16.msra.mxu0 %v1428_v46 }
  0x3b   : > { %857 = vmatpush2.bf16.msra.mxu1 %v1429_v47  ;;  %785 = vmatprep.subr.bf16.mxu0 %v1430_v48 }
  0x3c   : > { %858 = vmatprep.subr.bf16.mxu1 %v1432_v50 }
  0x3e   : > { %786 = vmatpush2.bf16.msra.mxu0 %v1434_v52 }
  0x3f   : > { %859 = vmatpush2.bf16.msra.mxu1 %v1435_v53  ;;  %787 = vmatprep.subr.bf16.mxu0 %v1436_v54 }
  0x40   : > { %860 = vmatprep.subr.bf16.mxu1 %v1438_v55 }
  0x42   : > { %788 = vmatpush2.bf16.msra.mxu0 %v1440_v56 }
  0x43   : > { %861 = vmatpush2.bf16.msra.mxu1 %v1441_v57  ;;  %789 = vmatprep.subr.bf16.mxu0 %v1442_v58 }
  0x44   : > { %862 = vmatprep.subr.bf16.mxu1 %v1444_v59 }
  0x46   : > { %790 = vmatpush2.bf16.msra.mxu0 %v1446_v60 }
  0x47   : > { %863 = vmatpush2.bf16.msra.mxu1 %v1447_v61  ;;  %791 = vmatprep.subr.bf16.mxu0 %v1448_v62 }
  0x48   : > { %864 = vmatprep.subr.bf16.mxu1 %v1450_v63 }
  0x4a   : > { %792 = vmatpush2.bf16.msra.mxu0 %v1452_v0 }
  0x4b   : > { %865 = vmatpush2.bf16.msra.mxu1 %v1453_v1 }
  0x4d   : > { %794 = vmatmul.mubr.bf16.vlgmr.msra.gmra.mxu0 %v1454_v2 }
  0x4e   : > { %867 = vmatmul.mubr.bf16.vlgmr.msra.gmra.mxu1 %v1457_v3  ;;  %803 = vmatprep.mubr.bf16.mxu0 %v1460_v4 }
  0x4f   : > { %876 = vmatprep.mubr.bf16.mxu1 %v1462_v5 }
  0x55   : > { %804 = vmatmul.mubr.bf16.gmra.mxu0 %v1464_v6 }
  0x56   : > { %877 = vmatmul.mubr.bf16.gmra.mxu1 %v1465_v7  ;;  %813 = vmatprep.mubr.bf16.mxu0 %v1466_v8 }
  0x57   : > { %886 = vmatprep.mubr.bf16.mxu1 %v1468_v9 }
  0x5d   : > { %814 = vmatmul.mubr.bf16.gmra.mxu0 %v1470_v10 }
  0x5e   : > { %887 = vmatmul.mubr.bf16.gmra.mxu1 %v1471_v11  ;;  %823 = vmatprep.mubr.bf16.mxu0 %v1472_v12 }
  0x5f   : > { %896 = vmatprep.mubr.bf16.mxu1 %v1474_v13 }
  0x65   : > { %824 = vmatmul.mubr.bf16.gmra.mxu0 %v1476_v14 }
  0x66   : > { %897 = vmatmul.mubr.bf16.gmra.mxu1 %v1477_v15 }
 0x10d   : > { %v795_v16 = vpop.f32.mrf.mxu0 }
 0x10e   : > { %v868_v17 = vpop.f32.mrf.mxu1 }
 0x10f   : > { %v797_v18 = vpop.f32.mrf.mxu0  ;;  %v869_v20 = vadd.f32 %v868_v17, %v795_v16 }
 0x110   : > { %v870_v19 = vpop.f32.mrf.mxu1 }
 0x111   : > { %v871_v21 = vadd.f32 %v870_v19, %v797_v18  ;;  %v799_v22 = vpop.f32.mrf.mxu0  ;;  %v1040_v47 = vmul.f32 %v869_v20, %v869_v20 }
 0x112   : > { %v872_v23 = vpop.f32.mrf.mxu1 }
 0x113   : > { %v1326_v24 = vpack.c.bf16 %v871_v21, %v869_v20  ;;  %v801_v25 = vpop.f32.mrf.mxu0  ;;  %v873_v27 = vadd.f32 %v872_v23, %v799_v22  ;;  %v1041_v63 = vmul.f32 %v871_v21, %v871_v21 }
 0x114   : > { %v874_v26 = vpop.f32.mrf.mxu1 }
 0x115   : > { %1006 = vst [vmem:[%s1763_s18] sm:$0xff] %v1326_v24  ;;  %v875_v28 = vadd.f32 %v874_v26, %v801_v25  ;;  %v805_v29 = vpop.f32.mrf.mxu0  ;;  %v1042_v43 = vmul.f32 %v873_v27, %v873_v27  ;;  %v1014_v50 = vadd.f32 %v873_v27, %v869_v20 }
 0x116   : > { %v878_v30 = vpop.f32.mrf.mxu1 }
 0x117   : > { %v1327_v31 = vpack.c.bf16 %v875_v28, %v873_v27  ;;  %v807_v32 = vpop.f32.mrf.mxu0  ;;  %v879_v34 = vadd.f32 %v878_v30, %v805_v29  ;;  %v1056_v54 = vadd.f32 %v1042_v43, %v1040_v47  ;;  %v1027_v55 = vadd.f32 %v875_v28, %v871_v21 }
 0x118   : > { %v880_v33 = vpop.f32.mrf.mxu1  ;;  %v1043_v56 = vmul.f32 %v875_v28, %v875_v28 }
 0x119   : > { %1007 = vst [vmem:[%s1763_s18 + $0x8] sm:$0xff] %v1327_v31  ;;  %v881_v35 = vadd.f32 %v880_v33, %v807_v32  ;;  %v809_v36 = vpop.f32.mrf.mxu0  ;;  %v1044_v51 = vmul.f32 %v879_v34, %v879_v34  ;;  %v1015_v59 = vadd.f32 %v1014_v50, %v879_v34 }
 0x11a   : > { %v882_v37 = vpop.f32.mrf.mxu1  ;;  %v1069_v8 = vadd.f32 %v1043_v56, %v1041_v63 }
 0x11b   : > { %v1328_v38 = vpack.c.bf16 %v881_v35, %v879_v34  ;;  %v811_v39 = vpop.f32.mrf.mxu0  ;;  %v883_v41 = vadd.f32 %v882_v37, %v809_v36  ;;  %v1028_v0 = vadd.f32 %v1027_v55, %v881_v35  ;;  %v1045_v1 = vmul.f32 %v881_v35, %v881_v35 }
 0x11c   : > { %v884_v40 = vpop.f32.mrf.mxu1  ;;  %v1057_v4 = vadd.f32 %v1056_v54, %v1044_v51 }
 0x11d   : > { %1008 = vst [vmem:[%s1763_s18 + $0x10] sm:$0xff] %v1328_v38  ;;  %v885_v42 = vadd.f32 %v884_v40, %v811_v39  ;;  %v815_v44 = vpop.f32.mrf.mxu0  ;;  %v1046_v60 = vmul.f32 %v883_v41, %v883_v41  ;;  %v1016_v5 = vadd.f32 %v1015_v59, %v883_v41  ;;  %v1070_v17 = vadd.f32 %v1069_v8, %v1045_v1 }
 0x11e   : > { %v888_v45 = vpop.f32.mrf.mxu1 }
 0x11f   : > { %v1329_v46 = vpack.c.bf16 %v885_v42, %v883_v41  ;;  %v817_v48 = vpop.f32.mrf.mxu0  ;;  %v889_v52 = vadd.f32 %v888_v45, %v815_v44  ;;  %v1029_v9 = vadd.f32 %v1028_v0, %v885_v42  ;;  %v1047_v10 = vmul.f32 %v885_v42, %v885_v42 }
 0x120   : > { %v890_v49 = vpop.f32.mrf.mxu1  ;;  %v1058_v13 = vadd.f32 %v1057_v4, %v1046_v60 }
 0x121   : > { %1009 = vst [vmem:[%s1763_s18 + $0x18] sm:$0xff] %v1329_v46  ;;  %v891_v53 = vadd.f32 %v890_v49, %v817_v48  ;;  %v819_v57 = vpop.f32.mrf.mxu0  ;;  %v1048_v6 = vmul.f32 %v889_v52, %v889_v52  ;;  %v1017_v14 = vadd.f32 %v1016_v5, %v889_v52  ;;  %v1071_v26 = vadd.f32 %v1070_v17, %v1047_v10 }
 0x122   : > { %v892_v58 = vpop.f32.mrf.mxu1 }
 0x123   : > { %v1330_v61 = vpack.c.bf16 %v891_v53, %v889_v52  ;;  %v893_v62 = vadd.f32 %v892_v58, %v819_v57  ;;  %v821_v2 = vpop.f32.mrf.mxu0  ;;  %v1030_v18 = vadd.f32 %v1029_v9, %v891_v53  ;;  %v1049_v19 = vmul.f32 %v891_v53, %v891_v53 }
 0x124   : > { %v894_v3 = vpop.f32.mrf.mxu1  ;;  %v1059_v23 = vadd.f32 %v1058_v13, %v1048_v6 }
 0x125   : > { %1010 = vst [vmem:[%s1763_s18 + $0x20] sm:$0xff] %v1330_v61  ;;  %v895_v7 = vadd.f32 %v894_v3, %v821_v2  ;;  %v825_v11 = vpop.f32.mrf.mxu0  ;;  %v1050_v15 = vmul.f32 %v893_v62, %v893_v62  ;;  %v1018_v24 = vadd.f32 %v1017_v14, %v893_v62  ;;  %v1072_v36 = vadd.f32 %v1071_v26, %v1049_v19 }
 0x126   : > { %v898_v12 = vpop.f32.mrf.mxu1 }
 0x127   : > { %v1331_v16 = vpack.c.bf16 %v895_v7, %v893_v62  ;;  %v899_v20 = vadd.f32 %v898_v12, %v825_v11  ;;  %v827_v21 = vpop.f32.mrf.mxu0  ;;  %v1031_v27 = vadd.f32 %v1030_v18, %v895_v7  ;;  %v1051_v28 = vmul.f32 %v895_v7, %v895_v7 }
 0x128   : > { %v900_v22 = vpop.f32.mrf.mxu1  ;;  %v1060_v32 = vadd.f32 %v1059_v23, %v1050_v15 }
 0x129   : > { %1011 = vst [vmem:[%s1763_s18 + $0x28] sm:$0xff] %v1331_v16  ;;  %v901_v25 = vadd.f32 %v900_v22, %v827_v21  ;;  %v1052_v29 = vmul.f32 %v899_v20, %v899_v20  ;;  %v829_v30 = vpop.f32.mrf.mxu0  ;;  %v1019_v33 = vadd.f32 %v1018_v24, %v899_v20  ;;  %v1073_v45 = vadd.f32 %v1072_v36, %v1051_v28 }
 0x12a   : > { %v902_v31 = vpop.f32.mrf.mxu1 }
 0x12b   : > { %v1332_v34 = vpack.c.bf16 %v901_v25, %v899_v20  ;;  %v903_v35 = vadd.f32 %v902_v31, %v829_v30  ;;  %v1032_v37 = vadd.f32 %v1031_v27, %v901_v25  ;;  %v1053_v38 = vmul.f32 %v901_v25, %v901_v25  ;;  %v831_v39 = vpop.f32.mrf.mxu0 }
 0x12c   : > { %v904_v40 = vpop.f32.mrf.mxu1  ;;  %v1061_v41 = vadd.f32 %v1060_v32, %v1052_v29 }
 0x12d   : > { %1012 = vst [vmem:[%s1763_s18 + $0x30] sm:$0xff] %v1332_v34  ;;  %v1020_v42 = vadd.f32 %v1019_v33, %v903_v35  ;;  %v1054_v43 = vmul.f32 %v903_v35, %v903_v35  ;;  %v905_v44 = vadd.f32 %v904_v40, %v831_v39  ;;  %v1074_v50 = vadd.f32 %v1073_v45, %v1053_v38 }
 0x12f   : > { %v1021_v46 = vrot.slane %v1020_v42, 4  ;;  %v1062_v47 = vadd.f32 %v1061_v41, %v1054_v43  ;;  %v1333_v48 = vpack.c.bf16 %v905_v44, %v903_v35  ;;  %v1033_v49 = vadd.f32 %v1032_v37, %v905_v44 }
 0x130   : > { %v1055_v51 = vmul.f32 %v905_v44, %v905_v44 }
 0x131   : > { %v1022_v52 = vadd.f32 %v1021_v46, %v1020_v42  ;;  %v1063_v53 = vrot.slane %v1062_v47, 4  ;;  %1013 = vst [vmem:[%s1763_s18 + $0x38] sm:$0xff] %v1333_v48  ;;  %v1034_v54 = vrot.slane %v1033_v49, 4 }
 0x132   : > { %v1075_v55 = vadd.f32 %v1074_v50, %v1055_v51 }
 0x133   : > { %v1023_v56 = vrot.slane %v1022_v52, 2  ;;  %v1064_v57 = vadd.f32 %v1063_v53, %v1062_v47  ;;  %v1035_v58 = vadd.f32 %v1034_v54, %v1033_v49 }
 0x134   : > { %v1076_v59 = vrot.slane %v1075_v55, 4 }
 0x135   : > { %v1065_v60 = vrot.slane %v1064_v57, 2  ;;  %v1036_v61 = vrot.slane %v1035_v58, 2  ;;  %v1024_v62 = vadd.f32 %v1023_v56, %v1022_v52 }
 0x136   : > { %v1077_v63 = vadd.f32 %v1076_v59, %v1075_v55 }
 0x137   : > { %v1066_v0 = vadd.f32 %v1065_v60, %v1064_v57  ;;  %v1037_v1 = vadd.f32 %v1036_v61, %v1035_v58  ;;  %v1025_v4 = vrot.slane %v1024_v62, 1 }
 0x138   : > { %v1078_v2 = vrot.slane %v1077_v63, 2 }
 0x139   : > { %v1067_v3 = vrot.slane %v1066_v0, 1  ;;  %v1038_v5 = vrot.slane %v1037_v1, 1  ;;  %v1026_v9 = vadd.f32 %v1025_v4, %v1024_v62 }
 0x13a   : > { %v1079_v6 = vadd.f32 %v1078_v2, %v1077_v63 }
 0x13b   : > { %v1068_v7 = vadd.f32 %v1067_v3, %v1066_v0  ;;  %v1039_v10 = vadd.f32 %v1038_v5, %v1037_v1 }
 0x13c   : > { %v1080_v8 = vrot.slane %v1079_v6, 1 }
 0x13d   : > { %v1083_v12 = vsel %vm1082_vm0, %v1026_v9, %v1068_v7 }
 0x13e   : > { %v1081_v11 = vadd.f32 %v1080_v8, %v1079_v6 }
 0x140   : > { %v1084_v13 = vsel %vm1082_vm0, %v1039_v10, %v1081_v11 }
 0x141   : > { %v1087_v14 = vcombine.low %v1083_v12, %v1084_v13 }
 0x143   : > { %1320 = vst.sshfl [vmem:[%s244_s21] sm:$0x33 pattern:$0x76325410] %v1087_v14 }
 0x144 PF: > { %s14_s14 = sadd.s32 1, %s1500_s14   ;;  %s1791_s12 = smov %s1496_s13 }
 0x145   : > { %p11_p6 = scmp.ge.s32.totalorder %s14_s14, 4   ;;  %s1792_s13 = smov %s1794_s15 }
 0x147   :  { %13 = sbr.rel (!%p11_p6) target bundleno = 2 (0x2), region = 81 }

// kernel: squeeze.102
= control target key start
LH: loop header
LB: loop body
LE: loop exit
PB: predicated region body
PF: predicated region fallthrough
CT: control target
= control target key end

     0   :  { %vm12_vm0 = vcmask 523264   ;;  %s67_s0 = inlined_call_operand.vmem [shape: f32[2,256], index: 0, kind: input, shape index: {}]   ;;  %s68_s1 = inlined_call_operand.vmem [shape: f32[2,4,64], index: 1, kind: output, shape index: {}]  }
   0x1   :  { %v41_v0 = vld [vmem:[%s67_s0 + $0x2] sm:$0x3]  ;;  %v9_v1 = vld [vmem:[%s67_s0] sm:$0x3]  ;;  %s44_s0 = smov 64  }
   0x2   :  { %8 = vst [vmem:[#allocation1 + $0x8] sm:$0x3] %v41_v0  ;;  %10 = vst [vmem:[#allocation1] sm:$0x3] %v9_v1 }
   0x9   :  { %v11_v2 = vld [vmem:[#allocation1] sm:$0x3]   ;;  %v15_v3 = vld [vmem:[#allocation1 + $0x8] sm:$0x3]  }
   0xa   :  { %v19_v4 = vld.sshfl [vmem:[#allocation1] sm:$0xff pattern:$0x99999180]   ;;  %13 = vst.msk [vmem:[#allocation0] ss:$8 sm:$0x3] %vm12_vm0, %v11_v2  }
   0xb   :  { %18 = vst.msk [vmem:[#allocation0 + $0x2] ss:$8 sm:$0x3] %vm12_vm0, %v15_v3   ;;  %20 = vrot.lane.b32.xlu0 %v19_v4, %s44_s0 }
  0x7d   :  { %v21_v5 = vpop.permute.xlu0 %20  }
  0x7e   :  { %24 = vst.msk [vmem:[#allocation0 + $0x1] ss:$2 sm:$0x3] %vm12_vm0, %v21_v5   ;;  %26 = vst.msk [vmem:[#allocation0 + $0x5] ss:$2 sm:$0xc] %vm12_vm0, %v21_v5  }
  0x85   :  { %v31_v6 = vld [vmem:[#allocation0] sm:$0xf]  ;;  %v36_v7 = vld [vmem:[#allocation0 + $0x8] sm:$0xf] }
  0x86   :  { %34 = vst [vmem:[%s68_s1] sm:$0xf] %v31_v6  ;;  %42 = vst [vmem:[%s68_s1 + $0x4] sm:$0xf] %v36_v7 }

// kernel: generator_forward.68
= control target key start
LH: loop header
LB: loop body
LE: loop exit
PB: predicated region body
PF: predicated region fallthrough
CT: control target
= control target key end

     0   :  { %s620_s12 = smov 0   ;;  %s622_s13 = smov 0   ;;  %s727_s0 = inlined_call_operand.vmem [shape: bf16[2,64,256], index: 0, kind: input, shape index: {}]   ;;  %s728_s1 = inlined_call_operand.vmem [shape: f32[2,1,256], index: 1, kind: input, shape index: {}]   ;;  %s729_s2 = inlined_call_operand.vmem [shape: f32[2,1,256], index: 2, kind: input, shape index: {}]   ;;  %s730_s3 = inlined_call_operand.vmem [shape: bf16[2,64,256], index: 3, kind: output, shape index: {}]  }
   0x1   :  { %s624_s14 = smov 0  }
   0x2 LB: > { %s25_s15 = sadd.s32 1, %s594_s13  ;;  %p525_p0 = scmp.ge.s32.totalorder %s598_s14, 1  ;;  %s598_s14 = sphi %s624_s14, %s13_s14   ;;  %s594_s13 = sphi %s622_s13, %s732_s13   ;;  %s590_s12 = sphi %s620_s12, %s731_s12  }
   0x3   : > { %p27_p1 = scmp.ge.s32.totalorder %s25_s15, 2  ;;  %p177_p2 = scmp.lt.s32.totalorder %s598_s14, 3 }
   0x5   : > { %s734_s15 = smov (%p27_p1, %s25_s15), 0  ;;  %p178_p3 = pnand %p525_p0, %p177_p2 }
   0x6   : > { %p220_p4 = scmp.lt.s32.totalorder (!%p178_p3), %s590_s12, 1 }
   0x7   : > { %181 = sbr.rel (%p178_p3) target bundleno = 40 (0x28), region = 32 }
   0xc   : > { %v275_v0 = vlaneseq  ;;  %s736_s12 = smov (!%p220_p4, %s590_s12), 1 }
   0xd   : > { %s542_s16 = sshll.u32 %s736_s12, 6  ;;  %s528_s17 = sshll.u32 %s736_s12, 1 }
   0xe   : > { %v276_v1 = vshrl.u32 %v275_v0, 7  ;;  %s647_s20 = scalar_lea.vmem %s727_s0, %s542_s16  ;;  %s233_s23 = scalar_lea.vmem %s728_s1, %s528_s17 }
   0xf   : > { %s237_s26 = scalar_lea.vmem %s729_s2, %s528_s17  ;;  %v249_v4 = vld [vmem:[%s647_s20] sm:$0xff]  ;;  %v250_v6 = vld [vmem:[%s647_s20 + $0x8] sm:$0xff]  ;;  %v251_v12 = vld [vmem:[%s647_s20 + $0x10] sm:$0xff]  ;;  %s687_s29 = scalar_lea.vmem %s730_s3, %s542_s16 }
  0x10   : > { %v277_v2 = vsub.s32 0, %v276_v1  ;;  %v281_v3 = vsub.s32 1, %v276_v1  ;;  %v273_v5 = vld [vmem:[%s233_s23] sm:$0x3]  ;;  %v257_v7 = vunpack.c.l.bf16 %v249_v4  ;;  %v258_v8 = vunpack.c.h.bf16 %v249_v4  ;;  %v252_v13 = vld [vmem:[%s647_s20 + $0x18] sm:$0xff]  ;;  %v254_v43 = vld [vmem:[%s647_s20 + $0x28] sm:$0xff] }
  0x11   : > { %v301_v11 = vld [vmem:[%s237_s26] sm:$0x3]  ;;  %v259_v16 = vunpack.c.l.bf16 %v250_v6  ;;  %v260_v17 = vunpack.c.h.bf16 %v250_v6  ;;  %v261_v20 = vunpack.c.l.bf16 %v251_v12  ;;  %v262_v21 = vunpack.c.h.bf16 %v251_v12  ;;  %v255_v48 = vld [vmem:[%s647_s20 + $0x30] sm:$0xff]  ;;  %v256_v53 = vld [vmem:[%s647_s20 + $0x38] sm:$0xff] }
  0x12   : > { %v657_v9 = vrot.slane %v273_v5, %v277_v2  ;;  %v659_v10 = vrot.slane %v273_v5, %v281_v3  ;;  %v663_v14 = vrot.slane %v301_v11, %v277_v2  ;;  %v665_v15 = vrot.slane %v301_v11, %v281_v3  ;;  %v253_v34 = vld [vmem:[%s647_s20 + $0x20] sm:$0xff] }
  0x13   : > { %v263_v24 = vunpack.c.l.bf16 %v252_v13  ;;  %v264_v25 = vunpack.c.h.bf16 %v252_v13  ;;  %v265_v47 = vunpack.c.l.bf16 %v253_v34  ;;  %v266_v52 = vunpack.c.h.bf16 %v253_v34 }
  0x14   : > { %v285_v18 = vmul.f32 %v657_v9, %v257_v7  ;;  %v286_v19 = vmul.f32 %v659_v10, %v258_v8  ;;  %v287_v22 = vmul.f32 %v657_v9, %v259_v16  ;;  %v288_v23 = vmul.f32 %v659_v10, %v260_v17 }
  0x15   : > { %v289_v28 = vmul.f32 %v657_v9, %v261_v20  ;;  %v290_v29 = vmul.f32 %v659_v10, %v262_v21  ;;  %v291_v32 = vmul.f32 %v657_v9, %v263_v24  ;;  %v292_v33 = vmul.f32 %v659_v10, %v264_v25 }
  0x16   : > { %v313_v26 = vadd.f32 %v663_v14, %v285_v18  ;;  %v314_v27 = vadd.f32 %v665_v15, %v286_v19  ;;  %v315_v30 = vadd.f32 %v663_v14, %v287_v22  ;;  %v316_v31 = vadd.f32 %v665_v15, %v288_v23 }
  0x17   : > { %v317_v37 = vadd.f32 %v663_v14, %v289_v28  ;;  %v318_v38 = vadd.f32 %v665_v15, %v290_v29  ;;  %v319_v41 = vadd.f32 %v663_v14, %v291_v32  ;;  %v320_v42 = vadd.f32 %v665_v15, %v292_v33 }
  0x18   : > { %v329_v35 = vmax.f32 %v313_v26, 0.0  ;;  %v330_v36 = vmax.f32 %v314_v27, 0.0  ;;  %v331_v39 = vmax.f32 %v315_v30, 0.0  ;;  %v332_v40 = vmax.f32 %v316_v31, 0.0 }
  0x19   : > { %v333_v45 = vmax.f32 %v317_v37, 0.0  ;;  %v334_v46 = vmax.f32 %v318_v38, 0.0  ;;  %v335_v50 = vmax.f32 %v319_v41, 0.0  ;;  %v336_v51 = vmax.f32 %v320_v42, 0.0 }
  0x1a   : > { %v544_v44 = vpack.c.bf16 %v330_v36, %v329_v35  ;;  %v545_v49 = vpack.c.bf16 %v332_v40, %v331_v39  ;;  %v293_v55 = vmul.f32 %v657_v9, %v265_v47  ;;  %v267_v56 = vunpack.c.l.bf16 %v254_v43 }
  0x1b   : > { %v546_v54 = vpack.c.bf16 %v334_v46, %v333_v45  ;;  %v268_v57 = vunpack.c.h.bf16 %v254_v43  ;;  %v547_v58 = vpack.c.bf16 %v336_v51, %v335_v50  ;;  %v294_v59 = vmul.f32 %v659_v10, %v266_v52 }
  0x1c   : > { %393 = vst [vmem:[%s687_s29] sm:$0xff] %v544_v44  ;;  %394 = vst [vmem:[%s687_s29 + $0x8] sm:$0xff] %v545_v49  ;;  %v269_v60 = vunpack.c.l.bf16 %v255_v48  ;;  %v270_v61 = vunpack.c.h.bf16 %v255_v48  ;;  %v321_v62 = vadd.f32 %v663_v14, %v293_v55  ;;  %v295_v63 = vmul.f32 %v657_v9, %v267_v56 }
  0x1d   : > { %395 = vst [vmem:[%s687_s29 + $0x10] sm:$0xff] %v546_v54  ;;  %v296_v0 = vmul.f32 %v659_v10, %v268_v57  ;;  %v271_v1 = vunpack.c.l.bf16 %v256_v53  ;;  %396 = vst [vmem:[%s687_s29 + $0x18] sm:$0xff] %v547_v58  ;;  %v322_v2 = vadd.f32 %v665_v15, %v294_v59  ;;  %v272_v5 = vunpack.c.h.bf16 %v256_v53 }
  0x1e   : > { %v297_v3 = vmul.f32 %v657_v9, %v269_v60  ;;  %v298_v4 = vmul.f32 %v659_v10, %v270_v61  ;;  %v337_v6 = vmax.f32 %v321_v62, 0.0  ;;  %v323_v7 = vadd.f32 %v663_v14, %v295_v63 }
  0x1f   : > { %v324_v8 = vadd.f32 %v665_v15, %v296_v0  ;;  %v299_v11 = vmul.f32 %v657_v9, %v271_v1  ;;  %v338_v12 = vmax.f32 %v322_v2, 0.0  ;;  %v300_v17 = vmul.f32 %v659_v10, %v272_v5 }
  0x20   : > { %v325_v13 = vadd.f32 %v663_v14, %v297_v3  ;;  %v326_v16 = vadd.f32 %v665_v15, %v298_v4  ;;  %v339_v18 = vmax.f32 %v323_v7, 0.0 }
  0x21   : > { %v340_v19 = vmax.f32 %v324_v8, 0.0  ;;  %v327_v20 = vadd.f32 %v663_v14, %v299_v11  ;;  %v548_v21 = vpack.c.bf16 %v338_v12, %v337_v6  ;;  %v328_v24 = vadd.f32 %v665_v15, %v300_v17 }
  0x22   : > { %v341_v22 = vmax.f32 %v325_v13, 0.0  ;;  %v342_v23 = vmax.f32 %v326_v16, 0.0 }
  0x23   : > { %v549_v9 = vpack.c.bf16 %v340_v19, %v339_v18  ;;  %v343_v25 = vmax.f32 %v327_v20, 0.0  ;;  %397 = vst [vmem:[%s687_s29 + $0x20] sm:$0xff] %v548_v21  ;;  %v344_v27 = vmax.f32 %v328_v24, 0.0 }
  0x24   : > { %v550_v26 = vpack.c.bf16 %v342_v23, %v341_v22 }
  0x25   : > { %398 = vst [vmem:[%s687_s29 + $0x28] sm:$0xff] %v549_v9  ;;  %v551_v28 = vpack.c.bf16 %v344_v27, %v343_v25 }
  0x26   : > { %399 = vst [vmem:[%s687_s29 + $0x30] sm:$0xff] %v550_v26 }
  0x27   : > { %400 = vst [vmem:[%s687_s29 + $0x38] sm:$0xff] %v551_v28 }
  0x28 PF: > { %s13_s14 = sadd.s32 1, %s598_s14   ;;  %s731_s12 = smov %s594_s13 }
  0x29   : > { %p10_p5 = scmp.ge.s32.totalorder %s13_s14, 4   ;;  %s732_s13 = smov %s734_s15 }
  0x2b   :  { %12 = sbr.rel (!%p10_p5) target bundleno = 2 (0x2), region = 68 }

// kernel: generator_forward.69
= control target key start
LH: loop header
LB: loop body
LE: loop exit
PB: predicated region body
PF: predicated region fallthrough
CT: control target
= control target key end

     0   :  { %s2978_s12 = smov 0   ;;  %s2980_s13 = smov 0   ;;  %s3700_s0 = inlined_call_operand.vmem [shape: bf16[512,3200], index: 0, kind: input, shape index: {}]   ;;  %s3701_s1 = inlined_call_operand.vmem [shape: bf16[3200,128], index: 1, kind: input, shape index: {}]   ;;  %s3702_s2 = inlined_call_operand.vmem [shape: f32[1,128], index: 2, kind: input, shape index: {}]   ;;  %s3703_s3 = inlined_call_operand.vmem [shape: f32[512,128], index: 3, kind: output, shape index: {}]  }
   0x1   :  { %s2982_s14 = smov 0   ;;  %s2984_s15 = smov 0  }
   0x2   :  { %s2986_s16 = smov 0   ;;  %s2988_s17 = smov 0  }
   0x3   :  { %s2990_s18 = smov 0  }
   0x4 LB: > { %s22_s19 = sadd.s32 1, %s2947_s16  ;;  %s25_s20 = sadd.s32 1, %s2951_s17  ;;  %s2955_s18 = sphi %s2990_s18, %s13_s18   ;;  %s2951_s17 = sphi %s2988_s17, %s3755_s17   ;;  %s2947_s16 = sphi %s2986_s16, %s3754_s16   ;;  %s2943_s15 = sphi %s2984_s15, %s3753_s15   ;;  %s2939_s14 = sphi %s2982_s14, %s3752_s14   ;;  %s2935_s13 = sphi %s2980_s13, %s3751_s13   ;;  %s2931_s12 = sphi %s2978_s12, %s3750_s12  }
   0x5   : > { %p23_p0 = scmp.ge.s32.totalorder %s22_s19, 5  ;;  %p41_p1 = scmp.ne.s32.totalorder %s2935_s13, %s2931_s12 }
   0x6   : > { %p42_p2 = scmp.eq.s32.totalorder %s2955_s18, 0  ;;  %s34_s24 = sadd.s32 1, %s2935_s13 }
   0x7   : > { %s3757_s19 = smov (%p23_p0, %s22_s19), 0  ;;  %s3759_s20 = smov (!%p23_p0, %s25_s20), %s2951_s17 }
   0x8   : > { %p43_p3 = por %p42_p2, %p41_p1  ;;  %p27_p4 = scmp.ge.s32.totalorder %s3759_s20, 2 }
   0x9   : > { %s30_s21 = ssub.s32 %s2947_s16, %s3757_s19  ;;  %p2116_p6 = scmp.ge.s32.totalorder %s2955_s18, 10 }
   0xa   : > { %s3761_s20 = smov (%p27_p4, %s3759_s20), 0 }
   0xb   : > { %s29_s22 = ssub.s32 %s2951_s17, %s3761_s20  ;;  %143 = sbr.rel (%p2116_p6) target bundleno = 78 (0x4e), region = 20 }
   0xc   : > { %s31_s23 = sor.u32 %s30_s21, %s29_s22 }
   0xd   : > { %p32_p5 = scmp.eq.s32.totalorder %s31_s23, 0 }
   0xf   : > { %s3029_s25 = scalar_select %p32_p5, %s2935_s13, %s34_s24  }
  0x10   : > { %146 = sbr.rel (!%p43_p3) target bundleno = 78 (0x4e), region = 24  ;;  %s148_s26 = sand.u32 (%p43_p3), 1, %s2935_s13  }
  0x11   : > { %s152_s27 = smul.u32 (%p43_p3), 5, %s2947_s16 }
  0x12   : > { %s2625_s28 = smul.u32 (%p43_p3), 640, %s148_s26 }
  0x13   : > { %s2626_s29 = smul.u32 (%p43_p3), 800, %s2951_s17 }
  0x14   : > { %s3043_s8 = scalar_lea.vmem (%p43_p3), [#allocation3], %s2625_s28 }
  0x15   : > { %s154_s30 = sadd.s32 %s2626_s29, %s152_s27 }
  0x16   : > { %s2119_s4 = sshll.u32 %s154_s30, 2 }
  0x17   : > { %s3038_s7 = scalar_lea.vmem %s3700_s0, %s2119_s4 }
  0x18   : > { %v171_v0 = vld [vmem:[%s3038_s7] sm:$0xff]  ;;  %v173_v1 = vld [vmem:[%s3038_s7 + $0x8] sm:$0xff]  ;;  %v181_v5 = vld [vmem:[%s3038_s7 + $0xd0] sm:$0xff] }
  0x19   : > { %v175_v2 = vld [vmem:[%s3038_s7 + $0x64] sm:$0xff]  ;;  %172 = vst [vmem:[%s3043_s8] sm:$0xff] %v171_v0  ;;  %174 = vst [vmem:[%s3043_s8 + $0x8] sm:$0xff] %v173_v1  ;;  %v177_v3 = vld [vmem:[%s3038_s7 + $0x6c] sm:$0xff] }
  0x1a   : > { %176 = vst [vmem:[%s3043_s8 + $0x14] sm:$0xff] %v175_v2  ;;  %v179_v4 = vld [vmem:[%s3038_s7 + $0xc8] sm:$0xff]  ;;  %178 = vst [vmem:[%s3043_s8 + $0x1c] sm:$0xff] %v177_v3  ;;  %v185_v7 = vld [vmem:[%s3038_s7 + $0x134] sm:$0xff] }
  0x1b   : > { %180 = vst [vmem:[%s3043_s8 + $0x28] sm:$0xff] %v179_v4  ;;  %182 = vst [vmem:[%s3043_s8 + $0x30] sm:$0xff] %v181_v5  ;;  %v183_v6 = vld [vmem:[%s3038_s7 + $0x12c] sm:$0xff]  ;;  %v189_v9 = vld [vmem:[%s3038_s7 + $0x198] sm:$0xff] }
  0x1c   : > { %v187_v8 = vld [vmem:[%s3038_s7 + $0x190] sm:$0xff]  ;;  %184 = vst [vmem:[%s3043_s8 + $0x3c] sm:$0xff] %v183_v6  ;;  %186 = vst [vmem:[%s3043_s8 + $0x44] sm:$0xff] %v185_v7  ;;  %v193_v11 = vld [vmem:[%s3038_s7 + $0x1fc] sm:$0xff] }
  0x1d   : > { %188 = vst [vmem:[%s3043_s8 + $0x50] sm:$0xff] %v187_v8  ;;  %v191_v10 = vld [vmem:[%s3038_s7 + $0x1f4] sm:$0xff]  ;;  %190 = vst [vmem:[%s3043_s8 + $0x58] sm:$0xff] %v189_v9  ;;  %v197_v13 = vld [vmem:[%s3038_s7 + $0x260] sm:$0xff] }
  0x1e   : > { %192 = vst [vmem:[%s3043_s8 + $0x64] sm:$0xff] %v191_v10  ;;  %194 = vst [vmem:[%s3043_s8 + $0x6c] sm:$0xff] %v193_v11  ;;  %v195_v12 = vld [vmem:[%s3038_s7 + $0x258] sm:$0xff]  ;;  %v201_v15 = vld [vmem:[%s3038_s7 + $0x2c4] sm:$0xff] }
  0x1f   : > { %v199_v14 = vld [vmem:[%s3038_s7 + $0x2bc] sm:$0xff]  ;;  %196 = vst [vmem:[%s3043_s8 + $0x78] sm:$0xff] %v195_v12  ;;  %198 = vst [vmem:[%s3043_s8 + $0x80] sm:$0xff] %v197_v13  ;;  %v205_v17 = vld [vmem:[%s3038_s7 + $0x328] sm:$0xff] }
  0x20   : > { %200 = vst [vmem:[%s3043_s8 + $0x8c] sm:$0xff] %v199_v14  ;;  %v203_v16 = vld [vmem:[%s3038_s7 + $0x320] sm:$0xff]  ;;  %202 = vst [vmem:[%s3043_s8 + $0x94] sm:$0xff] %v201_v15  ;;  %v209_v19 = vld [vmem:[%s3038_s7 + $0x38c] sm:$0xff] }
  0x21   : > { %204 = vst [vmem:[%s3043_s8 + $0xa0] sm:$0xff] %v203_v16  ;;  %206 = vst [vmem:[%s3043_s8 + $0xa8] sm:$0xff] %v205_v17  ;;  %v207_v18 = vld [vmem:[%s3038_s7 + $0x384] sm:$0xff]  ;;  %v213_v21 = vld [vmem:[%s3038_s7 + $0x3f0] sm:$0xff] }
  0x22   : > { %v211_v20 = vld [vmem:[%s3038_s7 + $0x3e8] sm:$0xff]  ;;  %208 = vst [vmem:[%s3043_s8 + $0xb4] sm:$0xff] %v207_v18  ;;  %210 = vst [vmem:[%s3043_s8 + $0xbc] sm:$0xff] %v209_v19  ;;  %v217_v23 = vld [vmem:[%s3038_s7 + $0x454] sm:$0xff] }
  0x23   : > { %212 = vst [vmem:[%s3043_s8 + $0xc8] sm:$0xff] %v211_v20  ;;  %v215_v22 = vld [vmem:[%s3038_s7 + $0x44c] sm:$0xff]  ;;  %214 = vst [vmem:[%s3043_s8 + $0xd0] sm:$0xff] %v213_v21  ;;  %v221_v25 = vld [vmem:[%s3038_s7 + $0x4b8] sm:$0xff] }
  0x24   : > { %216 = vst [vmem:[%s3043_s8 + $0xdc] sm:$0xff] %v215_v22  ;;  %218 = vst [vmem:[%s3043_s8 + $0xe4] sm:$0xff] %v217_v23  ;;  %v219_v24 = vld [vmem:[%s3038_s7 + $0x4b0] sm:$0xff]  ;;  %v225_v27 = vld [vmem:[%s3038_s7 + $0x51c] sm:$0xff] }
  0x25   : > { %v223_v26 = vld [vmem:[%s3038_s7 + $0x514] sm:$0xff]  ;;  %220 = vst [vmem:[%s3043_s8 + $0xf0] sm:$0xff] %v219_v24  ;;  %222 = vst [vmem:[%s3043_s8 + $0xf8] sm:$0xff] %v221_v25  ;;  %v229_v29 = vld [vmem:[%s3038_s7 + $0x580] sm:$0xff] }
  0x26   : > { %224 = vst [vmem:[%s3043_s8 + $0x104] sm:$0xff] %v223_v26  ;;  %v227_v28 = vld [vmem:[%s3038_s7 + $0x578] sm:$0xff]  ;;  %226 = vst [vmem:[%s3043_s8 + $0x10c] sm:$0xff] %v225_v27  ;;  %v233_v31 = vld [vmem:[%s3038_s7 + $0x5e4] sm:$0xff] }
  0x27   : > { %228 = vst [vmem:[%s3043_s8 + $0x118] sm:$0xff] %v227_v28  ;;  %230 = vst [vmem:[%s3043_s8 + $0x120] sm:$0xff] %v229_v29  ;;  %v231_v30 = vld [vmem:[%s3038_s7 + $0x5dc] sm:$0xff]  ;;  %v237_v33 = vld [vmem:[%s3038_s7 + $0x648] sm:$0xff] }
  0x28   : > { %v235_v32 = vld [vmem:[%s3038_s7 + $0x640] sm:$0xff]  ;;  %232 = vst [vmem:[%s3043_s8 + $0x12c] sm:$0xff] %v231_v30  ;;  %234 = vst [vmem:[%s3043_s8 + $0x134] sm:$0xff] %v233_v31  ;;  %v241_v35 = vld [vmem:[%s3038_s7 + $0x6ac] sm:$0xff] }
  0x29   : > { %236 = vst [vmem:[%s3043_s8 + $0x140] sm:$0xff] %v235_v32  ;;  %v239_v34 = vld [vmem:[%s3038_s7 + $0x6a4] sm:$0xff]  ;;  %238 = vst [vmem:[%s3043_s8 + $0x148] sm:$0xff] %v237_v33  ;;  %v245_v37 = vld [vmem:[%s3038_s7 + $0x710] sm:$0xff] }
  0x2a   : > { %240 = vst [vmem:[%s3043_s8 + $0x154] sm:$0xff] %v239_v34  ;;  %242 = vst [vmem:[%s3043_s8 + $0x15c] sm:$0xff] %v241_v35  ;;  %v243_v36 = vld [vmem:[%s3038_s7 + $0x708] sm:$0xff]  ;;  %v249_v39 = vld [vmem:[%s3038_s7 + $0x774] sm:$0xff] }
  0x2b   : > { %v247_v38 = vld [vmem:[%s3038_s7 + $0x76c] sm:$0xff]  ;;  %244 = vst [vmem:[%s3043_s8 + $0x168] sm:$0xff] %v243_v36  ;;  %246 = vst [vmem:[%s3043_s8 + $0x170] sm:$0xff] %v245_v37  ;;  %v253_v41 = vld [vmem:[%s3038_s7 + $0x7d8] sm:$0xff] }
  0x2c   : > { %248 = vst [vmem:[%s3043_s8 + $0x17c] sm:$0xff] %v247_v38  ;;  %v251_v40 = vld [vmem:[%s3038_s7 + $0x7d0] sm:$0xff]  ;;  %250 = vst [vmem:[%s3043_s8 + $0x184] sm:$0xff] %v249_v39  ;;  %v257_v43 = vld [vmem:[%s3038_s7 + $0x83c] sm:$0xff] }
  0x2d   : > { %252 = vst [vmem:[%s3043_s8 + $0x190] sm:$0xff] %v251_v40  ;;  %254 = vst [vmem:[%s3043_s8 + $0x198] sm:$0xff] %v253_v41  ;;  %v255_v42 = vld [vmem:[%s3038_s7 + $0x834] sm:$0xff]  ;;  %v261_v45 = vld [vmem:[%s3038_s7 + $0x8a0] sm:$0xff] }
  0x2e   : > { %v259_v44 = vld [vmem:[%s3038_s7 + $0x898] sm:$0xff]  ;;  %256 = vst [vmem:[%s3043_s8 + $0x1a4] sm:$0xff] %v255_v42  ;;  %258 = vst [vmem:[%s3043_s8 + $0x1ac] sm:$0xff] %v257_v43  ;;  %v265_v47 = vld [vmem:[%s3038_s7 + $0x904] sm:$0xff] }
  0x2f   : > { %260 = vst [vmem:[%s3043_s8 + $0x1b8] sm:$0xff] %v259_v44  ;;  %v263_v46 = vld [vmem:[%s3038_s7 + $0x8fc] sm:$0xff]  ;;  %262 = vst [vmem:[%s3043_s8 + $0x1c0] sm:$0xff] %v261_v45  ;;  %v269_v49 = vld [vmem:[%s3038_s7 + $0x968] sm:$0xff] }
  0x30   : > { %264 = vst [vmem:[%s3043_s8 + $0x1cc] sm:$0xff] %v263_v46  ;;  %266 = vst [vmem:[%s3043_s8 + $0x1d4] sm:$0xff] %v265_v47  ;;  %v267_v48 = vld [vmem:[%s3038_s7 + $0x960] sm:$0xff]  ;;  %v273_v51 = vld [vmem:[%s3038_s7 + $0x9cc] sm:$0xff] }
  0x31   : > { %v271_v50 = vld [vmem:[%s3038_s7 + $0x9c4] sm:$0xff]  ;;  %268 = vst [vmem:[%s3043_s8 + $0x1e0] sm:$0xff] %v267_v48  ;;  %270 = vst [vmem:[%s3043_s8 + $0x1e8] sm:$0xff] %v269_v49  ;;  %v277_v53 = vld [vmem:[%s3038_s7 + $0xa30] sm:$0xff] }
  0x32   : > { %272 = vst [vmem:[%s3043_s8 + $0x1f4] sm:$0xff] %v271_v50  ;;  %v275_v52 = vld [vmem:[%s3038_s7 + $0xa28] sm:$0xff]  ;;  %274 = vst [vmem:[%s3043_s8 + $0x1fc] sm:$0xff] %v273_v51  ;;  %v281_v55 = vld [vmem:[%s3038_s7 + $0xa94] sm:$0xff] }
  0x33   : > { %276 = vst [vmem:[%s3043_s8 + $0x208] sm:$0xff] %v275_v52  ;;  %278 = vst [vmem:[%s3043_s8 + $0x210] sm:$0xff] %v277_v53  ;;  %v279_v54 = vld [vmem:[%s3038_s7 + $0xa8c] sm:$0xff]  ;;  %v285_v57 = vld [vmem:[%s3038_s7 + $0xaf8] sm:$0xff] }
  0x34   : > { %v283_v56 = vld [vmem:[%s3038_s7 + $0xaf0] sm:$0xff]  ;;  %280 = vst [vmem:[%s3043_s8 + $0x21c] sm:$0xff] %v279_v54  ;;  %282 = vst [vmem:[%s3043_s8 + $0x224] sm:$0xff] %v281_v55  ;;  %v289_v59 = vld [vmem:[%s3038_s7 + $0xb5c] sm:$0xff] }
  0x35   : > { %284 = vst [vmem:[%s3043_s8 + $0x230] sm:$0xff] %v283_v56  ;;  %v287_v58 = vld [vmem:[%s3038_s7 + $0xb54] sm:$0xff]  ;;  %286 = vst [vmem:[%s3043_s8 + $0x238] sm:$0xff] %v285_v57  ;;  %v293_v61 = vld [vmem:[%s3038_s7 + $0xbc0] sm:$0xff] }
  0x36   : > { %288 = vst [vmem:[%s3043_s8 + $0x244] sm:$0xff] %v287_v58  ;;  %290 = vst [vmem:[%s3043_s8 + $0x24c] sm:$0xff] %v289_v59  ;;  %v291_v60 = vld [vmem:[%s3038_s7 + $0xbb8] sm:$0xff]  ;;  %v297_v63 = vld [vmem:[%s3038_s7 + $0xc24] sm:$0xff] }
  0x37   : > { %v295_v62 = vld [vmem:[%s3038_s7 + $0xc1c] sm:$0xff]  ;;  %292 = vst [vmem:[%s3043_s8 + $0x258] sm:$0xff] %v291_v60  ;;  %294 = vst [vmem:[%s3043_s8 + $0x260] sm:$0xff] %v293_v61  ;;  %v2120_v0 = vld [vmem:[%s3038_s7 + $0x10] sm:$0xf] }
  0x38   : > { %296 = vst [vmem:[%s3043_s8 + $0x26c] sm:$0xff] %v295_v62  ;;  %v2122_v1 = vld [vmem:[%s3038_s7 + $0x74] sm:$0xf]  ;;  %298 = vst [vmem:[%s3043_s8 + $0x274] sm:$0xff] %v297_v63  ;;  %v2124_v2 = vld [vmem:[%s3038_s7 + $0xd8] sm:$0xf] }
  0x39   : > { %2121 = vst [vmem:[%s3043_s8 + $0x10] sm:$0xf] %v2120_v0  ;;  %2123 = vst [vmem:[%s3043_s8 + $0x24] sm:$0xf] %v2122_v1  ;;  %v2126_v3 = vld [vmem:[%s3038_s7 + $0x13c] sm:$0xf] }
  0x3a   : > { %v2128_v4 = vld [vmem:[%s3038_s7 + $0x1a0] sm:$0xf]  ;;  %2125 = vst [vmem:[%s3043_s8 + $0x38] sm:$0xf] %v2124_v2  ;;  %2127 = vst [vmem:[%s3043_s8 + $0x4c] sm:$0xf] %v2126_v3 }
  0x3b   : > { %2129 = vst [vmem:[%s3043_s8 + $0x60] sm:$0xf] %v2128_v4  ;;  %v2130_v5 = vld [vmem:[%s3038_s7 + $0x204] sm:$0xf]  ;;  %v2132_v6 = vld [vmem:[%s3038_s7 + $0x268] sm:$0xf] }
  0x3c   : > { %v2134_v7 = vld [vmem:[%s3038_s7 + $0x2cc] sm:$0xf]  ;;  %2131 = vst [vmem:[%s3043_s8 + $0x74] sm:$0xf] %v2130_v5  ;;  %2133 = vst [vmem:[%s3043_s8 + $0x88] sm:$0xf] %v2132_v6 }
  0x3d   : > { %2135 = vst [vmem:[%s3043_s8 + $0x9c] sm:$0xf] %v2134_v7  ;;  %v2136_v8 = vld [vmem:[%s3038_s7 + $0x330] sm:$0xf]  ;;  %v2138_v9 = vld [vmem:[%s3038_s7 + $0x394] sm:$0xf] }
  0x3e   : > { %v2140_v10 = vld [vmem:[%s3038_s7 + $0x3f8] sm:$0xf]  ;;  %2137 = vst [vmem:[%s3043_s8 + $0xb0] sm:$0xf] %v2136_v8  ;;  %2139 = vst [vmem:[%s3043_s8 + $0xc4] sm:$0xf] %v2138_v9 }
  0x3f   : > { %2141 = vst [vmem:[%s3043_s8 + $0xd8] sm:$0xf] %v2140_v10  ;;  %v2142_v11 = vld [vmem:[%s3038_s7 + $0x45c] sm:$0xf]  ;;  %v2144_v12 = vld [vmem:[%s3038_s7 + $0x4c0] sm:$0xf] }
  0x40   : > { %v2146_v13 = vld [vmem:[%s3038_s7 + $0x524] sm:$0xf]  ;;  %2143 = vst [vmem:[%s3043_s8 + $0xec] sm:$0xf] %v2142_v11  ;;  %2145 = vst [vmem:[%s3043_s8 + $0x100] sm:$0xf] %v2144_v12 }
  0x41   : > { %2147 = vst [vmem:[%s3043_s8 + $0x114] sm:$0xf] %v2146_v13  ;;  %v2148_v14 = vld [vmem:[%s3038_s7 + $0x588] sm:$0xf]  ;;  %v2150_v15 = vld [vmem:[%s3038_s7 + $0x5ec] sm:$0xf] }
  0x42   : > { %v2152_v16 = vld [vmem:[%s3038_s7 + $0x650] sm:$0xf]  ;;  %2149 = vst [vmem:[%s3043_s8 + $0x128] sm:$0xf] %v2148_v14  ;;  %2151 = vst [vmem:[%s3043_s8 + $0x13c] sm:$0xf] %v2150_v15 }
  0x43   : > { %2153 = vst [vmem:[%s3043_s8 + $0x150] sm:$0xf] %v2152_v16  ;;  %v2154_v17 = vld [vmem:[%s3038_s7 + $0x6b4] sm:$0xf]  ;;  %v2156_v18 = vld [vmem:[%s3038_s7 + $0x718] sm:$0xf] }
  0x44   : > { %v2158_v19 = vld [vmem:[%s3038_s7 + $0x77c] sm:$0xf]  ;;  %2155 = vst [vmem:[%s3043_s8 + $0x164] sm:$0xf] %v2154_v17  ;;  %2157 = vst [vmem:[%s3043_s8 + $0x178] sm:$0xf] %v2156_v18 }
  0x45   : > { %2159 = vst [vmem:[%s3043_s8 + $0x18c] sm:$0xf] %v2158_v19  ;;  %v2160_v20 = vld [vmem:[%s3038_s7 + $0x7e0] sm:$0xf]  ;;  %v2162_v21 = vld [vmem:[%s3038_s7 + $0x844] sm:$0xf] }
  0x46   : > { %v2164_v22 = vld [vmem:[%s3038_s7 + $0x8a8] sm:$0xf]  ;;  %2161 = vst [vmem:[%s3043_s8 + $0x1a0] sm:$0xf] %v2160_v20  ;;  %2163 = vst [vmem:[%s3043_s8 + $0x1b4] sm:$0xf] %v2162_v21 }
  0x47   : > { %2165 = vst [vmem:[%s3043_s8 + $0x1c8] sm:$0xf] %v2164_v22  ;;  %v2166_v23 = vld [vmem:[%s3038_s7 + $0x90c] sm:$0xf]  ;;  %v2168_v24 = vld [vmem:[%s3038_s7 + $0x970] sm:$0xf] }
  0x48   : > { %v2170_v25 = vld [vmem:[%s3038_s7 + $0x9d4] sm:$0xf]  ;;  %2167 = vst [vmem:[%s3043_s8 + $0x1dc] sm:$0xf] %v2166_v23  ;;  %2169 = vst [vmem:[%s3043_s8 + $0x1f0] sm:$0xf] %v2168_v24 }
  0x49   : > { %2171 = vst [vmem:[%s3043_s8 + $0x204] sm:$0xf] %v2170_v25  ;;  %v2172_v26 = vld [vmem:[%s3038_s7 + $0xa38] sm:$0xf]  ;;  %v2174_v27 = vld [vmem:[%s3038_s7 + $0xa9c] sm:$0xf] }
  0x4a   : > { %v2176_v28 = vld [vmem:[%s3038_s7 + $0xb00] sm:$0xf]  ;;  %2173 = vst [vmem:[%s3043_s8 + $0x218] sm:$0xf] %v2172_v26  ;;  %2175 = vst [vmem:[%s3043_s8 + $0x22c] sm:$0xf] %v2174_v27 }
  0x4b   : > { %2177 = vst [vmem:[%s3043_s8 + $0x240] sm:$0xf] %v2176_v28  ;;  %v2178_v29 = vld [vmem:[%s3038_s7 + $0xb64] sm:$0xf]  ;;  %v2180_v30 = vld [vmem:[%s3038_s7 + $0xbc8] sm:$0xf] }
  0x4c   : > { %v2182_v31 = vld [vmem:[%s3038_s7 + $0xc2c] sm:$0xf]  ;;  %2179 = vst [vmem:[%s3043_s8 + $0x254] sm:$0xf] %v2178_v29  ;;  %2181 = vst [vmem:[%s3043_s8 + $0x268] sm:$0xf] %v2180_v30 }
  0x4d   : > { %2183 = vst [vmem:[%s3043_s8 + $0x27c] sm:$0xf] %v2182_v31 }
  0x4e PF: > { %p2184_p7 = scmp.ge.s32.totalorder %s2955_s18, 1  ;;  %p384_p8 = scmp.lt.s32.totalorder %s2955_s18, 11 }
  0x50   : > { %p385_p9 = pnand %p2184_p7, %p384_p8 }
  0x52   : > { %388 = sbr.rel (%p385_p9) target bundleno = 558 (0x22e), region = 54 }
  0x57   : > { %s391_s9 = sand.u32 1, %s2931_s12   ;;  %s421_s10 = smul.u32 80, %s2939_s14 }
  0x58   : > { %s2627_s11 = smul.u32 640, %s391_s9  ;;  %s2186_s21 = sshll.u32 %s2943_s15, 5 }
  0x59   : > { %p422_p10 = scmp.lt.s32.totalorder %s421_s10, 399  ;;  %p428_p11 = scmp.lt.s32.totalorder %s2186_s21, 63 }
  0x5a   : > { %s3249_s12 = scalar_lea.vmem [#allocation3], %s2627_s11  ;;  %p2188_p12 = scmp.ne.s32.totalorder %s2939_s14, 0 }
  0x5b   : > { %s3763_s10 = smov (!%p422_p10, %s421_s10), 399  ;;  %s3765_s21 = smov (!%p428_p11, %s2186_s21), 63 }
  0x5c   : > { %s2185_s22 = sshll.u32 %s3763_s10, 2  ;;  %s2187_s27 = sshll.u32 %s3765_s21, 3 }
  0x5d   : > { %s3242_s26 = scalar_lea.vmem %s3701_s1, %s2185_s22  ;;  %s3247_s30 = scalar_lea.vmem %s3703_s3, %s2187_s27 }
  0x5e   : > { %437 = sbr.rel (%p2188_p12) target bundleno = 116 (0x74), region = 62 }
  0x63   : > { %v2957_v32 = vmov 0.0  }
  0x64   : > { %438 = vst [vmem:[#allocation2 + $0xb0] sm:$0xff] %v2957_v32  ;;  %439 = vst [vmem:[#allocation2] sm:$0xff] %v2957_v32 }
  0x65   : > { %440 = vst [vmem:[#allocation2 + $0xd8] sm:$0xff] %v2957_v32  ;;  %441 = vst [vmem:[#allocation2 + $0x18] sm:$0xff] %v2957_v32 }
  0x66   : > { %442 = vst [vmem:[#allocation2 + $0x50] sm:$0xff] %v2957_v32  ;;  %443 = vst [vmem:[#allocation2 + $0x68] sm:$0xff] %v2957_v32 }
  0x67   : > { %444 = vst [vmem:[#allocation2 + $0x30] sm:$0xff] %v2957_v32  ;;  %445 = vst [vmem:[#allocation2 + $0x48] sm:$0xff] %v2957_v32 }
  0x68   : > { %446 = vst [vmem:[#allocation2 + $0x80] sm:$0xff] %v2957_v32  ;;  %447 = vst [vmem:[#allocation2 + $0x88] sm:$0xff] %v2957_v32 }
  0x69   : > { %448 = vst [vmem:[#allocation2 + $0xe8] sm:$0xff] %v2957_v32  ;;  %449 = vst [vmem:[#allocation2 + $0xb8] sm:$0xff] %v2957_v32 }
  0x6a   : > { %450 = vst [vmem:[#allocation2 + $0x60] sm:$0xff] %v2957_v32  ;;  %451 = vst [vmem:[#allocation2 + $0xf0] sm:$0xff] %v2957_v32 }
  0x6b   : > { %452 = vst [vmem:[#allocation2 + $0x8] sm:$0xff] %v2957_v32  ;;  %453 = vst [vmem:[#allocation2 + $0x78] sm:$0xff] %v2957_v32 }
  0x6c   : > { %454 = vst [vmem:[#allocation2 + $0x38] sm:$0xff] %v2957_v32  ;;  %455 = vst [vmem:[#allocation2 + $0x58] sm:$0xff] %v2957_v32 }
  0x6d   : > { %456 = vst [vmem:[#allocation2 + $0x40] sm:$0xff] %v2957_v32  ;;  %457 = vst [vmem:[#allocation2 + $0xc8] sm:$0xff] %v2957_v32 }
  0x6e   : > { %458 = vst [vmem:[#allocation2 + $0xe0] sm:$0xff] %v2957_v32  ;;  %459 = vst [vmem:[#allocation2 + $0x90] sm:$0xff] %v2957_v32 }
  0x6f   : > { %460 = vst [vmem:[#allocation2 + $0x70] sm:$0xff] %v2957_v32  ;;  %461 = vst [vmem:[#allocation2 + $0xc0] sm:$0xff] %v2957_v32 }
  0x70   : > { %462 = vst [vmem:[#allocation2 + $0xa8] sm:$0xff] %v2957_v32  ;;  %463 = vst [vmem:[#allocation2 + $0xd0] sm:$0xff] %v2957_v32 }
  0x71   : > { %464 = vst [vmem:[#allocation2 + $0x10] sm:$0xff] %v2957_v32  ;;  %465 = vst [vmem:[#allocation2 + $0x28] sm:$0xff] %v2957_v32 }
  0x72   : > { %466 = vst [vmem:[#allocation2 + $0xa0] sm:$0xff] %v2957_v32  ;;  %467 = vst [vmem:[#allocation2 + $0xf8] sm:$0xff] %v2957_v32 }
  0x73   : > { %468 = vst [vmem:[#allocation2 + $0x20] sm:$0xff] %v2957_v32  ;;  %469 = vst [vmem:[#allocation2 + $0x98] sm:$0xff] %v2957_v32 }
  0x74 PF: > { %v2685_v33 = vld [vmem:[%s3242_s26 + $0x78] sm:$0xff]   ;;  %v2687_v35 = vld [vmem:[%s3242_s26 + $0x70] sm:$0xff]   ;;  %v2689_v37 = vld [vmem:[%s3242_s26 + $0x68] sm:$0xff]   ;;  %p2309_p13 = scmp.ne.s32.totalorder %s2939_s14, 4 }
  0x75   : > { %v2686_v34 = vld [vmem:[%s3242_s26 + $0x38] sm:$0xff]   ;;  %2313 = vmatprep.subr.bf16.mxu0 %v2685_v33  ;;  %2609 = vmatprep.subr.bf16.mxu1 %v2685_v33  ;;  %v2688_v36 = vld [vmem:[%s3242_s26 + $0x30] sm:$0xff]   ;;  %v2690_v38 = vld [vmem:[%s3242_s26 + $0x28] sm:$0xff]  }
  0x76   : > { %2314 = vmatpush3.bf16.msra.mxu0 %v2686_v34  ;;  %2617 = vmatpush3.bf16.msra.mxu1 %v2686_v34  ;;  %v2691_v39 = vld [vmem:[%s3242_s26 + $0x60] sm:$0xff]   ;;  %v2693_v41 = vld [vmem:[%s3242_s26 + $0x58] sm:$0xff]   ;;  %v2695_v43 = vld [vmem:[%s3242_s26 + $0x50] sm:$0xff]  }
  0x77   : > { %2315 = vmatprep.subr.bf16.mxu0 %v2687_v35  ;;  %2610 = vmatprep.subr.bf16.mxu1 %v2687_v35  ;;  %v2692_v40 = vld [vmem:[%s3242_s26 + $0x20] sm:$0xff]   ;;  %v2694_v42 = vld [vmem:[%s3242_s26 + $0x18] sm:$0xff]   ;;  %v2696_v46 = vld [vmem:[%s3242_s26 + $0x10] sm:$0xff]  }
  0x78   : > { %v2703_v44 = vld [vmem:[%s3249_s12 + $0x4] ss:$20 sps:$4 sm:$0xff]   ;;  %v2697_v47 = vld [vmem:[%s3242_s26 + $0x48] sm:$0xff]   ;;  %v2701_v53 = vld [vmem:[%s3249_s12] ss:$20 sps:$4 sm:$0xff]  }
  0x79   : > { %v2706_v45 = vld [vmem:[%s3249_s12 + $0x1e4] ss:$20 sps:$4 sm:$0xff]   ;;  %1366 = vmatprep.mubr.bf16.mxu0 %v2703_v44  ;;  %v2698_v48 = vld [vmem:[%s3242_s26 + $0x8] sm:$0xff]   ;;  %v2704_v54 = vld [vmem:[%s3249_s12 + $0x1e0] ss:$20 sps:$4 sm:$0xff]  }
  0x7a   : > { %2316 = vmatpush3.bf16.msra.mxu0 %v2688_v36  ;;  %2618 = vmatpush3.bf16.msra.mxu1 %v2688_v36  ;;  %v2699_v49 = vld [vmem:[%s3242_s26 + $0x40] sm:$0xff]   ;;  %v2707_v51 = vld [vmem:[%s3242_s26 + $0xf8] sm:$0xff]   ;;  %v2709_v56 = vld [vmem:[%s3242_s26 + $0xf0] sm:$0xff]  }
  0x7b   : > { %2317 = vmatprep.subr.bf16.mxu0 %v2689_v37  ;;  %2611 = vmatprep.subr.bf16.mxu1 %v2689_v37  ;;  %v2700_v50 = vld [vmem:[%s3242_s26] sm:$0xff]   ;;  %v2710_v52 = vld [vmem:[%s3242_s26 + $0x138] sm:$0xff]   ;;  %v2729_v59 = vld [vmem:[%s3242_s26 + $0x130] sm:$0xff]  }
  0x7c   : > { %1462 = vmatprep.mubr.bf16.mxu1 %v2706_v45  ;;  %v2708_v55 = vld [vmem:[%s3242_s26 + $0xb8] sm:$0xff]   ;;  %v2712_v57 = vld [vmem:[%s3249_s12 + $0x2c] ss:$20 sps:$4 sm:$0xff]   ;;  %v2711_v60 = vld [vmem:[%s3242_s26 + $0xb0] sm:$0xff]  }
  0x7d   : > { %v2714_v58 = vld [vmem:[%s3249_s12 + $0x20c] ss:$20 sps:$4 sm:$0xff]   ;;  %v2716_v61 = vld [vmem:[%s3249_s12 + $0x28] ss:$20 sps:$4 sm:$0xff]   ;;  %v2726_v6 = vld [vmem:[%s3249_s12 + $0x50] ss:$20 sps:$4 sm:$0xff]  }
  0x7e   : > { %2318 = vmatpush3.bf16.msra.mxu0 %v2690_v38  ;;  %2619 = vmatpush3.bf16.msra.mxu1 %v2690_v38  ;;  %v2718_v62 = vld [vmem:[%s3242_s26 + $0xe8] sm:$0xff]   ;;  %v2720_v2 = vld [vmem:[%s3242_s26 + $0xe0] sm:$0xff]   ;;  %v2728_v5 = vld [vmem:[%s3242_s26 + $0xd8] sm:$0xff]  }
  0x7f   : > { %2319 = vmatprep.subr.bf16.mxu0 %v2691_v39  ;;  %2612 = vmatprep.subr.bf16.mxu1 %v2691_v39  ;;  %v2717_v63 = vld [vmem:[%s3249_s12 + $0x208] ss:$20 sps:$4 sm:$0xff]   ;;  %v2721_v4 = vld [vmem:[%s3242_s26 + $0xa0] sm:$0xff]   ;;  %v2731_v10 = vld [vmem:[%s3242_s26 + $0xd0] sm:$0xff]  }
  0x80   : > { %v2719_v0 = vld [vmem:[%s3242_s26 + $0xa8] sm:$0xff]   ;;  %v2727_v8 = vld [vmem:[%s3249_s12 + $0x230] ss:$20 sps:$4 sm:$0xff]   ;;  %v2730_v9 = vld [vmem:[%s3242_s26 + $0x98] sm:$0xff]  }
  0x81   : > { %v2722_v1 = vld [vmem:[%s3249_s12 + $0x54] ss:$20 sps:$4 sm:$0xff]   ;;  %v2733_v11 = vld [vmem:[%s3249_s12 + $0x7c] ss:$20 sps:$4 sm:$0xff]   ;;  %v2756_v14 = vld [vmem:[%s3242_s26 + $0x120] sm:$0xff]  }
  0x82   : > { %2320 = vmatpush3.bf16.msra.mxu0 %v2692_v40  ;;  %2620 = vmatpush3.bf16.msra.mxu1 %v2692_v40  ;;  %v2724_v3 = vld [vmem:[%s3249_s12 + $0x234] ss:$20 sps:$4 sm:$0xff]   ;;  %v2735_v12 = vld [vmem:[%s3249_s12 + $0x25c] ss:$20 sps:$4 sm:$0xff]   ;;  %v2737_v15 = vld [vmem:[%s3249_s12 + $0x78] ss:$20 sps:$4 sm:$0xff]  }
  0x83   : > { %2321 = vmatprep.subr.bf16.mxu0 %v2693_v41  ;;  %2613 = vmatprep.subr.bf16.mxu1 %v2693_v41  ;;  %v2742_v7 = vld [vmem:[%s3242_s26 + $0x128] sm:$0xff]   ;;  %v2732_v13 = vld [vmem:[%s3242_s26 + $0x90] sm:$0xff]   ;;  %v2741_v19 = vld [vmem:[%s3242_s26 + $0xc0] sm:$0xff]  }
  0x84   : > { %v2738_v16 = vld [vmem:[%s3249_s12 + $0x258] ss:$20 sps:$4 sm:$0xff]   ;;  %v2743_v23 = vld [vmem:[%s3242_s26 + $0x80] sm:$0xff]   ;;  %v2746_v24 = vld [vmem:[%s3249_s12 + $0x8] ss:$20 sps:$4 sm:$0xff]  }
  0x85   : > { %v2739_v17 = vld [vmem:[%s3242_s26 + $0xc8] sm:$0xff]   ;;  %v2744_v20 = vld [vmem:[%s3249_s12 + $0xa4] ss:$20 sps:$4 sm:$0xff]   ;;  %v2749_v25 = vld [vmem:[%s3249_s12 + $0xa0] ss:$20 sps:$4 sm:$0xff]  }
  0x86   : > { %2322 = vmatpush3.bf16.msra.mxu0 %v2694_v42  ;;  %2621 = vmatpush3.bf16.msra.mxu1 %v2694_v42  ;;  %v2740_v18 = vld [vmem:[%s3242_s26 + $0x88] sm:$0xff]   ;;  %v2763_v21 = vld [vmem:[%s3242_s26 + $0x118] sm:$0xff]   ;;  %v2776_v26 = vld [vmem:[%s3242_s26 + $0x110] sm:$0xff]  }
  0x87   : > { %2323 = vmatprep.subr.bf16.mxu0 %v2695_v43  ;;  %2614 = vmatprep.subr.bf16.mxu1 %v2695_v43  ;;  %v2748_v22 = vld [vmem:[%s3249_s12 + $0xc] ss:$20 sps:$4 sm:$0xff]   ;;  %v2752_v28 = vld [vmem:[%s3249_s12 + $0x34] ss:$20 sps:$4 sm:$0xff]   ;;  %v2755_v31 = vld [vmem:[%s3249_s12 + $0x30] ss:$20 sps:$4 sm:$0xff]  }
  0x88   : > { %v2750_v27 = vld [vmem:[%s3249_s12 + $0xcc] ss:$20 sps:$4 sm:$0xff]   ;;  %v2754_v30 = vld [vmem:[%s3249_s12 + $0xc8] ss:$20 sps:$4 sm:$0xff]   ;;  %v2761_v35 = vld [vmem:[%s3249_s12 + $0xf0] ss:$20 sps:$4 sm:$0xff]  }
  0x89   : > { %v2783_v29 = vld [vmem:[%s3242_s26 + $0x108] sm:$0xff]   ;;  %v2759_v33 = vld [vmem:[%s3249_s12 + $0x5c] ss:$20 sps:$4 sm:$0xff]   ;;  %v2796_v34 = vld [vmem:[%s3242_s26 + $0x100] sm:$0xff]  }
  0x8a   : > { %2324 = vmatpush3.bf16.msra.mxu0 %v2696_v46  ;;  %2622 = vmatpush3.bf16.msra.mxu1 %v2696_v46  ;;  %v2757_v32 = vld [vmem:[%s3249_s12 + $0xf4] ss:$20 sps:$4 sm:$0xff]   ;;  %v2762_v36 = vld [vmem:[%s3249_s12 + $0x58] ss:$20 sps:$4 sm:$0xff]   ;;  %v2764_v37 = vld [vmem:[%s3249_s12 + $0x11c] ss:$20 sps:$4 sm:$0xff]  }
  0x8b   : > { %2325 = vmatprep.subr.bf16.mxu0 %v2697_v47  ;;  %2615 = vmatprep.subr.bf16.mxu1 %v2697_v47  ;;  %v2766_v38 = vld [vmem:[%s3249_s12 + $0x84] ss:$20 sps:$4 sm:$0xff]   ;;  %v2769_v40 = vld [vmem:[%s3249_s12 + $0x80] ss:$20 sps:$4 sm:$0xff]   ;;  %v2775_v44 = vld [vmem:[%s3249_s12 + $0xa8] ss:$20 sps:$4 sm:$0xff]  }
  0x8c   : > { %v2768_v39 = vld [vmem:[%s3249_s12 + $0x118] ss:$20 sps:$4 sm:$0xff]   ;;  %v2774_v43 = vld [vmem:[%s3249_s12 + $0x140] ss:$20 sps:$4 sm:$0xff]   ;;  %v2781_v47 = vld [vmem:[%s3249_s12 + $0x168] ss:$20 sps:$4 sm:$0xff]  }
  0x8d   : > { %v2770_v41 = vld [vmem:[%s3249_s12 + $0x144] ss:$20 sps:$4 sm:$0xff]   ;;  %v2772_v42 = vld [vmem:[%s3249_s12 + $0xac] ss:$20 sps:$4 sm:$0xff]   ;;  %v2779_v46 = vld [vmem:[%s3249_s12 + $0xd4] ss:$20 sps:$4 sm:$0xff]  }
  0x8e   : > { %2326 = vmatpush3.bf16.msra.mxu0 %v2698_v48  ;;  %2623 = vmatpush3.bf16.msra.mxu1 %v2698_v48  ;;  %v2777_v45 = vld [vmem:[%s3249_s12 + $0x16c] ss:$20 sps:$4 sm:$0xff]   ;;  %v2782_v48 = vld [vmem:[%s3249_s12 + $0xd0] ss:$20 sps:$4 sm:$0xff]  }
  0x8f   : > { %2327 = vmatprep.subr.bf16.mxu0 %v2699_v49  ;;  %2616 = vmatprep.subr.bf16.mxu1 %v2699_v49  ;;  %v2784_v49 = vld [vmem:[%s3249_s12 + $0x194] ss:$20 sps:$4 sm:$0xff]  }
  0x92   : > { %2328 = vmatpush3.bf16.msra.mxu0 %v2700_v50  ;;  %2624 = vmatpush3.bf16.msra.mxu1 %v2700_v50  ;;  %v2786_v50 = vld [vmem:[%s3249_s12 + $0xfc] ss:$20 sps:$4 sm:$0xff]  }
  0x93   : > { %2425 = vmatprep.subr.bf16.mxu1 %v2707_v51  ;;  %2561 = vmatprep.subr.bf16.mxu0 %v2710_v52  ;;  %v2788_v51 = vld [vmem:[%s3249_s12 + $0x190] ss:$20 sps:$4 sm:$0xff]  }
  0x95   : > { %1367 = vmatmul.mubr.bf16.vlgmr.msra.gmra.mxu0 %v2701_v53  ;;  %1463 = vmatmul.mubr.bf16.vlgmr.msra.gmra.mxu1 %v2704_v54  ;;  %v2790_v53 = vld [vmem:[%s3249_s12 + $0x1bc] ss:$20 sps:$4 sm:$0xff]   ;;  %v2792_v54 = vld [vmem:[%s3249_s12 + $0x124] ss:$20 sps:$4 sm:$0xff]  }
  0x96   : > { %2426 = vmatpush3.bf16.msra.mxu1 %v2708_v55  ;;  %2562 = vmatpush3.bf16.msra.mxu0 %v2710_v52  ;;  %v2789_v52 = vld [vmem:[%s3249_s12 + $0xf8] ss:$20 sps:$4 sm:$0xff]  }
  0x97   : > { %2427 = vmatprep.subr.bf16.mxu1 %v2709_v56  ;;  %1374 = vmatprep.mubr.bf16.mxu0 %v2712_v57  ;;  %v2794_v55 = vld [vmem:[%s3249_s12 + $0x1b8] ss:$20 sps:$4 sm:$0xff]   ;;  %v2795_v56 = vld [vmem:[%s3249_s12 + $0x120] ss:$20 sps:$4 sm:$0xff]  }
  0x98   : > { %1470 = vmatprep.mubr.bf16.mxu1 %v2714_v58  ;;  %2563 = vmatprep.subr.bf16.mxu0 %v2729_v59  ;;  %v2797_v57 = vld [vmem:[%s3249_s12 + $0x14c] ss:$20 sps:$4 sm:$0xff]   ;;  %v2799_v58 = vld [vmem:[%s3249_s12 + $0x10] ss:$20 sps:$4 sm:$0xff]  }
  0x9a   : > { %2428 = vmatpush3.bf16.msra.mxu1 %v2711_v60  ;;  %2564 = vmatpush3.bf16.msra.mxu0 %v2729_v59  ;;  %v2800_v59 = vld [vmem:[%s3249_s12 + $0x148] ss:$20 sps:$4 sm:$0xff]   ;;  %v2801_v60 = vld [vmem:[%s3249_s12 + $0x38] ss:$20 sps:$4 sm:$0xff]  }
  0x9b   : > { %2429 = vmatprep.subr.bf16.mxu1 %v2718_v62  ;;  %2565 = vmatprep.subr.bf16.mxu0 %v2742_v7  ;;  %v2804_v62 = vld [vmem:[%s3249_s12 + $0x60] ss:$20 sps:$4 sm:$0xff]  }
  0x9d   : > { %1375 = vmatmul.mubr.bf16.gmra.mxu0 %v2716_v61  ;;  %1471 = vmatmul.mubr.bf16.gmra.mxu1 %v2717_v63  ;;  %v2802_v61 = vld [vmem:[%s3249_s12 + $0x174] ss:$20 sps:$4 sm:$0xff]   ;;  %v2805_v63 = vld [vmem:[%s3249_s12 + $0x170] ss:$20 sps:$4 sm:$0xff]  }
  0x9e   : > { %2430 = vmatpush3.bf16.msra.mxu1 %v2719_v0  ;;  %1382 = vmatprep.mubr.bf16.mxu0 %v2722_v1  ;;  %v2806_v0 = vld [vmem:[%s3249_s12 + $0x88] ss:$20 sps:$4 sm:$0xff]  }
  0x9f   : > { %2431 = vmatprep.subr.bf16.mxu1 %v2720_v2  ;;  %1478 = vmatprep.mubr.bf16.mxu1 %v2724_v3  ;;  %v2807_v1 = vld [vmem:[%s3249_s12 + $0x19c] ss:$20 sps:$4 sm:$0xff]   ;;  %v2810_v3 = vld [vmem:[%s3249_s12 + $0x198] ss:$20 sps:$4 sm:$0xff]  }
  0xa0   : > { %2566 = vmatpush3.bf16.msra.mxu0 %v2742_v7  ;;  %v2809_v2 = vld [vmem:[%s3249_s12 + $0xb0] ss:$20 sps:$4 sm:$0xff]   ;;  %v2815_v7 = vld [vmem:[%s3249_s12 + $0x1c0] ss:$20 sps:$4 sm:$0xff]  }
  0xa1   : > { %2567 = vmatprep.subr.bf16.mxu0 %v2756_v14 }
  0xa2   : > { %2432 = vmatpush3.bf16.msra.mxu1 %v2721_v4  ;;  %v2811_v4 = vld [vmem:[%s3249_s12 + $0xd8] ss:$20 sps:$4 sm:$0xff]  }
  0xa3   : > { %2433 = vmatprep.subr.bf16.mxu1 %v2728_v5  ;;  %v2812_v5 = vld [vmem:[%s3249_s12 + $0x1c4] ss:$20 sps:$4 sm:$0xff]  }
  0xa4   : > { %2568 = vmatpush3.bf16.msra.mxu0 %v2756_v14  ;;  %v2824_v14 = vld [vmem:[%s3249_s12 + $0x1a0] ss:$20 sps:$4 sm:$0xff]  }
  0xa5   : > { %1383 = vmatmul.mubr.bf16.gmra.mxu0 %v2726_v6  ;;  %1479 = vmatmul.mubr.bf16.gmra.mxu1 %v2727_v8  ;;  %v2814_v6 = vld [vmem:[%s3249_s12 + $0x100] ss:$20 sps:$4 sm:$0xff]   ;;  %v2816_v8 = vld [vmem:[%s3249_s12 + $0x128] ss:$20 sps:$4 sm:$0xff]  }
  0xa6   : > { %2434 = vmatpush3.bf16.msra.mxu1 %v2730_v9  ;;  %1390 = vmatprep.mubr.bf16.mxu0 %v2733_v11  ;;  %v2817_v9 = vld [vmem:[%s3249_s12 + $0x1ec] ss:$20 sps:$4 sm:$0xff]   ;;  %v2820_v11 = vld [vmem:[%s3249_s12 + $0x1e8] ss:$20 sps:$4 sm:$0xff]  }
  0xa7   : > { %2435 = vmatprep.subr.bf16.mxu1 %v2731_v10  ;;  %1486 = vmatprep.mubr.bf16.mxu1 %v2735_v12  ;;  %v2819_v10 = vld [vmem:[%s3249_s12 + $0x150] ss:$20 sps:$4 sm:$0xff]   ;;  %v2821_v12 = vld [vmem:[%s3249_s12 + $0x178] ss:$20 sps:$4 sm:$0xff]  }
  0xa8   : > { %2569 = vmatprep.subr.bf16.mxu0 %v2763_v21 }
  0xa9   : > { %2570 = vmatpush3.bf16.msra.mxu0 %v2763_v21  ;;  %v2832_v21 = vld [vmem:[%s3249_s12 + $0x264] ss:$20 sps:$4 sm:$0xff]  }
  0xaa   : > { %2436 = vmatpush3.bf16.msra.mxu1 %v2732_v13  ;;  %2571 = vmatprep.subr.bf16.mxu0 %v2776_v26  ;;  %v2822_v13 = vld [vmem:[%s3249_s12 + $0x214] ss:$20 sps:$4 sm:$0xff]  }
  0xab   : > { %2437 = vmatprep.subr.bf16.mxu1 %v2739_v17  ;;  %v2827_v17 = vld [vmem:[%s3249_s12 + $0x23c] ss:$20 sps:$4 sm:$0xff]  }
  0xad   : > { %1391 = vmatmul.mubr.bf16.gmra.mxu0 %v2737_v15  ;;  %1487 = vmatmul.mubr.bf16.gmra.mxu1 %v2738_v16  ;;  %v2825_v15 = vld [vmem:[%s3249_s12 + $0x210] ss:$20 sps:$4 sm:$0xff]   ;;  %v2826_v16 = vld [vmem:[%s3249_s12 + $0x1c8] ss:$20 sps:$4 sm:$0xff]  }
  0xae   : > { %2438 = vmatpush3.bf16.msra.mxu1 %v2740_v18  ;;  %1398 = vmatprep.mubr.bf16.mxu0 %v2744_v20  ;;  %v2829_v18 = vld [vmem:[%s3249_s12 + $0x1f0] ss:$20 sps:$4 sm:$0xff]   ;;  %v2831_v20 = vld [vmem:[%s3249_s12 + $0x218] ss:$20 sps:$4 sm:$0xff]  }
  0xaf   : > { %2439 = vmatprep.subr.bf16.mxu1 %v2741_v19  ;;  %1527 = vmatprep.mubr.bf16.mxu1 %v2748_v22  ;;  %v2830_v19 = vld [vmem:[%s3249_s12 + $0x238] ss:$20 sps:$4 sm:$0xff]   ;;  %v2834_v22 = vld [vmem:[%s3249_s12 + $0x240] ss:$20 sps:$4 sm:$0xff]  }
  0xb0   : > { %2572 = vmatpush3.bf16.msra.mxu0 %v2776_v26 }
  0xb1   : > { %2573 = vmatprep.subr.bf16.mxu0 %v2783_v29 }
  0xb2   : > { %2440 = vmatpush3.bf16.msra.mxu1 %v2743_v23  ;;  %v2835_v23 = vld [vmem:[%s3249_s12 + $0x260] ss:$20 sps:$4 sm:$0xff]  }
  0xb4   : > { %2574 = vmatpush3.bf16.msra.mxu0 %v2783_v29 }
  0xb5   : > { %1399 = vmatmul.mubr.bf16.gmra.mxu0 %v2749_v25  ;;  %1528 = vmatmul.mubr.bf16.vlgmr.msra.gmra.mxu1 %v2746_v24  ;;  %v2836_v24 = vld [vmem:[%s3249_s12 + $0x268] ss:$20 sps:$4 sm:$0xff]  }
  0xb6   : > { %1406 = vmatprep.mubr.bf16.mxu0 %v2750_v27  ;;  %1535 = vmatprep.mubr.bf16.mxu1 %v2752_v28 }
  0xb7   : > { %2575 = vmatprep.subr.bf16.mxu0 %v2796_v34 }
  0xb8   : > { %2576 = vmatpush3.bf16.msra.mxu0 %v2796_v34 }
  0xbd   : > { %1407 = vmatmul.mubr.bf16.gmra.mxu0 %v2754_v30  ;;  %1536 = vmatmul.mubr.bf16.gmra.mxu1 %v2755_v31 }
  0xbe   : > { %1414 = vmatprep.mubr.bf16.mxu0 %v2757_v32  ;;  %1543 = vmatprep.mubr.bf16.mxu1 %v2759_v33 }
  0xc5   : > { %1415 = vmatmul.mubr.bf16.gmra.mxu0 %v2761_v35  ;;  %1544 = vmatmul.mubr.bf16.gmra.mxu1 %v2762_v36 }
  0xc6   : > { %1422 = vmatprep.mubr.bf16.mxu0 %v2764_v37  ;;  %1551 = vmatprep.mubr.bf16.mxu1 %v2766_v38 }
  0xcd   : > { %1423 = vmatmul.mubr.bf16.gmra.mxu0 %v2768_v39  ;;  %1552 = vmatmul.mubr.bf16.gmra.mxu1 %v2769_v40 }
  0xce   : > { %1430 = vmatprep.mubr.bf16.mxu0 %v2770_v41  ;;  %1559 = vmatprep.mubr.bf16.mxu1 %v2772_v42 }
  0xd5   : > { %1431 = vmatmul.mubr.bf16.gmra.mxu0 %v2774_v43  ;;  %1560 = vmatmul.mubr.bf16.gmra.mxu1 %v2775_v44 }
  0xd6   : > { %1438 = vmatprep.mubr.bf16.mxu0 %v2777_v45  ;;  %1567 = vmatprep.mubr.bf16.mxu1 %v2779_v46 }
  0xdd   : > { %1439 = vmatmul.mubr.bf16.gmra.mxu0 %v2781_v47  ;;  %1568 = vmatmul.mubr.bf16.gmra.mxu1 %v2782_v48 }
  0xde   : > { %1446 = vmatprep.mubr.bf16.mxu0 %v2784_v49  ;;  %1575 = vmatprep.mubr.bf16.mxu1 %v2786_v50 }
  0xe5   : > { %1447 = vmatmul.mubr.bf16.gmra.mxu0 %v2788_v51  ;;  %1576 = vmatmul.mubr.bf16.gmra.mxu1 %v2789_v52 }
  0xe6   : > { %1454 = vmatprep.mubr.bf16.mxu0 %v2790_v53  ;;  %1583 = vmatprep.mubr.bf16.mxu1 %v2792_v54 }
  0xed   : > { %1455 = vmatmul.mubr.bf16.gmra.mxu0 %v2794_v55  ;;  %1584 = vmatmul.mubr.bf16.gmra.mxu1 %v2795_v56 }
  0xee   : > { %1591 = vmatprep.mubr.bf16.mxu1 %v2797_v57  ;;  %2577 = vmatprep.mubr.bf16.mxu0 %v2799_v58 }
  0xf5   : > { %1592 = vmatmul.mubr.bf16.gmra.mxu1 %v2800_v59  ;;  %2578 = vmatmul.mubr.bf16.vlgmr.msra.gmra.mxu0 %v2801_v60 }
  0xf6   : > { %1599 = vmatprep.mubr.bf16.mxu1 %v2802_v61  ;;  %2581 = vmatprep.mubr.bf16.mxu0 %v2804_v62 }
  0xfd   : > { %1600 = vmatmul.mubr.bf16.gmra.mxu1 %v2805_v63  ;;  %2582 = vmatmul.mubr.bf16.gmra.mxu0 %v2806_v0 }
  0xfe   : > { %1607 = vmatprep.mubr.bf16.mxu1 %v2807_v1  ;;  %2585 = vmatprep.mubr.bf16.mxu0 %v2809_v2 }
 0x105   : > { %1608 = vmatmul.mubr.bf16.gmra.mxu1 %v2810_v3  ;;  %2586 = vmatmul.mubr.bf16.gmra.mxu0 %v2811_v4 }
 0x106   : > { %1615 = vmatprep.mubr.bf16.mxu1 %v2812_v5  ;;  %2589 = vmatprep.mubr.bf16.mxu0 %v2814_v6 }
 0x10d   : > { %1616 = vmatmul.mubr.bf16.gmra.mxu1 %v2815_v7  ;;  %2590 = vmatmul.mubr.bf16.gmra.mxu0 %v2816_v8 }
 0x10e   : > { %1623 = vmatprep.mubr.bf16.mxu1 %v2817_v9  ;;  %2593 = vmatprep.mubr.bf16.mxu0 %v2819_v10 }
 0x115   : > { %1624 = vmatmul.mubr.bf16.gmra.mxu1 %v2820_v11  ;;  %2594 = vmatmul.mubr.bf16.gmra.mxu0 %v2821_v12 }
 0x116   : > { %1631 = vmatprep.mubr.bf16.mxu1 %v2822_v13  ;;  %2597 = vmatprep.mubr.bf16.mxu0 %v2824_v14 }
 0x11d   : > { %1632 = vmatmul.mubr.bf16.gmra.mxu1 %v2825_v15  ;;  %2598 = vmatmul.mubr.bf16.gmra.mxu0 %v2826_v16 }
 0x11e   : > { %1639 = vmatprep.mubr.bf16.mxu1 %v2827_v17  ;;  %2601 = vmatprep.mubr.bf16.mxu0 %v2829_v18 }
 0x125   : > { %1640 = vmatmul.mubr.bf16.gmra.mxu1 %v2830_v19  ;;  %2602 = vmatmul.mubr.bf16.gmra.mxu0 %v2831_v20 }
 0x126   : > { %1647 = vmatprep.mubr.bf16.mxu1 %v2832_v21  ;;  %2605 = vmatprep.mubr.bf16.mxu0 %v2834_v22 }
 0x12d   : > { %1648 = vmatmul.mubr.bf16.gmra.mxu1 %v2835_v23  ;;  %2606 = vmatmul.mubr.bf16.gmra.mxu0 %v2836_v24 }
 0x155   : > { %v2329_v25 = vpop.f32.mrf.mxu0  ;;  %v2401_v26 = vpop.f32.mrf.mxu1 }
 0x157   : > { %v2330_v27 = vpop.f32.mrf.mxu0  ;;  %v2402_v28 = vpop.f32.mrf.mxu1 }
 0x158   : > { %v3372_v29 = vadd.f32 %v2330_v27, %v2329_v25  ;;  %v3374_v30 = vadd.f32 %v2402_v28, %v2401_v26 }
 0x159   : > { %v2332_v31 = vpop.f32.mrf.mxu0  ;;  %v2404_v32 = vpop.f32.mrf.mxu1 }
 0x15a   : > { %3704 = vst [vmem:[#allocation4_spill] sm:$0xff] %v3374_v30 }
 0x15b   : > { %v2333_v33 = vpop.f32.mrf.mxu0  ;;  %v2405_v34 = vpop.f32.mrf.mxu1 }
 0x15c   : > { %v3376_v35 = vadd.f32 %v2333_v33, %v2332_v31  ;;  %v3378_v36 = vadd.f32 %v2405_v34, %v2404_v32 }
 0x15d   : > { %v2335_v37 = vpop.f32.mrf.mxu0  ;;  %v2407_v38 = vpop.f32.mrf.mxu1 }
 0x15e   : > { %3705 = vst [vmem:[#allocation5_spill] sm:$0xff] %v3378_v36 }
 0x15f   : > { %v2336_v39 = vpop.f32.mrf.mxu0  ;;  %v2408_v40 = vpop.f32.mrf.mxu1 }
 0x160   : > { %v3380_v41 = vadd.f32 %v2336_v39, %v2335_v37  ;;  %v3382_v42 = vadd.f32 %v2408_v40, %v2407_v38 }
 0x161   : > { %v2338_v43 = vpop.f32.mrf.mxu0  ;;  %v2410_v44 = vpop.f32.mrf.mxu1 }
 0x162   : > { %3706 = vst [vmem:[#allocation6_spill] sm:$0xff] %v3382_v42 }
 0x163   : > { %v2339_v45 = vpop.f32.mrf.mxu0  ;;  %v2411_v46 = vpop.f32.mrf.mxu1 }
 0x164   : > { %v3384_v47 = vadd.f32 %v2339_v45, %v2338_v43  ;;  %v3386_v48 = vadd.f32 %v2411_v46, %v2410_v44 }
 0x165   : > { %v2341_v49 = vpop.f32.mrf.mxu0  ;;  %v2413_v50 = vpop.f32.mrf.mxu1 }
 0x166   : > { %3707 = vst [vmem:[#allocation7_spill] sm:$0xff] %v3386_v48 }
 0x167   : > { %v2342_v51 = vpop.f32.mrf.mxu0  ;;  %v2414_v52 = vpop.f32.mrf.mxu1 }
 0x168   : > { %v3388_v53 = vadd.f32 %v2342_v51, %v2341_v49  ;;  %v3390_v54 = vadd.f32 %v2414_v52, %v2413_v50 }
 0x169   : > { %v2344_v55 = vpop.f32.mrf.mxu0  ;;  %v2416_v56 = vpop.f32.mrf.mxu1 }
 0x16a   : > { %3708 = vst [vmem:[#allocation8_spill] sm:$0xff] %v3390_v54 }
 0x16b   : > { %v2345_v57 = vpop.f32.mrf.mxu0  ;;  %v2417_v58 = vpop.f32.mrf.mxu1 }
 0x16c   : > { %v3392_v59 = vadd.f32 %v2345_v57, %v2344_v55  ;;  %v3394_v60 = vadd.f32 %v2417_v58, %v2416_v56 }
 0x16d   : > { %v2347_v61 = vpop.f32.mrf.mxu0  ;;  %v2419_v62 = vpop.f32.mrf.mxu1 }
 0x16e   : > { %3709 = vst [vmem:[#allocation9_spill] sm:$0xff] %v3394_v60 }
 0x16f   : > { %v2348_v63 = vpop.f32.mrf.mxu0  ;;  %v2420_v0 = vpop.f32.mrf.mxu1 }
 0x170   : > { %v3396_v1 = vadd.f32 %v2348_v63, %v2347_v61  ;;  %v3398_v2 = vadd.f32 %v2420_v0, %v2419_v62 }
 0x171   : > { %v2350_v3 = vpop.f32.mrf.mxu0  ;;  %v2422_v4 = vpop.f32.mrf.mxu1 }
 0x172   : > { %3710 = vst [vmem:[#allocation10_spill] sm:$0xff] %v3398_v2 }
 0x173   : > { %v2351_v5 = vpop.f32.mrf.mxu0  ;;  %v2423_v6 = vpop.f32.mrf.mxu1 }
 0x174   : > { %v3400_v7 = vadd.f32 %v2351_v5, %v2350_v3  ;;  %v3402_v8 = vadd.f32 %v2423_v6, %v2422_v4 }
 0x175   : > { %v2353_v9 = vpop.f32.mrf.mxu0  ;;  %v3404_v10 = vpop.f32.mrf.mxu1 }
 0x176   : > { %3711 = vst [vmem:[#allocation11_spill] sm:$0xff] %v3402_v8 }
 0x177   : > { %v2354_v11 = vpop.f32.mrf.mxu0  ;;  %v3406_v12 = vpop.f32.mrf.mxu1 }
 0x178   : > { %v3408_v13 = vadd.f32 %v2354_v11, %v2353_v9 }
 0x179   : > { %v2356_v14 = vpop.f32.mrf.mxu0  ;;  %v3410_v15 = vpop.f32.mrf.mxu1 }
 0x17b   : > { %v2357_v16 = vpop.f32.mrf.mxu0  ;;  %v3412_v17 = vpop.f32.mrf.mxu1 }
 0x17c   : > { %v3414_v18 = vadd.f32 %v2357_v16, %v2356_v14 }
 0x17d   : > { %v2359_v19 = vpop.f32.mrf.mxu0  ;;  %v2447_v20 = vpop.f32.mrf.mxu1 }
 0x17f   : > { %v2360_v21 = vpop.f32.mrf.mxu0  ;;  %v2448_v22 = vpop.f32.mrf.mxu1 }
 0x180   : > { %v3416_v23 = vadd.f32 %v2360_v21, %v2359_v19  ;;  %v2449_v30 = vadd.f32 %v2448_v22, %v2447_v20  ;;  %v2446_v20 = vadd.f32 %v3412_v17, %v3410_v15 }
 0x181   : > { %v2362_v24 = vpop.f32.mrf.mxu0  ;;  %v2450_v25 = vpop.f32.mrf.mxu1 }
 0x183   : > { %v2363_v26 = vpop.f32.mrf.mxu0  ;;  %v2451_v27 = vpop.f32.mrf.mxu1 }
 0x184   : > { %v3418_v28 = vadd.f32 %v2363_v26, %v2362_v24 }
 0x185   : > { %v2365_v31 = vpop.f32.mrf.mxu0  ;;  %v3420_v32 = vpop.f32.mrf.mxu1 }
 0x187   : > { %v2366_v33 = vpop.f32.mrf.mxu0  ;;  %v3422_v34 = vpop.f32.mrf.mxu1 }
 0x188   : > { %v3424_v37 = vadd.f32 %v2366_v33, %v2365_v31 }
 0x189   : > { %v2368_v38 = vpop.f32.mrf.mxu0  ;;  %v3426_v39 = vpop.f32.mrf.mxu1 }
 0x18b   : > { %v2369_v40 = vpop.f32.mrf.mxu0  ;;  %v3428_v43 = vpop.f32.mrf.mxu1 }
 0x18c   : > { %v3430_v44 = vadd.f32 %v2369_v40, %v2368_v38 }
 0x18d   : > { %v3432_v45 = vpop.f32.mrf.mxu0  ;;  %v2459_v46 = vpop.f32.mrf.mxu1 }
 0x18e   : > { %3712 = vst [vmem:[#allocation12_spill] sm:$0xff] %v3430_v44  ;;  %v2455_v44 = vadd.f32 %v3422_v34, %v3420_v32  ;;  %v2458_v34 = vadd.f32 %v3428_v43, %v3426_v39  ;;  %v477_v39 = vld [vmem:[#allocation2 + $0x48] sm:$0xff] }
 0x18f   : > { %v3434_v49 = vpop.f32.mrf.mxu0  ;;  %v2460_v50 = vpop.f32.mrf.mxu1 }
 0x191   : > { %v3436_v51 = vpop.f32.mrf.mxu0  ;;  %v3438_v52 = vpop.f32.mrf.mxu1 }
 0x193   : > { %v3440_v55 = vpop.f32.mrf.mxu0  ;;  %v2463_v56 = vpop.f32.mrf.mxu1 }
 0x195   : > { %v3442_v57 = vpop.f32.mrf.mxu0  ;;  %v3444_v58 = vpop.f32.mrf.mxu1 }
 0x196   : > { %3713 = vst [vmem:[#allocation13_spill] sm:$0xff] %v3442_v57 }
 0x197   : > { %v3446_v61 = vpop.f32.mrf.mxu0  ;;  %v3448_v62 = vpop.f32.mrf.mxu1 }
 0x198   : > { %3714 = vst [vmem:[#allocation14_spill] sm:$0xff] %v3446_v61 }
 0x199   : > { %v3450_v63 = vpop.f32.mrf.mxu0  ;;  %v3452_v0 = vpop.f32.mrf.mxu1 }
 0x19a   : > { %3715 = vst [vmem:[#allocation15_spill] sm:$0xff] %v3450_v63 }
 0x19b   : > { %v3454_v3 = vpop.f32.mrf.mxu0  ;;  %v3456_v4 = vpop.f32.mrf.mxu1 }
 0x19c   : > { %3716 = vst [vmem:[#allocation16_spill] sm:$0xff] %v3454_v3  ;;  %v2452_v3 = vadd.f32 %v2451_v27, %v2450_v25 }
 0x19d   : > { %v3458_v5 = vpop.f32.mrf.mxu0  ;;  %v3460_v6 = vpop.f32.mrf.mxu1 }
 0x19e   : > { %v1541_v25 = vadd.f32 %v2452_v3, %v3384_v47 }
 0x19f   : > { %v3462_v9 = vpop.f32.mrf.mxu0  ;;  %v3464_v11 = vpop.f32.mrf.mxu1 }
 0x1a1   : > { %v3466_v14 = vpop.f32.mrf.mxu0  ;;  %v3468_v16 = vpop.f32.mrf.mxu1 }
 0x1a2   : > { %3717 = vst [vmem:[#allocation17_spill] sm:$0xff] %v3466_v14 }
 0x1a3   : > { %v3470_v19 = vpop.f32.mrf.mxu0  ;;  %v3472_v21 = vpop.f32.mrf.mxu1 }
 0x1a4   : > { %3718 = vst [vmem:[#allocation18_spill] sm:$0xff] %v3470_v19 }
 0x1a5   : > { %v3474_v24 = vpop.f32.mrf.mxu0  ;;  %v3476_v26 = vpop.f32.mrf.mxu1 }
 0x1a6   : > { %3719 = vst [vmem:[#allocation19_spill] sm:$0xff] %v3474_v24 }
 0x1a7   : > { %v3478_v31 = vpop.f32.mrf.mxu0  ;;  %v3480_v33 = vpop.f32.mrf.mxu1 }
 0x1a8   : > { %3720 = vst [vmem:[#allocation20_spill] sm:$0xff] %v3478_v31 }
 0x1a9   : > { %v3482_v38 = vpop.f32.mrf.mxu0  ;;  %v3484_v40 = vpop.f32.mrf.mxu1 }
 0x1aa   : > { %3721 = vst [vmem:[#allocation21_spill] sm:$0xff] %v3482_v38  ;;  %v2443_v38 = vadd.f32 %v3406_v12, %v3404_v10  ;;  %v470_v10 = vld [vmem:[#allocation2 + $0xb0] sm:$0xff] }
 0x1ab   : > { %v3486_v8 = vpop.f32.mrf.mxu0  ;;  %v3488_v60 = vpop.f32.mrf.mxu1 }
 0x1ac   : > { %3722 = vst [vmem:[#allocation22_spill] sm:$0xff] %v3486_v8 }
 0x1ad   : > { %v3490_v2 = vpop.f32.mrf.mxu0  ;;  %v3492_v54 = vpop.f32.mrf.mxu1 }
 0x1ae   : > { %3723 = vst [vmem:[#allocation23_spill] sm:$0xff] %v3490_v2  ;;  %v1538_v2 = vadd.f32 %v2449_v30, %v3380_v41  ;;  %v473_v41 = vld [vmem:[#allocation2 + $0x18] sm:$0xff] }
 0x1af   : > { %v3494_v36 = vpop.f32.mrf.mxu0  ;;  %v3496_v48 = vpop.f32.mrf.mxu1 }
 0x1b0   : > { %3724 = vst [vmem:[#allocation24_spill] sm:$0xff] %v3494_v36  ;;  %v472_v36 = vld [vmem:[#allocation2 + $0xd8] sm:$0xff] }
 0x1b1   : > { %v3498_v42 = vpop.f32.mrf.mxu0  ;;  %v3500_v31 = vpop.f32.mrf.mxu1 }
 0x1b2   : > { %3725 = vst [vmem:[#allocation25_spill] sm:$0xff] %v3498_v42  ;;  %v1530_v42 = vadd.f32 %v2443_v38, %v3372_v29  ;;  %v1533_v29 = vadd.f32 %v2446_v20, %v3376_v35  ;;  %v476_v38 = vld [vmem:[#allocation2 + $0x30] sm:$0xff] }
 0x1b3   : > { %v3504_v24 = vpop.f32.mrf.mxu0  ;;  %v3506_v8 = vpop.f32.mrf.mxu1 }
 0x1b4   : > { %3726 = vst [vmem:[#allocation26_spill] sm:$0xff] %v3504_v24  ;;  %v2461_v24 = vadd.f32 %v2460_v50, %v2459_v46 }
 0x1b5   : > { %v3509_v63 = vpop.f32.mrf.mxu1  ;;  %v2579_v19 = vpop.f32.mrf.mxu0 }
 0x1b6   : > { %v1699_v22 = vadd.f32 %v2579_v19, %v1538_v2  ;;  %v471_v19 = vld [vmem:[#allocation2] sm:$0xff]  ;;  %v1554_v50 = vadd.f32 %v2461_v24, %v3396_v1 }
 0x1b7   : > { %v3514_v14 = vpop.f32.mrf.mxu1  ;;  %v1690_v12 = vpop.f32.mrf.mxu0 }
 0x1b8   : > { %v1819_v61 = vadd.f32 %v1699_v22, %v472_v36  ;;  %v1691_v57 = vadd.f32 %v1690_v12, %v1530_v42  ;;  %v2464_v36 = vadd.f32 %v2463_v56, %v3438_v52  ;;  %v474_v52 = vld [vmem:[#allocation2 + $0x50] sm:$0xff]  ;;  %v2473_v22 = vadd.f32 %v3464_v11, %v3460_v6  ;;  %v475_v6 = vld [vmem:[#allocation2 + $0x68] sm:$0xff] }
 0x1b9   : > { %v3517_v30 = vpop.f32.mrf.mxu1  ;;  %v2580_v27 = vpop.f32.mrf.mxu0 }
 0x1ba   : > { %1851 = vst [vmem:[#allocation2 + $0xd8] sm:$0xff] %v1819_v61  ;;  %v1817_v2 = vadd.f32 %v1691_v57, %v470_v10  ;;  %v1702_v15 = vadd.f32 %v2580_v27, %v1541_v25  ;;  %v1546_v61 = vadd.f32 %v2455_v44, %v3388_v53  ;;  %v1557_v10 = vadd.f32 %v2464_v36, %v3400_v7 }
 0x1bb   : > { %v3522_v17 = vpop.f32.mrf.mxu1  ;;  %v1693_v46 = vpop.f32.mrf.mxu0  ;;  %v2467_v25 = vadd.f32 %v3448_v62, %v3444_v58  ;;  %v480_v58 = vld [vmem:[#allocation2 + $0xe8] sm:$0xff] }
 0x1bc   : > { %1849 = vst [vmem:[#allocation2 + $0xb0] sm:$0xff] %v1817_v2  ;;  %v1820_v42 = vadd.f32 %v1702_v15, %v473_v41  ;;  %v1694_v47 = vadd.f32 %v1693_v46, %v1533_v29  ;;  %v1549_v41 = vadd.f32 %v2458_v34, %v3392_v59  ;;  %v2476_v2 = vadd.f32 %v3472_v21, %v3468_v16  ;;  %v478_v16 = vld [vmem:[#allocation2 + $0x80] sm:$0xff]  ;;  %v481_v34 = vld [vmem:[#allocation2 + $0xb8] sm:$0xff] }
 0x1bd   : > { %v3526_v3 = vpop.f32.mrf.mxu1  ;;  %v2583_v32 = vpop.f32.mrf.mxu0  ;;  %v1570_v29 = vadd.f32 %v2473_v22, %v3416_v23  ;;  %v2470_v46 = vadd.f32 %v3456_v4, %v3452_v0  ;;  %v2373_v0 = vadd.f32 %v3434_v49, %v3432_v45 }
 0x1be   : > { %1852 = vst [vmem:[#allocation2 + $0x18] sm:$0xff] %v1820_v42  ;;  %v1818_v35 = vadd.f32 %v1694_v47, %v471_v19  ;;  %v1715_v57 = vadd.f32 %v2583_v32, %v1554_v50  ;;  %v1562_v42 = vadd.f32 %v2467_v25, %v3408_v13  ;;  %v2485_v50 = vadd.f32 %v3496_v48, %v3492_v54 }
 0x1bf   : > { %v3531_v20 = vpop.f32.mrf.mxu1  ;;  %v1706_v56 = vpop.f32.mrf.mxu0  ;;  %v1573_v32 = vadd.f32 %v2476_v2, %v3418_v28  ;;  %v2479_v13 = vadd.f32 %v3480_v33, %v3476_v26  ;;  %v1565_v48 = vadd.f32 %v2470_v46, %v3414_v18  ;;  %v2488_v28 = vadd.f32 %v3506_v8, %v3500_v31  ;;  %v484_v33 = vld [vmem:[#allocation2 + $0x8] sm:$0xff]  ;;  %v482_v8 = vld [vmem:[#allocation2 + $0x60] sm:$0xff] }
 0x1c0   : > { %1850 = vst [vmem:[#allocation2] sm:$0xff] %v1818_v35  ;;  %v1823_v1 = vadd.f32 %v1715_v57, %v476_v38  ;;  %v1707_v24 = vadd.f32 %v1706_v56, %v1546_v61  ;;  %v1586_v22 = vadd.f32 %v2485_v50, %v2373_v0  ;;  %v2482_v18 = vadd.f32 %v3488_v60, %v3484_v40  ;;  %v485_v60 = vld [vmem:[#allocation2 + $0x78] sm:$0xff] }
 0x1c1   : > { %v3536_v12 = vpop.f32.mrf.mxu1  ;;  %v2584_v43 = vpop.f32.mrf.mxu0 }
 0x1c2   : > { %1855 = vst [vmem:[#allocation2 + $0x30] sm:$0xff] %v1823_v1  ;;  %v1821_v53 = vadd.f32 %v1707_v24, %v474_v52  ;;  %v1718_v44 = vadd.f32 %v2584_v43, %v1557_v10  ;;  %v479_v52 = vld [vmem:[#allocation2 + $0x88] sm:$0xff]  ;;  %v2376_v1 = vadd.f32 %v3440_v55, %v3436_v51  ;;  %v1578_v43 = vadd.f32 %v2479_v13, %v3424_v37  ;;  %v486_v13 = vld [vmem:[#allocation2 + $0x38] sm:$0xff] }
 0x1c3   : > { %v3541_v27 = vpop.f32.mrf.mxu1  ;;  %v1709_v11 = vpop.f32.mrf.mxu0 }
 0x1c4   : > { %1853 = vst [vmem:[#allocation2 + $0x50] sm:$0xff] %v1821_v53  ;;  %v1824_v7 = vadd.f32 %v1718_v44, %v477_v39  ;;  %v1710_v15 = vadd.f32 %v1709_v11, %v1549_v41  ;;  %v2497_v53 = vadd.f32 %v3531_v20, %v3526_v3  ;;  %v1589_v55 = vadd.f32 %v2488_v28, %v2376_v1  ;;  %v3729_v3 = vld [vmem:[#allocation14_spill] sm:$0xff]  ;;  %v3734_v28 = vld [vmem:[#allocation23_spill] sm:$0xff] }
 0x1c5   : > { %v3546_v19 = vpop.f32.mrf.mxu1  ;;  %v2587_v62 = vpop.f32.mrf.mxu0  ;;  %v2385_v41 = vadd.f32 %v3462_v9, %v3458_v5  ;;  %v2491_v11 = vadd.f32 %v3514_v14, %v3509_v63  ;;  %v2500_v5 = vadd.f32 %v3541_v27, %v3536_v12  ;;  %v3731_v63 = vld [vmem:[#allocation18_spill] sm:$0xff] }
 0x1c6   : > { %1856 = vst [vmem:[#allocation2 + $0x48] sm:$0xff] %v1824_v7  ;;  %v1822_v59 = vadd.f32 %v1710_v15, %v475_v6  ;;  %v1731_v36 = vadd.f32 %v2587_v62, %v1570_v29  ;;  %v3727_v7 = vld [vmem:[#allocation12_spill] sm:$0xff]  ;;  %v3728_v29 = vld [vmem:[#allocation13_spill] sm:$0xff]  ;;  %v483_v62 = vld [vmem:[#allocation2 + $0xf0] sm:$0xff] }
 0x1c7   : > { %v3551_v47 = vpop.f32.mrf.mxu1  ;;  %v1722_v21 = vpop.f32.mrf.mxu0  ;;  %v1581_v15 = vadd.f32 %v2482_v18, %v3727_v7  ;;  %v2379_v20 = vadd.f32 %v3729_v3, %v3728_v29  ;;  %v3741_v29 = vld [vmem:[#allocation22_spill] sm:$0xff] }
 0x1c8   : > { %1854 = vst [vmem:[#allocation2 + $0x68] sm:$0xff] %v1822_v59  ;;  %v1827_v23 = vadd.f32 %v1731_v36, %v480_v58  ;;  %v1723_v38 = vadd.f32 %v1722_v21, %v1562_v42  ;;  %v1602_v36 = vadd.f32 %v2497_v53, %v2385_v41  ;;  %v3730_v42 = vld [vmem:[#allocation17_spill] sm:$0xff]  ;;  %v488_v21 = vld [vmem:[#allocation2 + $0x40] sm:$0xff]  ;;  %v2503_v1 = vadd.f32 %v3551_v47, %v3546_v19  ;;  %v3739_v41 = vld [vmem:[#allocation26_spill] sm:$0xff] }
 0x1c9   : > { %v3558_v4 = vpop.f32.mrf.mxu1  ;;  %v2588_v35 = vpop.f32.mrf.mxu0  ;;  %v2388_v14 = vadd.f32 %v3731_v63, %v3730_v42  ;;  %v1594_v0 = vadd.f32 %v2491_v11, %v2379_v20  ;;  %v492_v19 = vld [vmem:[#allocation2 + $0x70] sm:$0xff]  ;;  %v490_v20 = vld [vmem:[#allocation2 + $0xe0] sm:$0xff] }
 0x1ca   : > { %1859 = vst [vmem:[#allocation2 + $0xe8] sm:$0xff] %v1827_v23  ;;  %v1825_v57 = vadd.f32 %v1723_v38, %v478_v16  ;;  %v1734_v61 = vadd.f32 %v2588_v35, %v1573_v32  ;;  %v2494_v23 = vadd.f32 %v3522_v17, %v3517_v30  ;;  %v3733_v35 = vld [vmem:[#allocation16_spill] sm:$0xff]  ;;  %v489_v30 = vld [vmem:[#allocation2 + $0xc8] sm:$0xff] }
 0x1cb   : > { %v3563_v54 = vpop.f32.mrf.mxu1  ;;  %v1725_v56 = vpop.f32.mrf.mxu0 }
 0x1cc   : > { %1857 = vst [vmem:[#allocation2 + $0x80] sm:$0xff] %v1825_v57  ;;  %v1828_v45 = vadd.f32 %v1734_v61, %v481_v34  ;;  %v1726_v49 = vadd.f32 %v1725_v56, %v1565_v48  ;;  %v3732_v34 = vld [vmem:[#allocation15_spill] sm:$0xff]  ;;  %v1605_v56 = vadd.f32 %v2500_v5, %v2388_v14  ;;  %v2506_v11 = vadd.f32 %v3563_v54, %v3558_v4 }
 0x1cd   : > { %v2507_v26 = vpop.f32.mrf.mxu1  ;;  %v2591_v24 = vpop.f32.mrf.mxu0  ;;  %v2382_v12 = vadd.f32 %v3733_v35, %v3732_v34  ;;  %v3742_v34 = vld [vmem:[#allocation6_spill] sm:$0xff] }
 0x1ce   : > { %1860 = vst [vmem:[#allocation2 + $0xb8] sm:$0xff] %v1828_v45  ;;  %v1826_v10 = vadd.f32 %v1726_v49, %v479_v52  ;;  %v1747_v39 = vadd.f32 %v2591_v24, %v1586_v22  ;;  %v3735_v45 = vld [vmem:[#allocation24_spill] sm:$0xff] }
 0x1cf   : > { %v2508_v25 = vpop.f32.mrf.mxu1  ;;  %v1738_v31 = vpop.f32.mrf.mxu0  ;;  %v2397_v49 = vadd.f32 %v3735_v45, %v3734_v28  ;;  %v1597_v18 = vadd.f32 %v2494_v23, %v2382_v12  ;;  %v494_v28 = vld [vmem:[#allocation2 + $0xa8] sm:$0xff] }
 0x1d0   : > { %1858 = vst [vmem:[#allocation2 + $0x88] sm:$0xff] %v1826_v10  ;;  %v1831_v44 = vadd.f32 %v1747_v39, %v484_v33  ;;  %v1739_v51 = vadd.f32 %v1738_v31, %v1578_v43  ;;  %v2509_v61 = vadd.f32 %v2508_v25, %v2507_v26  ;;  %v3736_v10 = vld [vmem:[#allocation19_spill] sm:$0xff]  ;;  %v3737_v39 = vld [vmem:[#allocation20_spill] sm:$0xff] }
 0x1d1   : > { %v2510_v6 = vpop.f32.mrf.mxu1  ;;  %v2592_v40 = vpop.f32.mrf.mxu0  ;;  %v2391_v26 = vadd.f32 %v3737_v39, %v3736_v10  ;;  %v487_v25 = vld [vmem:[#allocation2 + $0x58] sm:$0xff] }
 0x1d2   : > { %1863 = vst [vmem:[#allocation2 + $0x8] sm:$0xff] %v1831_v44  ;;  %v1829_v37 = vadd.f32 %v1739_v51, %v482_v8  ;;  %v1750_v2 = vadd.f32 %v2592_v40, %v1589_v55  ;;  %v1618_v51 = vadd.f32 %v2509_v61, %v2397_v49  ;;  %v3738_v55 = vld [vmem:[#allocation25_spill] sm:$0xff] }
 0x1d3   : > { %v2511_v58 = vpop.f32.mrf.mxu1  ;;  %v1741_v46 = vpop.f32.mrf.mxu0  ;;  %v1610_v7 = vadd.f32 %v2503_v1, %v2391_v26  ;;  %v3745_v26 = vld [vmem:[#allocation5_spill] sm:$0xff] }
 0x1d4   : > { %1861 = vst [vmem:[#allocation2 + $0x60] sm:$0xff] %v1829_v37  ;;  %v1832_v9 = vadd.f32 %v1750_v2, %v485_v60  ;;  %v1742_v59 = vadd.f32 %v1741_v46, %v1581_v15  ;;  %v2512_v31 = vadd.f32 %v2511_v58, %v2510_v6  ;;  %v2400_v60 = vadd.f32 %v3739_v41, %v3738_v55  ;;  %v3740_v15 = vld [vmem:[#allocation21_spill] sm:$0xff] }
 0x1d5   : > { %v2513_v16 = vpop.f32.mrf.mxu1  ;;  %v2595_v50 = vpop.f32.mrf.mxu0  ;;  %v2394_v6 = vadd.f32 %v3741_v29, %v3740_v15 }
 0x1d6   : > { %1864 = vst [vmem:[#allocation2 + $0x78] sm:$0xff] %v1832_v9  ;;  %v1830_v38 = vadd.f32 %v1742_v59, %v483_v62  ;;  %v1763_v32 = vadd.f32 %v2595_v50, %v1602_v36  ;;  %v1621_v9 = vadd.f32 %v2512_v31, %v2400_v60  ;;  %v493_v36 = vld [vmem:[#allocation2 + $0xc0] sm:$0xff]  ;;  %v491_v50 = vld [vmem:[#allocation2 + $0x90] sm:$0xff] }
 0x1d7   : > { %v2514_v27 = vpop.f32.mrf.mxu1  ;;  %v1754_v57 = vpop.f32.mrf.mxu0  ;;  %v1613_v14 = vadd.f32 %v2506_v11, %v2394_v6  ;;  %v498_v11 = vld [vmem:[#allocation2 + $0xa0] sm:$0xff]  ;;  %v3747_v6 = vld [vmem:[#allocation10_spill] sm:$0xff] }
 0x1d8   : > { %1862 = vst [vmem:[#allocation2 + $0xf0] sm:$0xff] %v1830_v38  ;;  %v1835_v48 = vadd.f32 %v1763_v32, %v488_v21  ;;  %v1755_v52 = vadd.f32 %v1754_v57, %v1594_v0  ;;  %v2515_v63 = vadd.f32 %v2514_v27, %v2513_v16  ;;  %v3743_v27 = vld [vmem:[#allocation4_spill] sm:$0xff] }
 0x1d9   : > { %v2516_v22 = vpop.f32.mrf.mxu1  ;;  %v2596_v17 = vpop.f32.mrf.mxu0 }
 0x1da   : > { %1867 = vst [vmem:[#allocation2 + $0x40] sm:$0xff] %v1835_v48  ;;  %v1833_v33 = vadd.f32 %v1755_v52, %v486_v13  ;;  %v1766_v24 = vadd.f32 %v2596_v17, %v1605_v56  ;;  %v496_v13 = vld [vmem:[#allocation2 + $0x10] sm:$0xff]  ;;  %v1626_v52 = vadd.f32 %v2515_v63, %v3743_v27  ;;  %v3744_v17 = vld [vmem:[#allocation7_spill] sm:$0xff] }
 0x1db   : > { %v2517_v43 = vpop.f32.mrf.mxu1  ;;  %v1757_v8 = vpop.f32.mrf.mxu0 }
 0x1dc   : > { %1865 = vst [vmem:[#allocation2 + $0x38] sm:$0xff] %v1833_v33  ;;  %v1836_v53 = vadd.f32 %v1766_v24, %v489_v30  ;;  %v1758_v44 = vadd.f32 %v1757_v8, %v1597_v18  ;;  %v2518_v61 = vadd.f32 %v2517_v43, %v2516_v22  ;;  %v497_v24 = vld [vmem:[#allocation2 + $0x28] sm:$0xff]  ;;  %v495_v8 = vld [vmem:[#allocation2 + $0xd0] sm:$0xff] }
 0x1dd   : > { %v2519_v40 = vpop.f32.mrf.mxu1  ;;  %v2599_v47 = vpop.f32.mrf.mxu0 }
 0x1de   : > { %1868 = vst [vmem:[#allocation2 + $0xc8] sm:$0xff] %v1836_v53  ;;  %v1834_v37 = vadd.f32 %v1758_v44, %v487_v25  ;;  %v1779_v2 = vadd.f32 %v2599_v47, %v1618_v51  ;;  %v1629_v43 = vadd.f32 %v2518_v61, %v3745_v26 }
 0x1df   : > { %v2520_v3 = vpop.f32.mrf.mxu1  ;;  %v1770_v58 = vpop.f32.mrf.mxu0 }
 0x1e0   : > { %1866 = vst [vmem:[#allocation2 + $0x58] sm:$0xff] %v1834_v37  ;;  %v1839_v62 = vadd.f32 %v1779_v2, %v492_v19  ;;  %v2521_v46 = vadd.f32 %v2520_v3, %v2519_v40  ;;  %v1771_v5 = vadd.f32 %v1770_v58, %v1610_v7  ;;  %v3746_v40 = vld [vmem:[#allocation8_spill] sm:$0xff]  ;;  %v3748_v58 = vld [vmem:[#allocation9_spill] sm:$0xff] }
 0x1e1   : > { %v2522_v59 = vpop.f32.mrf.mxu1  ;;  %v2600_v42 = vpop.f32.mrf.mxu0 }
 0x1e2   : > { %1871 = vst [vmem:[#allocation2 + $0x70] sm:$0xff] %v1839_v62  ;;  %v1837_v4 = vadd.f32 %v1771_v5, %v490_v20  ;;  %v1782_v54 = vadd.f32 %v2600_v42, %v1621_v9  ;;  %v1634_v35 = vadd.f32 %v2521_v46, %v3742_v34  ;;  %v500_v46 = vld [vmem:[#allocation2 + $0x20] sm:$0xff]  ;;  %v499_v9 = vld [vmem:[#allocation2 + $0xf8] sm:$0xff] }
 0x1e3   : > { %v2523_v21 = vpop.f32.mrf.mxu1  ;;  %v1773_v23 = vpop.f32.mrf.mxu0 }
 0x1e4   : > { %1869 = vst [vmem:[#allocation2 + $0xe0] sm:$0xff] %v1837_v4  ;;  %v1840_v38 = vadd.f32 %v1782_v54, %v493_v36  ;;  %v2524_v32 = vadd.f32 %v2523_v21, %v2522_v59  ;;  %v1774_v0 = vadd.f32 %v1773_v23, %v1613_v14  ;;  %v3749_v54 = vld [vmem:[#allocation11_spill] sm:$0xff] }
 0x1e5   : > { %v2525_v12 = vpop.f32.mrf.mxu1  ;;  %v2603_v57 = vpop.f32.mrf.mxu0 }
 0x1e6   : > { %1872 = vst [vmem:[#allocation2 + $0xc0] sm:$0xff] %v1840_v38  ;;  %v1838_v48 = vadd.f32 %v1774_v0, %v491_v50  ;;  %v1795_v16 = vadd.f32 %v2603_v57, %v1634_v35  ;;  %v1637_v1 = vadd.f32 %v2524_v32, %v3744_v17  ;;  %v501_v50 = vld [vmem:[#allocation2 + $0x98] sm:$0xff] }
 0x1e7   : > { %v2526_v56 = vpop.f32.mrf.mxu1  ;;  %v1786_v45 = vpop.f32.mrf.mxu0 }
 0x1e8   : > { %1870 = vst [vmem:[#allocation2 + $0x90] sm:$0xff] %v1838_v48  ;;  %v1843_v49 = vadd.f32 %v1795_v16, %v496_v13  ;;  %v1787_v30 = vadd.f32 %v1786_v45, %v1626_v52  ;;  %v2527_v10 = vadd.f32 %v2526_v56, %v2525_v12 }
 0x1e9   : > { %v2528_v33 = vpop.f32.mrf.mxu1  ;;  %v2604_v18 = vpop.f32.mrf.mxu0 }
 0x1ea   : > { %1875 = vst [vmem:[#allocation2 + $0x10] sm:$0xff] %v1843_v49  ;;  %v1841_v39 = vadd.f32 %v1787_v30, %v494_v28  ;;  %v1798_v22 = vadd.f32 %v2604_v18, %v1637_v1  ;;  %v1642_v19 = vadd.f32 %v2527_v10, %v3746_v40 }
 0x1eb   : > { %v2529_v25 = vpop.f32.mrf.mxu1  ;;  %v1789_v31 = vpop.f32.mrf.mxu0 }
 0x1ec   : > { %1873 = vst [vmem:[#allocation2 + $0xa8] sm:$0xff] %v1841_v39  ;;  %v1844_v53 = vadd.f32 %v1798_v22, %v497_v24  ;;  %v1790_v44 = vadd.f32 %v1789_v31, %v1629_v43  ;;  %v2530_v41 = vadd.f32 %v2529_v25, %v2528_v33 }
 0x1ed   : > { %v2531_v51 = vpop.f32.mrf.mxu1  ;;  %v2607_v55 = vpop.f32.mrf.mxu0 }
 0x1ee   : > { %1876 = vst [vmem:[#allocation2 + $0x28] sm:$0xff] %v1844_v53  ;;  %v1842_v60 = vadd.f32 %v1790_v44, %v495_v8  ;;  %v1645_v62 = vadd.f32 %v2530_v41, %v3748_v58 }
 0x1ef   : > { %v2532_v47 = vpop.f32.mrf.mxu1  ;;  %v1802_v37 = vpop.f32.mrf.mxu0 }
 0x1f0   : > { %1874 = vst [vmem:[#allocation2 + $0xd0] sm:$0xff] %v1842_v60  ;;  %v2533_v2 = vadd.f32 %v2532_v47, %v2531_v51  ;;  %v1803_v7 = vadd.f32 %v1802_v37, %v1642_v19 }
 0x1f1   : > { %v2534_v15 = vpop.f32.mrf.mxu1  ;;  %v2608_v29 = vpop.f32.mrf.mxu0 }
 0x1f2   : > { %v1650_v3 = vadd.f32 %v2533_v2, %v3747_v6  ;;  %v1845_v20 = vadd.f32 %v1803_v7, %v498_v11 }
 0x1f3   : > { %v2535_v5 = vpop.f32.mrf.mxu1  ;;  %v1805_v59 = vpop.f32.mrf.mxu0 }
 0x1f4   : > { %v1811_v36 = vadd.f32 %v2607_v55, %v1650_v3  ;;  %1877 = vst [vmem:[#allocation2 + $0xa0] sm:$0xff] %v1845_v20  ;;  %v2536_v42 = vadd.f32 %v2535_v5, %v2534_v15  ;;  %v1806_v63 = vadd.f32 %v1805_v59, %v1645_v62 }
 0x1f6   : > { %v1847_v4 = vadd.f32 %v1811_v36, %v500_v46  ;;  %v1653_v14 = vadd.f32 %v2536_v42, %v3749_v54  ;;  %v1846_v21 = vadd.f32 %v1806_v63, %v499_v9 }
 0x1f8   : > { %1879 = vst [vmem:[#allocation2 + $0x20] sm:$0xff] %v1847_v4  ;;  %v1814_v23 = vadd.f32 %v2608_v29, %v1653_v14  ;;  %1878 = vst [vmem:[#allocation2 + $0xf8] sm:$0xff] %v1846_v21  ;;  %1884 = sbr.rel (%p2309_p13) target bundleno = 558 (0x22e), region = 66 }
 0x1fa   : > { %v1848_v38 = vadd.f32 %v1814_v23, %v501_v50 }
 0x1fc   : > { %1880 = vst [vmem:[#allocation2 + $0x98] sm:$0xff] %v1848_v38 }
 0x1fd   : > { %v1885_v32 = vld [vmem:[#allocation2 + $0xb0] sm:$0xff]  ;;  %v3613_v0 = vld [vmem:[%s3702_s2] ss:$0 sm:$0xff]  ;;  %v1887_v13 = vld [vmem:[#allocation2 + $0xd8] sm:$0xff] }
 0x1fe   : > { %v1886_v34 = vld [vmem:[#allocation2] sm:$0xff]  ;;  %v1924_v35 = vadd.f32 %v3613_v0, %v1885_v32  ;;  %v1888_v57 = vld [vmem:[#allocation2 + $0x18] sm:$0xff]  ;;  %v1889_v61 = vld [vmem:[#allocation2 + $0x50] sm:$0xff]  ;;  %v1926_v48 = vadd.f32 %v3613_v0, %v1887_v13 }
 0x1ff   : > { %v1925_v12 = vadd.f32 %v3613_v0, %v1886_v34  ;;  %v1927_v16 = vadd.f32 %v3613_v0, %v1888_v57  ;;  %v1890_v27 = vld [vmem:[#allocation2 + $0x68] sm:$0xff]  ;;  %v1891_v52 = vld [vmem:[#allocation2 + $0x30] sm:$0xff]  ;;  %v1928_v56 = vadd.f32 %v3613_v0, %v1889_v61  ;;  %v1893_v49 = vld [vmem:[#allocation2 + $0x80] sm:$0xff] }
 0x200   : > { %2837 = vtanh.f32 %v1924_v35  ;;  %v1892_v28 = vld [vmem:[#allocation2 + $0x48] sm:$0xff]  ;;  %v1929_v45 = vadd.f32 %v3613_v0, %v1890_v27  ;;  %v1930_v30 = vadd.f32 %v3613_v0, %v1891_v52  ;;  %v1932_v24 = vadd.f32 %v3613_v0, %v1893_v49  ;;  %v1896_v18 = vld [vmem:[#allocation2 + $0xb8] sm:$0xff]  ;;  %v1897_v39 = vld [vmem:[#allocation2 + $0x60] sm:$0xff] }
 0x201   : > { %2839 = vtanh.f32 %v1925_v12  ;;  %v1894_v17 = vld [vmem:[#allocation2 + $0x88] sm:$0xff]  ;;  %v1931_v1 = vadd.f32 %v3613_v0, %v1892_v28  ;;  %v1898_v26 = vld [vmem:[#allocation2 + $0xf0] sm:$0xff]  ;;  %v1935_v43 = vadd.f32 %v3613_v0, %v1896_v18  ;;  %v1936_v8 = vadd.f32 %v3613_v0, %v1897_v39  ;;  %v1900_v31 = vld [vmem:[#allocation2 + $0x78] sm:$0xff] }
 0x202   : > { %2841 = vtanh.f32 %v1926_v48  ;;  %v1895_v33 = vld [vmem:[#allocation2 + $0xe8] sm:$0xff]  ;;  %v1933_v10 = vadd.f32 %v3613_v0, %v1894_v17  ;;  %v1937_v53 = vadd.f32 %v3613_v0, %v1898_v26  ;;  %v1901_v44 = vld [vmem:[#allocation2 + $0x38] sm:$0xff]  ;;  %v1939_v41 = vadd.f32 %v3613_v0, %v1900_v31  ;;  %v1903_v60 = vld [vmem:[#allocation2 + $0x40] sm:$0xff] }
 0x203   : > { %2843 = vtanh.f32 %v1927_v16  ;;  %v1934_v22 = vadd.f32 %v3613_v0, %v1895_v33  ;;  %v1899_v25 = vld [vmem:[#allocation2 + $0x8] sm:$0xff]  ;;  %v1902_v55 = vld [vmem:[#allocation2 + $0x58] sm:$0xff]  ;;  %v1940_v40 = vadd.f32 %v3613_v0, %v1901_v44  ;;  %v1905_v37 = vld [vmem:[#allocation2 + $0xe0] sm:$0xff]  ;;  %v1942_v7 = vadd.f32 %v3613_v0, %v1903_v60 }
 0x204   : > { %2845 = vtanh.f32 %v1928_v56  ;;  %v1938_v51 = vadd.f32 %v3613_v0, %v1899_v25  ;;  %v1904_v19 = vld [vmem:[#allocation2 + $0xc8] sm:$0xff]  ;;  %v1941_v11 = vadd.f32 %v3613_v0, %v1902_v55  ;;  %v1906_v15 = vld [vmem:[#allocation2 + $0x90] sm:$0xff]  ;;  %v1944_v58 = vadd.f32 %v3613_v0, %v1905_v37  ;;  %v1908_v62 = vld [vmem:[#allocation2 + $0xc0] sm:$0xff] }
 0x205   : > { %2847 = vtanh.f32 %v1929_v45  ;;  %v1943_v6 = vadd.f32 %v3613_v0, %v1904_v19  ;;  %v1907_v3 = vld [vmem:[#allocation2 + $0x70] sm:$0xff]  ;;  %v1945_v5 = vadd.f32 %v3613_v0, %v1906_v15  ;;  %v1909_v9 = vld [vmem:[#allocation2 + $0xa8] sm:$0xff]  ;;  %v1947_v4 = vadd.f32 %v3613_v0, %v1908_v62  ;;  %v1913_v32 = vld [vmem:[#allocation2 + $0xa0] sm:$0xff] }
 0x206   : > { %2849 = vtanh.f32 %v1930_v30  ;;  %v1946_v36 = vadd.f32 %v3613_v0, %v1907_v3  ;;  %v1910_v42 = vld [vmem:[#allocation2 + $0xd0] sm:$0xff]  ;;  %v1948_v21 = vadd.f32 %v3613_v0, %v1909_v9  ;;  %v1912_v50 = vld [vmem:[#allocation2 + $0x28] sm:$0xff]  ;;  %v1914_v12 = vld [vmem:[#allocation2 + $0xf8] sm:$0xff]  ;;  %v1952_v16 = vadd.f32 %v3613_v0, %v1913_v32 }
 0x207   : > { %2851 = vtanh.f32 %v1931_v1  ;;  %v1911_v54 = vld [vmem:[#allocation2 + $0x10] sm:$0xff]  ;;  %v1949_v38 = vadd.f32 %v3613_v0, %v1910_v42  ;;  %v1951_v57 = vadd.f32 %v3613_v0, %v1912_v50  ;;  %v1915_v61 = vld [vmem:[#allocation2 + $0x20] sm:$0xff]  ;;  %v1916_v27 = vld [vmem:[#allocation2 + $0x98] sm:$0xff]  ;;  %v1953_v56 = vadd.f32 %v3613_v0, %v1914_v12 }
 0x208   : > { %2853 = vtanh.f32 %v1932_v24  ;;  %v1950_v35 = vadd.f32 %v3613_v0, %v1911_v54  ;;  %v1954_v45 = vadd.f32 %v3613_v0, %v1915_v61  ;;  %v1955_v30 = vadd.f32 %v3613_v0, %v1916_v27 }
 0x209   : > { %2855 = vtanh.f32 %v1933_v10 }
 0x20a   : > { %2857 = vtanh.f32 %v1934_v22 }
 0x20b   : > { %2859 = vtanh.f32 %v1935_v43 }
 0x20c   : > { %2861 = vtanh.f32 %v1936_v8 }
 0x20d   : > { %v2838_v47 = vpop.eup %2837  ;;  %2863 = vtanh.f32 %v1937_v53 }
 0x20e   : > { %v2840_v2 = vpop.eup %2839  ;;  %1988 = vst [vmem:[%s3247_s30] sm:$0xff] %v2838_v47  ;;  %2865 = vtanh.f32 %v1938_v51 }
 0x20f   : > { %v2842_v29 = vpop.eup %2841  ;;  %1989 = vst [vmem:[%s3247_s30 + $0x8] sm:$0xff] %v2840_v2  ;;  %2867 = vtanh.f32 %v1939_v41 }
 0x210   : > { %v2844_v20 = vpop.eup %2843  ;;  %1990 = vst [vmem:[%s3247_s30 + $0x10] sm:$0xff] %v2842_v29  ;;  %2869 = vtanh.f32 %v1940_v40 }
 0x211   : > { %v2846_v46 = vpop.eup %2845  ;;  %1991 = vst [vmem:[%s3247_s30 + $0x18] sm:$0xff] %v2844_v20  ;;  %2871 = vtanh.f32 %v1941_v11 }
 0x212   : > { %v2848_v59 = vpop.eup %2847  ;;  %1992 = vst [vmem:[%s3247_s30 + $0x20] sm:$0xff] %v2846_v46  ;;  %2873 = vtanh.f32 %v1942_v7 }
 0x213   : > { %v2850_v63 = vpop.eup %2849  ;;  %1993 = vst [vmem:[%s3247_s30 + $0x28] sm:$0xff] %v2848_v59  ;;  %2875 = vtanh.f32 %v1943_v6 }
 0x214   : > { %v2852_v14 = vpop.eup %2851  ;;  %1994 = vst [vmem:[%s3247_s30 + $0x30] sm:$0xff] %v2850_v63  ;;  %2877 = vtanh.f32 %v1944_v58 }
 0x215   : > { %v2854_v23 = vpop.eup %2853  ;;  %1995 = vst [vmem:[%s3247_s30 + $0x38] sm:$0xff] %v2852_v14  ;;  %2879 = vtanh.f32 %v1945_v5 }
 0x216   : > { %v2856_v34 = vpop.eup %2855  ;;  %1996 = vst [vmem:[%s3247_s30 + $0x40] sm:$0xff] %v2854_v23  ;;  %2881 = vtanh.f32 %v1946_v36 }
 0x217   : > { %v2858_v13 = vpop.eup %2857  ;;  %1997 = vst [vmem:[%s3247_s30 + $0x48] sm:$0xff] %v2856_v34  ;;  %2883 = vtanh.f32 %v1947_v4 }
 0x218   : > { %v2860_v48 = vpop.eup %2859  ;;  %1998 = vst [vmem:[%s3247_s30 + $0x50] sm:$0xff] %v2858_v13  ;;  %2885 = vtanh.f32 %v1948_v21 }
 0x219   : > { %v2862_v52 = vpop.eup %2861  ;;  %1999 = vst [vmem:[%s3247_s30 + $0x58] sm:$0xff] %v2860_v48  ;;  %2887 = vtanh.f32 %v1949_v38 }
 0x21a   : > { %v2864_v28 = vpop.eup %2863  ;;  %2000 = vst [vmem:[%s3247_s30 + $0x60] sm:$0xff] %v2862_v52  ;;  %2889 = vtanh.f32 %v1950_v35 }
 0x21b   : > { %v2866_v49 = vpop.eup %2865  ;;  %2001 = vst [vmem:[%s3247_s30 + $0x68] sm:$0xff] %v2864_v28  ;;  %2891 = vtanh.f32 %v1951_v57 }
 0x21c   : > { %v2868_v17 = vpop.eup %2867  ;;  %2002 = vst [vmem:[%s3247_s30 + $0x70] sm:$0xff] %v2866_v49  ;;  %2893 = vtanh.f32 %v1952_v16 }
 0x21d   : > { %v2870_v1 = vpop.eup %2869  ;;  %2003 = vst [vmem:[%s3247_s30 + $0x78] sm:$0xff] %v2868_v17  ;;  %2895 = vtanh.f32 %v1953_v56 }
 0x21e   : > { %v2872_v33 = vpop.eup %2871  ;;  %2004 = vst [vmem:[%s3247_s30 + $0x80] sm:$0xff] %v2870_v1  ;;  %2897 = vtanh.f32 %v1954_v45 }
 0x21f   : > { %v2874_v24 = vpop.eup %2873  ;;  %2005 = vst [vmem:[%s3247_s30 + $0x88] sm:$0xff] %v2872_v33  ;;  %2899 = vtanh.f32 %v1955_v30 }
 0x220   : > { %v2876_v0 = vpop.eup %2875  ;;  %2006 = vst [vmem:[%s3247_s30 + $0x90] sm:$0xff] %v2874_v24 }
 0x221   : > { %v2878_v18 = vpop.eup %2877  ;;  %2007 = vst [vmem:[%s3247_s30 + $0x98] sm:$0xff] %v2876_v0 }
 0x222   : > { %v2880_v10 = vpop.eup %2879  ;;  %2008 = vst [vmem:[%s3247_s30 + $0xa0] sm:$0xff] %v2878_v18 }
 0x223   : > { %v2882_v39 = vpop.eup %2881  ;;  %2009 = vst [vmem:[%s3247_s30 + $0xa8] sm:$0xff] %v2880_v10 }
 0x224   : > { %v2884_v22 = vpop.eup %2883  ;;  %2010 = vst [vmem:[%s3247_s30 + $0xb0] sm:$0xff] %v2882_v39 }
 0x225   : > { %v2886_v26 = vpop.eup %2885  ;;  %2011 = vst [vmem:[%s3247_s30 + $0xb8] sm:$0xff] %v2884_v22 }
 0x226   : > { %v2888_v43 = vpop.eup %2887  ;;  %2012 = vst [vmem:[%s3247_s30 + $0xc0] sm:$0xff] %v2886_v26 }
 0x227   : > { %v2890_v25 = vpop.eup %2889  ;;  %2013 = vst [vmem:[%s3247_s30 + $0xc8] sm:$0xff] %v2888_v43 }
 0x228   : > { %v2892_v8 = vpop.eup %2891  ;;  %2014 = vst [vmem:[%s3247_s30 + $0xd0] sm:$0xff] %v2890_v25 }
 0x229   : > { %v2894_v31 = vpop.eup %2893  ;;  %2015 = vst [vmem:[%s3247_s30 + $0xd8] sm:$0xff] %v2892_v8 }
 0x22a   : > { %v2896_v53 = vpop.eup %2895  ;;  %2016 = vst [vmem:[%s3247_s30 + $0xe0] sm:$0xff] %v2894_v31 }
 0x22b   : > { %v2898_v44 = vpop.eup %2897  ;;  %2017 = vst [vmem:[%s3247_s30 + $0xe8] sm:$0xff] %v2896_v53 }
 0x22c   : > { %v2900_v51 = vpop.eup %2899  ;;  %2018 = vst [vmem:[%s3247_s30 + $0xf0] sm:$0xff] %v2898_v44 }
 0x22d   : > { %2019 = vst [vmem:[%s3247_s30 + $0xf8] sm:$0xff] %v2900_v51 }
 0x22e PF: > { %s13_s18 = sadd.s32 1, %s2955_s18   ;;  %s3750_s12 = smov %s2935_s13 }
 0x22f   : > { %p10_p0 = scmp.ge.s32.totalorder %s13_s18, 12   ;;  %s3751_s13 = smov %s3029_s25 }
 0x230   : > { %s3752_s14 = smov %s2947_s16  ;;  %s3753_s15 = smov %s2951_s17 }
 0x231   : > { %s3754_s16 = smov %s3757_s19  ;;  %s3755_s17 = smov %s3761_s20 }
 0x232   :  { %12 = sbr.rel (!%p10_p0) target bundleno = 4 (0x4), region = 110 }

</bundles_post_ra>
